<compile_context>
chip_gen: v6e
topology: v6e:2x2x1
jax: 0.10.0
libtpu: 0.0.40
codegen_flags: <defaults>
</compile_context>

<pallas_src>
import jax
import jax.numpy as jnp
from jax import lax
from jax.experimental import pallas as pl
from jax.experimental.pallas import tpu as pltpu

EPS = 1e-5
K = 3  # conv kernel size


def residual_block_kernel(w1_ref, b1_ref, g1_ref, be1_ref, a_ref,
                          w2_ref, b2_ref, g2_ref, be2_ref,
                          x_ref, o_ref, xp_ref, mid_ref):
    """Fused conv3x3 -> BN -> PReLU -> conv3x3 -> BN -> residual add.

    x_ref  : (N, C, H, W)        native NCHW input, VMEM
    o_ref  : (H, C*N*W)          lane-dense packed output, VMEM
    xp_ref : (C, H+2, N*(W+2)+2) padded packed input scratch (guard col each side)
    mid_ref: (C, H+2, N*(W+2)+2) padded packed intermediate scratch
    Conv weights are flattened (C*C*3*3,) in SMEM; biases / BN affine params
    are (C,) in SMEM; the PReLU slope is a (1,) SMEM scalar.
    """
    N, C, H, W = x_ref.shape
    Hp, Wp = H + 2, W + 2
    Wl = N * Wp          # packed padded width (global columns 0 .. Wl-1)
    Wg = Wl + 2          # scratch width: one guard column on each side
    inv_cnt = 1.0 / float(N * H * W)
    alpha = a_ref[0]

    # Lane mask: True on columns that hold real (interior) data of some plane.
    lane = lax.broadcasted_iota(jnp.int32, (H, Wl), 1)
    interior = jnp.logical_and(lane >= 1, lane <= W)
    for n in range(1, N):
        lo, hi = n * Wp + 1, n * Wp + W
        interior = jnp.logical_or(interior,
                                  jnp.logical_and(lane >= lo, lane <= hi))

    # ---- pack x (native NCHW) into the zero-padded, lane-packed scratch ----
    xp_ref[...] = jnp.zeros(xp_ref.shape, jnp.float32)
    for n in range(N):
        for c in range(C):
            xp_ref[c, 1:1 + H, n * Wp + 2:n * Wp + 2 + W] = x_ref[n, c, :, :]

    def conv_all(src_ref, w_ref, b_ref):
        """3x3 / stride 1 / pad 1 conv for all C output channels at once.

        Each shifted window is loaded once per (ci, dy, dx) and FMA'd into all
        C accumulators.  Accumulator column g corresponds to packed global
        column g; per-plane pad columns receive garbage and are masked later.
        """
        accs = [jnp.full((H, Wl), b_ref[co], jnp.float32) for co in range(C)]
        for ci in range(C):
            for dy in range(K):
                for dx in range(K):
                    win = src_ref[ci, dy:dy + H, dx:dx + Wl]
                    for co in range(C):
                        w = w_ref[((co * C + ci) * K + dy) * K + dx]
                        accs[co] = accs[co] + w * win
        return accs

    def batchnorm(acc, g_ref, be_ref, co):
        """Training-mode BN over the N*H*W real positions; one-pass stats."""
        y = jnp.where(interior, acc, 0.0)
        s = jnp.sum(y)
        ss = jnp.sum(y * y)
        mean = s * inv_cnt
        var = ss * inv_cnt - mean * mean
        return (y - mean) * lax.rsqrt(var + EPS) * g_ref[co] + be_ref[co]

    # ---- stage 1: conv1 -> BN1 -> PReLU -> padded packed mid scratch ----
    accs1 = conv_all(xp_ref, w1_ref, b1_ref)
    zrow = jnp.zeros((1, Wg), jnp.float32)
    for co in range(C):
        y = batchnorm(accs1[co], g1_ref, be1_ref, co)
        y = jnp.where(y > 0, y, alpha * y)                  # PReLU, shared slope
        # The masked interior store supplies the per-plane zero-pad columns,
        # so only the two border rows of mid need explicit zeroing.
        mid_ref[co, 1:1 + H, 1:1 + Wl] = jnp.where(interior, y, 0.0)
        mid_ref[co, 0:1, :] = zrow
        mid_ref[co, Hp - 1:Hp, :] = zrow

    # ---- stage 2: conv2 -> BN2 -> residual add -> lane-dense output ----
    accs2 = conv_all(mid_ref, w2_ref, b2_ref)
    for co in range(C):
        y = batchnorm(accs2[co], g2_ref, be2_ref, co)
        for n in range(N):
            res = x_ref[n, co, :, :]                        # aligned, unshifted
            col = n * Wp + 1
            o_ref[:, (co * N + n) * W:(co * N + n + 1) * W] = (
                res + y[:, col:col + W])


def residual_block(x, params):
    """x: (N, C, H, W) float32, NCHW.  Returns (N, C, H, W) float32."""
    w1, b1, g1, be1, alpha, w2, b2, g2, be2 = params
    N, C, H, W = x.shape
    Hp, Wp = H + 2, W + 2
    Wg = N * Wp + 2

    smem = pl.BlockSpec(memory_space=pltpu.MemorySpace.SMEM)
    vmem = pl.BlockSpec(memory_space=pltpu.MemorySpace.VMEM)

    out_packed = pl.pallas_call(
        residual_block_kernel,
        out_shape=jax.ShapeDtypeStruct((H, C * N * W), jnp.float32),
        in_specs=[smem, smem, smem, smem, smem,   # conv1 / bn1 / prelu params
                  smem, smem, smem, smem,         # conv2 / bn2 params
                  vmem],                          # x, native NCHW (no pad)
        out_specs=vmem,
        scratch_shapes=[pltpu.VMEM((C, Hp, Wg), jnp.float32),   # padded packed x
                        pltpu.VMEM((C, Hp, Wg), jnp.float32)],  # padded packed mid
    )(w1.reshape(-1), b1, g1, be1, alpha,
      w2.reshape(-1), b2, g2, be2, x)

    # (H, C*N*W) lane-dense slab -> NCHW.  Wrapper-side layout plumbing only.
    return jnp.transpose(out_packed.reshape(H, C, N, W), (2, 1, 0, 3))


def residual_block_ref(x, params):
    """Pure-JAX reference mirroring PyTorch training-mode forward."""
    w1, b1, g1, be1, alpha, w2, b2, g2, be2 = params

    def conv(h, w, b):
        y = lax.conv_general_dilated(h, w, (1, 1), ((1, 1), (1, 1)),
                                     dimension_numbers=('NCHW', 'OIHW', 'NCHW'))
        return y + b[None, :, None, None]

    def bn(y, g, be):
        m = jnp.mean(y, axis=(0, 2, 3), keepdims=True)
        v = jnp.mean((y - m) ** 2, axis=(0, 2, 3), keepdims=True)
        return (y - m) / jnp.sqrt(v + EPS) * g[None, :, None, None] + be[None, :, None, None]

    h = bn(conv(x, w1, b1), g1, be1)
    h = jnp.where(h > 0, h, alpha[0] * h)
    h = bn(conv(h, w2, b2), g2, be2)
    return x + h


if __name__ == "__main__":
    N, C, H, W = 2, 4, 16, 16
    key = jax.random.PRNGKey(0)
    ks = jax.random.split(key, 8)

    x = jax.random.normal(ks[0], (N, C, H, W), jnp.float32)

    # Deterministic synthetic parameters (shapes follow nn.Conv2d / BatchNorm2d / PReLU).
    w1 = 0.2 * jax.random.normal(ks[1], (C, C, K, K), jnp.float32)   # OIHW
    b1 = 0.1 * jax.random.normal(ks[2], (C,), jnp.float32)
    g1 = 1.0 + 0.1 * jax.random.normal(ks[3], (C,), jnp.float32)
    be1 = 0.1 * jax.random.normal(ks[4], (C,), jnp.float32)
    w2 = 0.2 * jax.random.normal(ks[5], (C, C, K, K), jnp.float32)
    b2 = 0.1 * jax.random.normal(ks[6], (C,), jnp.float32)
    g2 = 1.0 + 0.1 * jax.random.normal(ks[7], (C,), jnp.float32)
    be2 = jnp.zeros((C,), jnp.float32)
    alpha = jnp.array([0.25], jnp.float32)   # nn.PReLU() default init

    params = (w1, b1, g1, be1, alpha, w2, b2, g2, be2)

    out = jax.block_until_ready(jax.jit(residual_block)(x, params))
    ref = residual_block_ref(x, params)

    assert out.shape == (N, C, H, W) and out.dtype == jnp.float32
    max_err = float(jnp.max(jnp.abs(out - ref)))
    if max_err > 1e-3:
        raise AssertionError(f"kernel/reference mismatch: max abs err = {max_err}")

    print("KERNEL_OK")
</pallas_src>

<mosaic_0001>
module attributes {stable_mosaic.version = 11 : i64} {
  func.func @residual_block_kernel(%arg0: memref<144xf32, #tpu.memory_space<smem>>, %arg1: memref<4xf32, #tpu.memory_space<smem>>, %arg2: memref<4xf32, #tpu.memory_space<smem>>, %arg3: memref<4xf32, #tpu.memory_space<smem>>, %arg4: memref<1xf32, #tpu.memory_space<smem>>, %arg5: memref<144xf32, #tpu.memory_space<smem>>, %arg6: memref<4xf32, #tpu.memory_space<smem>>, %arg7: memref<4xf32, #tpu.memory_space<smem>>, %arg8: memref<4xf32, #tpu.memory_space<smem>>, %arg9: memref<2x4x16x16xf32, #tpu.memory_space<vmem>>, %arg10: memref<16x128xf32, #tpu.memory_space<vmem>>, %arg11: memref<4x18x38xf32, #tpu.memory_space<vmem>>, %arg12: memref<4x18x38xf32, #tpu.memory_space<vmem>>) attributes {dimension_semantics = [], scalar_prefetch = 0 : i64, scratch_operands = 2 : i64, tpu.core_type = #tpu.core_type<tc>} {
    %c0 = arith.constant 0 : index
    %0 = memref.load %arg4[%c0] : memref<1xf32, #tpu.memory_space<smem>>
    %1 = tpu.iota {dimensions = array<i32: 1>} : vector<16x36xi32>
    %c1_i32 = arith.constant 1 : i32
    %2 = vector.broadcast %c1_i32 : i32 to vector<16x36xi32>
    %3 = arith.cmpi sge, %1, %2 : vector<16x36xi32>
    %c16_i32 = arith.constant 16 : i32
    %4 = vector.broadcast %c16_i32 : i32 to vector<16x36xi32>
    %5 = arith.cmpi sle, %1, %4 : vector<16x36xi32>
    %6 = arith.andi %3, %5 : vector<16x36xi1>
    %c19_i32 = arith.constant 19 : i32
    %7 = vector.broadcast %c19_i32 : i32 to vector<16x36xi32>
    %8 = arith.cmpi sge, %1, %7 : vector<16x36xi32>
    %c34_i32 = arith.constant 34 : i32
    %9 = vector.broadcast %c34_i32 : i32 to vector<16x36xi32>
    %10 = arith.cmpi sle, %1, %9 : vector<16x36xi32>
    %11 = arith.andi %8, %10 : vector<16x36xi1>
    %12 = arith.ori %6, %11 : vector<16x36xi1>
    %cst = arith.constant 0.000000e+00 : f32
    %13 = vector.broadcast %cst : f32 to vector<4x18x38xf32>
    %c0_0 = arith.constant 0 : index
    %c0_1 = arith.constant 0 : index
    %c0_2 = arith.constant 0 : index
    %14 = vector.load %arg11[%c0_0, %c0_1, %c0_2] : memref<4x18x38xf32, #tpu.memory_space<vmem>>, vector<4x18x38xf32>
    tpu.vector_store %arg11[%c0_0, %c0_1, %c0_2], %13 {strides = array<i32>} : memref<4x18x38xf32, #tpu.memory_space<vmem>>, vector<4x18x38xf32>,
    %c0_3 = arith.constant 0 : index
    %c0_4 = arith.constant 0 : index
    %c0_5 = arith.constant 0 : index
    %c0_6 = arith.constant 0 : index
    %15 = vector.load %arg9[%c0_3, %c0_4, %c0_5, %c0_6] : memref<2x4x16x16xf32, #tpu.memory_space<vmem>>, vector<1x1x16x16xf32>
    %16 = vector.shape_cast %15 : vector<1x1x16x16xf32> to vector<16x16xf32>
    %c0_7 = arith.constant 0 : index
    %c1 = arith.constant 1 : index
    %c2 = arith.constant 2 : index
    %17 = vector.load %arg11[%c0_7, %c1, %c2] : memref<4x18x38xf32, #tpu.memory_space<vmem>>, vector<1x16x16xf32>
    %18 = vector.shape_cast %17 : vector<1x16x16xf32> to vector<16x16xf32>
    %19 = vector.shape_cast %16 : vector<16x16xf32> to vector<1x16x16xf32>
    tpu.vector_store %arg11[%c0_7, %c1, %c2], %19 {strides = array<i32>} : memref<4x18x38xf32, #tpu.memory_space<vmem>>, vector<1x16x16xf32>,
    %c0_8 = arith.constant 0 : index
    %c1_9 = arith.constant 1 : index
    %c0_10 = arith.constant 0 : index
    %c0_11 = arith.constant 0 : index
    %20 = vector.load %arg9[%c0_8, %c1_9, %c0_10, %c0_11] : memref<2x4x16x16xf32, #tpu.memory_space<vmem>>, vector<1x1x16x16xf32>
    %21 = vector.shape_cast %20 : vector<1x1x16x16xf32> to vector<16x16xf32>
    %c1_12 = arith.constant 1 : index
    %c1_13 = arith.constant 1 : index
    %c2_14 = arith.constant 2 : index
    %22 = vector.load %arg11[%c1_12, %c1_13, %c2_14] : memref<4x18x38xf32, #tpu.memory_space<vmem>>, vector<1x16x16xf32>
    %23 = vector.shape_cast %22 : vector<1x16x16xf32> to vector<16x16xf32>
    %24 = vector.shape_cast %21 : vector<16x16xf32> to vector<1x16x16xf32>
    tpu.vector_store %arg11[%c1_12, %c1_13, %c2_14], %24 {strides = array<i32>} : memref<4x18x38xf32, #tpu.memory_space<vmem>>, vector<1x16x16xf32>,
    %c0_15 = arith.constant 0 : index
    %c2_16 = arith.constant 2 : index
    %c0_17 = arith.constant 0 : index
    %c0_18 = arith.constant 0 : index
    %25 = vector.load %arg9[%c0_15, %c2_16, %c0_17, %c0_18] : memref<2x4x16x16xf32, #tpu.memory_space<vmem>>, vector<1x1x16x16xf32>
    %26 = vector.shape_cast %25 : vector<1x1x16x16xf32> to vector<16x16xf32>
    %c2_19 = arith.constant 2 : index
    %c1_20 = arith.constant 1 : index
    %c2_21 = arith.constant 2 : index
    %27 = vector.load %arg11[%c2_19, %c1_20, %c2_21] : memref<4x18x38xf32, #tpu.memory_space<vmem>>, vector<1x16x16xf32>
    %28 = vector.shape_cast %27 : vector<1x16x16xf32> to vector<16x16xf32>
    %29 = vector.shape_cast %26 : vector<16x16xf32> to vector<1x16x16xf32>
    tpu.vector_store %arg11[%c2_19, %c1_20, %c2_21], %29 {strides = array<i32>} : memref<4x18x38xf32, #tpu.memory_space<vmem>>, vector<1x16x16xf32>,
    %c0_22 = arith.constant 0 : index
    %c3 = arith.constant 3 : index
    %c0_23 = arith.constant 0 : index
    %c0_24 = arith.constant 0 : index
    %30 = vector.load %arg9[%c0_22, %c3, %c0_23, %c0_24] : memref<2x4x16x16xf32, #tpu.memory_space<vmem>>, vector<1x1x16x16xf32>
    %31 = vector.shape_cast %30 : vector<1x1x16x16xf32> to vector<16x16xf32>
    %c3_25 = arith.constant 3 : index
    %c1_26 = arith.constant 1 : index
    %c2_27 = arith.constant 2 : index
    %32 = vector.load %arg11[%c3_25, %c1_26, %c2_27] : memref<4x18x38xf32, #tpu.memory_space<vmem>>, vector<1x16x16xf32>
    %33 = vector.shape_cast %32 : vector<1x16x16xf32> to vector<16x16xf32>
    %34 = vector.shape_cast %31 : vector<16x16xf32> to vector<1x16x16xf32>
    tpu.vector_store %arg11[%c3_25, %c1_26, %c2_27], %34 {strides = array<i32>} : memref<4x18x38xf32, #tpu.memory_space<vmem>>, vector<1x16x16xf32>,
    %c1_28 = arith.constant 1 : index
    %c0_29 = arith.constant 0 : index
    %c0_30 = arith.constant 0 : index
    %c0_31 = arith.constant 0 : index
    %35 = vector.load %arg9[%c1_28, %c0_29, %c0_30, %c0_31] : memref<2x4x16x16xf32, #tpu.memory_space<vmem>>, vector<1x1x16x16xf32>
    %36 = vector.shape_cast %35 : vector<1x1x16x16xf32> to vector<16x16xf32>
    %c0_32 = arith.constant 0 : index
    %c1_33 = arith.constant 1 : index
    %c20 = arith.constant 20 : index
    %37 = vector.load %arg11[%c0_32, %c1_33, %c20] : memref<4x18x38xf32, #tpu.memory_space<vmem>>, vector<1x16x16xf32>
    %38 = vector.shape_cast %37 : vector<1x16x16xf32> to vector<16x16xf32>
    %39 = vector.shape_cast %36 : vector<16x16xf32> to vector<1x16x16xf32>
    tpu.vector_store %arg11[%c0_32, %c1_33, %c20], %39 {strides = array<i32>} : memref<4x18x38xf32, #tpu.memory_space<vmem>>, vector<1x16x16xf32>,
    %c1_34 = arith.constant 1 : index
    %c1_35 = arith.constant 1 : index
    %c0_36 = arith.constant 0 : index
    %c0_37 = arith.constant 0 : index
    %40 = vector.load %arg9[%c1_34, %c1_35, %c0_36, %c0_37] : memref<2x4x16x16xf32, #tpu.memory_space<vmem>>, vector<1x1x16x16xf32>
    %41 = vector.shape_cast %40 : vector<1x1x16x16xf32> to vector<16x16xf32>
    %c1_38 = arith.constant 1 : index
    %c1_39 = arith.constant 1 : index
    %c20_40 = arith.constant 20 : index
    %42 = vector.load %arg11[%c1_38, %c1_39, %c20_40] : memref<4x18x38xf32, #tpu.memory_space<vmem>>, vector<1x16x16xf32>
    %43 = vector.shape_cast %42 : vector<1x16x16xf32> to vector<16x16xf32>
    %44 = vector.shape_cast %41 : vector<16x16xf32> to vector<1x16x16xf32>
    tpu.vector_store %arg11[%c1_38, %c1_39, %c20_40], %44 {strides = array<i32>} : memref<4x18x38xf32, #tpu.memory_space<vmem>>, vector<1x16x16xf32>,
    %c1_41 = arith.constant 1 : index
    %c2_42 = arith.constant 2 : index
    %c0_43 = arith.constant 0 : index
    %c0_44 = arith.constant 0 : index
    %45 = vector.load %arg9[%c1_41, %c2_42, %c0_43, %c0_44] : memref<2x4x16x16xf32, #tpu.memory_space<vmem>>, vector<1x1x16x16xf32>
    %46 = vector.shape_cast %45 : vector<1x1x16x16xf32> to vector<16x16xf32>
    %c2_45 = arith.constant 2 : index
    %c1_46 = arith.constant 1 : index
    %c20_47 = arith.constant 20 : index
    %47 = vector.load %arg11[%c2_45, %c1_46, %c20_47] : memref<4x18x38xf32, #tpu.memory_space<vmem>>, vector<1x16x16xf32>
    %48 = vector.shape_cast %47 : vector<1x16x16xf32> to vector<16x16xf32>
    %49 = vector.shape_cast %46 : vector<16x16xf32> to vector<1x16x16xf32>
    tpu.vector_store %arg11[%c2_45, %c1_46, %c20_47], %49 {strides = array<i32>} : memref<4x18x38xf32, #tpu.memory_space<vmem>>, vector<1x16x16xf32>,
    %c1_48 = arith.constant 1 : index
    %c3_49 = arith.constant 3 : index
    %c0_50 = arith.constant 0 : index
    %c0_51 = arith.constant 0 : index
    %50 = vector.load %arg9[%c1_48, %c3_49, %c0_50, %c0_51] : memref<2x4x16x16xf32, #tpu.memory_space<vmem>>, vector<1x1x16x16xf32>
    %51 = vector.shape_cast %50 : vector<1x1x16x16xf32> to vector<16x16xf32>
    %c3_52 = arith.constant 3 : index
    %c1_53 = arith.constant 1 : index
    %c20_54 = arith.constant 20 : index
    %52 = vector.load %arg11[%c3_52, %c1_53, %c20_54] : memref<4x18x38xf32, #tpu.memory_space<vmem>>, vector<1x16x16xf32>
    %53 = vector.shape_cast %52 : vector<1x16x16xf32> to vector<16x16xf32>
    %54 = vector.shape_cast %51 : vector<16x16xf32> to vector<1x16x16xf32>
    tpu.vector_store %arg11[%c3_52, %c1_53, %c20_54], %54 {strides = array<i32>} : memref<4x18x38xf32, #tpu.memory_space<vmem>>, vector<1x16x16xf32>,
    %c0_55 = arith.constant 0 : index
    %55 = memref.load %arg1[%c0_55] : memref<4xf32, #tpu.memory_space<smem>>
    %56 = vector.broadcast %55 : f32 to vector<16x36xf32>
    %c1_56 = arith.constant 1 : index
    %57 = memref.load %arg1[%c1_56] : memref<4xf32, #tpu.memory_space<smem>>
    %58 = vector.broadcast %57 : f32 to vector<16x36xf32>
    %c2_57 = arith.constant 2 : index
    %59 = memref.load %arg1[%c2_57] : memref<4xf32, #tpu.memory_space<smem>>
    %60 = vector.broadcast %59 : f32 to vector<16x36xf32>
    %c3_58 = arith.constant 3 : index
    %61 = memref.load %arg1[%c3_58] : memref<4xf32, #tpu.memory_space<smem>>
    %62 = vector.broadcast %61 : f32 to vector<16x36xf32>
    %c0_59 = arith.constant 0 : index
    %c0_60 = arith.constant 0 : index
    %c0_61 = arith.constant 0 : index
    %63 = vector.load %arg11[%c0_59, %c0_60, %c0_61] : memref<4x18x38xf32, #tpu.memory_space<vmem>>, vector<1x16x36xf32>
    %64 = vector.shape_cast %63 : vector<1x16x36xf32> to vector<16x36xf32>
    %c0_62 = arith.constant 0 : index
    %65 = memref.load %arg0[%c0_62] : memref<144xf32, #tpu.memory_space<smem>>
    %66 = vector.broadcast %65 : f32 to vector<16x36xf32>
    %67 = arith.mulf %66, %64 : vector<16x36xf32>
    %68 = arith.addf %56, %67 : vector<16x36xf32>
    %c36 = arith.constant 36 : index
    %69 = memref.load %arg0[%c36] : memref<144xf32, #tpu.memory_space<smem>>
    %70 = vector.broadcast %69 : f32 to vector<16x36xf32>
    %71 = arith.mulf %70, %64 : vector<16x36xf32>
    %72 = arith.addf %58, %71 : vector<16x36xf32>
    %c72 = arith.constant 72 : index
    %73 = memref.load %arg0[%c72] : memref<144xf32, #tpu.memory_space<smem>>
    %74 = vector.broadcast %73 : f32 to vector<16x36xf32>
    %75 = arith.mulf %74, %64 : vector<16x36xf32>
    %76 = arith.addf %60, %75 : vector<16x36xf32>
    %c108 = arith.constant 108 : index
    %77 = memref.load %arg0[%c108] : memref<144xf32, #tpu.memory_space<smem>>
    %78 = vector.broadcast %77 : f32 to vector<16x36xf32>
    %79 = arith.mulf %78, %64 : vector<16x36xf32>
    %80 = arith.addf %62, %79 : vector<16x36xf32>
    %c0_63 = arith.constant 0 : index
    %c0_64 = arith.constant 0 : index
    %c1_65 = arith.constant 1 : index
    %81 = vector.load %arg11[%c0_63, %c0_64, %c1_65] : memref<4x18x38xf32, #tpu.memory_space<vmem>>, vector<1x16x36xf32>
    %82 = vector.shape_cast %81 : vector<1x16x36xf32> to vector<16x36xf32>
    %c1_66 = arith.constant 1 : index
    %83 = memref.load %arg0[%c1_66] : memref<144xf32, #tpu.memory_space<smem>>
    %84 = vector.broadcast %83 : f32 to vector<16x36xf32>
    %85 = arith.mulf %84, %82 : vector<16x36xf32>
    %86 = arith.addf %68, %85 : vector<16x36xf32>
    %c37 = arith.constant 37 : index
    %87 = memref.load %arg0[%c37] : memref<144xf32, #tpu.memory_space<smem>>
    %88 = vector.broadcast %87 : f32 to vector<16x36xf32>
    %89 = arith.mulf %88, %82 : vector<16x36xf32>
    %90 = arith.addf %72, %89 : vector<16x36xf32>
    %c73 = arith.constant 73 : index
    %91 = memref.load %arg0[%c73] : memref<144xf32, #tpu.memory_space<smem>>
    %92 = vector.broadcast %91 : f32 to vector<16x36xf32>
    %93 = arith.mulf %92, %82 : vector<16x36xf32>
    %94 = arith.addf %76, %93 : vector<16x36xf32>
    %c109 = arith.constant 109 : index
    %95 = memref.load %arg0[%c109] : memref<144xf32, #tpu.memory_space<smem>>
    %96 = vector.broadcast %95 : f32 to vector<16x36xf32>
    %97 = arith.mulf %96, %82 : vector<16x36xf32>
    %98 = arith.addf %80, %97 : vector<16x36xf32>
    %c0_67 = arith.constant 0 : index
    %c0_68 = arith.constant 0 : index
    %c2_69 = arith.constant 2 : index
    %99 = vector.load %arg11[%c0_67, %c0_68, %c2_69] : memref<4x18x38xf32, #tpu.memory_space<vmem>>, vector<1x16x36xf32>
    %100 = vector.shape_cast %99 : vector<1x16x36xf32> to vector<16x36xf32>
    %c2_70 = arith.constant 2 : index
    %101 = memref.load %arg0[%c2_70] : memref<144xf32, #tpu.memory_space<smem>>
    %102 = vector.broadcast %101 : f32 to vector<16x36xf32>
    %103 = arith.mulf %102, %100 : vector<16x36xf32>
    %104 = arith.addf %86, %103 : vector<16x36xf32>
    %c38 = arith.constant 38 : index
    %105 = memref.load %arg0[%c38] : memref<144xf32, #tpu.memory_space<smem>>
    %106 = vector.broadcast %105 : f32 to vector<16x36xf32>
    %107 = arith.mulf %106, %100 : vector<16x36xf32>
    %108 = arith.addf %90, %107 : vector<16x36xf32>
    %c74 = arith.constant 74 : index
    %109 = memref.load %arg0[%c74] : memref<144xf32, #tpu.memory_space<smem>>
    %110 = vector.broadcast %109 : f32 to vector<16x36xf32>
    %111 = arith.mulf %110, %100 : vector<16x36xf32>
    %112 = arith.addf %94, %111 : vector<16x36xf32>
    %c110 = arith.constant 110 : index
    %113 = memref.load %arg0[%c110] : memref<144xf32, #tpu.memory_space<smem>>
    %114 = vector.broadcast %113 : f32 to vector<16x36xf32>
    %115 = arith.mulf %114, %100 : vector<16x36xf32>
    %116 = arith.addf %98, %115 : vector<16x36xf32>
    %c0_71 = arith.constant 0 : index
    %c1_72 = arith.constant 1 : index
    %c0_73 = arith.constant 0 : index
    %117 = vector.load %arg11[%c0_71, %c1_72, %c0_73] : memref<4x18x38xf32, #tpu.memory_space<vmem>>, vector<1x16x36xf32>
    %118 = vector.shape_cast %117 : vector<1x16x36xf32> to vector<16x36xf32>
    %c3_74 = arith.constant 3 : index
    %119 = memref.load %arg0[%c3_74] : memref<144xf32, #tpu.memory_space<smem>>
    %120 = vector.broadcast %119 : f32 to vector<16x36xf32>
    %121 = arith.mulf %120, %118 : vector<16x36xf32>
    %122 = arith.addf %104, %121 : vector<16x36xf32>
    %c39 = arith.constant 39 : index
    %123 = memref.load %arg0[%c39] : memref<144xf32, #tpu.memory_space<smem>>
    %124 = vector.broadcast %123 : f32 to vector<16x36xf32>
    %125 = arith.mulf %124, %118 : vector<16x36xf32>
    %126 = arith.addf %108, %125 : vector<16x36xf32>
    %c75 = arith.constant 75 : index
    %127 = memref.load %arg0[%c75] : memref<144xf32, #tpu.memory_space<smem>>
    %128 = vector.broadcast %127 : f32 to vector<16x36xf32>
    %129 = arith.mulf %128, %118 : vector<16x36xf32>
    %130 = arith.addf %112, %129 : vector<16x36xf32>
    %c111 = arith.constant 111 : index
    %131 = memref.load %arg0[%c111] : memref<144xf32, #tpu.memory_space<smem>>
    %132 = vector.broadcast %131 : f32 to vector<16x36xf32>
    %133 = arith.mulf %132, %118 : vector<16x36xf32>
    %134 = arith.addf %116, %133 : vector<16x36xf32>
    %c0_75 = arith.constant 0 : index
    %c1_76 = arith.constant 1 : index
    %c1_77 = arith.constant 1 : index
    %135 = vector.load %arg11[%c0_75, %c1_76, %c1_77] : memref<4x18x38xf32, #tpu.memory_space<vmem>>, vector<1x16x36xf32>
    %136 = vector.shape_cast %135 : vector<1x16x36xf32> to vector<16x36xf32>
    %c4 = arith.constant 4 : index
    %137 = memref.load %arg0[%c4] : memref<144xf32, #tpu.memory_space<smem>>
    %138 = vector.broadcast %137 : f32 to vector<16x36xf32>
    %139 = arith.mulf %138, %136 : vector<16x36xf32>
    %140 = arith.addf %122, %139 : vector<16x36xf32>
    %c40 = arith.constant 40 : index
    %141 = memref.load %arg0[%c40] : memref<144xf32, #tpu.memory_space<smem>>
    %142 = vector.broadcast %141 : f32 to vector<16x36xf32>
    %143 = arith.mulf %142, %136 : vector<16x36xf32>
    %144 = arith.addf %126, %143 : vector<16x36xf32>
    %c76 = arith.constant 76 : index
    %145 = memref.load %arg0[%c76] : memref<144xf32, #tpu.memory_space<smem>>
    %146 = vector.broadcast %145 : f32 to vector<16x36xf32>
    %147 = arith.mulf %146, %136 : vector<16x36xf32>
    %148 = arith.addf %130, %147 : vector<16x36xf32>
    %c112 = arith.constant 112 : index
    %149 = memref.load %arg0[%c112] : memref<144xf32, #tpu.memory_space<smem>>
    %150 = vector.broadcast %149 : f32 to vector<16x36xf32>
    %151 = arith.mulf %150, %136 : vector<16x36xf32>
    %152 = arith.addf %134, %151 : vector<16x36xf32>
    %c0_78 = arith.constant 0 : index
    %c1_79 = arith.constant 1 : index
    %c2_80 = arith.constant 2 : index
    %153 = vector.load %arg11[%c0_78, %c1_79, %c2_80] : memref<4x18x38xf32, #tpu.memory_space<vmem>>, vector<1x16x36xf32>
    %154 = vector.shape_cast %153 : vector<1x16x36xf32> to vector<16x36xf32>
    %c5 = arith.constant 5 : index
    %155 = memref.load %arg0[%c5] : memref<144xf32, #tpu.memory_space<smem>>
    %156 = vector.broadcast %155 : f32 to vector<16x36xf32>
    %157 = arith.mulf %156, %154 : vector<16x36xf32>
    %158 = arith.addf %140, %157 : vector<16x36xf32>
    %c41 = arith.constant 41 : index
    %159 = memref.load %arg0[%c41] : memref<144xf32, #tpu.memory_space<smem>>
    %160 = vector.broadcast %159 : f32 to vector<16x36xf32>
    %161 = arith.mulf %160, %154 : vector<16x36xf32>
    %162 = arith.addf %144, %161 : vector<16x36xf32>
    %c77 = arith.constant 77 : index
    %163 = memref.load %arg0[%c77] : memref<144xf32, #tpu.memory_space<smem>>
    %164 = vector.broadcast %163 : f32 to vector<16x36xf32>
    %165 = arith.mulf %164, %154 : vector<16x36xf32>
    %166 = arith.addf %148, %165 : vector<16x36xf32>
    %c113 = arith.constant 113 : index
    %167 = memref.load %arg0[%c113] : memref<144xf32, #tpu.memory_space<smem>>
    %168 = vector.broadcast %167 : f32 to vector<16x36xf32>
    %169 = arith.mulf %168, %154 : vector<16x36xf32>
    %170 = arith.addf %152, %169 : vector<16x36xf32>
    %c0_81 = arith.constant 0 : index
    %c2_82 = arith.constant 2 : index
    %c0_83 = arith.constant 0 : index
    %171 = vector.load %arg11[%c0_81, %c2_82, %c0_83] : memref<4x18x38xf32, #tpu.memory_space<vmem>>, vector<1x16x36xf32>
    %172 = vector.shape_cast %171 : vector<1x16x36xf32> to vector<16x36xf32>
    %c6 = arith.constant 6 : index
    %173 = memref.load %arg0[%c6] : memref<144xf32, #tpu.memory_space<smem>>
    %174 = vector.broadcast %173 : f32 to vector<16x36xf32>
    %175 = arith.mulf %174, %172 : vector<16x36xf32>
    %176 = arith.addf %158, %175 : vector<16x36xf32>
    %c42 = arith.constant 42 : index
    %177 = memref.load %arg0[%c42] : memref<144xf32, #tpu.memory_space<smem>>
    %178 = vector.broadcast %177 : f32 to vector<16x36xf32>
    %179 = arith.mulf %178, %172 : vector<16x36xf32>
    %180 = arith.addf %162, %179 : vector<16x36xf32>
    %c78 = arith.constant 78 : index
    %181 = memref.load %arg0[%c78] : memref<144xf32, #tpu.memory_space<smem>>
    %182 = vector.broadcast %181 : f32 to vector<16x36xf32>
    %183 = arith.mulf %182, %172 : vector<16x36xf32>
    %184 = arith.addf %166, %183 : vector<16x36xf32>
    %c114 = arith.constant 114 : index
    %185 = memref.load %arg0[%c114] : memref<144xf32, #tpu.memory_space<smem>>
    %186 = vector.broadcast %185 : f32 to vector<16x36xf32>
    %187 = arith.mulf %186, %172 : vector<16x36xf32>
    %188 = arith.addf %170, %187 : vector<16x36xf32>
    %c0_84 = arith.constant 0 : index
    %c2_85 = arith.constant 2 : index
    %c1_86 = arith.constant 1 : index
    %189 = vector.load %arg11[%c0_84, %c2_85, %c1_86] : memref<4x18x38xf32, #tpu.memory_space<vmem>>, vector<1x16x36xf32>
    %190 = vector.shape_cast %189 : vector<1x16x36xf32> to vector<16x36xf32>
    %c7 = arith.constant 7 : index
    %191 = memref.load %arg0[%c7] : memref<144xf32, #tpu.memory_space<smem>>
    %192 = vector.broadcast %191 : f32 to vector<16x36xf32>
    %193 = arith.mulf %192, %190 : vector<16x36xf32>
    %194 = arith.addf %176, %193 : vector<16x36xf32>
    %c43 = arith.constant 43 : index
    %195 = memref.load %arg0[%c43] : memref<144xf32, #tpu.memory_space<smem>>
    %196 = vector.broadcast %195 : f32 to vector<16x36xf32>
    %197 = arith.mulf %196, %190 : vector<16x36xf32>
    %198 = arith.addf %180, %197 : vector<16x36xf32>
    %c79 = arith.constant 79 : index
    %199 = memref.load %arg0[%c79] : memref<144xf32, #tpu.memory_space<smem>>
    %200 = vector.broadcast %199 : f32 to vector<16x36xf32>
    %201 = arith.mulf %200, %190 : vector<16x36xf32>
    %202 = arith.addf %184, %201 : vector<16x36xf32>
    %c115 = arith.constant 115 : index
    %203 = memref.load %arg0[%c115] : memref<144xf32, #tpu.memory_space<smem>>
    %204 = vector.broadcast %203 : f32 to vector<16x36xf32>
    %205 = arith.mulf %204, %190 : vector<16x36xf32>
    %206 = arith.addf %188, %205 : vector<16x36xf32>
    %c0_87 = arith.constant 0 : index
    %c2_88 = arith.constant 2 : index
    %c2_89 = arith.constant 2 : index
    %207 = vector.load %arg11[%c0_87, %c2_88, %c2_89] : memref<4x18x38xf32, #tpu.memory_space<vmem>>, vector<1x16x36xf32>
    %208 = vector.shape_cast %207 : vector<1x16x36xf32> to vector<16x36xf32>
    %c8 = arith.constant 8 : index
    %209 = memref.load %arg0[%c8] : memref<144xf32, #tpu.memory_space<smem>>
    %210 = vector.broadcast %209 : f32 to vector<16x36xf32>
    %211 = arith.mulf %210, %208 : vector<16x36xf32>
    %212 = arith.addf %194, %211 : vector<16x36xf32>
    %c44 = arith.constant 44 : index
    %213 = memref.load %arg0[%c44] : memref<144xf32, #tpu.memory_space<smem>>
    %214 = vector.broadcast %213 : f32 to vector<16x36xf32>
    %215 = arith.mulf %214, %208 : vector<16x36xf32>
    %216 = arith.addf %198, %215 : vector<16x36xf32>
    %c80 = arith.constant 80 : index
    %217 = memref.load %arg0[%c80] : memref<144xf32, #tpu.memory_space<smem>>
    %218 = vector.broadcast %217 : f32 to vector<16x36xf32>
    %219 = arith.mulf %218, %208 : vector<16x36xf32>
    %220 = arith.addf %202, %219 : vector<16x36xf32>
    %c116 = arith.constant 116 : index
    %221 = memref.load %arg0[%c116] : memref<144xf32, #tpu.memory_space<smem>>
    %222 = vector.broadcast %221 : f32 to vector<16x36xf32>
    %223 = arith.mulf %222, %208 : vector<16x36xf32>
    %224 = arith.addf %206, %223 : vector<16x36xf32>
    %c1_90 = arith.constant 1 : index
    %c0_91 = arith.constant 0 : index
    %c0_92 = arith.constant 0 : index
    %225 = vector.load %arg11[%c1_90, %c0_91, %c0_92] : memref<4x18x38xf32, #tpu.memory_space<vmem>>, vector<1x16x36xf32>
    %226 = vector.shape_cast %225 : vector<1x16x36xf32> to vector<16x36xf32>
    %c9 = arith.constant 9 : index
    %227 = memref.load %arg0[%c9] : memref<144xf32, #tpu.memory_space<smem>>
    %228 = vector.broadcast %227 : f32 to vector<16x36xf32>
    %229 = arith.mulf %228, %226 : vector<16x36xf32>
    %230 = arith.addf %212, %229 : vector<16x36xf32>
    %c45 = arith.constant 45 : index
    %231 = memref.load %arg0[%c45] : memref<144xf32, #tpu.memory_space<smem>>
    %232 = vector.broadcast %231 : f32 to vector<16x36xf32>
    %233 = arith.mulf %232, %226 : vector<16x36xf32>
    %234 = arith.addf %216, %233 : vector<16x36xf32>
    %c81 = arith.constant 81 : index
    %235 = memref.load %arg0[%c81] : memref<144xf32, #tpu.memory_space<smem>>
    %236 = vector.broadcast %235 : f32 to vector<16x36xf32>
    %237 = arith.mulf %236, %226 : vector<16x36xf32>
    %238 = arith.addf %220, %237 : vector<16x36xf32>
    %c117 = arith.constant 117 : index
    %239 = memref.load %arg0[%c117] : memref<144xf32, #tpu.memory_space<smem>>
    %240 = vector.broadcast %239 : f32 to vector<16x36xf32>
    %241 = arith.mulf %240, %226 : vector<16x36xf32>
    %242 = arith.addf %224, %241 : vector<16x36xf32>
    %c1_93 = arith.constant 1 : index
    %c0_94 = arith.constant 0 : index
    %c1_95 = arith.constant 1 : index
    %243 = vector.load %arg11[%c1_93, %c0_94, %c1_95] : memref<4x18x38xf32, #tpu.memory_space<vmem>>, vector<1x16x36xf32>
    %244 = vector.shape_cast %243 : vector<1x16x36xf32> to vector<16x36xf32>
    %c10 = arith.constant 10 : index
    %245 = memref.load %arg0[%c10] : memref<144xf32, #tpu.memory_space<smem>>
    %246 = vector.broadcast %245 : f32 to vector<16x36xf32>
    %247 = arith.mulf %246, %244 : vector<16x36xf32>
    %248 = arith.addf %230, %247 : vector<16x36xf32>
    %c46 = arith.constant 46 : index
    %249 = memref.load %arg0[%c46] : memref<144xf32, #tpu.memory_space<smem>>
    %250 = vector.broadcast %249 : f32 to vector<16x36xf32>
    %251 = arith.mulf %250, %244 : vector<16x36xf32>
    %252 = arith.addf %234, %251 : vector<16x36xf32>
    %c82 = arith.constant 82 : index
    %253 = memref.load %arg0[%c82] : memref<144xf32, #tpu.memory_space<smem>>
    %254 = vector.broadcast %253 : f32 to vector<16x36xf32>
    %255 = arith.mulf %254, %244 : vector<16x36xf32>
    %256 = arith.addf %238, %255 : vector<16x36xf32>
    %c118 = arith.constant 118 : index
    %257 = memref.load %arg0[%c118] : memref<144xf32, #tpu.memory_space<smem>>
    %258 = vector.broadcast %257 : f32 to vector<16x36xf32>
    %259 = arith.mulf %258, %244 : vector<16x36xf32>
    %260 = arith.addf %242, %259 : vector<16x36xf32>
    %c1_96 = arith.constant 1 : index
    %c0_97 = arith.constant 0 : index
    %c2_98 = arith.constant 2 : index
    %261 = vector.load %arg11[%c1_96, %c0_97, %c2_98] : memref<4x18x38xf32, #tpu.memory_space<vmem>>, vector<1x16x36xf32>
    %262 = vector.shape_cast %261 : vector<1x16x36xf32> to vector<16x36xf32>
    %c11 = arith.constant 11 : index
    %263 = memref.load %arg0[%c11] : memref<144xf32, #tpu.memory_space<smem>>
    %264 = vector.broadcast %263 : f32 to vector<16x36xf32>
    %265 = arith.mulf %264, %262 : vector<16x36xf32>
    %266 = arith.addf %248, %265 : vector<16x36xf32>
    %c47 = arith.constant 47 : index
    %267 = memref.load %arg0[%c47] : memref<144xf32, #tpu.memory_space<smem>>
    %268 = vector.broadcast %267 : f32 to vector<16x36xf32>
    %269 = arith.mulf %268, %262 : vector<16x36xf32>
    %270 = arith.addf %252, %269 : vector<16x36xf32>
    %c83 = arith.constant 83 : index
    %271 = memref.load %arg0[%c83] : memref<144xf32, #tpu.memory_space<smem>>
    %272 = vector.broadcast %271 : f32 to vector<16x36xf32>
    %273 = arith.mulf %272, %262 : vector<16x36xf32>
    %274 = arith.addf %256, %273 : vector<16x36xf32>
    %c119 = arith.constant 119 : index
    %275 = memref.load %arg0[%c119] : memref<144xf32, #tpu.memory_space<smem>>
    %276 = vector.broadcast %275 : f32 to vector<16x36xf32>
    %277 = arith.mulf %276, %262 : vector<16x36xf32>
    %278 = arith.addf %260, %277 : vector<16x36xf32>
    %c1_99 = arith.constant 1 : index
    %c1_100 = arith.constant 1 : index
    %c0_101 = arith.constant 0 : index
    %279 = vector.load %arg11[%c1_99, %c1_100, %c0_101] : memref<4x18x38xf32, #tpu.memory_space<vmem>>, vector<1x16x36xf32>
    %280 = vector.shape_cast %279 : vector<1x16x36xf32> to vector<16x36xf32>
    %c12 = arith.constant 12 : index
    %281 = memref.load %arg0[%c12] : memref<144xf32, #tpu.memory_space<smem>>
    %282 = vector.broadcast %281 : f32 to vector<16x36xf32>
    %283 = arith.mulf %282, %280 : vector<16x36xf32>
    %284 = arith.addf %266, %283 : vector<16x36xf32>
    %c48 = arith.constant 48 : index
    %285 = memref.load %arg0[%c48] : memref<144xf32, #tpu.memory_space<smem>>
    %286 = vector.broadcast %285 : f32 to vector<16x36xf32>
    %287 = arith.mulf %286, %280 : vector<16x36xf32>
    %288 = arith.addf %270, %287 : vector<16x36xf32>
    %c84 = arith.constant 84 : index
    %289 = memref.load %arg0[%c84] : memref<144xf32, #tpu.memory_space<smem>>
    %290 = vector.broadcast %289 : f32 to vector<16x36xf32>
    %291 = arith.mulf %290, %280 : vector<16x36xf32>
    %292 = arith.addf %274, %291 : vector<16x36xf32>
    %c120 = arith.constant 120 : index
    %293 = memref.load %arg0[%c120] : memref<144xf32, #tpu.memory_space<smem>>
    %294 = vector.broadcast %293 : f32 to vector<16x36xf32>
    %295 = arith.mulf %294, %280 : vector<16x36xf32>
    %296 = arith.addf %278, %295 : vector<16x36xf32>
    %c1_102 = arith.constant 1 : index
    %c1_103 = arith.constant 1 : index
    %c1_104 = arith.constant 1 : index
    %297 = vector.load %arg11[%c1_102, %c1_103, %c1_104] : memref<4x18x38xf32, #tpu.memory_space<vmem>>, vector<1x16x36xf32>
    %298 = vector.shape_cast %297 : vector<1x16x36xf32> to vector<16x36xf32>
    %c13 = arith.constant 13 : index
    %299 = memref.load %arg0[%c13] : memref<144xf32, #tpu.memory_space<smem>>
    %300 = vector.broadcast %299 : f32 to vector<16x36xf32>
    %301 = arith.mulf %300, %298 : vector<16x36xf32>
    %302 = arith.addf %284, %301 : vector<16x36xf32>
    %c49 = arith.constant 49 : index
    %303 = memref.load %arg0[%c49] : memref<144xf32, #tpu.memory_space<smem>>
    %304 = vector.broadcast %303 : f32 to vector<16x36xf32>
    %305 = arith.mulf %304, %298 : vector<16x36xf32>
    %306 = arith.addf %288, %305 : vector<16x36xf32>
    %c85 = arith.constant 85 : index
    %307 = memref.load %arg0[%c85] : memref<144xf32, #tpu.memory_space<smem>>
    %308 = vector.broadcast %307 : f32 to vector<16x36xf32>
    %309 = arith.mulf %308, %298 : vector<16x36xf32>
    %310 = arith.addf %292, %309 : vector<16x36xf32>
    %c121 = arith.constant 121 : index
    %311 = memref.load %arg0[%c121] : memref<144xf32, #tpu.memory_space<smem>>
    %312 = vector.broadcast %311 : f32 to vector<16x36xf32>
    %313 = arith.mulf %312, %298 : vector<16x36xf32>
    %314 = arith.addf %296, %313 : vector<16x36xf32>
    %c1_105 = arith.constant 1 : index
    %c1_106 = arith.constant 1 : index
    %c2_107 = arith.constant 2 : index
    %315 = vector.load %arg11[%c1_105, %c1_106, %c2_107] : memref<4x18x38xf32, #tpu.memory_space<vmem>>, vector<1x16x36xf32>
    %316 = vector.shape_cast %315 : vector<1x16x36xf32> to vector<16x36xf32>
    %c14 = arith.constant 14 : index
    %317 = memref.load %arg0[%c14] : memref<144xf32, #tpu.memory_space<smem>>
    %318 = vector.broadcast %317 : f32 to vector<16x36xf32>
    %319 = arith.mulf %318, %316 : vector<16x36xf32>
    %320 = arith.addf %302, %319 : vector<16x36xf32>
    %c50 = arith.constant 50 : index
    %321 = memref.load %arg0[%c50] : memref<144xf32, #tpu.memory_space<smem>>
    %322 = vector.broadcast %321 : f32 to vector<16x36xf32>
    %323 = arith.mulf %322, %316 : vector<16x36xf32>
    %324 = arith.addf %306, %323 : vector<16x36xf32>
    %c86 = arith.constant 86 : index
    %325 = memref.load %arg0[%c86] : memref<144xf32, #tpu.memory_space<smem>>
    %326 = vector.broadcast %325 : f32 to vector<16x36xf32>
    %327 = arith.mulf %326, %316 : vector<16x36xf32>
    %328 = arith.addf %310, %327 : vector<16x36xf32>
    %c122 = arith.constant 122 : index
    %329 = memref.load %arg0[%c122] : memref<144xf32, #tpu.memory_space<smem>>
    %330 = vector.broadcast %329 : f32 to vector<16x36xf32>
    %331 = arith.mulf %330, %316 : vector<16x36xf32>
    %332 = arith.addf %314, %331 : vector<16x36xf32>
    %c1_108 = arith.constant 1 : index
    %c2_109 = arith.constant 2 : index
    %c0_110 = arith.constant 0 : index
    %333 = vector.load %arg11[%c1_108, %c2_109, %c0_110] : memref<4x18x38xf32, #tpu.memory_space<vmem>>, vector<1x16x36xf32>
    %334 = vector.shape_cast %333 : vector<1x16x36xf32> to vector<16x36xf32>
    %c15 = arith.constant 15 : index
    %335 = memref.load %arg0[%c15] : memref<144xf32, #tpu.memory_space<smem>>
    %336 = vector.broadcast %335 : f32 to vector<16x36xf32>
    %337 = arith.mulf %336, %334 : vector<16x36xf32>
    %338 = arith.addf %320, %337 : vector<16x36xf32>
    %c51 = arith.constant 51 : index
    %339 = memref.load %arg0[%c51] : memref<144xf32, #tpu.memory_space<smem>>
    %340 = vector.broadcast %339 : f32 to vector<16x36xf32>
    %341 = arith.mulf %340, %334 : vector<16x36xf32>
    %342 = arith.addf %324, %341 : vector<16x36xf32>
    %c87 = arith.constant 87 : index
    %343 = memref.load %arg0[%c87] : memref<144xf32, #tpu.memory_space<smem>>
    %344 = vector.broadcast %343 : f32 to vector<16x36xf32>
    %345 = arith.mulf %344, %334 : vector<16x36xf32>
    %346 = arith.addf %328, %345 : vector<16x36xf32>
    %c123 = arith.constant 123 : index
    %347 = memref.load %arg0[%c123] : memref<144xf32, #tpu.memory_space<smem>>
    %348 = vector.broadcast %347 : f32 to vector<16x36xf32>
    %349 = arith.mulf %348, %334 : vector<16x36xf32>
    %350 = arith.addf %332, %349 : vector<16x36xf32>
    %c1_111 = arith.constant 1 : index
    %c2_112 = arith.constant 2 : index
    %c1_113 = arith.constant 1 : index
    %351 = vector.load %arg11[%c1_111, %c2_112, %c1_113] : memref<4x18x38xf32, #tpu.memory_space<vmem>>, vector<1x16x36xf32>
    %352 = vector.shape_cast %351 : vector<1x16x36xf32> to vector<16x36xf32>
    %c16 = arith.constant 16 : index
    %353 = memref.load %arg0[%c16] : memref<144xf32, #tpu.memory_space<smem>>
    %354 = vector.broadcast %353 : f32 to vector<16x36xf32>
    %355 = arith.mulf %354, %352 : vector<16x36xf32>
    %356 = arith.addf %338, %355 : vector<16x36xf32>
    %c52 = arith.constant 52 : index
    %357 = memref.load %arg0[%c52] : memref<144xf32, #tpu.memory_space<smem>>
    %358 = vector.broadcast %357 : f32 to vector<16x36xf32>
    %359 = arith.mulf %358, %352 : vector<16x36xf32>
    %360 = arith.addf %342, %359 : vector<16x36xf32>
    %c88 = arith.constant 88 : index
    %361 = memref.load %arg0[%c88] : memref<144xf32, #tpu.memory_space<smem>>
    %362 = vector.broadcast %361 : f32 to vector<16x36xf32>
    %363 = arith.mulf %362, %352 : vector<16x36xf32>
    %364 = arith.addf %346, %363 : vector<16x36xf32>
    %c124 = arith.constant 124 : index
    %365 = memref.load %arg0[%c124] : memref<144xf32, #tpu.memory_space<smem>>
    %366 = vector.broadcast %365 : f32 to vector<16x36xf32>
    %367 = arith.mulf %366, %352 : vector<16x36xf32>
    %368 = arith.addf %350, %367 : vector<16x36xf32>
    %c1_114 = arith.constant 1 : index
    %c2_115 = arith.constant 2 : index
    %c2_116 = arith.constant 2 : index
    %369 = vector.load %arg11[%c1_114, %c2_115, %c2_116] : memref<4x18x38xf32, #tpu.memory_space<vmem>>, vector<1x16x36xf32>
    %370 = vector.shape_cast %369 : vector<1x16x36xf32> to vector<16x36xf32>
    %c17 = arith.constant 17 : index
    %371 = memref.load %arg0[%c17] : memref<144xf32, #tpu.memory_space<smem>>
    %372 = vector.broadcast %371 : f32 to vector<16x36xf32>
    %373 = arith.mulf %372, %370 : vector<16x36xf32>
    %374 = arith.addf %356, %373 : vector<16x36xf32>
    %c53 = arith.constant 53 : index
    %375 = memref.load %arg0[%c53] : memref<144xf32, #tpu.memory_space<smem>>
    %376 = vector.broadcast %375 : f32 to vector<16x36xf32>
    %377 = arith.mulf %376, %370 : vector<16x36xf32>
    %378 = arith.addf %360, %377 : vector<16x36xf32>
    %c89 = arith.constant 89 : index
    %379 = memref.load %arg0[%c89] : memref<144xf32, #tpu.memory_space<smem>>
    %380 = vector.broadcast %379 : f32 to vector<16x36xf32>
    %381 = arith.mulf %380, %370 : vector<16x36xf32>
    %382 = arith.addf %364, %381 : vector<16x36xf32>
    %c125 = arith.constant 125 : index
    %383 = memref.load %arg0[%c125] : memref<144xf32, #tpu.memory_space<smem>>
    %384 = vector.broadcast %383 : f32 to vector<16x36xf32>
    %385 = arith.mulf %384, %370 : vector<16x36xf32>
    %386 = arith.addf %368, %385 : vector<16x36xf32>
    %c2_117 = arith.constant 2 : index
    %c0_118 = arith.constant 0 : index
    %c0_119 = arith.constant 0 : index
    %387 = vector.load %arg11[%c2_117, %c0_118, %c0_119] : memref<4x18x38xf32, #tpu.memory_space<vmem>>, vector<1x16x36xf32>
    %388 = vector.shape_cast %387 : vector<1x16x36xf32> to vector<16x36xf32>
    %c18 = arith.constant 18 : index
    %389 = memref.load %arg0[%c18] : memref<144xf32, #tpu.memory_space<smem>>
    %390 = vector.broadcast %389 : f32 to vector<16x36xf32>
    %391 = arith.mulf %390, %388 : vector<16x36xf32>
    %392 = arith.addf %374, %391 : vector<16x36xf32>
    %c54 = arith.constant 54 : index
    %393 = memref.load %arg0[%c54] : memref<144xf32, #tpu.memory_space<smem>>
    %394 = vector.broadcast %393 : f32 to vector<16x36xf32>
    %395 = arith.mulf %394, %388 : vector<16x36xf32>
    %396 = arith.addf %378, %395 : vector<16x36xf32>
    %c90 = arith.constant 90 : index
    %397 = memref.load %arg0[%c90] : memref<144xf32, #tpu.memory_space<smem>>
    %398 = vector.broadcast %397 : f32 to vector<16x36xf32>
    %399 = arith.mulf %398, %388 : vector<16x36xf32>
    %400 = arith.addf %382, %399 : vector<16x36xf32>
    %c126 = arith.constant 126 : index
    %401 = memref.load %arg0[%c126] : memref<144xf32, #tpu.memory_space<smem>>
    %402 = vector.broadcast %401 : f32 to vector<16x36xf32>
    %403 = arith.mulf %402, %388 : vector<16x36xf32>
    %404 = arith.addf %386, %403 : vector<16x36xf32>
    %c2_120 = arith.constant 2 : index
    %c0_121 = arith.constant 0 : index
    %c1_122 = arith.constant 1 : index
    %405 = vector.load %arg11[%c2_120, %c0_121, %c1_122] : memref<4x18x38xf32, #tpu.memory_space<vmem>>, vector<1x16x36xf32>
    %406 = vector.shape_cast %405 : vector<1x16x36xf32> to vector<16x36xf32>
    %c19 = arith.constant 19 : index
    %407 = memref.load %arg0[%c19] : memref<144xf32, #tpu.memory_space<smem>>
    %408 = vector.broadcast %407 : f32 to vector<16x36xf32>
    %409 = arith.mulf %408, %406 : vector<16x36xf32>
    %410 = arith.addf %392, %409 : vector<16x36xf32>
    %c55 = arith.constant 55 : index
    %411 = memref.load %arg0[%c55] : memref<144xf32, #tpu.memory_space<smem>>
    %412 = vector.broadcast %411 : f32 to vector<16x36xf32>
    %413 = arith.mulf %412, %406 : vector<16x36xf32>
    %414 = arith.addf %396, %413 : vector<16x36xf32>
    %c91 = arith.constant 91 : index
    %415 = memref.load %arg0[%c91] : memref<144xf32, #tpu.memory_space<smem>>
    %416 = vector.broadcast %415 : f32 to vector<16x36xf32>
    %417 = arith.mulf %416, %406 : vector<16x36xf32>
    %418 = arith.addf %400, %417 : vector<16x36xf32>
    %c127 = arith.constant 127 : index
    %419 = memref.load %arg0[%c127] : memref<144xf32, #tpu.memory_space<smem>>
    %420 = vector.broadcast %419 : f32 to vector<16x36xf32>
    %421 = arith.mulf %420, %406 : vector<16x36xf32>
    %422 = arith.addf %404, %421 : vector<16x36xf32>
    %c2_123 = arith.constant 2 : index
    %c0_124 = arith.constant 0 : index
    %c2_125 = arith.constant 2 : index
    %423 = vector.load %arg11[%c2_123, %c0_124, %c2_125] : memref<4x18x38xf32, #tpu.memory_space<vmem>>, vector<1x16x36xf32>
    %424 = vector.shape_cast %423 : vector<1x16x36xf32> to vector<16x36xf32>
    %c20_126 = arith.constant 20 : index
    %425 = memref.load %arg0[%c20_126] : memref<144xf32, #tpu.memory_space<smem>>
    %426 = vector.broadcast %425 : f32 to vector<16x36xf32>
    %427 = arith.mulf %426, %424 : vector<16x36xf32>
    %428 = arith.addf %410, %427 : vector<16x36xf32>
    %c56 = arith.constant 56 : index
    %429 = memref.load %arg0[%c56] : memref<144xf32, #tpu.memory_space<smem>>
    %430 = vector.broadcast %429 : f32 to vector<16x36xf32>
    %431 = arith.mulf %430, %424 : vector<16x36xf32>
    %432 = arith.addf %414, %431 : vector<16x36xf32>
    %c92 = arith.constant 92 : index
    %433 = memref.load %arg0[%c92] : memref<144xf32, #tpu.memory_space<smem>>
    %434 = vector.broadcast %433 : f32 to vector<16x36xf32>
    %435 = arith.mulf %434, %424 : vector<16x36xf32>
    %436 = arith.addf %418, %435 : vector<16x36xf32>
    %c128 = arith.constant 128 : index
    %437 = memref.load %arg0[%c128] : memref<144xf32, #tpu.memory_space<smem>>
    %438 = vector.broadcast %437 : f32 to vector<16x36xf32>
    %439 = arith.mulf %438, %424 : vector<16x36xf32>
    %440 = arith.addf %422, %439 : vector<16x36xf32>
    %c2_127 = arith.constant 2 : index
    %c1_128 = arith.constant 1 : index
    %c0_129 = arith.constant 0 : index
    %441 = vector.load %arg11[%c2_127, %c1_128, %c0_129] : memref<4x18x38xf32, #tpu.memory_space<vmem>>, vector<1x16x36xf32>
    %442 = vector.shape_cast %441 : vector<1x16x36xf32> to vector<16x36xf32>
    %c21 = arith.constant 21 : index
    %443 = memref.load %arg0[%c21] : memref<144xf32, #tpu.memory_space<smem>>
    %444 = vector.broadcast %443 : f32 to vector<16x36xf32>
    %445 = arith.mulf %444, %442 : vector<16x36xf32>
    %446 = arith.addf %428, %445 : vector<16x36xf32>
    %c57 = arith.constant 57 : index
    %447 = memref.load %arg0[%c57] : memref<144xf32, #tpu.memory_space<smem>>
    %448 = vector.broadcast %447 : f32 to vector<16x36xf32>
    %449 = arith.mulf %448, %442 : vector<16x36xf32>
    %450 = arith.addf %432, %449 : vector<16x36xf32>
    %c93 = arith.constant 93 : index
    %451 = memref.load %arg0[%c93] : memref<144xf32, #tpu.memory_space<smem>>
    %452 = vector.broadcast %451 : f32 to vector<16x36xf32>
    %453 = arith.mulf %452, %442 : vector<16x36xf32>
    %454 = arith.addf %436, %453 : vector<16x36xf32>
    %c129 = arith.constant 129 : index
    %455 = memref.load %arg0[%c129] : memref<144xf32, #tpu.memory_space<smem>>
    %456 = vector.broadcast %455 : f32 to vector<16x36xf32>
    %457 = arith.mulf %456, %442 : vector<16x36xf32>
    %458 = arith.addf %440, %457 : vector<16x36xf32>
    %c2_130 = arith.constant 2 : index
    %c1_131 = arith.constant 1 : index
    %c1_132 = arith.constant 1 : index
    %459 = vector.load %arg11[%c2_130, %c1_131, %c1_132] : memref<4x18x38xf32, #tpu.memory_space<vmem>>, vector<1x16x36xf32>
    %460 = vector.shape_cast %459 : vector<1x16x36xf32> to vector<16x36xf32>
    %c22 = arith.constant 22 : index
    %461 = memref.load %arg0[%c22] : memref<144xf32, #tpu.memory_space<smem>>
    %462 = vector.broadcast %461 : f32 to vector<16x36xf32>
    %463 = arith.mulf %462, %460 : vector<16x36xf32>
    %464 = arith.addf %446, %463 : vector<16x36xf32>
    %c58 = arith.constant 58 : index
    %465 = memref.load %arg0[%c58] : memref<144xf32, #tpu.memory_space<smem>>
    %466 = vector.broadcast %465 : f32 to vector<16x36xf32>
    %467 = arith.mulf %466, %460 : vector<16x36xf32>
    %468 = arith.addf %450, %467 : vector<16x36xf32>
    %c94 = arith.constant 94 : index
    %469 = memref.load %arg0[%c94] : memref<144xf32, #tpu.memory_space<smem>>
    %470 = vector.broadcast %469 : f32 to vector<16x36xf32>
    %471 = arith.mulf %470, %460 : vector<16x36xf32>
    %472 = arith.addf %454, %471 : vector<16x36xf32>
    %c130 = arith.constant 130 : index
    %473 = memref.load %arg0[%c130] : memref<144xf32, #tpu.memory_space<smem>>
    %474 = vector.broadcast %473 : f32 to vector<16x36xf32>
    %475 = arith.mulf %474, %460 : vector<16x36xf32>
    %476 = arith.addf %458, %475 : vector<16x36xf32>
    %c2_133 = arith.constant 2 : index
    %c1_134 = arith.constant 1 : index
    %c2_135 = arith.constant 2 : index
    %477 = vector.load %arg11[%c2_133, %c1_134, %c2_135] : memref<4x18x38xf32, #tpu.memory_space<vmem>>, vector<1x16x36xf32>
    %478 = vector.shape_cast %477 : vector<1x16x36xf32> to vector<16x36xf32>
    %c23 = arith.constant 23 : index
    %479 = memref.load %arg0[%c23] : memref<144xf32, #tpu.memory_space<smem>>
    %480 = vector.broadcast %479 : f32 to vector<16x36xf32>
    %481 = arith.mulf %480, %478 : vector<16x36xf32>
    %482 = arith.addf %464, %481 : vector<16x36xf32>
    %c59 = arith.constant 59 : index
    %483 = memref.load %arg0[%c59] : memref<144xf32, #tpu.memory_space<smem>>
    %484 = vector.broadcast %483 : f32 to vector<16x36xf32>
    %485 = arith.mulf %484, %478 : vector<16x36xf32>
    %486 = arith.addf %468, %485 : vector<16x36xf32>
    %c95 = arith.constant 95 : index
    %487 = memref.load %arg0[%c95] : memref<144xf32, #tpu.memory_space<smem>>
    %488 = vector.broadcast %487 : f32 to vector<16x36xf32>
    %489 = arith.mulf %488, %478 : vector<16x36xf32>
    %490 = arith.addf %472, %489 : vector<16x36xf32>
    %c131 = arith.constant 131 : index
    %491 = memref.load %arg0[%c131] : memref<144xf32, #tpu.memory_space<smem>>
    %492 = vector.broadcast %491 : f32 to vector<16x36xf32>
    %493 = arith.mulf %492, %478 : vector<16x36xf32>
    %494 = arith.addf %476, %493 : vector<16x36xf32>
    %c2_136 = arith.constant 2 : index
    %c2_137 = arith.constant 2 : index
    %c0_138 = arith.constant 0 : index
    %495 = vector.load %arg11[%c2_136, %c2_137, %c0_138] : memref<4x18x38xf32, #tpu.memory_space<vmem>>, vector<1x16x36xf32>
    %496 = vector.shape_cast %495 : vector<1x16x36xf32> to vector<16x36xf32>
    %c24 = arith.constant 24 : index
    %497 = memref.load %arg0[%c24] : memref<144xf32, #tpu.memory_space<smem>>
    %498 = vector.broadcast %497 : f32 to vector<16x36xf32>
    %499 = arith.mulf %498, %496 : vector<16x36xf32>
    %500 = arith.addf %482, %499 : vector<16x36xf32>
    %c60 = arith.constant 60 : index
    %501 = memref.load %arg0[%c60] : memref<144xf32, #tpu.memory_space<smem>>
    %502 = vector.broadcast %501 : f32 to vector<16x36xf32>
    %503 = arith.mulf %502, %496 : vector<16x36xf32>
    %504 = arith.addf %486, %503 : vector<16x36xf32>
    %c96 = arith.constant 96 : index
    %505 = memref.load %arg0[%c96] : memref<144xf32, #tpu.memory_space<smem>>
    %506 = vector.broadcast %505 : f32 to vector<16x36xf32>
    %507 = arith.mulf %506, %496 : vector<16x36xf32>
    %508 = arith.addf %490, %507 : vector<16x36xf32>
    %c132 = arith.constant 132 : index
    %509 = memref.load %arg0[%c132] : memref<144xf32, #tpu.memory_space<smem>>
    %510 = vector.broadcast %509 : f32 to vector<16x36xf32>
    %511 = arith.mulf %510, %496 : vector<16x36xf32>
    %512 = arith.addf %494, %511 : vector<16x36xf32>
    %c2_139 = arith.constant 2 : index
    %c2_140 = arith.constant 2 : index
    %c1_141 = arith.constant 1 : index
    %513 = vector.load %arg11[%c2_139, %c2_140, %c1_141] : memref<4x18x38xf32, #tpu.memory_space<vmem>>, vector<1x16x36xf32>
    %514 = vector.shape_cast %513 : vector<1x16x36xf32> to vector<16x36xf32>
    %c25 = arith.constant 25 : index
    %515 = memref.load %arg0[%c25] : memref<144xf32, #tpu.memory_space<smem>>
    %516 = vector.broadcast %515 : f32 to vector<16x36xf32>
    %517 = arith.mulf %516, %514 : vector<16x36xf32>
    %518 = arith.addf %500, %517 : vector<16x36xf32>
    %c61 = arith.constant 61 : index
    %519 = memref.load %arg0[%c61] : memref<144xf32, #tpu.memory_space<smem>>
    %520 = vector.broadcast %519 : f32 to vector<16x36xf32>
    %521 = arith.mulf %520, %514 : vector<16x36xf32>
    %522 = arith.addf %504, %521 : vector<16x36xf32>
    %c97 = arith.constant 97 : index
    %523 = memref.load %arg0[%c97] : memref<144xf32, #tpu.memory_space<smem>>
    %524 = vector.broadcast %523 : f32 to vector<16x36xf32>
    %525 = arith.mulf %524, %514 : vector<16x36xf32>
    %526 = arith.addf %508, %525 : vector<16x36xf32>
    %c133 = arith.constant 133 : index
    %527 = memref.load %arg0[%c133] : memref<144xf32, #tpu.memory_space<smem>>
    %528 = vector.broadcast %527 : f32 to vector<16x36xf32>
    %529 = arith.mulf %528, %514 : vector<16x36xf32>
    %530 = arith.addf %512, %529 : vector<16x36xf32>
    %c2_142 = arith.constant 2 : index
    %c2_143 = arith.constant 2 : index
    %c2_144 = arith.constant 2 : index
    %531 = vector.load %arg11[%c2_142, %c2_143, %c2_144] : memref<4x18x38xf32, #tpu.memory_space<vmem>>, vector<1x16x36xf32>
    %532 = vector.shape_cast %531 : vector<1x16x36xf32> to vector<16x36xf32>
    %c26 = arith.constant 26 : index
    %533 = memref.load %arg0[%c26] : memref<144xf32, #tpu.memory_space<smem>>
    %534 = vector.broadcast %533 : f32 to vector<16x36xf32>
    %535 = arith.mulf %534, %532 : vector<16x36xf32>
    %536 = arith.addf %518, %535 : vector<16x36xf32>
    %c62 = arith.constant 62 : index
    %537 = memref.load %arg0[%c62] : memref<144xf32, #tpu.memory_space<smem>>
    %538 = vector.broadcast %537 : f32 to vector<16x36xf32>
    %539 = arith.mulf %538, %532 : vector<16x36xf32>
    %540 = arith.addf %522, %539 : vector<16x36xf32>
    %c98 = arith.constant 98 : index
    %541 = memref.load %arg0[%c98] : memref<144xf32, #tpu.memory_space<smem>>
    %542 = vector.broadcast %541 : f32 to vector<16x36xf32>
    %543 = arith.mulf %542, %532 : vector<16x36xf32>
    %544 = arith.addf %526, %543 : vector<16x36xf32>
    %c134 = arith.constant 134 : index
    %545 = memref.load %arg0[%c134] : memref<144xf32, #tpu.memory_space<smem>>
    %546 = vector.broadcast %545 : f32 to vector<16x36xf32>
    %547 = arith.mulf %546, %532 : vector<16x36xf32>
    %548 = arith.addf %530, %547 : vector<16x36xf32>
    %c3_145 = arith.constant 3 : index
    %c0_146 = arith.constant 0 : index
    %c0_147 = arith.constant 0 : index
    %549 = vector.load %arg11[%c3_145, %c0_146, %c0_147] : memref<4x18x38xf32, #tpu.memory_space<vmem>>, vector<1x16x36xf32>
    %550 = vector.shape_cast %549 : vector<1x16x36xf32> to vector<16x36xf32>
    %c27 = arith.constant 27 : index
    %551 = memref.load %arg0[%c27] : memref<144xf32, #tpu.memory_space<smem>>
    %552 = vector.broadcast %551 : f32 to vector<16x36xf32>
    %553 = arith.mulf %552, %550 : vector<16x36xf32>
    %554 = arith.addf %536, %553 : vector<16x36xf32>
    %c63 = arith.constant 63 : index
    %555 = memref.load %arg0[%c63] : memref<144xf32, #tpu.memory_space<smem>>
    %556 = vector.broadcast %555 : f32 to vector<16x36xf32>
    %557 = arith.mulf %556, %550 : vector<16x36xf32>
    %558 = arith.addf %540, %557 : vector<16x36xf32>
    %c99 = arith.constant 99 : index
    %559 = memref.load %arg0[%c99] : memref<144xf32, #tpu.memory_space<smem>>
    %560 = vector.broadcast %559 : f32 to vector<16x36xf32>
    %561 = arith.mulf %560, %550 : vector<16x36xf32>
    %562 = arith.addf %544, %561 : vector<16x36xf32>
    %c135 = arith.constant 135 : index
    %563 = memref.load %arg0[%c135] : memref<144xf32, #tpu.memory_space<smem>>
    %564 = vector.broadcast %563 : f32 to vector<16x36xf32>
    %565 = arith.mulf %564, %550 : vector<16x36xf32>
    %566 = arith.addf %548, %565 : vector<16x36xf32>
    %c3_148 = arith.constant 3 : index
    %c0_149 = arith.constant 0 : index
    %c1_150 = arith.constant 1 : index
    %567 = vector.load %arg11[%c3_148, %c0_149, %c1_150] : memref<4x18x38xf32, #tpu.memory_space<vmem>>, vector<1x16x36xf32>
    %568 = vector.shape_cast %567 : vector<1x16x36xf32> to vector<16x36xf32>
    %c28 = arith.constant 28 : index
    %569 = memref.load %arg0[%c28] : memref<144xf32, #tpu.memory_space<smem>>
    %570 = vector.broadcast %569 : f32 to vector<16x36xf32>
    %571 = arith.mulf %570, %568 : vector<16x36xf32>
    %572 = arith.addf %554, %571 : vector<16x36xf32>
    %c64 = arith.constant 64 : index
    %573 = memref.load %arg0[%c64] : memref<144xf32, #tpu.memory_space<smem>>
    %574 = vector.broadcast %573 : f32 to vector<16x36xf32>
    %575 = arith.mulf %574, %568 : vector<16x36xf32>
    %576 = arith.addf %558, %575 : vector<16x36xf32>
    %c100 = arith.constant 100 : index
    %577 = memref.load %arg0[%c100] : memref<144xf32, #tpu.memory_space<smem>>
    %578 = vector.broadcast %577 : f32 to vector<16x36xf32>
    %579 = arith.mulf %578, %568 : vector<16x36xf32>
    %580 = arith.addf %562, %579 : vector<16x36xf32>
    %c136 = arith.constant 136 : index
    %581 = memref.load %arg0[%c136] : memref<144xf32, #tpu.memory_space<smem>>
    %582 = vector.broadcast %581 : f32 to vector<16x36xf32>
    %583 = arith.mulf %582, %568 : vector<16x36xf32>
    %584 = arith.addf %566, %583 : vector<16x36xf32>
    %c3_151 = arith.constant 3 : index
    %c0_152 = arith.constant 0 : index
    %c2_153 = arith.constant 2 : index
    %585 = vector.load %arg11[%c3_151, %c0_152, %c2_153] : memref<4x18x38xf32, #tpu.memory_space<vmem>>, vector<1x16x36xf32>
    %586 = vector.shape_cast %585 : vector<1x16x36xf32> to vector<16x36xf32>
    %c29 = arith.constant 29 : index
    %587 = memref.load %arg0[%c29] : memref<144xf32, #tpu.memory_space<smem>>
    %588 = vector.broadcast %587 : f32 to vector<16x36xf32>
    %589 = arith.mulf %588, %586 : vector<16x36xf32>
    %590 = arith.addf %572, %589 : vector<16x36xf32>
    %c65 = arith.constant 65 : index
    %591 = memref.load %arg0[%c65] : memref<144xf32, #tpu.memory_space<smem>>
    %592 = vector.broadcast %591 : f32 to vector<16x36xf32>
    %593 = arith.mulf %592, %586 : vector<16x36xf32>
    %594 = arith.addf %576, %593 : vector<16x36xf32>
    %c101 = arith.constant 101 : index
    %595 = memref.load %arg0[%c101] : memref<144xf32, #tpu.memory_space<smem>>
    %596 = vector.broadcast %595 : f32 to vector<16x36xf32>
    %597 = arith.mulf %596, %586 : vector<16x36xf32>
    %598 = arith.addf %580, %597 : vector<16x36xf32>
    %c137 = arith.constant 137 : index
    %599 = memref.load %arg0[%c137] : memref<144xf32, #tpu.memory_space<smem>>
    %600 = vector.broadcast %599 : f32 to vector<16x36xf32>
    %601 = arith.mulf %600, %586 : vector<16x36xf32>
    %602 = arith.addf %584, %601 : vector<16x36xf32>
    %c3_154 = arith.constant 3 : index
    %c1_155 = arith.constant 1 : index
    %c0_156 = arith.constant 0 : index
    %603 = vector.load %arg11[%c3_154, %c1_155, %c0_156] : memref<4x18x38xf32, #tpu.memory_space<vmem>>, vector<1x16x36xf32>
    %604 = vector.shape_cast %603 : vector<1x16x36xf32> to vector<16x36xf32>
    %c30 = arith.constant 30 : index
    %605 = memref.load %arg0[%c30] : memref<144xf32, #tpu.memory_space<smem>>
    %606 = vector.broadcast %605 : f32 to vector<16x36xf32>
    %607 = arith.mulf %606, %604 : vector<16x36xf32>
    %608 = arith.addf %590, %607 : vector<16x36xf32>
    %c66 = arith.constant 66 : index
    %609 = memref.load %arg0[%c66] : memref<144xf32, #tpu.memory_space<smem>>
    %610 = vector.broadcast %609 : f32 to vector<16x36xf32>
    %611 = arith.mulf %610, %604 : vector<16x36xf32>
    %612 = arith.addf %594, %611 : vector<16x36xf32>
    %c102 = arith.constant 102 : index
    %613 = memref.load %arg0[%c102] : memref<144xf32, #tpu.memory_space<smem>>
    %614 = vector.broadcast %613 : f32 to vector<16x36xf32>
    %615 = arith.mulf %614, %604 : vector<16x36xf32>
    %616 = arith.addf %598, %615 : vector<16x36xf32>
    %c138 = arith.constant 138 : index
    %617 = memref.load %arg0[%c138] : memref<144xf32, #tpu.memory_space<smem>>
    %618 = vector.broadcast %617 : f32 to vector<16x36xf32>
    %619 = arith.mulf %618, %604 : vector<16x36xf32>
    %620 = arith.addf %602, %619 : vector<16x36xf32>
    %c3_157 = arith.constant 3 : index
    %c1_158 = arith.constant 1 : index
    %c1_159 = arith.constant 1 : index
    %621 = vector.load %arg11[%c3_157, %c1_158, %c1_159] : memref<4x18x38xf32, #tpu.memory_space<vmem>>, vector<1x16x36xf32>
    %622 = vector.shape_cast %621 : vector<1x16x36xf32> to vector<16x36xf32>
    %c31 = arith.constant 31 : index
    %623 = memref.load %arg0[%c31] : memref<144xf32, #tpu.memory_space<smem>>
    %624 = vector.broadcast %623 : f32 to vector<16x36xf32>
    %625 = arith.mulf %624, %622 : vector<16x36xf32>
    %626 = arith.addf %608, %625 : vector<16x36xf32>
    %c67 = arith.constant 67 : index
    %627 = memref.load %arg0[%c67] : memref<144xf32, #tpu.memory_space<smem>>
    %628 = vector.broadcast %627 : f32 to vector<16x36xf32>
    %629 = arith.mulf %628, %622 : vector<16x36xf32>
    %630 = arith.addf %612, %629 : vector<16x36xf32>
    %c103 = arith.constant 103 : index
    %631 = memref.load %arg0[%c103] : memref<144xf32, #tpu.memory_space<smem>>
    %632 = vector.broadcast %631 : f32 to vector<16x36xf32>
    %633 = arith.mulf %632, %622 : vector<16x36xf32>
    %634 = arith.addf %616, %633 : vector<16x36xf32>
    %c139 = arith.constant 139 : index
    %635 = memref.load %arg0[%c139] : memref<144xf32, #tpu.memory_space<smem>>
    %636 = vector.broadcast %635 : f32 to vector<16x36xf32>
    %637 = arith.mulf %636, %622 : vector<16x36xf32>
    %638 = arith.addf %620, %637 : vector<16x36xf32>
    %c3_160 = arith.constant 3 : index
    %c1_161 = arith.constant 1 : index
    %c2_162 = arith.constant 2 : index
    %639 = vector.load %arg11[%c3_160, %c1_161, %c2_162] : memref<4x18x38xf32, #tpu.memory_space<vmem>>, vector<1x16x36xf32>
    %640 = vector.shape_cast %639 : vector<1x16x36xf32> to vector<16x36xf32>
    %c32 = arith.constant 32 : index
    %641 = memref.load %arg0[%c32] : memref<144xf32, #tpu.memory_space<smem>>
    %642 = vector.broadcast %641 : f32 to vector<16x36xf32>
    %643 = arith.mulf %642, %640 : vector<16x36xf32>
    %644 = arith.addf %626, %643 : vector<16x36xf32>
    %c68 = arith.constant 68 : index
    %645 = memref.load %arg0[%c68] : memref<144xf32, #tpu.memory_space<smem>>
    %646 = vector.broadcast %645 : f32 to vector<16x36xf32>
    %647 = arith.mulf %646, %640 : vector<16x36xf32>
    %648 = arith.addf %630, %647 : vector<16x36xf32>
    %c104 = arith.constant 104 : index
    %649 = memref.load %arg0[%c104] : memref<144xf32, #tpu.memory_space<smem>>
    %650 = vector.broadcast %649 : f32 to vector<16x36xf32>
    %651 = arith.mulf %650, %640 : vector<16x36xf32>
    %652 = arith.addf %634, %651 : vector<16x36xf32>
    %c140 = arith.constant 140 : index
    %653 = memref.load %arg0[%c140] : memref<144xf32, #tpu.memory_space<smem>>
    %654 = vector.broadcast %653 : f32 to vector<16x36xf32>
    %655 = arith.mulf %654, %640 : vector<16x36xf32>
    %656 = arith.addf %638, %655 : vector<16x36xf32>
    %c3_163 = arith.constant 3 : index
    %c2_164 = arith.constant 2 : index
    %c0_165 = arith.constant 0 : index
    %657 = vector.load %arg11[%c3_163, %c2_164, %c0_165] : memref<4x18x38xf32, #tpu.memory_space<vmem>>, vector<1x16x36xf32>
    %658 = vector.shape_cast %657 : vector<1x16x36xf32> to vector<16x36xf32>
    %c33 = arith.constant 33 : index
    %659 = memref.load %arg0[%c33] : memref<144xf32, #tpu.memory_space<smem>>
    %660 = vector.broadcast %659 : f32 to vector<16x36xf32>
    %661 = arith.mulf %660, %658 : vector<16x36xf32>
    %662 = arith.addf %644, %661 : vector<16x36xf32>
    %c69 = arith.constant 69 : index
    %663 = memref.load %arg0[%c69] : memref<144xf32, #tpu.memory_space<smem>>
    %664 = vector.broadcast %663 : f32 to vector<16x36xf32>
    %665 = arith.mulf %664, %658 : vector<16x36xf32>
    %666 = arith.addf %648, %665 : vector<16x36xf32>
    %c105 = arith.constant 105 : index
    %667 = memref.load %arg0[%c105] : memref<144xf32, #tpu.memory_space<smem>>
    %668 = vector.broadcast %667 : f32 to vector<16x36xf32>
    %669 = arith.mulf %668, %658 : vector<16x36xf32>
    %670 = arith.addf %652, %669 : vector<16x36xf32>
    %c141 = arith.constant 141 : index
    %671 = memref.load %arg0[%c141] : memref<144xf32, #tpu.memory_space<smem>>
    %672 = vector.broadcast %671 : f32 to vector<16x36xf32>
    %673 = arith.mulf %672, %658 : vector<16x36xf32>
    %674 = arith.addf %656, %673 : vector<16x36xf32>
    %c3_166 = arith.constant 3 : index
    %c2_167 = arith.constant 2 : index
    %c1_168 = arith.constant 1 : index
    %675 = vector.load %arg11[%c3_166, %c2_167, %c1_168] : memref<4x18x38xf32, #tpu.memory_space<vmem>>, vector<1x16x36xf32>
    %676 = vector.shape_cast %675 : vector<1x16x36xf32> to vector<16x36xf32>
    %c34 = arith.constant 34 : index
    %677 = memref.load %arg0[%c34] : memref<144xf32, #tpu.memory_space<smem>>
    %678 = vector.broadcast %677 : f32 to vector<16x36xf32>
    %679 = arith.mulf %678, %676 : vector<16x36xf32>
    %680 = arith.addf %662, %679 : vector<16x36xf32>
    %c70 = arith.constant 70 : index
    %681 = memref.load %arg0[%c70] : memref<144xf32, #tpu.memory_space<smem>>
    %682 = vector.broadcast %681 : f32 to vector<16x36xf32>
    %683 = arith.mulf %682, %676 : vector<16x36xf32>
    %684 = arith.addf %666, %683 : vector<16x36xf32>
    %c106 = arith.constant 106 : index
    %685 = memref.load %arg0[%c106] : memref<144xf32, #tpu.memory_space<smem>>
    %686 = vector.broadcast %685 : f32 to vector<16x36xf32>
    %687 = arith.mulf %686, %676 : vector<16x36xf32>
    %688 = arith.addf %670, %687 : vector<16x36xf32>
    %c142 = arith.constant 142 : index
    %689 = memref.load %arg0[%c142] : memref<144xf32, #tpu.memory_space<smem>>
    %690 = vector.broadcast %689 : f32 to vector<16x36xf32>
    %691 = arith.mulf %690, %676 : vector<16x36xf32>
    %692 = arith.addf %674, %691 : vector<16x36xf32>
    %c3_169 = arith.constant 3 : index
    %c2_170 = arith.constant 2 : index
    %c2_171 = arith.constant 2 : index
    %693 = vector.load %arg11[%c3_169, %c2_170, %c2_171] : memref<4x18x38xf32, #tpu.memory_space<vmem>>, vector<1x16x36xf32>
    %694 = vector.shape_cast %693 : vector<1x16x36xf32> to vector<16x36xf32>
    %c35 = arith.constant 35 : index
    %695 = memref.load %arg0[%c35] : memref<144xf32, #tpu.memory_space<smem>>
    %696 = vector.broadcast %695 : f32 to vector<16x36xf32>
    %697 = arith.mulf %696, %694 : vector<16x36xf32>
    %698 = arith.addf %680, %697 : vector<16x36xf32>
    %c71 = arith.constant 71 : index
    %699 = memref.load %arg0[%c71] : memref<144xf32, #tpu.memory_space<smem>>
    %700 = vector.broadcast %699 : f32 to vector<16x36xf32>
    %701 = arith.mulf %700, %694 : vector<16x36xf32>
    %702 = arith.addf %684, %701 : vector<16x36xf32>
    %c107 = arith.constant 107 : index
    %703 = memref.load %arg0[%c107] : memref<144xf32, #tpu.memory_space<smem>>
    %704 = vector.broadcast %703 : f32 to vector<16x36xf32>
    %705 = arith.mulf %704, %694 : vector<16x36xf32>
    %706 = arith.addf %688, %705 : vector<16x36xf32>
    %c143 = arith.constant 143 : index
    %707 = memref.load %arg0[%c143] : memref<144xf32, #tpu.memory_space<smem>>
    %708 = vector.broadcast %707 : f32 to vector<16x36xf32>
    %709 = arith.mulf %708, %694 : vector<16x36xf32>
    %710 = arith.addf %692, %709 : vector<16x36xf32>
    %cst_172 = arith.constant 0.000000e+00 : f32
    %711 = vector.broadcast %cst_172 : f32 to vector<1x38xf32>
    %cst_173 = arith.constant 0.000000e+00 : f32
    %712 = vector.broadcast %cst_173 : f32 to vector<16x36xf32>
    %713 = arith.select %12, %698, %712 : vector<16x36xi1>, vector<16x36xf32>
    %714 = vector.shape_cast %713 : vector<16x36xf32> to vector<1x16x36xf32>
    %cst_174 = arith.constant dense<0.000000e+00> : vector<1xf32>
    %715 = vector.multi_reduction <add>, %714, %cst_174 [1, 2] : vector<1x16x36xf32> to vector<1xf32>
    %716 = vector.shape_cast %715 : vector<1xf32> to vector<1x1x1xf32>
    %717 = vector.extract %716[0, 0, 0] : f32 from vector<1x1x1xf32>
    %718 = arith.mulf %713, %713 : vector<16x36xf32>
    %719 = vector.shape_cast %718 : vector<16x36xf32> to vector<1x16x36xf32>
    %cst_175 = arith.constant dense<0.000000e+00> : vector<1xf32>
    %720 = vector.multi_reduction <add>, %719, %cst_175 [1, 2] : vector<1x16x36xf32> to vector<1xf32>
    %721 = vector.shape_cast %720 : vector<1xf32> to vector<1x1x1xf32>
    %722 = vector.extract %721[0, 0, 0] : f32 from vector<1x1x1xf32>
    %cst_176 = arith.constant 0.001953125 : f32
    %723 = arith.mulf %717, %cst_176 : f32
    %cst_177 = arith.constant 0.001953125 : f32
    %724 = arith.mulf %722, %cst_177 : f32
    %725 = arith.mulf %723, %723 : f32
    %726 = arith.subf %724, %725 : f32
    %727 = vector.broadcast %723 : f32 to vector<16x36xf32>
    %728 = arith.subf %713, %727 : vector<16x36xf32>
    %cst_178 = arith.constant 9.99999974E-6 : f32
    %729 = arith.addf %726, %cst_178 : f32
    %730 = math.rsqrt %729 : f32
    %731 = vector.broadcast %730 : f32 to vector<16x36xf32>
    %732 = arith.mulf %728, %731 : vector<16x36xf32>
    %c0_179 = arith.constant 0 : index
    %733 = memref.load %arg2[%c0_179] : memref<4xf32, #tpu.memory_space<smem>>
    %734 = vector.broadcast %733 : f32 to vector<16x36xf32>
    %735 = arith.mulf %732, %734 : vector<16x36xf32>
    %c0_180 = arith.constant 0 : index
    %736 = memref.load %arg3[%c0_180] : memref<4xf32, #tpu.memory_space<smem>>
    %737 = vector.broadcast %736 : f32 to vector<16x36xf32>
    %738 = arith.addf %735, %737 : vector<16x36xf32>
    %cst_181 = arith.constant 0.000000e+00 : f32
    %739 = vector.broadcast %cst_181 : f32 to vector<16x36xf32>
    %740 = arith.cmpf ogt, %738, %739 : vector<16x36xf32>
    %741 = vector.broadcast %0 : f32 to vector<16x36xf32>
    %742 = arith.mulf %741, %738 : vector<16x36xf32>
    %743 = arith.select %740, %738, %742 : vector<16x36xi1>, vector<16x36xf32>
    %cst_182 = arith.constant 0.000000e+00 : f32
    %744 = vector.broadcast %cst_182 : f32 to vector<16x36xf32>
    %745 = arith.select %12, %743, %744 : vector<16x36xi1>, vector<16x36xf32>
    %c0_183 = arith.constant 0 : index
    %c1_184 = arith.constant 1 : index
    %c1_185 = arith.constant 1 : index
    %746 = vector.load %arg12[%c0_183, %c1_184, %c1_185] : memref<4x18x38xf32, #tpu.memory_space<vmem>>, vector<1x16x36xf32>
    %747 = vector.shape_cast %746 : vector<1x16x36xf32> to vector<16x36xf32>
    %748 = vector.shape_cast %745 : vector<16x36xf32> to vector<1x16x36xf32>
    tpu.vector_store %arg12[%c0_183, %c1_184, %c1_185], %748 {strides = array<i32>} : memref<4x18x38xf32, #tpu.memory_space<vmem>>, vector<1x16x36xf32>,
    %c0_186 = arith.constant 0 : index
    %c0_187 = arith.constant 0 : index
    %c0_188 = arith.constant 0 : index
    %749 = vector.load %arg12[%c0_186, %c0_187, %c0_188] : memref<4x18x38xf32, #tpu.memory_space<vmem>>, vector<1x1x38xf32>
    %750 = vector.shape_cast %749 : vector<1x1x38xf32> to vector<1x38xf32>
    %751 = vector.shape_cast %711 : vector<1x38xf32> to vector<1x1x38xf32>
    tpu.vector_store %arg12[%c0_186, %c0_187, %c0_188], %751 {strides = array<i32>} : memref<4x18x38xf32, #tpu.memory_space<vmem>>, vector<1x1x38xf32>,
    %c0_189 = arith.constant 0 : index
    %c17_190 = arith.constant 17 : index
    %c0_191 = arith.constant 0 : index
    %752 = vector.load %arg12[%c0_189, %c17_190, %c0_191] : memref<4x18x38xf32, #tpu.memory_space<vmem>>, vector<1x1x38xf32>
    %753 = vector.shape_cast %752 : vector<1x1x38xf32> to vector<1x38xf32>
    %754 = vector.shape_cast %711 : vector<1x38xf32> to vector<1x1x38xf32>
    tpu.vector_store %arg12[%c0_189, %c17_190, %c0_191], %754 {strides = array<i32>} : memref<4x18x38xf32, #tpu.memory_space<vmem>>, vector<1x1x38xf32>,
    %cst_192 = arith.constant 0.000000e+00 : f32
    %755 = vector.broadcast %cst_192 : f32 to vector<16x36xf32>
    %756 = arith.select %12, %702, %755 : vector<16x36xi1>, vector<16x36xf32>
    %757 = vector.shape_cast %756 : vector<16x36xf32> to vector<1x16x36xf32>
    %cst_193 = arith.constant dense<0.000000e+00> : vector<1xf32>
    %758 = vector.multi_reduction <add>, %757, %cst_193 [1, 2] : vector<1x16x36xf32> to vector<1xf32>
    %759 = vector.shape_cast %758 : vector<1xf32> to vector<1x1x1xf32>
    %760 = vector.extract %759[0, 0, 0] : f32 from vector<1x1x1xf32>
    %761 = arith.mulf %756, %756 : vector<16x36xf32>
    %762 = vector.shape_cast %761 : vector<16x36xf32> to vector<1x16x36xf32>
    %cst_194 = arith.constant dense<0.000000e+00> : vector<1xf32>
    %763 = vector.multi_reduction <add>, %762, %cst_194 [1, 2] : vector<1x16x36xf32> to vector<1xf32>
    %764 = vector.shape_cast %763 : vector<1xf32> to vector<1x1x1xf32>
    %765 = vector.extract %764[0, 0, 0] : f32 from vector<1x1x1xf32>
    %cst_195 = arith.constant 0.001953125 : f32
    %766 = arith.mulf %760, %cst_195 : f32
    %cst_196 = arith.constant 0.001953125 : f32
    %767 = arith.mulf %765, %cst_196 : f32
    %768 = arith.mulf %766, %766 : f32
    %769 = arith.subf %767, %768 : f32
    %770 = vector.broadcast %766 : f32 to vector<16x36xf32>
    %771 = arith.subf %756, %770 : vector<16x36xf32>
    %cst_197 = arith.constant 9.99999974E-6 : f32
    %772 = arith.addf %769, %cst_197 : f32
    %773 = math.rsqrt %772 : f32
    %774 = vector.broadcast %773 : f32 to vector<16x36xf32>
    %775 = arith.mulf %771, %774 : vector<16x36xf32>
    %c1_198 = arith.constant 1 : index
    %776 = memref.load %arg2[%c1_198] : memref<4xf32, #tpu.memory_space<smem>>
    %777 = vector.broadcast %776 : f32 to vector<16x36xf32>
    %778 = arith.mulf %775, %777 : vector<16x36xf32>
    %c1_199 = arith.constant 1 : index
    %779 = memref.load %arg3[%c1_199] : memref<4xf32, #tpu.memory_space<smem>>
    %780 = vector.broadcast %779 : f32 to vector<16x36xf32>
    %781 = arith.addf %778, %780 : vector<16x36xf32>
    %cst_200 = arith.constant 0.000000e+00 : f32
    %782 = vector.broadcast %cst_200 : f32 to vector<16x36xf32>
    %783 = arith.cmpf ogt, %781, %782 : vector<16x36xf32>
    %784 = vector.broadcast %0 : f32 to vector<16x36xf32>
    %785 = arith.mulf %784, %781 : vector<16x36xf32>
    %786 = arith.select %783, %781, %785 : vector<16x36xi1>, vector<16x36xf32>
    %cst_201 = arith.constant 0.000000e+00 : f32
    %787 = vector.broadcast %cst_201 : f32 to vector<16x36xf32>
    %788 = arith.select %12, %786, %787 : vector<16x36xi1>, vector<16x36xf32>
    %c1_202 = arith.constant 1 : index
    %c1_203 = arith.constant 1 : index
    %c1_204 = arith.constant 1 : index
    %789 = vector.load %arg12[%c1_202, %c1_203, %c1_204] : memref<4x18x38xf32, #tpu.memory_space<vmem>>, vector<1x16x36xf32>
    %790 = vector.shape_cast %789 : vector<1x16x36xf32> to vector<16x36xf32>
    %791 = vector.shape_cast %788 : vector<16x36xf32> to vector<1x16x36xf32>
    tpu.vector_store %arg12[%c1_202, %c1_203, %c1_204], %791 {strides = array<i32>} : memref<4x18x38xf32, #tpu.memory_space<vmem>>, vector<1x16x36xf32>,
    %c1_205 = arith.constant 1 : index
    %c0_206 = arith.constant 0 : index
    %c0_207 = arith.constant 0 : index
    %792 = vector.load %arg12[%c1_205, %c0_206, %c0_207] : memref<4x18x38xf32, #tpu.memory_space<vmem>>, vector<1x1x38xf32>
    %793 = vector.shape_cast %792 : vector<1x1x38xf32> to vector<1x38xf32>
    %794 = vector.shape_cast %711 : vector<1x38xf32> to vector<1x1x38xf32>
    tpu.vector_store %arg12[%c1_205, %c0_206, %c0_207], %794 {strides = array<i32>} : memref<4x18x38xf32, #tpu.memory_space<vmem>>, vector<1x1x38xf32>,
    %c1_208 = arith.constant 1 : index
    %c17_209 = arith.constant 17 : index
    %c0_210 = arith.constant 0 : index
    %795 = vector.load %arg12[%c1_208, %c17_209, %c0_210] : memref<4x18x38xf32, #tpu.memory_space<vmem>>, vector<1x1x38xf32>
    %796 = vector.shape_cast %795 : vector<1x1x38xf32> to vector<1x38xf32>
    %797 = vector.shape_cast %711 : vector<1x38xf32> to vector<1x1x38xf32>
    tpu.vector_store %arg12[%c1_208, %c17_209, %c0_210], %797 {strides = array<i32>} : memref<4x18x38xf32, #tpu.memory_space<vmem>>, vector<1x1x38xf32>,
    %cst_211 = arith.constant 0.000000e+00 : f32
    %798 = vector.broadcast %cst_211 : f32 to vector<16x36xf32>
    %799 = arith.select %12, %706, %798 : vector<16x36xi1>, vector<16x36xf32>
    %800 = vector.shape_cast %799 : vector<16x36xf32> to vector<1x16x36xf32>
    %cst_212 = arith.constant dense<0.000000e+00> : vector<1xf32>
    %801 = vector.multi_reduction <add>, %800, %cst_212 [1, 2] : vector<1x16x36xf32> to vector<1xf32>
    %802 = vector.shape_cast %801 : vector<1xf32> to vector<1x1x1xf32>
    %803 = vector.extract %802[0, 0, 0] : f32 from vector<1x1x1xf32>
    %804 = arith.mulf %799, %799 : vector<16x36xf32>
    %805 = vector.shape_cast %804 : vector<16x36xf32> to vector<1x16x36xf32>
    %cst_213 = arith.constant dense<0.000000e+00> : vector<1xf32>
    %806 = vector.multi_reduction <add>, %805, %cst_213 [1, 2] : vector<1x16x36xf32> to vector<1xf32>
    %807 = vector.shape_cast %806 : vector<1xf32> to vector<1x1x1xf32>
    %808 = vector.extract %807[0, 0, 0] : f32 from vector<1x1x1xf32>
    %cst_214 = arith.constant 0.001953125 : f32
    %809 = arith.mulf %803, %cst_214 : f32
    %cst_215 = arith.constant 0.001953125 : f32
    %810 = arith.mulf %808, %cst_215 : f32
    %811 = arith.mulf %809, %809 : f32
    %812 = arith.subf %810, %811 : f32
    %813 = vector.broadcast %809 : f32 to vector<16x36xf32>
    %814 = arith.subf %799, %813 : vector<16x36xf32>
    %cst_216 = arith.constant 9.99999974E-6 : f32
    %815 = arith.addf %812, %cst_216 : f32
    %816 = math.rsqrt %815 : f32
    %817 = vector.broadcast %816 : f32 to vector<16x36xf32>
    %818 = arith.mulf %814, %817 : vector<16x36xf32>
    %c2_217 = arith.constant 2 : index
    %819 = memref.load %arg2[%c2_217] : memref<4xf32, #tpu.memory_space<smem>>
    %820 = vector.broadcast %819 : f32 to vector<16x36xf32>
    %821 = arith.mulf %818, %820 : vector<16x36xf32>
    %c2_218 = arith.constant 2 : index
    %822 = memref.load %arg3[%c2_218] : memref<4xf32, #tpu.memory_space<smem>>
    %823 = vector.broadcast %822 : f32 to vector<16x36xf32>
    %824 = arith.addf %821, %823 : vector<16x36xf32>
    %cst_219 = arith.constant 0.000000e+00 : f32
    %825 = vector.broadcast %cst_219 : f32 to vector<16x36xf32>
    %826 = arith.cmpf ogt, %824, %825 : vector<16x36xf32>
    %827 = vector.broadcast %0 : f32 to vector<16x36xf32>
    %828 = arith.mulf %827, %824 : vector<16x36xf32>
    %829 = arith.select %826, %824, %828 : vector<16x36xi1>, vector<16x36xf32>
    %cst_220 = arith.constant 0.000000e+00 : f32
    %830 = vector.broadcast %cst_220 : f32 to vector<16x36xf32>
    %831 = arith.select %12, %829, %830 : vector<16x36xi1>, vector<16x36xf32>
    %c2_221 = arith.constant 2 : index
    %c1_222 = arith.constant 1 : index
    %c1_223 = arith.constant 1 : index
    %832 = vector.load %arg12[%c2_221, %c1_222, %c1_223] : memref<4x18x38xf32, #tpu.memory_space<vmem>>, vector<1x16x36xf32>
    %833 = vector.shape_cast %832 : vector<1x16x36xf32> to vector<16x36xf32>
    %834 = vector.shape_cast %831 : vector<16x36xf32> to vector<1x16x36xf32>
    tpu.vector_store %arg12[%c2_221, %c1_222, %c1_223], %834 {strides = array<i32>} : memref<4x18x38xf32, #tpu.memory_space<vmem>>, vector<1x16x36xf32>,
    %c2_224 = arith.constant 2 : index
    %c0_225 = arith.constant 0 : index
    %c0_226 = arith.constant 0 : index
    %835 = vector.load %arg12[%c2_224, %c0_225, %c0_226] : memref<4x18x38xf32, #tpu.memory_space<vmem>>, vector<1x1x38xf32>
    %836 = vector.shape_cast %835 : vector<1x1x38xf32> to vector<1x38xf32>
    %837 = vector.shape_cast %711 : vector<1x38xf32> to vector<1x1x38xf32>
    tpu.vector_store %arg12[%c2_224, %c0_225, %c0_226], %837 {strides = array<i32>} : memref<4x18x38xf32, #tpu.memory_space<vmem>>, vector<1x1x38xf32>,
    %c2_227 = arith.constant 2 : index
    %c17_228 = arith.constant 17 : index
    %c0_229 = arith.constant 0 : index
    %838 = vector.load %arg12[%c2_227, %c17_228, %c0_229] : memref<4x18x38xf32, #tpu.memory_space<vmem>>, vector<1x1x38xf32>
    %839 = vector.shape_cast %838 : vector<1x1x38xf32> to vector<1x38xf32>
    %840 = vector.shape_cast %711 : vector<1x38xf32> to vector<1x1x38xf32>
    tpu.vector_store %arg12[%c2_227, %c17_228, %c0_229], %840 {strides = array<i32>} : memref<4x18x38xf32, #tpu.memory_space<vmem>>, vector<1x1x38xf32>,
    %cst_230 = arith.constant 0.000000e+00 : f32
    %841 = vector.broadcast %cst_230 : f32 to vector<16x36xf32>
    %842 = arith.select %12, %710, %841 : vector<16x36xi1>, vector<16x36xf32>
    %843 = vector.shape_cast %842 : vector<16x36xf32> to vector<1x16x36xf32>
    %cst_231 = arith.constant dense<0.000000e+00> : vector<1xf32>
    %844 = vector.multi_reduction <add>, %843, %cst_231 [1, 2] : vector<1x16x36xf32> to vector<1xf32>
    %845 = vector.shape_cast %844 : vector<1xf32> to vector<1x1x1xf32>
    %846 = vector.extract %845[0, 0, 0] : f32 from vector<1x1x1xf32>
    %847 = arith.mulf %842, %842 : vector<16x36xf32>
    %848 = vector.shape_cast %847 : vector<16x36xf32> to vector<1x16x36xf32>
    %cst_232 = arith.constant dense<0.000000e+00> : vector<1xf32>
    %849 = vector.multi_reduction <add>, %848, %cst_232 [1, 2] : vector<1x16x36xf32> to vector<1xf32>
    %850 = vector.shape_cast %849 : vector<1xf32> to vector<1x1x1xf32>
    %851 = vector.extract %850[0, 0, 0] : f32 from vector<1x1x1xf32>
    %cst_233 = arith.constant 0.001953125 : f32
    %852 = arith.mulf %846, %cst_233 : f32
    %cst_234 = arith.constant 0.001953125 : f32
    %853 = arith.mulf %851, %cst_234 : f32
    %854 = arith.mulf %852, %852 : f32
    %855 = arith.subf %853, %854 : f32
    %856 = vector.broadcast %852 : f32 to vector<16x36xf32>
    %857 = arith.subf %842, %856 : vector<16x36xf32>
    %cst_235 = arith.constant 9.99999974E-6 : f32
    %858 = arith.addf %855, %cst_235 : f32
    %859 = math.rsqrt %858 : f32
    %860 = vector.broadcast %859 : f32 to vector<16x36xf32>
    %861 = arith.mulf %857, %860 : vector<16x36xf32>
    %c3_236 = arith.constant 3 : index
    %862 = memref.load %arg2[%c3_236] : memref<4xf32, #tpu.memory_space<smem>>
    %863 = vector.broadcast %862 : f32 to vector<16x36xf32>
    %864 = arith.mulf %861, %863 : vector<16x36xf32>
    %c3_237 = arith.constant 3 : index
    %865 = memref.load %arg3[%c3_237] : memref<4xf32, #tpu.memory_space<smem>>
    %866 = vector.broadcast %865 : f32 to vector<16x36xf32>
    %867 = arith.addf %864, %866 : vector<16x36xf32>
    %cst_238 = arith.constant 0.000000e+00 : f32
    %868 = vector.broadcast %cst_238 : f32 to vector<16x36xf32>
    %869 = arith.cmpf ogt, %867, %868 : vector<16x36xf32>
    %870 = vector.broadcast %0 : f32 to vector<16x36xf32>
    %871 = arith.mulf %870, %867 : vector<16x36xf32>
    %872 = arith.select %869, %867, %871 : vector<16x36xi1>, vector<16x36xf32>
    %cst_239 = arith.constant 0.000000e+00 : f32
    %873 = vector.broadcast %cst_239 : f32 to vector<16x36xf32>
    %874 = arith.select %12, %872, %873 : vector<16x36xi1>, vector<16x36xf32>
    %c3_240 = arith.constant 3 : index
    %c1_241 = arith.constant 1 : index
    %c1_242 = arith.constant 1 : index
    %875 = vector.load %arg12[%c3_240, %c1_241, %c1_242] : memref<4x18x38xf32, #tpu.memory_space<vmem>>, vector<1x16x36xf32>
    %876 = vector.shape_cast %875 : vector<1x16x36xf32> to vector<16x36xf32>
    %877 = vector.shape_cast %874 : vector<16x36xf32> to vector<1x16x36xf32>
    tpu.vector_store %arg12[%c3_240, %c1_241, %c1_242], %877 {strides = array<i32>} : memref<4x18x38xf32, #tpu.memory_space<vmem>>, vector<1x16x36xf32>,
    %c3_243 = arith.constant 3 : index
    %c0_244 = arith.constant 0 : index
    %c0_245 = arith.constant 0 : index
    %878 = vector.load %arg12[%c3_243, %c0_244, %c0_245] : memref<4x18x38xf32, #tpu.memory_space<vmem>>, vector<1x1x38xf32>
    %879 = vector.shape_cast %878 : vector<1x1x38xf32> to vector<1x38xf32>
    %880 = vector.shape_cast %711 : vector<1x38xf32> to vector<1x1x38xf32>
    tpu.vector_store %arg12[%c3_243, %c0_244, %c0_245], %880 {strides = array<i32>} : memref<4x18x38xf32, #tpu.memory_space<vmem>>, vector<1x1x38xf32>,
    %c3_246 = arith.constant 3 : index
    %c17_247 = arith.constant 17 : index
    %c0_248 = arith.constant 0 : index
    %881 = vector.load %arg12[%c3_246, %c17_247, %c0_248] : memref<4x18x38xf32, #tpu.memory_space<vmem>>, vector<1x1x38xf32>
    %882 = vector.shape_cast %881 : vector<1x1x38xf32> to vector<1x38xf32>
    %883 = vector.shape_cast %711 : vector<1x38xf32> to vector<1x1x38xf32>
    tpu.vector_store %arg12[%c3_246, %c17_247, %c0_248], %883 {strides = array<i32>} : memref<4x18x38xf32, #tpu.memory_space<vmem>>, vector<1x1x38xf32>,
    %c0_249 = arith.constant 0 : index
    %884 = memref.load %arg6[%c0_249] : memref<4xf32, #tpu.memory_space<smem>>
    %885 = vector.broadcast %884 : f32 to vector<16x36xf32>
    %c1_250 = arith.constant 1 : index
    %886 = memref.load %arg6[%c1_250] : memref<4xf32, #tpu.memory_space<smem>>
    %887 = vector.broadcast %886 : f32 to vector<16x36xf32>
    %c2_251 = arith.constant 2 : index
    %888 = memref.load %arg6[%c2_251] : memref<4xf32, #tpu.memory_space<smem>>
    %889 = vector.broadcast %888 : f32 to vector<16x36xf32>
    %c3_252 = arith.constant 3 : index
    %890 = memref.load %arg6[%c3_252] : memref<4xf32, #tpu.memory_space<smem>>
    %891 = vector.broadcast %890 : f32 to vector<16x36xf32>
    %c0_253 = arith.constant 0 : index
    %c0_254 = arith.constant 0 : index
    %c0_255 = arith.constant 0 : index
    %892 = vector.load %arg12[%c0_253, %c0_254, %c0_255] : memref<4x18x38xf32, #tpu.memory_space<vmem>>, vector<1x16x36xf32>
    %893 = vector.shape_cast %892 : vector<1x16x36xf32> to vector<16x36xf32>
    %c0_256 = arith.constant 0 : index
    %894 = memref.load %arg5[%c0_256] : memref<144xf32, #tpu.memory_space<smem>>
    %895 = vector.broadcast %894 : f32 to vector<16x36xf32>
    %896 = arith.mulf %895, %893 : vector<16x36xf32>
    %897 = arith.addf %885, %896 : vector<16x36xf32>
    %c36_257 = arith.constant 36 : index
    %898 = memref.load %arg5[%c36_257] : memref<144xf32, #tpu.memory_space<smem>>
    %899 = vector.broadcast %898 : f32 to vector<16x36xf32>
    %900 = arith.mulf %899, %893 : vector<16x36xf32>
    %901 = arith.addf %887, %900 : vector<16x36xf32>
    %c72_258 = arith.constant 72 : index
    %902 = memref.load %arg5[%c72_258] : memref<144xf32, #tpu.memory_space<smem>>
    %903 = vector.broadcast %902 : f32 to vector<16x36xf32>
    %904 = arith.mulf %903, %893 : vector<16x36xf32>
    %905 = arith.addf %889, %904 : vector<16x36xf32>
    %c108_259 = arith.constant 108 : index
    %906 = memref.load %arg5[%c108_259] : memref<144xf32, #tpu.memory_space<smem>>
    %907 = vector.broadcast %906 : f32 to vector<16x36xf32>
    %908 = arith.mulf %907, %893 : vector<16x36xf32>
    %909 = arith.addf %891, %908 : vector<16x36xf32>
    %c0_260 = arith.constant 0 : index
    %c0_261 = arith.constant 0 : index
    %c1_262 = arith.constant 1 : index
    %910 = vector.load %arg12[%c0_260, %c0_261, %c1_262] : memref<4x18x38xf32, #tpu.memory_space<vmem>>, vector<1x16x36xf32>
    %911 = vector.shape_cast %910 : vector<1x16x36xf32> to vector<16x36xf32>
    %c1_263 = arith.constant 1 : index
    %912 = memref.load %arg5[%c1_263] : memref<144xf32, #tpu.memory_space<smem>>
    %913 = vector.broadcast %912 : f32 to vector<16x36xf32>
    %914 = arith.mulf %913, %911 : vector<16x36xf32>
    %915 = arith.addf %897, %914 : vector<16x36xf32>
    %c37_264 = arith.constant 37 : index
    %916 = memref.load %arg5[%c37_264] : memref<144xf32, #tpu.memory_space<smem>>
    %917 = vector.broadcast %916 : f32 to vector<16x36xf32>
    %918 = arith.mulf %917, %911 : vector<16x36xf32>
    %919 = arith.addf %901, %918 : vector<16x36xf32>
    %c73_265 = arith.constant 73 : index
    %920 = memref.load %arg5[%c73_265] : memref<144xf32, #tpu.memory_space<smem>>
    %921 = vector.broadcast %920 : f32 to vector<16x36xf32>
    %922 = arith.mulf %921, %911 : vector<16x36xf32>
    %923 = arith.addf %905, %922 : vector<16x36xf32>
    %c109_266 = arith.constant 109 : index
    %924 = memref.load %arg5[%c109_266] : memref<144xf32, #tpu.memory_space<smem>>
    %925 = vector.broadcast %924 : f32 to vector<16x36xf32>
    %926 = arith.mulf %925, %911 : vector<16x36xf32>
    %927 = arith.addf %909, %926 : vector<16x36xf32>
    %c0_267 = arith.constant 0 : index
    %c0_268 = arith.constant 0 : index
    %c2_269 = arith.constant 2 : index
    %928 = vector.load %arg12[%c0_267, %c0_268, %c2_269] : memref<4x18x38xf32, #tpu.memory_space<vmem>>, vector<1x16x36xf32>
    %929 = vector.shape_cast %928 : vector<1x16x36xf32> to vector<16x36xf32>
    %c2_270 = arith.constant 2 : index
    %930 = memref.load %arg5[%c2_270] : memref<144xf32, #tpu.memory_space<smem>>
    %931 = vector.broadcast %930 : f32 to vector<16x36xf32>
    %932 = arith.mulf %931, %929 : vector<16x36xf32>
    %933 = arith.addf %915, %932 : vector<16x36xf32>
    %c38_271 = arith.constant 38 : index
    %934 = memref.load %arg5[%c38_271] : memref<144xf32, #tpu.memory_space<smem>>
    %935 = vector.broadcast %934 : f32 to vector<16x36xf32>
    %936 = arith.mulf %935, %929 : vector<16x36xf32>
    %937 = arith.addf %919, %936 : vector<16x36xf32>
    %c74_272 = arith.constant 74 : index
    %938 = memref.load %arg5[%c74_272] : memref<144xf32, #tpu.memory_space<smem>>
    %939 = vector.broadcast %938 : f32 to vector<16x36xf32>
    %940 = arith.mulf %939, %929 : vector<16x36xf32>
    %941 = arith.addf %923, %940 : vector<16x36xf32>
    %c110_273 = arith.constant 110 : index
    %942 = memref.load %arg5[%c110_273] : memref<144xf32, #tpu.memory_space<smem>>
    %943 = vector.broadcast %942 : f32 to vector<16x36xf32>
    %944 = arith.mulf %943, %929 : vector<16x36xf32>
    %945 = arith.addf %927, %944 : vector<16x36xf32>
    %c0_274 = arith.constant 0 : index
    %c1_275 = arith.constant 1 : index
    %c0_276 = arith.constant 0 : index
    %946 = vector.load %arg12[%c0_274, %c1_275, %c0_276] : memref<4x18x38xf32, #tpu.memory_space<vmem>>, vector<1x16x36xf32>
    %947 = vector.shape_cast %946 : vector<1x16x36xf32> to vector<16x36xf32>
    %c3_277 = arith.constant 3 : index
    %948 = memref.load %arg5[%c3_277] : memref<144xf32, #tpu.memory_space<smem>>
    %949 = vector.broadcast %948 : f32 to vector<16x36xf32>
    %950 = arith.mulf %949, %947 : vector<16x36xf32>
    %951 = arith.addf %933, %950 : vector<16x36xf32>
    %c39_278 = arith.constant 39 : index
    %952 = memref.load %arg5[%c39_278] : memref<144xf32, #tpu.memory_space<smem>>
    %953 = vector.broadcast %952 : f32 to vector<16x36xf32>
    %954 = arith.mulf %953, %947 : vector<16x36xf32>
    %955 = arith.addf %937, %954 : vector<16x36xf32>
    %c75_279 = arith.constant 75 : index
    %956 = memref.load %arg5[%c75_279] : memref<144xf32, #tpu.memory_space<smem>>
    %957 = vector.broadcast %956 : f32 to vector<16x36xf32>
    %958 = arith.mulf %957, %947 : vector<16x36xf32>
    %959 = arith.addf %941, %958 : vector<16x36xf32>
    %c111_280 = arith.constant 111 : index
    %960 = memref.load %arg5[%c111_280] : memref<144xf32, #tpu.memory_space<smem>>
    %961 = vector.broadcast %960 : f32 to vector<16x36xf32>
    %962 = arith.mulf %961, %947 : vector<16x36xf32>
    %963 = arith.addf %945, %962 : vector<16x36xf32>
    %c0_281 = arith.constant 0 : index
    %c1_282 = arith.constant 1 : index
    %c1_283 = arith.constant 1 : index
    %964 = vector.load %arg12[%c0_281, %c1_282, %c1_283] : memref<4x18x38xf32, #tpu.memory_space<vmem>>, vector<1x16x36xf32>
    %965 = vector.shape_cast %964 : vector<1x16x36xf32> to vector<16x36xf32>
    %c4_284 = arith.constant 4 : index
    %966 = memref.load %arg5[%c4_284] : memref<144xf32, #tpu.memory_space<smem>>
    %967 = vector.broadcast %966 : f32 to vector<16x36xf32>
    %968 = arith.mulf %967, %965 : vector<16x36xf32>
    %969 = arith.addf %951, %968 : vector<16x36xf32>
    %c40_285 = arith.constant 40 : index
    %970 = memref.load %arg5[%c40_285] : memref<144xf32, #tpu.memory_space<smem>>
    %971 = vector.broadcast %970 : f32 to vector<16x36xf32>
    %972 = arith.mulf %971, %965 : vector<16x36xf32>
    %973 = arith.addf %955, %972 : vector<16x36xf32>
    %c76_286 = arith.constant 76 : index
    %974 = memref.load %arg5[%c76_286] : memref<144xf32, #tpu.memory_space<smem>>
    %975 = vector.broadcast %974 : f32 to vector<16x36xf32>
    %976 = arith.mulf %975, %965 : vector<16x36xf32>
    %977 = arith.addf %959, %976 : vector<16x36xf32>
    %c112_287 = arith.constant 112 : index
    %978 = memref.load %arg5[%c112_287] : memref<144xf32, #tpu.memory_space<smem>>
    %979 = vector.broadcast %978 : f32 to vector<16x36xf32>
    %980 = arith.mulf %979, %965 : vector<16x36xf32>
    %981 = arith.addf %963, %980 : vector<16x36xf32>
    %c0_288 = arith.constant 0 : index
    %c1_289 = arith.constant 1 : index
    %c2_290 = arith.constant 2 : index
    %982 = vector.load %arg12[%c0_288, %c1_289, %c2_290] : memref<4x18x38xf32, #tpu.memory_space<vmem>>, vector<1x16x36xf32>
    %983 = vector.shape_cast %982 : vector<1x16x36xf32> to vector<16x36xf32>
    %c5_291 = arith.constant 5 : index
    %984 = memref.load %arg5[%c5_291] : memref<144xf32, #tpu.memory_space<smem>>
    %985 = vector.broadcast %984 : f32 to vector<16x36xf32>
    %986 = arith.mulf %985, %983 : vector<16x36xf32>
    %987 = arith.addf %969, %986 : vector<16x36xf32>
    %c41_292 = arith.constant 41 : index
    %988 = memref.load %arg5[%c41_292] : memref<144xf32, #tpu.memory_space<smem>>
    %989 = vector.broadcast %988 : f32 to vector<16x36xf32>
    %990 = arith.mulf %989, %983 : vector<16x36xf32>
    %991 = arith.addf %973, %990 : vector<16x36xf32>
    %c77_293 = arith.constant 77 : index
    %992 = memref.load %arg5[%c77_293] : memref<144xf32, #tpu.memory_space<smem>>
    %993 = vector.broadcast %992 : f32 to vector<16x36xf32>
    %994 = arith.mulf %993, %983 : vector<16x36xf32>
    %995 = arith.addf %977, %994 : vector<16x36xf32>
    %c113_294 = arith.constant 113 : index
    %996 = memref.load %arg5[%c113_294] : memref<144xf32, #tpu.memory_space<smem>>
    %997 = vector.broadcast %996 : f32 to vector<16x36xf32>
    %998 = arith.mulf %997, %983 : vector<16x36xf32>
    %999 = arith.addf %981, %998 : vector<16x36xf32>
    %c0_295 = arith.constant 0 : index
    %c2_296 = arith.constant 2 : index
    %c0_297 = arith.constant 0 : index
    %1000 = vector.load %arg12[%c0_295, %c2_296, %c0_297] : memref<4x18x38xf32, #tpu.memory_space<vmem>>, vector<1x16x36xf32>
    %1001 = vector.shape_cast %1000 : vector<1x16x36xf32> to vector<16x36xf32>
    %c6_298 = arith.constant 6 : index
    %1002 = memref.load %arg5[%c6_298] : memref<144xf32, #tpu.memory_space<smem>>
    %1003 = vector.broadcast %1002 : f32 to vector<16x36xf32>
    %1004 = arith.mulf %1003, %1001 : vector<16x36xf32>
    %1005 = arith.addf %987, %1004 : vector<16x36xf32>
    %c42_299 = arith.constant 42 : index
    %1006 = memref.load %arg5[%c42_299] : memref<144xf32, #tpu.memory_space<smem>>
    %1007 = vector.broadcast %1006 : f32 to vector<16x36xf32>
    %1008 = arith.mulf %1007, %1001 : vector<16x36xf32>
    %1009 = arith.addf %991, %1008 : vector<16x36xf32>
    %c78_300 = arith.constant 78 : index
    %1010 = memref.load %arg5[%c78_300] : memref<144xf32, #tpu.memory_space<smem>>
    %1011 = vector.broadcast %1010 : f32 to vector<16x36xf32>
    %1012 = arith.mulf %1011, %1001 : vector<16x36xf32>
    %1013 = arith.addf %995, %1012 : vector<16x36xf32>
    %c114_301 = arith.constant 114 : index
    %1014 = memref.load %arg5[%c114_301] : memref<144xf32, #tpu.memory_space<smem>>
    %1015 = vector.broadcast %1014 : f32 to vector<16x36xf32>
    %1016 = arith.mulf %1015, %1001 : vector<16x36xf32>
    %1017 = arith.addf %999, %1016 : vector<16x36xf32>
    %c0_302 = arith.constant 0 : index
    %c2_303 = arith.constant 2 : index
    %c1_304 = arith.constant 1 : index
    %1018 = vector.load %arg12[%c0_302, %c2_303, %c1_304] : memref<4x18x38xf32, #tpu.memory_space<vmem>>, vector<1x16x36xf32>
    %1019 = vector.shape_cast %1018 : vector<1x16x36xf32> to vector<16x36xf32>
    %c7_305 = arith.constant 7 : index
    %1020 = memref.load %arg5[%c7_305] : memref<144xf32, #tpu.memory_space<smem>>
    %1021 = vector.broadcast %1020 : f32 to vector<16x36xf32>
    %1022 = arith.mulf %1021, %1019 : vector<16x36xf32>
    %1023 = arith.addf %1005, %1022 : vector<16x36xf32>
    %c43_306 = arith.constant 43 : index
    %1024 = memref.load %arg5[%c43_306] : memref<144xf32, #tpu.memory_space<smem>>
    %1025 = vector.broadcast %1024 : f32 to vector<16x36xf32>
    %1026 = arith.mulf %1025, %1019 : vector<16x36xf32>
    %1027 = arith.addf %1009, %1026 : vector<16x36xf32>
    %c79_307 = arith.constant 79 : index
    %1028 = memref.load %arg5[%c79_307] : memref<144xf32, #tpu.memory_space<smem>>
    %1029 = vector.broadcast %1028 : f32 to vector<16x36xf32>
    %1030 = arith.mulf %1029, %1019 : vector<16x36xf32>
    %1031 = arith.addf %1013, %1030 : vector<16x36xf32>
    %c115_308 = arith.constant 115 : index
    %1032 = memref.load %arg5[%c115_308] : memref<144xf32, #tpu.memory_space<smem>>
    %1033 = vector.broadcast %1032 : f32 to vector<16x36xf32>
    %1034 = arith.mulf %1033, %1019 : vector<16x36xf32>
    %1035 = arith.addf %1017, %1034 : vector<16x36xf32>
    %c0_309 = arith.constant 0 : index
    %c2_310 = arith.constant 2 : index
    %c2_311 = arith.constant 2 : index
    %1036 = vector.load %arg12[%c0_309, %c2_310, %c2_311] : memref<4x18x38xf32, #tpu.memory_space<vmem>>, vector<1x16x36xf32>
    %1037 = vector.shape_cast %1036 : vector<1x16x36xf32> to vector<16x36xf32>
    %c8_312 = arith.constant 8 : index
    %1038 = memref.load %arg5[%c8_312] : memref<144xf32, #tpu.memory_space<smem>>
    %1039 = vector.broadcast %1038 : f32 to vector<16x36xf32>
    %1040 = arith.mulf %1039, %1037 : vector<16x36xf32>
    %1041 = arith.addf %1023, %1040 : vector<16x36xf32>
    %c44_313 = arith.constant 44 : index
    %1042 = memref.load %arg5[%c44_313] : memref<144xf32, #tpu.memory_space<smem>>
    %1043 = vector.broadcast %1042 : f32 to vector<16x36xf32>
    %1044 = arith.mulf %1043, %1037 : vector<16x36xf32>
    %1045 = arith.addf %1027, %1044 : vector<16x36xf32>
    %c80_314 = arith.constant 80 : index
    %1046 = memref.load %arg5[%c80_314] : memref<144xf32, #tpu.memory_space<smem>>
    %1047 = vector.broadcast %1046 : f32 to vector<16x36xf32>
    %1048 = arith.mulf %1047, %1037 : vector<16x36xf32>
    %1049 = arith.addf %1031, %1048 : vector<16x36xf32>
    %c116_315 = arith.constant 116 : index
    %1050 = memref.load %arg5[%c116_315] : memref<144xf32, #tpu.memory_space<smem>>
    %1051 = vector.broadcast %1050 : f32 to vector<16x36xf32>
    %1052 = arith.mulf %1051, %1037 : vector<16x36xf32>
    %1053 = arith.addf %1035, %1052 : vector<16x36xf32>
    %c1_316 = arith.constant 1 : index
    %c0_317 = arith.constant 0 : index
    %c0_318 = arith.constant 0 : index
    %1054 = vector.load %arg12[%c1_316, %c0_317, %c0_318] : memref<4x18x38xf32, #tpu.memory_space<vmem>>, vector<1x16x36xf32>
    %1055 = vector.shape_cast %1054 : vector<1x16x36xf32> to vector<16x36xf32>
    %c9_319 = arith.constant 9 : index
    %1056 = memref.load %arg5[%c9_319] : memref<144xf32, #tpu.memory_space<smem>>
    %1057 = vector.broadcast %1056 : f32 to vector<16x36xf32>
    %1058 = arith.mulf %1057, %1055 : vector<16x36xf32>
    %1059 = arith.addf %1041, %1058 : vector<16x36xf32>
    %c45_320 = arith.constant 45 : index
    %1060 = memref.load %arg5[%c45_320] : memref<144xf32, #tpu.memory_space<smem>>
    %1061 = vector.broadcast %1060 : f32 to vector<16x36xf32>
    %1062 = arith.mulf %1061, %1055 : vector<16x36xf32>
    %1063 = arith.addf %1045, %1062 : vector<16x36xf32>
    %c81_321 = arith.constant 81 : index
    %1064 = memref.load %arg5[%c81_321] : memref<144xf32, #tpu.memory_space<smem>>
    %1065 = vector.broadcast %1064 : f32 to vector<16x36xf32>
    %1066 = arith.mulf %1065, %1055 : vector<16x36xf32>
    %1067 = arith.addf %1049, %1066 : vector<16x36xf32>
    %c117_322 = arith.constant 117 : index
    %1068 = memref.load %arg5[%c117_322] : memref<144xf32, #tpu.memory_space<smem>>
    %1069 = vector.broadcast %1068 : f32 to vector<16x36xf32>
    %1070 = arith.mulf %1069, %1055 : vector<16x36xf32>
    %1071 = arith.addf %1053, %1070 : vector<16x36xf32>
    %c1_323 = arith.constant 1 : index
    %c0_324 = arith.constant 0 : index
    %c1_325 = arith.constant 1 : index
    %1072 = vector.load %arg12[%c1_323, %c0_324, %c1_325] : memref<4x18x38xf32, #tpu.memory_space<vmem>>, vector<1x16x36xf32>
    %1073 = vector.shape_cast %1072 : vector<1x16x36xf32> to vector<16x36xf32>
    %c10_326 = arith.constant 10 : index
    %1074 = memref.load %arg5[%c10_326] : memref<144xf32, #tpu.memory_space<smem>>
    %1075 = vector.broadcast %1074 : f32 to vector<16x36xf32>
    %1076 = arith.mulf %1075, %1073 : vector<16x36xf32>
    %1077 = arith.addf %1059, %1076 : vector<16x36xf32>
    %c46_327 = arith.constant 46 : index
    %1078 = memref.load %arg5[%c46_327] : memref<144xf32, #tpu.memory_space<smem>>
    %1079 = vector.broadcast %1078 : f32 to vector<16x36xf32>
    %1080 = arith.mulf %1079, %1073 : vector<16x36xf32>
    %1081 = arith.addf %1063, %1080 : vector<16x36xf32>
    %c82_328 = arith.constant 82 : index
    %1082 = memref.load %arg5[%c82_328] : memref<144xf32, #tpu.memory_space<smem>>
    %1083 = vector.broadcast %1082 : f32 to vector<16x36xf32>
    %1084 = arith.mulf %1083, %1073 : vector<16x36xf32>
    %1085 = arith.addf %1067, %1084 : vector<16x36xf32>
    %c118_329 = arith.constant 118 : index
    %1086 = memref.load %arg5[%c118_329] : memref<144xf32, #tpu.memory_space<smem>>
    %1087 = vector.broadcast %1086 : f32 to vector<16x36xf32>
    %1088 = arith.mulf %1087, %1073 : vector<16x36xf32>
    %1089 = arith.addf %1071, %1088 : vector<16x36xf32>
    %c1_330 = arith.constant 1 : index
    %c0_331 = arith.constant 0 : index
    %c2_332 = arith.constant 2 : index
    %1090 = vector.load %arg12[%c1_330, %c0_331, %c2_332] : memref<4x18x38xf32, #tpu.memory_space<vmem>>, vector<1x16x36xf32>
    %1091 = vector.shape_cast %1090 : vector<1x16x36xf32> to vector<16x36xf32>
    %c11_333 = arith.constant 11 : index
    %1092 = memref.load %arg5[%c11_333] : memref<144xf32, #tpu.memory_space<smem>>
    %1093 = vector.broadcast %1092 : f32 to vector<16x36xf32>
    %1094 = arith.mulf %1093, %1091 : vector<16x36xf32>
    %1095 = arith.addf %1077, %1094 : vector<16x36xf32>
    %c47_334 = arith.constant 47 : index
    %1096 = memref.load %arg5[%c47_334] : memref<144xf32, #tpu.memory_space<smem>>
    %1097 = vector.broadcast %1096 : f32 to vector<16x36xf32>
    %1098 = arith.mulf %1097, %1091 : vector<16x36xf32>
    %1099 = arith.addf %1081, %1098 : vector<16x36xf32>
    %c83_335 = arith.constant 83 : index
    %1100 = memref.load %arg5[%c83_335] : memref<144xf32, #tpu.memory_space<smem>>
    %1101 = vector.broadcast %1100 : f32 to vector<16x36xf32>
    %1102 = arith.mulf %1101, %1091 : vector<16x36xf32>
    %1103 = arith.addf %1085, %1102 : vector<16x36xf32>
    %c119_336 = arith.constant 119 : index
    %1104 = memref.load %arg5[%c119_336] : memref<144xf32, #tpu.memory_space<smem>>
    %1105 = vector.broadcast %1104 : f32 to vector<16x36xf32>
    %1106 = arith.mulf %1105, %1091 : vector<16x36xf32>
    %1107 = arith.addf %1089, %1106 : vector<16x36xf32>
    %c1_337 = arith.constant 1 : index
    %c1_338 = arith.constant 1 : index
    %c0_339 = arith.constant 0 : index
    %1108 = vector.load %arg12[%c1_337, %c1_338, %c0_339] : memref<4x18x38xf32, #tpu.memory_space<vmem>>, vector<1x16x36xf32>
    %1109 = vector.shape_cast %1108 : vector<1x16x36xf32> to vector<16x36xf32>
    %c12_340 = arith.constant 12 : index
    %1110 = memref.load %arg5[%c12_340] : memref<144xf32, #tpu.memory_space<smem>>
    %1111 = vector.broadcast %1110 : f32 to vector<16x36xf32>
    %1112 = arith.mulf %1111, %1109 : vector<16x36xf32>
    %1113 = arith.addf %1095, %1112 : vector<16x36xf32>
    %c48_341 = arith.constant 48 : index
    %1114 = memref.load %arg5[%c48_341] : memref<144xf32, #tpu.memory_space<smem>>
    %1115 = vector.broadcast %1114 : f32 to vector<16x36xf32>
    %1116 = arith.mulf %1115, %1109 : vector<16x36xf32>
    %1117 = arith.addf %1099, %1116 : vector<16x36xf32>
    %c84_342 = arith.constant 84 : index
    %1118 = memref.load %arg5[%c84_342] : memref<144xf32, #tpu.memory_space<smem>>
    %1119 = vector.broadcast %1118 : f32 to vector<16x36xf32>
    %1120 = arith.mulf %1119, %1109 : vector<16x36xf32>
    %1121 = arith.addf %1103, %1120 : vector<16x36xf32>
    %c120_343 = arith.constant 120 : index
    %1122 = memref.load %arg5[%c120_343] : memref<144xf32, #tpu.memory_space<smem>>
    %1123 = vector.broadcast %1122 : f32 to vector<16x36xf32>
    %1124 = arith.mulf %1123, %1109 : vector<16x36xf32>
    %1125 = arith.addf %1107, %1124 : vector<16x36xf32>
    %c1_344 = arith.constant 1 : index
    %c1_345 = arith.constant 1 : index
    %c1_346 = arith.constant 1 : index
    %1126 = vector.load %arg12[%c1_344, %c1_345, %c1_346] : memref<4x18x38xf32, #tpu.memory_space<vmem>>, vector<1x16x36xf32>
    %1127 = vector.shape_cast %1126 : vector<1x16x36xf32> to vector<16x36xf32>
    %c13_347 = arith.constant 13 : index
    %1128 = memref.load %arg5[%c13_347] : memref<144xf32, #tpu.memory_space<smem>>
    %1129 = vector.broadcast %1128 : f32 to vector<16x36xf32>
    %1130 = arith.mulf %1129, %1127 : vector<16x36xf32>
    %1131 = arith.addf %1113, %1130 : vector<16x36xf32>
    %c49_348 = arith.constant 49 : index
    %1132 = memref.load %arg5[%c49_348] : memref<144xf32, #tpu.memory_space<smem>>
    %1133 = vector.broadcast %1132 : f32 to vector<16x36xf32>
    %1134 = arith.mulf %1133, %1127 : vector<16x36xf32>
    %1135 = arith.addf %1117, %1134 : vector<16x36xf32>
    %c85_349 = arith.constant 85 : index
    %1136 = memref.load %arg5[%c85_349] : memref<144xf32, #tpu.memory_space<smem>>
    %1137 = vector.broadcast %1136 : f32 to vector<16x36xf32>
    %1138 = arith.mulf %1137, %1127 : vector<16x36xf32>
    %1139 = arith.addf %1121, %1138 : vector<16x36xf32>
    %c121_350 = arith.constant 121 : index
    %1140 = memref.load %arg5[%c121_350] : memref<144xf32, #tpu.memory_space<smem>>
    %1141 = vector.broadcast %1140 : f32 to vector<16x36xf32>
    %1142 = arith.mulf %1141, %1127 : vector<16x36xf32>
    %1143 = arith.addf %1125, %1142 : vector<16x36xf32>
    %c1_351 = arith.constant 1 : index
    %c1_352 = arith.constant 1 : index
    %c2_353 = arith.constant 2 : index
    %1144 = vector.load %arg12[%c1_351, %c1_352, %c2_353] : memref<4x18x38xf32, #tpu.memory_space<vmem>>, vector<1x16x36xf32>
    %1145 = vector.shape_cast %1144 : vector<1x16x36xf32> to vector<16x36xf32>
    %c14_354 = arith.constant 14 : index
    %1146 = memref.load %arg5[%c14_354] : memref<144xf32, #tpu.memory_space<smem>>
    %1147 = vector.broadcast %1146 : f32 to vector<16x36xf32>
    %1148 = arith.mulf %1147, %1145 : vector<16x36xf32>
    %1149 = arith.addf %1131, %1148 : vector<16x36xf32>
    %c50_355 = arith.constant 50 : index
    %1150 = memref.load %arg5[%c50_355] : memref<144xf32, #tpu.memory_space<smem>>
    %1151 = vector.broadcast %1150 : f32 to vector<16x36xf32>
    %1152 = arith.mulf %1151, %1145 : vector<16x36xf32>
    %1153 = arith.addf %1135, %1152 : vector<16x36xf32>
    %c86_356 = arith.constant 86 : index
    %1154 = memref.load %arg5[%c86_356] : memref<144xf32, #tpu.memory_space<smem>>
    %1155 = vector.broadcast %1154 : f32 to vector<16x36xf32>
    %1156 = arith.mulf %1155, %1145 : vector<16x36xf32>
    %1157 = arith.addf %1139, %1156 : vector<16x36xf32>
    %c122_357 = arith.constant 122 : index
    %1158 = memref.load %arg5[%c122_357] : memref<144xf32, #tpu.memory_space<smem>>
    %1159 = vector.broadcast %1158 : f32 to vector<16x36xf32>
    %1160 = arith.mulf %1159, %1145 : vector<16x36xf32>
    %1161 = arith.addf %1143, %1160 : vector<16x36xf32>
    %c1_358 = arith.constant 1 : index
    %c2_359 = arith.constant 2 : index
    %c0_360 = arith.constant 0 : index
    %1162 = vector.load %arg12[%c1_358, %c2_359, %c0_360] : memref<4x18x38xf32, #tpu.memory_space<vmem>>, vector<1x16x36xf32>
    %1163 = vector.shape_cast %1162 : vector<1x16x36xf32> to vector<16x36xf32>
    %c15_361 = arith.constant 15 : index
    %1164 = memref.load %arg5[%c15_361] : memref<144xf32, #tpu.memory_space<smem>>
    %1165 = vector.broadcast %1164 : f32 to vector<16x36xf32>
    %1166 = arith.mulf %1165, %1163 : vector<16x36xf32>
    %1167 = arith.addf %1149, %1166 : vector<16x36xf32>
    %c51_362 = arith.constant 51 : index
    %1168 = memref.load %arg5[%c51_362] : memref<144xf32, #tpu.memory_space<smem>>
    %1169 = vector.broadcast %1168 : f32 to vector<16x36xf32>
    %1170 = arith.mulf %1169, %1163 : vector<16x36xf32>
    %1171 = arith.addf %1153, %1170 : vector<16x36xf32>
    %c87_363 = arith.constant 87 : index
    %1172 = memref.load %arg5[%c87_363] : memref<144xf32, #tpu.memory_space<smem>>
    %1173 = vector.broadcast %1172 : f32 to vector<16x36xf32>
    %1174 = arith.mulf %1173, %1163 : vector<16x36xf32>
    %1175 = arith.addf %1157, %1174 : vector<16x36xf32>
    %c123_364 = arith.constant 123 : index
    %1176 = memref.load %arg5[%c123_364] : memref<144xf32, #tpu.memory_space<smem>>
    %1177 = vector.broadcast %1176 : f32 to vector<16x36xf32>
    %1178 = arith.mulf %1177, %1163 : vector<16x36xf32>
    %1179 = arith.addf %1161, %1178 : vector<16x36xf32>
    %c1_365 = arith.constant 1 : index
    %c2_366 = arith.constant 2 : index
    %c1_367 = arith.constant 1 : index
    %1180 = vector.load %arg12[%c1_365, %c2_366, %c1_367] : memref<4x18x38xf32, #tpu.memory_space<vmem>>, vector<1x16x36xf32>
    %1181 = vector.shape_cast %1180 : vector<1x16x36xf32> to vector<16x36xf32>
    %c16_368 = arith.constant 16 : index
    %1182 = memref.load %arg5[%c16_368] : memref<144xf32, #tpu.memory_space<smem>>
    %1183 = vector.broadcast %1182 : f32 to vector<16x36xf32>
    %1184 = arith.mulf %1183, %1181 : vector<16x36xf32>
    %1185 = arith.addf %1167, %1184 : vector<16x36xf32>
    %c52_369 = arith.constant 52 : index
    %1186 = memref.load %arg5[%c52_369] : memref<144xf32, #tpu.memory_space<smem>>
    %1187 = vector.broadcast %1186 : f32 to vector<16x36xf32>
    %1188 = arith.mulf %1187, %1181 : vector<16x36xf32>
    %1189 = arith.addf %1171, %1188 : vector<16x36xf32>
    %c88_370 = arith.constant 88 : index
    %1190 = memref.load %arg5[%c88_370] : memref<144xf32, #tpu.memory_space<smem>>
    %1191 = vector.broadcast %1190 : f32 to vector<16x36xf32>
    %1192 = arith.mulf %1191, %1181 : vector<16x36xf32>
    %1193 = arith.addf %1175, %1192 : vector<16x36xf32>
    %c124_371 = arith.constant 124 : index
    %1194 = memref.load %arg5[%c124_371] : memref<144xf32, #tpu.memory_space<smem>>
    %1195 = vector.broadcast %1194 : f32 to vector<16x36xf32>
    %1196 = arith.mulf %1195, %1181 : vector<16x36xf32>
    %1197 = arith.addf %1179, %1196 : vector<16x36xf32>
    %c1_372 = arith.constant 1 : index
    %c2_373 = arith.constant 2 : index
    %c2_374 = arith.constant 2 : index
    %1198 = vector.load %arg12[%c1_372, %c2_373, %c2_374] : memref<4x18x38xf32, #tpu.memory_space<vmem>>, vector<1x16x36xf32>
    %1199 = vector.shape_cast %1198 : vector<1x16x36xf32> to vector<16x36xf32>
    %c17_375 = arith.constant 17 : index
    %1200 = memref.load %arg5[%c17_375] : memref<144xf32, #tpu.memory_space<smem>>
    %1201 = vector.broadcast %1200 : f32 to vector<16x36xf32>
    %1202 = arith.mulf %1201, %1199 : vector<16x36xf32>
    %1203 = arith.addf %1185, %1202 : vector<16x36xf32>
    %c53_376 = arith.constant 53 : index
    %1204 = memref.load %arg5[%c53_376] : memref<144xf32, #tpu.memory_space<smem>>
    %1205 = vector.broadcast %1204 : f32 to vector<16x36xf32>
    %1206 = arith.mulf %1205, %1199 : vector<16x36xf32>
    %1207 = arith.addf %1189, %1206 : vector<16x36xf32>
    %c89_377 = arith.constant 89 : index
    %1208 = memref.load %arg5[%c89_377] : memref<144xf32, #tpu.memory_space<smem>>
    %1209 = vector.broadcast %1208 : f32 to vector<16x36xf32>
    %1210 = arith.mulf %1209, %1199 : vector<16x36xf32>
    %1211 = arith.addf %1193, %1210 : vector<16x36xf32>
    %c125_378 = arith.constant 125 : index
    %1212 = memref.load %arg5[%c125_378] : memref<144xf32, #tpu.memory_space<smem>>
    %1213 = vector.broadcast %1212 : f32 to vector<16x36xf32>
    %1214 = arith.mulf %1213, %1199 : vector<16x36xf32>
    %1215 = arith.addf %1197, %1214 : vector<16x36xf32>
    %c2_379 = arith.constant 2 : index
    %c0_380 = arith.constant 0 : index
    %c0_381 = arith.constant 0 : index
    %1216 = vector.load %arg12[%c2_379, %c0_380, %c0_381] : memref<4x18x38xf32, #tpu.memory_space<vmem>>, vector<1x16x36xf32>
    %1217 = vector.shape_cast %1216 : vector<1x16x36xf32> to vector<16x36xf32>
    %c18_382 = arith.constant 18 : index
    %1218 = memref.load %arg5[%c18_382] : memref<144xf32, #tpu.memory_space<smem>>
    %1219 = vector.broadcast %1218 : f32 to vector<16x36xf32>
    %1220 = arith.mulf %1219, %1217 : vector<16x36xf32>
    %1221 = arith.addf %1203, %1220 : vector<16x36xf32>
    %c54_383 = arith.constant 54 : index
    %1222 = memref.load %arg5[%c54_383] : memref<144xf32, #tpu.memory_space<smem>>
    %1223 = vector.broadcast %1222 : f32 to vector<16x36xf32>
    %1224 = arith.mulf %1223, %1217 : vector<16x36xf32>
    %1225 = arith.addf %1207, %1224 : vector<16x36xf32>
    %c90_384 = arith.constant 90 : index
    %1226 = memref.load %arg5[%c90_384] : memref<144xf32, #tpu.memory_space<smem>>
    %1227 = vector.broadcast %1226 : f32 to vector<16x36xf32>
    %1228 = arith.mulf %1227, %1217 : vector<16x36xf32>
    %1229 = arith.addf %1211, %1228 : vector<16x36xf32>
    %c126_385 = arith.constant 126 : index
    %1230 = memref.load %arg5[%c126_385] : memref<144xf32, #tpu.memory_space<smem>>
    %1231 = vector.broadcast %1230 : f32 to vector<16x36xf32>
    %1232 = arith.mulf %1231, %1217 : vector<16x36xf32>
    %1233 = arith.addf %1215, %1232 : vector<16x36xf32>
    %c2_386 = arith.constant 2 : index
    %c0_387 = arith.constant 0 : index
    %c1_388 = arith.constant 1 : index
    %1234 = vector.load %arg12[%c2_386, %c0_387, %c1_388] : memref<4x18x38xf32, #tpu.memory_space<vmem>>, vector<1x16x36xf32>
    %1235 = vector.shape_cast %1234 : vector<1x16x36xf32> to vector<16x36xf32>
    %c19_389 = arith.constant 19 : index
    %1236 = memref.load %arg5[%c19_389] : memref<144xf32, #tpu.memory_space<smem>>
    %1237 = vector.broadcast %1236 : f32 to vector<16x36xf32>
    %1238 = arith.mulf %1237, %1235 : vector<16x36xf32>
    %1239 = arith.addf %1221, %1238 : vector<16x36xf32>
    %c55_390 = arith.constant 55 : index
    %1240 = memref.load %arg5[%c55_390] : memref<144xf32, #tpu.memory_space<smem>>
    %1241 = vector.broadcast %1240 : f32 to vector<16x36xf32>
    %1242 = arith.mulf %1241, %1235 : vector<16x36xf32>
    %1243 = arith.addf %1225, %1242 : vector<16x36xf32>
    %c91_391 = arith.constant 91 : index
    %1244 = memref.load %arg5[%c91_391] : memref<144xf32, #tpu.memory_space<smem>>
    %1245 = vector.broadcast %1244 : f32 to vector<16x36xf32>
    %1246 = arith.mulf %1245, %1235 : vector<16x36xf32>
    %1247 = arith.addf %1229, %1246 : vector<16x36xf32>
    %c127_392 = arith.constant 127 : index
    %1248 = memref.load %arg5[%c127_392] : memref<144xf32, #tpu.memory_space<smem>>
    %1249 = vector.broadcast %1248 : f32 to vector<16x36xf32>
    %1250 = arith.mulf %1249, %1235 : vector<16x36xf32>
    %1251 = arith.addf %1233, %1250 : vector<16x36xf32>
    %c2_393 = arith.constant 2 : index
    %c0_394 = arith.constant 0 : index
    %c2_395 = arith.constant 2 : index
    %1252 = vector.load %arg12[%c2_393, %c0_394, %c2_395] : memref<4x18x38xf32, #tpu.memory_space<vmem>>, vector<1x16x36xf32>
    %1253 = vector.shape_cast %1252 : vector<1x16x36xf32> to vector<16x36xf32>
    %c20_396 = arith.constant 20 : index
    %1254 = memref.load %arg5[%c20_396] : memref<144xf32, #tpu.memory_space<smem>>
    %1255 = vector.broadcast %1254 : f32 to vector<16x36xf32>
    %1256 = arith.mulf %1255, %1253 : vector<16x36xf32>
    %1257 = arith.addf %1239, %1256 : vector<16x36xf32>
    %c56_397 = arith.constant 56 : index
    %1258 = memref.load %arg5[%c56_397] : memref<144xf32, #tpu.memory_space<smem>>
    %1259 = vector.broadcast %1258 : f32 to vector<16x36xf32>
    %1260 = arith.mulf %1259, %1253 : vector<16x36xf32>
    %1261 = arith.addf %1243, %1260 : vector<16x36xf32>
    %c92_398 = arith.constant 92 : index
    %1262 = memref.load %arg5[%c92_398] : memref<144xf32, #tpu.memory_space<smem>>
    %1263 = vector.broadcast %1262 : f32 to vector<16x36xf32>
    %1264 = arith.mulf %1263, %1253 : vector<16x36xf32>
    %1265 = arith.addf %1247, %1264 : vector<16x36xf32>
    %c128_399 = arith.constant 128 : index
    %1266 = memref.load %arg5[%c128_399] : memref<144xf32, #tpu.memory_space<smem>>
    %1267 = vector.broadcast %1266 : f32 to vector<16x36xf32>
    %1268 = arith.mulf %1267, %1253 : vector<16x36xf32>
    %1269 = arith.addf %1251, %1268 : vector<16x36xf32>
    %c2_400 = arith.constant 2 : index
    %c1_401 = arith.constant 1 : index
    %c0_402 = arith.constant 0 : index
    %1270 = vector.load %arg12[%c2_400, %c1_401, %c0_402] : memref<4x18x38xf32, #tpu.memory_space<vmem>>, vector<1x16x36xf32>
    %1271 = vector.shape_cast %1270 : vector<1x16x36xf32> to vector<16x36xf32>
    %c21_403 = arith.constant 21 : index
    %1272 = memref.load %arg5[%c21_403] : memref<144xf32, #tpu.memory_space<smem>>
    %1273 = vector.broadcast %1272 : f32 to vector<16x36xf32>
    %1274 = arith.mulf %1273, %1271 : vector<16x36xf32>
    %1275 = arith.addf %1257, %1274 : vector<16x36xf32>
    %c57_404 = arith.constant 57 : index
    %1276 = memref.load %arg5[%c57_404] : memref<144xf32, #tpu.memory_space<smem>>
    %1277 = vector.broadcast %1276 : f32 to vector<16x36xf32>
    %1278 = arith.mulf %1277, %1271 : vector<16x36xf32>
    %1279 = arith.addf %1261, %1278 : vector<16x36xf32>
    %c93_405 = arith.constant 93 : index
    %1280 = memref.load %arg5[%c93_405] : memref<144xf32, #tpu.memory_space<smem>>
    %1281 = vector.broadcast %1280 : f32 to vector<16x36xf32>
    %1282 = arith.mulf %1281, %1271 : vector<16x36xf32>
    %1283 = arith.addf %1265, %1282 : vector<16x36xf32>
    %c129_406 = arith.constant 129 : index
    %1284 = memref.load %arg5[%c129_406] : memref<144xf32, #tpu.memory_space<smem>>
    %1285 = vector.broadcast %1284 : f32 to vector<16x36xf32>
    %1286 = arith.mulf %1285, %1271 : vector<16x36xf32>
    %1287 = arith.addf %1269, %1286 : vector<16x36xf32>
    %c2_407 = arith.constant 2 : index
    %c1_408 = arith.constant 1 : index
    %c1_409 = arith.constant 1 : index
    %1288 = vector.load %arg12[%c2_407, %c1_408, %c1_409] : memref<4x18x38xf32, #tpu.memory_space<vmem>>, vector<1x16x36xf32>
    %1289 = vector.shape_cast %1288 : vector<1x16x36xf32> to vector<16x36xf32>
    %c22_410 = arith.constant 22 : index
    %1290 = memref.load %arg5[%c22_410] : memref<144xf32, #tpu.memory_space<smem>>
    %1291 = vector.broadcast %1290 : f32 to vector<16x36xf32>
    %1292 = arith.mulf %1291, %1289 : vector<16x36xf32>
    %1293 = arith.addf %1275, %1292 : vector<16x36xf32>
    %c58_411 = arith.constant 58 : index
    %1294 = memref.load %arg5[%c58_411] : memref<144xf32, #tpu.memory_space<smem>>
    %1295 = vector.broadcast %1294 : f32 to vector<16x36xf32>
    %1296 = arith.mulf %1295, %1289 : vector<16x36xf32>
    %1297 = arith.addf %1279, %1296 : vector<16x36xf32>
    %c94_412 = arith.constant 94 : index
    %1298 = memref.load %arg5[%c94_412] : memref<144xf32, #tpu.memory_space<smem>>
    %1299 = vector.broadcast %1298 : f32 to vector<16x36xf32>
    %1300 = arith.mulf %1299, %1289 : vector<16x36xf32>
    %1301 = arith.addf %1283, %1300 : vector<16x36xf32>
    %c130_413 = arith.constant 130 : index
    %1302 = memref.load %arg5[%c130_413] : memref<144xf32, #tpu.memory_space<smem>>
    %1303 = vector.broadcast %1302 : f32 to vector<16x36xf32>
    %1304 = arith.mulf %1303, %1289 : vector<16x36xf32>
    %1305 = arith.addf %1287, %1304 : vector<16x36xf32>
    %c2_414 = arith.constant 2 : index
    %c1_415 = arith.constant 1 : index
    %c2_416 = arith.constant 2 : index
    %1306 = vector.load %arg12[%c2_414, %c1_415, %c2_416] : memref<4x18x38xf32, #tpu.memory_space<vmem>>, vector<1x16x36xf32>
    %1307 = vector.shape_cast %1306 : vector<1x16x36xf32> to vector<16x36xf32>
    %c23_417 = arith.constant 23 : index
    %1308 = memref.load %arg5[%c23_417] : memref<144xf32, #tpu.memory_space<smem>>
    %1309 = vector.broadcast %1308 : f32 to vector<16x36xf32>
    %1310 = arith.mulf %1309, %1307 : vector<16x36xf32>
    %1311 = arith.addf %1293, %1310 : vector<16x36xf32>
    %c59_418 = arith.constant 59 : index
    %1312 = memref.load %arg5[%c59_418] : memref<144xf32, #tpu.memory_space<smem>>
    %1313 = vector.broadcast %1312 : f32 to vector<16x36xf32>
    %1314 = arith.mulf %1313, %1307 : vector<16x36xf32>
    %1315 = arith.addf %1297, %1314 : vector<16x36xf32>
    %c95_419 = arith.constant 95 : index
    %1316 = memref.load %arg5[%c95_419] : memref<144xf32, #tpu.memory_space<smem>>
    %1317 = vector.broadcast %1316 : f32 to vector<16x36xf32>
    %1318 = arith.mulf %1317, %1307 : vector<16x36xf32>
    %1319 = arith.addf %1301, %1318 : vector<16x36xf32>
    %c131_420 = arith.constant 131 : index
    %1320 = memref.load %arg5[%c131_420] : memref<144xf32, #tpu.memory_space<smem>>
    %1321 = vector.broadcast %1320 : f32 to vector<16x36xf32>
    %1322 = arith.mulf %1321, %1307 : vector<16x36xf32>
    %1323 = arith.addf %1305, %1322 : vector<16x36xf32>
    %c2_421 = arith.constant 2 : index
    %c2_422 = arith.constant 2 : index
    %c0_423 = arith.constant 0 : index
    %1324 = vector.load %arg12[%c2_421, %c2_422, %c0_423] : memref<4x18x38xf32, #tpu.memory_space<vmem>>, vector<1x16x36xf32>
    %1325 = vector.shape_cast %1324 : vector<1x16x36xf32> to vector<16x36xf32>
    %c24_424 = arith.constant 24 : index
    %1326 = memref.load %arg5[%c24_424] : memref<144xf32, #tpu.memory_space<smem>>
    %1327 = vector.broadcast %1326 : f32 to vector<16x36xf32>
    %1328 = arith.mulf %1327, %1325 : vector<16x36xf32>
    %1329 = arith.addf %1311, %1328 : vector<16x36xf32>
    %c60_425 = arith.constant 60 : index
    %1330 = memref.load %arg5[%c60_425] : memref<144xf32, #tpu.memory_space<smem>>
    %1331 = vector.broadcast %1330 : f32 to vector<16x36xf32>
    %1332 = arith.mulf %1331, %1325 : vector<16x36xf32>
    %1333 = arith.addf %1315, %1332 : vector<16x36xf32>
    %c96_426 = arith.constant 96 : index
    %1334 = memref.load %arg5[%c96_426] : memref<144xf32, #tpu.memory_space<smem>>
    %1335 = vector.broadcast %1334 : f32 to vector<16x36xf32>
    %1336 = arith.mulf %1335, %1325 : vector<16x36xf32>
    %1337 = arith.addf %1319, %1336 : vector<16x36xf32>
    %c132_427 = arith.constant 132 : index
    %1338 = memref.load %arg5[%c132_427] : memref<144xf32, #tpu.memory_space<smem>>
    %1339 = vector.broadcast %1338 : f32 to vector<16x36xf32>
    %1340 = arith.mulf %1339, %1325 : vector<16x36xf32>
    %1341 = arith.addf %1323, %1340 : vector<16x36xf32>
    %c2_428 = arith.constant 2 : index
    %c2_429 = arith.constant 2 : index
    %c1_430 = arith.constant 1 : index
    %1342 = vector.load %arg12[%c2_428, %c2_429, %c1_430] : memref<4x18x38xf32, #tpu.memory_space<vmem>>, vector<1x16x36xf32>
    %1343 = vector.shape_cast %1342 : vector<1x16x36xf32> to vector<16x36xf32>
    %c25_431 = arith.constant 25 : index
    %1344 = memref.load %arg5[%c25_431] : memref<144xf32, #tpu.memory_space<smem>>
    %1345 = vector.broadcast %1344 : f32 to vector<16x36xf32>
    %1346 = arith.mulf %1345, %1343 : vector<16x36xf32>
    %1347 = arith.addf %1329, %1346 : vector<16x36xf32>
    %c61_432 = arith.constant 61 : index
    %1348 = memref.load %arg5[%c61_432] : memref<144xf32, #tpu.memory_space<smem>>
    %1349 = vector.broadcast %1348 : f32 to vector<16x36xf32>
    %1350 = arith.mulf %1349, %1343 : vector<16x36xf32>
    %1351 = arith.addf %1333, %1350 : vector<16x36xf32>
    %c97_433 = arith.constant 97 : index
    %1352 = memref.load %arg5[%c97_433] : memref<144xf32, #tpu.memory_space<smem>>
    %1353 = vector.broadcast %1352 : f32 to vector<16x36xf32>
    %1354 = arith.mulf %1353, %1343 : vector<16x36xf32>
    %1355 = arith.addf %1337, %1354 : vector<16x36xf32>
    %c133_434 = arith.constant 133 : index
    %1356 = memref.load %arg5[%c133_434] : memref<144xf32, #tpu.memory_space<smem>>
    %1357 = vector.broadcast %1356 : f32 to vector<16x36xf32>
    %1358 = arith.mulf %1357, %1343 : vector<16x36xf32>
    %1359 = arith.addf %1341, %1358 : vector<16x36xf32>
    %c2_435 = arith.constant 2 : index
    %c2_436 = arith.constant 2 : index
    %c2_437 = arith.constant 2 : index
    %1360 = vector.load %arg12[%c2_435, %c2_436, %c2_437] : memref<4x18x38xf32, #tpu.memory_space<vmem>>, vector<1x16x36xf32>
    %1361 = vector.shape_cast %1360 : vector<1x16x36xf32> to vector<16x36xf32>
    %c26_438 = arith.constant 26 : index
    %1362 = memref.load %arg5[%c26_438] : memref<144xf32, #tpu.memory_space<smem>>
    %1363 = vector.broadcast %1362 : f32 to vector<16x36xf32>
    %1364 = arith.mulf %1363, %1361 : vector<16x36xf32>
    %1365 = arith.addf %1347, %1364 : vector<16x36xf32>
    %c62_439 = arith.constant 62 : index
    %1366 = memref.load %arg5[%c62_439] : memref<144xf32, #tpu.memory_space<smem>>
    %1367 = vector.broadcast %1366 : f32 to vector<16x36xf32>
    %1368 = arith.mulf %1367, %1361 : vector<16x36xf32>
    %1369 = arith.addf %1351, %1368 : vector<16x36xf32>
    %c98_440 = arith.constant 98 : index
    %1370 = memref.load %arg5[%c98_440] : memref<144xf32, #tpu.memory_space<smem>>
    %1371 = vector.broadcast %1370 : f32 to vector<16x36xf32>
    %1372 = arith.mulf %1371, %1361 : vector<16x36xf32>
    %1373 = arith.addf %1355, %1372 : vector<16x36xf32>
    %c134_441 = arith.constant 134 : index
    %1374 = memref.load %arg5[%c134_441] : memref<144xf32, #tpu.memory_space<smem>>
    %1375 = vector.broadcast %1374 : f32 to vector<16x36xf32>
    %1376 = arith.mulf %1375, %1361 : vector<16x36xf32>
    %1377 = arith.addf %1359, %1376 : vector<16x36xf32>
    %c3_442 = arith.constant 3 : index
    %c0_443 = arith.constant 0 : index
    %c0_444 = arith.constant 0 : index
    %1378 = vector.load %arg12[%c3_442, %c0_443, %c0_444] : memref<4x18x38xf32, #tpu.memory_space<vmem>>, vector<1x16x36xf32>
    %1379 = vector.shape_cast %1378 : vector<1x16x36xf32> to vector<16x36xf32>
    %c27_445 = arith.constant 27 : index
    %1380 = memref.load %arg5[%c27_445] : memref<144xf32, #tpu.memory_space<smem>>
    %1381 = vector.broadcast %1380 : f32 to vector<16x36xf32>
    %1382 = arith.mulf %1381, %1379 : vector<16x36xf32>
    %1383 = arith.addf %1365, %1382 : vector<16x36xf32>
    %c63_446 = arith.constant 63 : index
    %1384 = memref.load %arg5[%c63_446] : memref<144xf32, #tpu.memory_space<smem>>
    %1385 = vector.broadcast %1384 : f32 to vector<16x36xf32>
    %1386 = arith.mulf %1385, %1379 : vector<16x36xf32>
    %1387 = arith.addf %1369, %1386 : vector<16x36xf32>
    %c99_447 = arith.constant 99 : index
    %1388 = memref.load %arg5[%c99_447] : memref<144xf32, #tpu.memory_space<smem>>
    %1389 = vector.broadcast %1388 : f32 to vector<16x36xf32>
    %1390 = arith.mulf %1389, %1379 : vector<16x36xf32>
    %1391 = arith.addf %1373, %1390 : vector<16x36xf32>
    %c135_448 = arith.constant 135 : index
    %1392 = memref.load %arg5[%c135_448] : memref<144xf32, #tpu.memory_space<smem>>
    %1393 = vector.broadcast %1392 : f32 to vector<16x36xf32>
    %1394 = arith.mulf %1393, %1379 : vector<16x36xf32>
    %1395 = arith.addf %1377, %1394 : vector<16x36xf32>
    %c3_449 = arith.constant 3 : index
    %c0_450 = arith.constant 0 : index
    %c1_451 = arith.constant 1 : index
    %1396 = vector.load %arg12[%c3_449, %c0_450, %c1_451] : memref<4x18x38xf32, #tpu.memory_space<vmem>>, vector<1x16x36xf32>
    %1397 = vector.shape_cast %1396 : vector<1x16x36xf32> to vector<16x36xf32>
    %c28_452 = arith.constant 28 : index
    %1398 = memref.load %arg5[%c28_452] : memref<144xf32, #tpu.memory_space<smem>>
    %1399 = vector.broadcast %1398 : f32 to vector<16x36xf32>
    %1400 = arith.mulf %1399, %1397 : vector<16x36xf32>
    %1401 = arith.addf %1383, %1400 : vector<16x36xf32>
    %c64_453 = arith.constant 64 : index
    %1402 = memref.load %arg5[%c64_453] : memref<144xf32, #tpu.memory_space<smem>>
    %1403 = vector.broadcast %1402 : f32 to vector<16x36xf32>
    %1404 = arith.mulf %1403, %1397 : vector<16x36xf32>
    %1405 = arith.addf %1387, %1404 : vector<16x36xf32>
    %c100_454 = arith.constant 100 : index
    %1406 = memref.load %arg5[%c100_454] : memref<144xf32, #tpu.memory_space<smem>>
    %1407 = vector.broadcast %1406 : f32 to vector<16x36xf32>
    %1408 = arith.mulf %1407, %1397 : vector<16x36xf32>
    %1409 = arith.addf %1391, %1408 : vector<16x36xf32>
    %c136_455 = arith.constant 136 : index
    %1410 = memref.load %arg5[%c136_455] : memref<144xf32, #tpu.memory_space<smem>>
    %1411 = vector.broadcast %1410 : f32 to vector<16x36xf32>
    %1412 = arith.mulf %1411, %1397 : vector<16x36xf32>
    %1413 = arith.addf %1395, %1412 : vector<16x36xf32>
    %c3_456 = arith.constant 3 : index
    %c0_457 = arith.constant 0 : index
    %c2_458 = arith.constant 2 : index
    %1414 = vector.load %arg12[%c3_456, %c0_457, %c2_458] : memref<4x18x38xf32, #tpu.memory_space<vmem>>, vector<1x16x36xf32>
    %1415 = vector.shape_cast %1414 : vector<1x16x36xf32> to vector<16x36xf32>
    %c29_459 = arith.constant 29 : index
    %1416 = memref.load %arg5[%c29_459] : memref<144xf32, #tpu.memory_space<smem>>
    %1417 = vector.broadcast %1416 : f32 to vector<16x36xf32>
    %1418 = arith.mulf %1417, %1415 : vector<16x36xf32>
    %1419 = arith.addf %1401, %1418 : vector<16x36xf32>
    %c65_460 = arith.constant 65 : index
    %1420 = memref.load %arg5[%c65_460] : memref<144xf32, #tpu.memory_space<smem>>
    %1421 = vector.broadcast %1420 : f32 to vector<16x36xf32>
    %1422 = arith.mulf %1421, %1415 : vector<16x36xf32>
    %1423 = arith.addf %1405, %1422 : vector<16x36xf32>
    %c101_461 = arith.constant 101 : index
    %1424 = memref.load %arg5[%c101_461] : memref<144xf32, #tpu.memory_space<smem>>
    %1425 = vector.broadcast %1424 : f32 to vector<16x36xf32>
    %1426 = arith.mulf %1425, %1415 : vector<16x36xf32>
    %1427 = arith.addf %1409, %1426 : vector<16x36xf32>
    %c137_462 = arith.constant 137 : index
    %1428 = memref.load %arg5[%c137_462] : memref<144xf32, #tpu.memory_space<smem>>
    %1429 = vector.broadcast %1428 : f32 to vector<16x36xf32>
    %1430 = arith.mulf %1429, %1415 : vector<16x36xf32>
    %1431 = arith.addf %1413, %1430 : vector<16x36xf32>
    %c3_463 = arith.constant 3 : index
    %c1_464 = arith.constant 1 : index
    %c0_465 = arith.constant 0 : index
    %1432 = vector.load %arg12[%c3_463, %c1_464, %c0_465] : memref<4x18x38xf32, #tpu.memory_space<vmem>>, vector<1x16x36xf32>
    %1433 = vector.shape_cast %1432 : vector<1x16x36xf32> to vector<16x36xf32>
    %c30_466 = arith.constant 30 : index
    %1434 = memref.load %arg5[%c30_466] : memref<144xf32, #tpu.memory_space<smem>>
    %1435 = vector.broadcast %1434 : f32 to vector<16x36xf32>
    %1436 = arith.mulf %1435, %1433 : vector<16x36xf32>
    %1437 = arith.addf %1419, %1436 : vector<16x36xf32>
    %c66_467 = arith.constant 66 : index
    %1438 = memref.load %arg5[%c66_467] : memref<144xf32, #tpu.memory_space<smem>>
    %1439 = vector.broadcast %1438 : f32 to vector<16x36xf32>
    %1440 = arith.mulf %1439, %1433 : vector<16x36xf32>
    %1441 = arith.addf %1423, %1440 : vector<16x36xf32>
    %c102_468 = arith.constant 102 : index
    %1442 = memref.load %arg5[%c102_468] : memref<144xf32, #tpu.memory_space<smem>>
    %1443 = vector.broadcast %1442 : f32 to vector<16x36xf32>
    %1444 = arith.mulf %1443, %1433 : vector<16x36xf32>
    %1445 = arith.addf %1427, %1444 : vector<16x36xf32>
    %c138_469 = arith.constant 138 : index
    %1446 = memref.load %arg5[%c138_469] : memref<144xf32, #tpu.memory_space<smem>>
    %1447 = vector.broadcast %1446 : f32 to vector<16x36xf32>
    %1448 = arith.mulf %1447, %1433 : vector<16x36xf32>
    %1449 = arith.addf %1431, %1448 : vector<16x36xf32>
    %c3_470 = arith.constant 3 : index
    %c1_471 = arith.constant 1 : index
    %c1_472 = arith.constant 1 : index
    %1450 = vector.load %arg12[%c3_470, %c1_471, %c1_472] : memref<4x18x38xf32, #tpu.memory_space<vmem>>, vector<1x16x36xf32>
    %1451 = vector.shape_cast %1450 : vector<1x16x36xf32> to vector<16x36xf32>
    %c31_473 = arith.constant 31 : index
    %1452 = memref.load %arg5[%c31_473] : memref<144xf32, #tpu.memory_space<smem>>
    %1453 = vector.broadcast %1452 : f32 to vector<16x36xf32>
    %1454 = arith.mulf %1453, %1451 : vector<16x36xf32>
    %1455 = arith.addf %1437, %1454 : vector<16x36xf32>
    %c67_474 = arith.constant 67 : index
    %1456 = memref.load %arg5[%c67_474] : memref<144xf32, #tpu.memory_space<smem>>
    %1457 = vector.broadcast %1456 : f32 to vector<16x36xf32>
    %1458 = arith.mulf %1457, %1451 : vector<16x36xf32>
    %1459 = arith.addf %1441, %1458 : vector<16x36xf32>
    %c103_475 = arith.constant 103 : index
    %1460 = memref.load %arg5[%c103_475] : memref<144xf32, #tpu.memory_space<smem>>
    %1461 = vector.broadcast %1460 : f32 to vector<16x36xf32>
    %1462 = arith.mulf %1461, %1451 : vector<16x36xf32>
    %1463 = arith.addf %1445, %1462 : vector<16x36xf32>
    %c139_476 = arith.constant 139 : index
    %1464 = memref.load %arg5[%c139_476] : memref<144xf32, #tpu.memory_space<smem>>
    %1465 = vector.broadcast %1464 : f32 to vector<16x36xf32>
    %1466 = arith.mulf %1465, %1451 : vector<16x36xf32>
    %1467 = arith.addf %1449, %1466 : vector<16x36xf32>
    %c3_477 = arith.constant 3 : index
    %c1_478 = arith.constant 1 : index
    %c2_479 = arith.constant 2 : index
    %1468 = vector.load %arg12[%c3_477, %c1_478, %c2_479] : memref<4x18x38xf32, #tpu.memory_space<vmem>>, vector<1x16x36xf32>
    %1469 = vector.shape_cast %1468 : vector<1x16x36xf32> to vector<16x36xf32>
    %c32_480 = arith.constant 32 : index
    %1470 = memref.load %arg5[%c32_480] : memref<144xf32, #tpu.memory_space<smem>>
    %1471 = vector.broadcast %1470 : f32 to vector<16x36xf32>
    %1472 = arith.mulf %1471, %1469 : vector<16x36xf32>
    %1473 = arith.addf %1455, %1472 : vector<16x36xf32>
    %c68_481 = arith.constant 68 : index
    %1474 = memref.load %arg5[%c68_481] : memref<144xf32, #tpu.memory_space<smem>>
    %1475 = vector.broadcast %1474 : f32 to vector<16x36xf32>
    %1476 = arith.mulf %1475, %1469 : vector<16x36xf32>
    %1477 = arith.addf %1459, %1476 : vector<16x36xf32>
    %c104_482 = arith.constant 104 : index
    %1478 = memref.load %arg5[%c104_482] : memref<144xf32, #tpu.memory_space<smem>>
    %1479 = vector.broadcast %1478 : f32 to vector<16x36xf32>
    %1480 = arith.mulf %1479, %1469 : vector<16x36xf32>
    %1481 = arith.addf %1463, %1480 : vector<16x36xf32>
    %c140_483 = arith.constant 140 : index
    %1482 = memref.load %arg5[%c140_483] : memref<144xf32, #tpu.memory_space<smem>>
    %1483 = vector.broadcast %1482 : f32 to vector<16x36xf32>
    %1484 = arith.mulf %1483, %1469 : vector<16x36xf32>
    %1485 = arith.addf %1467, %1484 : vector<16x36xf32>
    %c3_484 = arith.constant 3 : index
    %c2_485 = arith.constant 2 : index
    %c0_486 = arith.constant 0 : index
    %1486 = vector.load %arg12[%c3_484, %c2_485, %c0_486] : memref<4x18x38xf32, #tpu.memory_space<vmem>>, vector<1x16x36xf32>
    %1487 = vector.shape_cast %1486 : vector<1x16x36xf32> to vector<16x36xf32>
    %c33_487 = arith.constant 33 : index
    %1488 = memref.load %arg5[%c33_487] : memref<144xf32, #tpu.memory_space<smem>>
    %1489 = vector.broadcast %1488 : f32 to vector<16x36xf32>
    %1490 = arith.mulf %1489, %1487 : vector<16x36xf32>
    %1491 = arith.addf %1473, %1490 : vector<16x36xf32>
    %c69_488 = arith.constant 69 : index
    %1492 = memref.load %arg5[%c69_488] : memref<144xf32, #tpu.memory_space<smem>>
    %1493 = vector.broadcast %1492 : f32 to vector<16x36xf32>
    %1494 = arith.mulf %1493, %1487 : vector<16x36xf32>
    %1495 = arith.addf %1477, %1494 : vector<16x36xf32>
    %c105_489 = arith.constant 105 : index
    %1496 = memref.load %arg5[%c105_489] : memref<144xf32, #tpu.memory_space<smem>>
    %1497 = vector.broadcast %1496 : f32 to vector<16x36xf32>
    %1498 = arith.mulf %1497, %1487 : vector<16x36xf32>
    %1499 = arith.addf %1481, %1498 : vector<16x36xf32>
    %c141_490 = arith.constant 141 : index
    %1500 = memref.load %arg5[%c141_490] : memref<144xf32, #tpu.memory_space<smem>>
    %1501 = vector.broadcast %1500 : f32 to vector<16x36xf32>
    %1502 = arith.mulf %1501, %1487 : vector<16x36xf32>
    %1503 = arith.addf %1485, %1502 : vector<16x36xf32>
    %c3_491 = arith.constant 3 : index
    %c2_492 = arith.constant 2 : index
    %c1_493 = arith.constant 1 : index
    %1504 = vector.load %arg12[%c3_491, %c2_492, %c1_493] : memref<4x18x38xf32, #tpu.memory_space<vmem>>, vector<1x16x36xf32>
    %1505 = vector.shape_cast %1504 : vector<1x16x36xf32> to vector<16x36xf32>
    %c34_494 = arith.constant 34 : index
    %1506 = memref.load %arg5[%c34_494] : memref<144xf32, #tpu.memory_space<smem>>
    %1507 = vector.broadcast %1506 : f32 to vector<16x36xf32>
    %1508 = arith.mulf %1507, %1505 : vector<16x36xf32>
    %1509 = arith.addf %1491, %1508 : vector<16x36xf32>
    %c70_495 = arith.constant 70 : index
    %1510 = memref.load %arg5[%c70_495] : memref<144xf32, #tpu.memory_space<smem>>
    %1511 = vector.broadcast %1510 : f32 to vector<16x36xf32>
    %1512 = arith.mulf %1511, %1505 : vector<16x36xf32>
    %1513 = arith.addf %1495, %1512 : vector<16x36xf32>
    %c106_496 = arith.constant 106 : index
    %1514 = memref.load %arg5[%c106_496] : memref<144xf32, #tpu.memory_space<smem>>
    %1515 = vector.broadcast %1514 : f32 to vector<16x36xf32>
    %1516 = arith.mulf %1515, %1505 : vector<16x36xf32>
    %1517 = arith.addf %1499, %1516 : vector<16x36xf32>
    %c142_497 = arith.constant 142 : index
    %1518 = memref.load %arg5[%c142_497] : memref<144xf32, #tpu.memory_space<smem>>
    %1519 = vector.broadcast %1518 : f32 to vector<16x36xf32>
    %1520 = arith.mulf %1519, %1505 : vector<16x36xf32>
    %1521 = arith.addf %1503, %1520 : vector<16x36xf32>
    %c3_498 = arith.constant 3 : index
    %c2_499 = arith.constant 2 : index
    %c2_500 = arith.constant 2 : index
    %1522 = vector.load %arg12[%c3_498, %c2_499, %c2_500] : memref<4x18x38xf32, #tpu.memory_space<vmem>>, vector<1x16x36xf32>
    %1523 = vector.shape_cast %1522 : vector<1x16x36xf32> to vector<16x36xf32>
    %c35_501 = arith.constant 35 : index
    %1524 = memref.load %arg5[%c35_501] : memref<144xf32, #tpu.memory_space<smem>>
    %1525 = vector.broadcast %1524 : f32 to vector<16x36xf32>
    %1526 = arith.mulf %1525, %1523 : vector<16x36xf32>
    %1527 = arith.addf %1509, %1526 : vector<16x36xf32>
    %c71_502 = arith.constant 71 : index
    %1528 = memref.load %arg5[%c71_502] : memref<144xf32, #tpu.memory_space<smem>>
    %1529 = vector.broadcast %1528 : f32 to vector<16x36xf32>
    %1530 = arith.mulf %1529, %1523 : vector<16x36xf32>
    %1531 = arith.addf %1513, %1530 : vector<16x36xf32>
    %c107_503 = arith.constant 107 : index
    %1532 = memref.load %arg5[%c107_503] : memref<144xf32, #tpu.memory_space<smem>>
    %1533 = vector.broadcast %1532 : f32 to vector<16x36xf32>
    %1534 = arith.mulf %1533, %1523 : vector<16x36xf32>
    %1535 = arith.addf %1517, %1534 : vector<16x36xf32>
    %c143_504 = arith.constant 143 : index
    %1536 = memref.load %arg5[%c143_504] : memref<144xf32, #tpu.memory_space<smem>>
    %1537 = vector.broadcast %1536 : f32 to vector<16x36xf32>
    %1538 = arith.mulf %1537, %1523 : vector<16x36xf32>
    %1539 = arith.addf %1521, %1538 : vector<16x36xf32>
    %cst_505 = arith.constant 0.000000e+00 : f32
    %1540 = vector.broadcast %cst_505 : f32 to vector<16x36xf32>
    %1541 = arith.select %12, %1527, %1540 : vector<16x36xi1>, vector<16x36xf32>
    %1542 = vector.shape_cast %1541 : vector<16x36xf32> to vector<1x16x36xf32>
    %cst_506 = arith.constant dense<0.000000e+00> : vector<1xf32>
    %1543 = vector.multi_reduction <add>, %1542, %cst_506 [1, 2] : vector<1x16x36xf32> to vector<1xf32>
    %1544 = vector.shape_cast %1543 : vector<1xf32> to vector<1x1x1xf32>
    %1545 = vector.extract %1544[0, 0, 0] : f32 from vector<1x1x1xf32>
    %1546 = arith.mulf %1541, %1541 : vector<16x36xf32>
    %1547 = vector.shape_cast %1546 : vector<16x36xf32> to vector<1x16x36xf32>
    %cst_507 = arith.constant dense<0.000000e+00> : vector<1xf32>
    %1548 = vector.multi_reduction <add>, %1547, %cst_507 [1, 2] : vector<1x16x36xf32> to vector<1xf32>
    %1549 = vector.shape_cast %1548 : vector<1xf32> to vector<1x1x1xf32>
    %1550 = vector.extract %1549[0, 0, 0] : f32 from vector<1x1x1xf32>
    %cst_508 = arith.constant 0.001953125 : f32
    %1551 = arith.mulf %1545, %cst_508 : f32
    %cst_509 = arith.constant 0.001953125 : f32
    %1552 = arith.mulf %1550, %cst_509 : f32
    %1553 = arith.mulf %1551, %1551 : f32
    %1554 = arith.subf %1552, %1553 : f32
    %1555 = vector.broadcast %1551 : f32 to vector<16x36xf32>
    %1556 = arith.subf %1541, %1555 : vector<16x36xf32>
    %cst_510 = arith.constant 9.99999974E-6 : f32
    %1557 = arith.addf %1554, %cst_510 : f32
    %1558 = math.rsqrt %1557 : f32
    %1559 = vector.broadcast %1558 : f32 to vector<16x36xf32>
    %1560 = arith.mulf %1556, %1559 : vector<16x36xf32>
    %c0_511 = arith.constant 0 : index
    %1561 = memref.load %arg7[%c0_511] : memref<4xf32, #tpu.memory_space<smem>>
    %1562 = vector.broadcast %1561 : f32 to vector<16x36xf32>
    %1563 = arith.mulf %1560, %1562 : vector<16x36xf32>
    %c0_512 = arith.constant 0 : index
    %1564 = memref.load %arg8[%c0_512] : memref<4xf32, #tpu.memory_space<smem>>
    %1565 = vector.broadcast %1564 : f32 to vector<16x36xf32>
    %1566 = arith.addf %1563, %1565 : vector<16x36xf32>
    %c0_513 = arith.constant 0 : index
    %c0_514 = arith.constant 0 : index
    %c0_515 = arith.constant 0 : index
    %c0_516 = arith.constant 0 : index
    %1567 = vector.load %arg9[%c0_513, %c0_514, %c0_515, %c0_516] : memref<2x4x16x16xf32, #tpu.memory_space<vmem>>, vector<1x1x16x16xf32>
    %1568 = vector.shape_cast %1567 : vector<1x1x16x16xf32> to vector<16x16xf32>
    %1569 = vector.extract_strided_slice %1566 {offsets = [0, 1], sizes = [16, 16], strides = [1, 1]} : vector<16x36xf32> to vector<16x16xf32>
    %1570 = arith.addf %1568, %1569 : vector<16x16xf32>
    %c0_517 = arith.constant 0 : index
    %c0_518 = arith.constant 0 : index
    %1571 = vector.load %arg10[%c0_517, %c0_518] : memref<16x128xf32, #tpu.memory_space<vmem>>, vector<16x16xf32>
    tpu.vector_store %arg10[%c0_517, %c0_518], %1570 {strides = array<i32>} : memref<16x128xf32, #tpu.memory_space<vmem>>, vector<16x16xf32>,
    %c1_519 = arith.constant 1 : index
    %c0_520 = arith.constant 0 : index
    %c0_521 = arith.constant 0 : index
    %c0_522 = arith.constant 0 : index
    %1572 = vector.load %arg9[%c1_519, %c0_520, %c0_521, %c0_522] : memref<2x4x16x16xf32, #tpu.memory_space<vmem>>, vector<1x1x16x16xf32>
    %1573 = vector.shape_cast %1572 : vector<1x1x16x16xf32> to vector<16x16xf32>
    %1574 = vector.extract_strided_slice %1566 {offsets = [0, 19], sizes = [16, 16], strides = [1, 1]} : vector<16x36xf32> to vector<16x16xf32>
    %1575 = arith.addf %1573, %1574 : vector<16x16xf32>
    %c0_523 = arith.constant 0 : index
    %c16_524 = arith.constant 16 : index
    %1576 = vector.load %arg10[%c0_523, %c16_524] : memref<16x128xf32, #tpu.memory_space<vmem>>, vector<16x16xf32>
    tpu.vector_store %arg10[%c0_523, %c16_524], %1575 {strides = array<i32>} : memref<16x128xf32, #tpu.memory_space<vmem>>, vector<16x16xf32>,
    %cst_525 = arith.constant 0.000000e+00 : f32
    %1577 = vector.broadcast %cst_525 : f32 to vector<16x36xf32>
    %1578 = arith.select %12, %1531, %1577 : vector<16x36xi1>, vector<16x36xf32>
    %1579 = vector.shape_cast %1578 : vector<16x36xf32> to vector<1x16x36xf32>
    %cst_526 = arith.constant dense<0.000000e+00> : vector<1xf32>
    %1580 = vector.multi_reduction <add>, %1579, %cst_526 [1, 2] : vector<1x16x36xf32> to vector<1xf32>
    %1581 = vector.shape_cast %1580 : vector<1xf32> to vector<1x1x1xf32>
    %1582 = vector.extract %1581[0, 0, 0] : f32 from vector<1x1x1xf32>
    %1583 = arith.mulf %1578, %1578 : vector<16x36xf32>
    %1584 = vector.shape_cast %1583 : vector<16x36xf32> to vector<1x16x36xf32>
    %cst_527 = arith.constant dense<0.000000e+00> : vector<1xf32>
    %1585 = vector.multi_reduction <add>, %1584, %cst_527 [1, 2] : vector<1x16x36xf32> to vector<1xf32>
    %1586 = vector.shape_cast %1585 : vector<1xf32> to vector<1x1x1xf32>
    %1587 = vector.extract %1586[0, 0, 0] : f32 from vector<1x1x1xf32>
    %cst_528 = arith.constant 0.001953125 : f32
    %1588 = arith.mulf %1582, %cst_528 : f32
    %cst_529 = arith.constant 0.001953125 : f32
    %1589 = arith.mulf %1587, %cst_529 : f32
    %1590 = arith.mulf %1588, %1588 : f32
    %1591 = arith.subf %1589, %1590 : f32
    %1592 = vector.broadcast %1588 : f32 to vector<16x36xf32>
    %1593 = arith.subf %1578, %1592 : vector<16x36xf32>
    %cst_530 = arith.constant 9.99999974E-6 : f32
    %1594 = arith.addf %1591, %cst_530 : f32
    %1595 = math.rsqrt %1594 : f32
    %1596 = vector.broadcast %1595 : f32 to vector<16x36xf32>
    %1597 = arith.mulf %1593, %1596 : vector<16x36xf32>
    %c1_531 = arith.constant 1 : index
    %1598 = memref.load %arg7[%c1_531] : memref<4xf32, #tpu.memory_space<smem>>
    %1599 = vector.broadcast %1598 : f32 to vector<16x36xf32>
    %1600 = arith.mulf %1597, %1599 : vector<16x36xf32>
    %c1_532 = arith.constant 1 : index
    %1601 = memref.load %arg8[%c1_532] : memref<4xf32, #tpu.memory_space<smem>>
    %1602 = vector.broadcast %1601 : f32 to vector<16x36xf32>
    %1603 = arith.addf %1600, %1602 : vector<16x36xf32>
    %c0_533 = arith.constant 0 : index
    %c1_534 = arith.constant 1 : index
    %c0_535 = arith.constant 0 : index
    %c0_536 = arith.constant 0 : index
    %1604 = vector.load %arg9[%c0_533, %c1_534, %c0_535, %c0_536] : memref<2x4x16x16xf32, #tpu.memory_space<vmem>>, vector<1x1x16x16xf32>
    %1605 = vector.shape_cast %1604 : vector<1x1x16x16xf32> to vector<16x16xf32>
    %1606 = vector.extract_strided_slice %1603 {offsets = [0, 1], sizes = [16, 16], strides = [1, 1]} : vector<16x36xf32> to vector<16x16xf32>
    %1607 = arith.addf %1605, %1606 : vector<16x16xf32>
    %c0_537 = arith.constant 0 : index
    %c32_538 = arith.constant 32 : index
    %1608 = vector.load %arg10[%c0_537, %c32_538] : memref<16x128xf32, #tpu.memory_space<vmem>>, vector<16x16xf32>
    tpu.vector_store %arg10[%c0_537, %c32_538], %1607 {strides = array<i32>} : memref<16x128xf32, #tpu.memory_space<vmem>>, vector<16x16xf32>,
    %c1_539 = arith.constant 1 : index
    %c1_540 = arith.constant 1 : index
    %c0_541 = arith.constant 0 : index
    %c0_542 = arith.constant 0 : index
    %1609 = vector.load %arg9[%c1_539, %c1_540, %c0_541, %c0_542] : memref<2x4x16x16xf32, #tpu.memory_space<vmem>>, vector<1x1x16x16xf32>
    %1610 = vector.shape_cast %1609 : vector<1x1x16x16xf32> to vector<16x16xf32>
    %1611 = vector.extract_strided_slice %1603 {offsets = [0, 19], sizes = [16, 16], strides = [1, 1]} : vector<16x36xf32> to vector<16x16xf32>
    %1612 = arith.addf %1610, %1611 : vector<16x16xf32>
    %c0_543 = arith.constant 0 : index
    %c48_544 = arith.constant 48 : index
    %1613 = vector.load %arg10[%c0_543, %c48_544] : memref<16x128xf32, #tpu.memory_space<vmem>>, vector<16x16xf32>
    tpu.vector_store %arg10[%c0_543, %c48_544], %1612 {strides = array<i32>} : memref<16x128xf32, #tpu.memory_space<vmem>>, vector<16x16xf32>,
    %cst_545 = arith.constant 0.000000e+00 : f32
    %1614 = vector.broadcast %cst_545 : f32 to vector<16x36xf32>
    %1615 = arith.select %12, %1535, %1614 : vector<16x36xi1>, vector<16x36xf32>
    %1616 = vector.shape_cast %1615 : vector<16x36xf32> to vector<1x16x36xf32>
    %cst_546 = arith.constant dense<0.000000e+00> : vector<1xf32>
    %1617 = vector.multi_reduction <add>, %1616, %cst_546 [1, 2] : vector<1x16x36xf32> to vector<1xf32>
    %1618 = vector.shape_cast %1617 : vector<1xf32> to vector<1x1x1xf32>
    %1619 = vector.extract %1618[0, 0, 0] : f32 from vector<1x1x1xf32>
    %1620 = arith.mulf %1615, %1615 : vector<16x36xf32>
    %1621 = vector.shape_cast %1620 : vector<16x36xf32> to vector<1x16x36xf32>
    %cst_547 = arith.constant dense<0.000000e+00> : vector<1xf32>
    %1622 = vector.multi_reduction <add>, %1621, %cst_547 [1, 2] : vector<1x16x36xf32> to vector<1xf32>
    %1623 = vector.shape_cast %1622 : vector<1xf32> to vector<1x1x1xf32>
    %1624 = vector.extract %1623[0, 0, 0] : f32 from vector<1x1x1xf32>
    %cst_548 = arith.constant 0.001953125 : f32
    %1625 = arith.mulf %1619, %cst_548 : f32
    %cst_549 = arith.constant 0.001953125 : f32
    %1626 = arith.mulf %1624, %cst_549 : f32
    %1627 = arith.mulf %1625, %1625 : f32
    %1628 = arith.subf %1626, %1627 : f32
    %1629 = vector.broadcast %1625 : f32 to vector<16x36xf32>
    %1630 = arith.subf %1615, %1629 : vector<16x36xf32>
    %cst_550 = arith.constant 9.99999974E-6 : f32
    %1631 = arith.addf %1628, %cst_550 : f32
    %1632 = math.rsqrt %1631 : f32
    %1633 = vector.broadcast %1632 : f32 to vector<16x36xf32>
    %1634 = arith.mulf %1630, %1633 : vector<16x36xf32>
    %c2_551 = arith.constant 2 : index
    %1635 = memref.load %arg7[%c2_551] : memref<4xf32, #tpu.memory_space<smem>>
    %1636 = vector.broadcast %1635 : f32 to vector<16x36xf32>
    %1637 = arith.mulf %1634, %1636 : vector<16x36xf32>
    %c2_552 = arith.constant 2 : index
    %1638 = memref.load %arg8[%c2_552] : memref<4xf32, #tpu.memory_space<smem>>
    %1639 = vector.broadcast %1638 : f32 to vector<16x36xf32>
    %1640 = arith.addf %1637, %1639 : vector<16x36xf32>
    %c0_553 = arith.constant 0 : index
    %c2_554 = arith.constant 2 : index
    %c0_555 = arith.constant 0 : index
    %c0_556 = arith.constant 0 : index
    %1641 = vector.load %arg9[%c0_553, %c2_554, %c0_555, %c0_556] : memref<2x4x16x16xf32, #tpu.memory_space<vmem>>, vector<1x1x16x16xf32>
    %1642 = vector.shape_cast %1641 : vector<1x1x16x16xf32> to vector<16x16xf32>
    %1643 = vector.extract_strided_slice %1640 {offsets = [0, 1], sizes = [16, 16], strides = [1, 1]} : vector<16x36xf32> to vector<16x16xf32>
    %1644 = arith.addf %1642, %1643 : vector<16x16xf32>
    %c0_557 = arith.constant 0 : index
    %c64_558 = arith.constant 64 : index
    %1645 = vector.load %arg10[%c0_557, %c64_558] : memref<16x128xf32, #tpu.memory_space<vmem>>, vector<16x16xf32>
    tpu.vector_store %arg10[%c0_557, %c64_558], %1644 {strides = array<i32>} : memref<16x128xf32, #tpu.memory_space<vmem>>, vector<16x16xf32>,
    %c1_559 = arith.constant 1 : index
    %c2_560 = arith.constant 2 : index
    %c0_561 = arith.constant 0 : index
    %c0_562 = arith.constant 0 : index
    %1646 = vector.load %arg9[%c1_559, %c2_560, %c0_561, %c0_562] : memref<2x4x16x16xf32, #tpu.memory_space<vmem>>, vector<1x1x16x16xf32>
    %1647 = vector.shape_cast %1646 : vector<1x1x16x16xf32> to vector<16x16xf32>
    %1648 = vector.extract_strided_slice %1640 {offsets = [0, 19], sizes = [16, 16], strides = [1, 1]} : vector<16x36xf32> to vector<16x16xf32>
    %1649 = arith.addf %1647, %1648 : vector<16x16xf32>
    %c0_563 = arith.constant 0 : index
    %c80_564 = arith.constant 80 : index
    %1650 = vector.load %arg10[%c0_563, %c80_564] : memref<16x128xf32, #tpu.memory_space<vmem>>, vector<16x16xf32>
    tpu.vector_store %arg10[%c0_563, %c80_564], %1649 {strides = array<i32>} : memref<16x128xf32, #tpu.memory_space<vmem>>, vector<16x16xf32>,
    %cst_565 = arith.constant 0.000000e+00 : f32
    %1651 = vector.broadcast %cst_565 : f32 to vector<16x36xf32>
    %1652 = arith.select %12, %1539, %1651 : vector<16x36xi1>, vector<16x36xf32>
    %1653 = vector.shape_cast %1652 : vector<16x36xf32> to vector<1x16x36xf32>
    %cst_566 = arith.constant dense<0.000000e+00> : vector<1xf32>
    %1654 = vector.multi_reduction <add>, %1653, %cst_566 [1, 2] : vector<1x16x36xf32> to vector<1xf32>
    %1655 = vector.shape_cast %1654 : vector<1xf32> to vector<1x1x1xf32>
    %1656 = vector.extract %1655[0, 0, 0] : f32 from vector<1x1x1xf32>
    %1657 = arith.mulf %1652, %1652 : vector<16x36xf32>
    %1658 = vector.shape_cast %1657 : vector<16x36xf32> to vector<1x16x36xf32>
    %cst_567 = arith.constant dense<0.000000e+00> : vector<1xf32>
    %1659 = vector.multi_reduction <add>, %1658, %cst_567 [1, 2] : vector<1x16x36xf32> to vector<1xf32>
    %1660 = vector.shape_cast %1659 : vector<1xf32> to vector<1x1x1xf32>
    %1661 = vector.extract %1660[0, 0, 0] : f32 from vector<1x1x1xf32>
    %cst_568 = arith.constant 0.001953125 : f32
    %1662 = arith.mulf %1656, %cst_568 : f32
    %cst_569 = arith.constant 0.001953125 : f32
    %1663 = arith.mulf %1661, %cst_569 : f32
    %1664 = arith.mulf %1662, %1662 : f32
    %1665 = arith.subf %1663, %1664 : f32
    %1666 = vector.broadcast %1662 : f32 to vector<16x36xf32>
    %1667 = arith.subf %1652, %1666 : vector<16x36xf32>
    %cst_570 = arith.constant 9.99999974E-6 : f32
    %1668 = arith.addf %1665, %cst_570 : f32
    %1669 = math.rsqrt %1668 : f32
    %1670 = vector.broadcast %1669 : f32 to vector<16x36xf32>
    %1671 = arith.mulf %1667, %1670 : vector<16x36xf32>
    %c3_571 = arith.constant 3 : index
    %1672 = memref.load %arg7[%c3_571] : memref<4xf32, #tpu.memory_space<smem>>
    %1673 = vector.broadcast %1672 : f32 to vector<16x36xf32>
    %1674 = arith.mulf %1671, %1673 : vector<16x36xf32>
    %c3_572 = arith.constant 3 : index
    %1675 = memref.load %arg8[%c3_572] : memref<4xf32, #tpu.memory_space<smem>>
    %1676 = vector.broadcast %1675 : f32 to vector<16x36xf32>
    %1677 = arith.addf %1674, %1676 : vector<16x36xf32>
    %c0_573 = arith.constant 0 : index
    %c3_574 = arith.constant 3 : index
    %c0_575 = arith.constant 0 : index
    %c0_576 = arith.constant 0 : index
    %1678 = vector.load %arg9[%c0_573, %c3_574, %c0_575, %c0_576] : memref<2x4x16x16xf32, #tpu.memory_space<vmem>>, vector<1x1x16x16xf32>
    %1679 = vector.shape_cast %1678 : vector<1x1x16x16xf32> to vector<16x16xf32>
    %1680 = vector.extract_strided_slice %1677 {offsets = [0, 1], sizes = [16, 16], strides = [1, 1]} : vector<16x36xf32> to vector<16x16xf32>
    %1681 = arith.addf %1679, %1680 : vector<16x16xf32>
    %c0_577 = arith.constant 0 : index
    %c96_578 = arith.constant 96 : index
    %1682 = vector.load %arg10[%c0_577, %c96_578] : memref<16x128xf32, #tpu.memory_space<vmem>>, vector<16x16xf32>
    tpu.vector_store %arg10[%c0_577, %c96_578], %1681 {strides = array<i32>} : memref<16x128xf32, #tpu.memory_space<vmem>>, vector<16x16xf32>,
    %c1_579 = arith.constant 1 : index
    %c3_580 = arith.constant 3 : index
    %c0_581 = arith.constant 0 : index
    %c0_582 = arith.constant 0 : index
    %1683 = vector.load %arg9[%c1_579, %c3_580, %c0_581, %c0_582] : memref<2x4x16x16xf32, #tpu.memory_space<vmem>>, vector<1x1x16x16xf32>
    %1684 = vector.shape_cast %1683 : vector<1x1x16x16xf32> to vector<16x16xf32>
    %1685 = vector.extract_strided_slice %1677 {offsets = [0, 19], sizes = [16, 16], strides = [1, 1]} : vector<16x36xf32> to vector<16x16xf32>
    %1686 = arith.addf %1684, %1685 : vector<16x16xf32>
    %c0_583 = arith.constant 0 : index
    %c112_584 = arith.constant 112 : index
    %1687 = vector.load %arg10[%c0_583, %c112_584] : memref<16x128xf32, #tpu.memory_space<vmem>>, vector<16x16xf32>
    tpu.vector_store %arg10[%c0_583, %c112_584], %1686 {strides = array<i32>} : memref<16x128xf32, #tpu.memory_space<vmem>>, vector<16x16xf32>,
    return
  }
}

</mosaic_0001>

<bundles_post_ra>
// kernel: residual_block.1
= control target key start
LH: loop header
LB: loop body
LE: loop exit
PB: predicated region body
PF: predicated region fallthrough
CT: control target
= control target key end

     0   :  { %16 = vsyncpa [#allocation6], 0  ;;  %s7332_s0 = inlined_call_operand.vmem [shape: f32[144], index: 0, kind: input, shape index: {}]   ;;  %s7333_s1 = inlined_call_operand.vmem [shape: f32[4], index: 1, kind: input, shape index: {}]   ;;  %s7334_s2 = inlined_call_operand.vmem [shape: f32[4], index: 2, kind: input, shape index: {}]   ;;  %s7335_s3 = inlined_call_operand.vmem [shape: f32[4], index: 3, kind: input, shape index: {}]   ;;  %s7336_s4 = inlined_call_operand.<no memory space> [shape: f32[1], index: 4, kind: input, shape index: {}]   ;;  %s7337_s5 = inlined_call_operand.vmem [shape: f32[144], index: 5, kind: input, shape index: {}]   ;;  %s7338_s6 = inlined_call_operand.vmem [shape: f32[4], index: 6, kind: input, shape index: {}]   ;;  %s7339_s7 = inlined_call_operand.vmem [shape: f32[4], index: 7, kind: input, shape index: {}]   ;;  %s7340_s8 = inlined_call_operand.vmem [shape: f32[4], index: 8, kind: input, shape index: {}]   ;;  %s7341_s9 = inlined_call_operand.vmem [shape: f32[2,4,16,16], index: 9, kind: input, shape index: {}]   ;;  %s7342_s10 = inlined_call_operand.vmem [shape: f32[16,128], index: 10, kind: output, shape index: {}]  }
   0x1   :  { %17 = vsyncpa [#allocation8], 0 }
   0x2   :  { %18 = vsyncpa [#allocation11], 0 }
   0x3   :  { %19 = vsyncpa [#allocation14], 0  ;;  %s37_s15 = sshll.u32 %s7333_s1, 4  ;;  %s38_s15 = int_to_ptr.vmem [resolvable:$true] %s37_s15 }
   0x4   :  { %20 = vsyncpa [#allocation17], 0  ;;  %s57_s18 = sshll.u32 %s7335_s3, 4  ;;  %s4744_s19 = scalar_lea.vmem %s38_s15, 16  ;;  %s58_s18 = int_to_ptr.vmem [resolvable:$true] %s57_s18 }
   0x5   :  { %p4745_p0 = scmp.ne.s32.totalorder %s38_s15, %s4744_s19  ;;  %p4749_p1 = scmp.lt.s32.totalorder %s38_s15, %s38_s15 }
   0x6   :  { %p4750_p2 = scmp.lt.s32.totalorder %s4744_s19, %s4744_s19 }
   0x8   :  { %p4751_p3 = por %p4750_p2, %p4749_p1 }
   0xa   :  { %p4752_p4 = pnand %p4751_p3, %p4745_p0 }
   0xc   :  { %4755 = shalt.err (!%p4752_p4)
}
   0xd   :  { %s4850_s20 = smov [#allocation7]   ;;  %s4756_s21 = scalar_lea.vmem %s58_s18, 16 }
   0xe   :  { %40 = dma.vmem_to_smem %s38_s15, 16, %s4850_s20, [#allocation8]  }
   0xf   :  { %p4757_p5 = scmp.ne.s32.totalorder %s58_s18, %s4756_s21  ;;  %p4761_p6 = scmp.lt.s32.totalorder %s58_s18, %s58_s18 }
  0x10   :  { %p4762_p7 = scmp.lt.s32.totalorder %s4756_s21, %s4756_s21 }
  0x12   :  { %p4763_p8 = por %p4762_p7, %p4761_p6 }
  0x14   :  { %p4764_p9 = pnand %p4763_p8, %p4757_p5 }
  0x16   :  { %4767 = shalt.err (!%p4764_p9)
}
  0x17   :  { %s4851_s1 = smov [#allocation10]   ;;  %s79_s23 = sshll.u32 %s7338_s6, 4  ;;  %s80_s23 = int_to_ptr.vmem [resolvable:$true] %s79_s23 }
  0x18   :  { %60 = dma.vmem_to_smem %s58_s18, 16, %s4851_s1, [#allocation11]  }
  0x19   :  { %s27_s26 = sshll.u32 %s7332_s0, 4  ;;  %s4768_s27 = scalar_lea.vmem %s80_s23, 16  ;;  %s28_s26 = int_to_ptr.vmem [resolvable:$true] %s27_s26 }
  0x1a   :  { %p4769_p10 = scmp.ne.s32.totalorder %s80_s23, %s4768_s27  ;;  %p4773_p11 = scmp.lt.s32.totalorder %s80_s23, %s80_s23 }
  0x1b   :  { %p4774_p12 = scmp.lt.s32.totalorder %s4768_s27, %s4768_s27 }
  0x1d   :  { %p4775_p13 = por %p4774_p12, %p4773_p11 }
  0x1f   :  { %p4776_p0 = pnand %p4775_p13, %p4769_p10 }
  0x21   :  { %4779 = shalt.err (!%p4776_p0)
}
  0x22   :  { %s4852_s28 = smov [#allocation13]   ;;  %s4780_s29 = scalar_lea.vmem %s28_s26, 32 }
  0x23   :  { %82 = dma.vmem_to_smem %s80_s23, 16, %s4852_s28, [#allocation14]  }
  0x24   :  { %p4781_p1 = scmp.ne.s32.totalorder %s28_s26, %s4780_s29  ;;  %p4785_p2 = scmp.lt.s32.totalorder %s28_s26, %s28_s26 }
  0x25   :  { %p4786_p3 = scmp.lt.s32.totalorder %s4780_s29, %s4780_s29 }
  0x27   :  { %p4787_p4 = por %p4786_p3, %p4785_p2 }
  0x29   :  { %p4788_p5 = pnand %p4787_p4, %p4781_p1 }
  0x2b   :  { %4791 = shalt.err (!%p4788_p5)
}
  0x2c   :  { %s4853_s6 = smov [#allocation5]   ;;  %s47_s11 = sshll.u32 %s7334_s2, 4  ;;  %s48_s11 = int_to_ptr.vmem [resolvable:$true] %s47_s11 }
  0x2d   :  { %30 = dma.vmem_to_smem %s28_s26, 32, %s4853_s6, [#allocation6]  }
  0x2e   :  { %s69_s14 = sshll.u32 %s7337_s5, 4  ;;  %s4792_s15 = scalar_lea.vmem %s48_s11, 16  ;;  %s70_s14 = int_to_ptr.vmem [resolvable:$true] %s69_s14 }
  0x2f   :  { %p4793_p6 = scmp.ne.s32.totalorder %s48_s11, %s4792_s15  ;;  %p4797_p7 = scmp.lt.s32.totalorder %s48_s11, %s48_s11 }
  0x30   :  { %p4798_p8 = scmp.lt.s32.totalorder %s4792_s15, %s4792_s15 }
  0x32   :  { %p4799_p9 = por %p4798_p8, %p4797_p7 }
  0x34   :  { %p4800_p10 = pnand %p4799_p9, %p4793_p6 }
  0x36   :  { %4803 = shalt.err (!%p4800_p10)
}
  0x37   :  { %s4854_s16 = smov [#allocation9]   ;;  %s4804_s17 = scalar_lea.vmem %s70_s14, 32 }
  0x38   :  { %50 = dma.vmem_to_smem %s48_s11, 16, %s4854_s16, [#allocation8]  }
  0x39   :  { %p4805_p11 = scmp.ne.s32.totalorder %s70_s14, %s4804_s17  ;;  %p4809_p12 = scmp.lt.s32.totalorder %s70_s14, %s70_s14 }
  0x3a   :  { %p4810_p13 = scmp.lt.s32.totalorder %s4804_s17, %s4804_s17 }
  0x3c   :  { %p4811_p0 = por %p4810_p13, %p4809_p12 }
  0x3e   :  { %p4812_p1 = pnand %p4811_p0, %p4805_p11 }
  0x40   :  { %4815 = shalt.err (!%p4812_p1)
}
  0x41   :  { %s4855_s2 = smov [#allocation12]   ;;  %s89_s19 = sshll.u32 %s7339_s7, 4  ;;  %s90_s19 = int_to_ptr.vmem [resolvable:$true] %s89_s19 }
  0x42   :  { %72 = dma.vmem_to_smem %s70_s14, 32, %s4855_s2, [#allocation11]  }
  0x43   :  { %s99_s1 = sshll.u32 %s7340_s8, 4  ;;  %s4816_s3 = scalar_lea.vmem %s90_s19, 16  ;;  %s100_s1 = int_to_ptr.vmem [resolvable:$true] %s99_s1 }
  0x44   :  { %p4817_p2 = scmp.ne.s32.totalorder %s90_s19, %s4816_s3  ;;  %p4821_p3 = scmp.lt.s32.totalorder %s90_s19, %s90_s19 }
  0x45   :  { %p4822_p4 = scmp.lt.s32.totalorder %s4816_s3, %s4816_s3 }
  0x47   :  { %p4823_p5 = por %p4822_p4, %p4821_p3 }
  0x49   :  { %p4824_p6 = pnand %p4823_p5, %p4817_p2 }
  0x4b   :  { %4827 = shalt.err (!%p4824_p6)
}
  0x4c   :  { %s4856_s22 = smov [#allocation15]   ;;  %s4828_s23 = scalar_lea.vmem %s100_s1, 16 }
  0x4d   :  { %92 = dma.vmem_to_smem %s90_s19, 16, %s4856_s22, [#allocation14]  }
  0x4e   :  { %p4829_p7 = scmp.ne.s32.totalorder %s100_s1, %s4828_s23  ;;  %p4833_p8 = scmp.lt.s32.totalorder %s100_s1, %s100_s1 }
  0x4f   :  { %p4834_p9 = scmp.lt.s32.totalorder %s4828_s23, %s4828_s23 }
  0x51   :  { %p4835_p10 = por %p4834_p9, %p4833_p8 }
  0x53   :  { %p4836_p11 = pnand %p4835_p10, %p4829_p7 }
  0x55   :  { %4839 = shalt.err (!%p4836_p11)
}
  0x56   :  { %s4857_s7 = smov [#allocation16]  }
  0x57   :  { %102 = dma.vmem_to_smem %s100_s1, 16, %s4857_s7, [#allocation17]  }
  0x58   :  { %4840 = dma.done.wait [#allocation6], 32  }
  0x59   :  { %4841 = vsyncadd [#allocation6], 4294967264 }
  0x5a   :  { %4842 = dma.done.wait [#allocation8], 32  }
  0x5b   :  { %4843 = vsyncadd [#allocation8], 4294967264 }
  0x5c   :  { %4844 = dma.done.wait [#allocation11], 48  }
  0x5d   :  { %4845 = vsyncadd [#allocation11], 4294967248 }
  0x5e   :  { %4846 = dma.done.wait [#allocation14], 32  }
  0x5f   :  { %4847 = vsyncadd [#allocation14], 4294967264 }
  0x60   :  { %4848 = dma.done.wait [#allocation17], 16  }
  0x61   :  { %4849 = vsyncadd [#allocation17], 4294967280 }
  0x62   :  { %129 = sfence }
  0x63   :  { %v154_v0 = vld [vmem:[%s7341_s9] sm:$0xff]  ;;  %s4858_s27 = smov 2   ;;  %s4859_s28 = smov 20   ;;  %vm140_vm0 = vcmask 310272   ;;  %vm143_vm1 = vcmask 304128   ;;  %v155_v2 = vld [vmem:[%s7341_s9 + $0x8] sm:$0xff] }
  0x64   :  { %v4260_v1 = vld [vmem:[%s7341_s9 + $0x40] sm:$0xff]  ;;  %158 = vrot.lane.b32.xlu0 %v154_v0, %s4858_s27  ;;  %v4261_v3 = vld [vmem:[%s7341_s9 + $0x48] sm:$0xff]  ;;  %v4860_v4 = vmov 0.0   ;;  %v4254_v5 = vld [vmem:[%s7341_s9 + $0x10] sm:$0xff]  ;;  %vm164_vm2 = vcmask 146448   ;;  %vm220_vm3 = vcmask 294048  }
  0x65   :  { %214 = vrot.lane.b32.xlu1 %v4260_v1, %s4859_s28  ;;  %141 = vst.msk [vmem:[#allocation2] sm:$0xff] %vm140_vm0, %v4860_v4  ;;  %142 = vst.msk [vmem:[#allocation2 + $0x8] sm:$0xff] %vm140_vm0, %v4860_v4  ;;  %v4255_v6 = vld [vmem:[%s7341_s9 + $0x18] sm:$0xff]  ;;  %v4262_v7 = vld [vmem:[%s7341_s9 + $0x50] sm:$0xff]  ;;  %s4274_s0 = sld [smem:[#allocation5 + $0x1]]  ;;  %s4861_s11 = smov 127  }
  0x66   :  { %145 = vst.msk [vmem:[#allocation2 + $0x18] sm:$0xff] %vm140_vm0, %v4860_v4  ;;  %146 = vst.msk [vmem:[#allocation2 + $0x20] sm:$0xff] %vm140_vm0, %v4860_v4  ;;  %v4263_v8 = vld [vmem:[%s7341_s9 + $0x58] sm:$0xff]  ;;  %v4256_v9 = vld [vmem:[%s7341_s9 + $0x20] sm:$0xff]  ;;  %s5041_s30 = sld [smem:[#allocation5 + $0x5]]  ;;  %s4862_s13 = smov 126  }
  0x67   :  { %148 = vst.msk [vmem:[#allocation2 + $0x30] sm:$0xff] %vm140_vm0, %v4860_v4  ;;  %149 = vst.msk [vmem:[#allocation2 + $0x38] sm:$0xff] %vm140_vm0, %v4860_v4  ;;  %v4257_v10 = vld [vmem:[%s7341_s9 + $0x28] sm:$0xff]  ;;  %v4264_v11 = vld [vmem:[%s7341_s9 + $0x60] sm:$0xff]  ;;  %s5053_s12 = sld [smem:[#allocation5 + $0x7]]  ;;  %vm1928_vm11 = vcmask 293888  }
  0x68   :  { %151 = vst.msk [vmem:[#allocation2 + $0x48] sm:$0xff] %vm140_vm0, %v4860_v4  ;;  %152 = vst.msk [vmem:[#allocation2 + $0x50] sm:$0xff] %vm140_vm0, %v4860_v4  ;;  %160 = vrot.lane.b32.xlu0 %v155_v2, %s4858_s27  ;;  %v4265_v12 = vld [vmem:[%s7341_s9 + $0x68] sm:$0xff]  ;;  %v4258_v13 = vld [vmem:[%s7341_s9 + $0x30] sm:$0xff]  ;;  %s5064_s14 = sld [smem:[#allocation5 + $0x8]]  ;;  %vm1997_vm13 = vcmask 303104  }
  0x69   :  { %144 = vst.msk [vmem:[#allocation2 + $0x10] sm:$0x3] %vm143_vm1, %v4860_v4  ;;  %147 = vst.msk [vmem:[#allocation2 + $0x28] sm:$0x3] %vm143_vm1, %v4860_v4  ;;  %216 = vrot.lane.b32.xlu1 %v4261_v3, %s4859_s28  ;;  %v4259_v14 = vld [vmem:[%s7341_s9 + $0x38] sm:$0xff]  ;;  %v4266_v15 = vld [vmem:[%s7341_s9 + $0x70] sm:$0xff] }
  0x6a   :  { %150 = vst.msk [vmem:[#allocation2 + $0x40] sm:$0x3] %vm143_vm1, %v4860_v4  ;;  %153 = vst.msk [vmem:[#allocation2 + $0x58] sm:$0x3] %vm143_vm1, %v4860_v4  ;;  %v4267_v16 = vld [vmem:[%s7341_s9 + $0x78] sm:$0xff]  ;;  %s5068_s15 = sld [smem:[#allocation5 + $0xa]] }
  0x6b   :  { %v297_v21 = vstv %s4274_s0  ;;  %s5079_s16 = sld [smem:[#allocation5 + $0xb]]  ;;  %1998 = vst.msk [vmem:[#allocation3] sm:$0x1] %vm1997_vm13, %v4860_v4  ;;  %1999 = vst.msk [vmem:[#allocation3 + $0x11] sm:$0x1] %vm1997_vm13, %v4860_v4  ;;  %vm1994_vm1 = vcmask 302088  }
  0x6c   :  { %172 = vrot.lane.b32.xlu0 %v4254_v5, %s4858_s27  ;;  %v491_v39 = vstv %s5041_s30  ;;  %s4322_s17 = sld [smem:[#allocation5 + $0xd]]  ;;  %2069 = vst.msk [vmem:[#allocation3 + $0x18] sm:$0x1] %vm1997_vm13, %v4860_v4  ;;  %2070 = vst.msk [vmem:[#allocation3 + $0x29] sm:$0x1] %vm1997_vm13, %v4860_v4 }
  0x6d   :  { %174 = vrot.lane.b32.xlu1 %v4255_v6, %s4858_s27  ;;  %v573_v45 = vstv %s5053_s12  ;;  %s4326_s2 = sld [smem:[#allocation5 + $0xe]]  ;;  %2140 = vst.msk [vmem:[#allocation3 + $0x30] sm:$0x1] %vm1997_vm13, %v4860_v4  ;;  %2141 = vst.msk [vmem:[#allocation3 + $0x41] sm:$0x1] %vm1997_vm13, %v4860_v4 }
  0x6e   :  { %v629_v51 = vstv %s5064_s14  ;;  %s4334_s5 = sld [smem:[#allocation5 + $0x10]]  ;;  %2211 = vst.msk [vmem:[#allocation3 + $0x48] sm:$0x1] %vm1997_vm13, %v4860_v4  ;;  %2212 = vst.msk [vmem:[#allocation3 + $0x59] sm:$0x1] %vm1997_vm13, %v4860_v4  ;;  %vm4242_vm13 = vcmask 1048448  }
  0x6f   :  { %s4338_s18 = sld [smem:[#allocation5 + $0x11]] }
  0x70   :  { %228 = vrot.lane.b32.xlu0 %v4262_v7, %s4859_s28  ;;  %v711_v55 = vstv %s5068_s15  ;;  %s4346_s19 = sld [smem:[#allocation5 + $0x13]] }
  0x71   :  { %230 = vrot.lane.b32.xlu1 %v4263_v8, %s4859_s28  ;;  %v767_v60 = vstv %s5079_s16  ;;  %s4350_s20 = sld [smem:[#allocation5 + $0x14]] }
  0x72   :  { %v849_v1 = vstv %s4322_s17  ;;  %s4358_s21 = sld [smem:[#allocation5 + $0x16]] }
  0x73   :  { %v905_v6 = vstv %s4326_s2  ;;  %s4362_s1 = sld [smem:[#allocation5 + $0x17]] }
  0x74   :  { %186 = vrot.lane.b32.xlu0 %v4256_v9, %s4858_s27  ;;  %s4370_s3 = sld [smem:[#allocation5 + $0x19]] }
  0x75   :  { %188 = vrot.lane.b32.xlu1 %v4257_v10, %s4858_s27  ;;  %v987_v10 = vstv %s4334_s5  ;;  %s4374_s22 = sld [smem:[#allocation5 + $0x1a]] }
  0x76   :  { %s4382_s23 = sld [smem:[#allocation5 + $0x1c]] }
  0x77   :  { %s4386_s7 = sld [smem:[#allocation5 + $0x1d]] }
  0x78   :  { %241 = vrot.lane.b32.xlu0 %v4264_v11, %s4859_s28  ;;  %s4394_s8 = sld [smem:[#allocation5 + $0x1f]] }
  0x79   :  { %243 = vrot.lane.b32.xlu1 %v4265_v12, %s4859_s28  ;;  %s4398_s24 = sld [smem:[#allocation5 + $0x20]] }
  0x7a   :  { %s4406_s25 = sld [smem:[#allocation5 + $0x22]] }
  0x7b   :  { %s4410_s26 = sld [smem:[#allocation5 + $0x23]] }
  0x7c   :  { %200 = vrot.lane.b32.xlu0 %v4258_v13, %s4858_s27  ;;  %s4275_s29 = sld [smem:[#allocation5 + $0x25]] }
  0x7d   :  { %202 = vrot.lane.b32.xlu1 %v4259_v14, %s4858_s27  ;;  %s5029_s27 = sld [smem:[#allocation5 + $0x2]]  ;;  %v1043_v14 = vstv %s4338_s18 }
  0x7e   :  { %s4279_s6 = sld [smem:[#allocation5 + $0x26]] }
  0x7f   :  { %s4287_s0 = sld [smem:[#allocation5 + $0x28]] }
  0x80   :  { %254 = vrot.lane.b32.xlu0 %v4266_v15, %s4859_s28  ;;  %s272_s30 = sld [smem:[#allocation5]] }
  0x81   :  { %256 = vrot.lane.b32.xlu1 %v4267_v16, %s4859_s28  ;;  %s5033_s28 = sld [smem:[#allocation5 + $0x4]]  ;;  %v1125_v16 = vstv %s4346_s19 }
  0x82   :  { %s5216_s12 = sld [smem:[#allocation5 + $0x2c]] }
  0x83   :  { %v353_v26 = vstv %s5029_s27  ;;  %s4291_s27 = sld [smem:[#allocation5 + $0x29]] }
  0x84   :  { %s5220_s14 = sld [smem:[#allocation7]] }
  0x85   :  { %s5224_s15 = sld [smem:[#allocation5 + $0x2e]] }
  0x86   :  { %s5228_s16 = sld [smem:[#allocation5 + $0x3]] }
  0x87   :  { %v435_v33 = vstv %s5033_s28  ;;  %s4299_s28 = sld [smem:[#allocation5 + $0x2b]] }
  0x88   :  { %s5234_s17 = sld [smem:[#allocation5 + $0x2f]] }
  0x89   :  { %s5243_s2 = sld [smem:[#allocation5 + $0x31]] }
  0x8a   :  { %s5248_s5 = sld [smem:[#allocation5 + $0x6]] }
  0x8b   :  { %s5254_s18 = sld [smem:[#allocation5 + $0x32]] }
  0x8c   :  { %s5262_s19 = sld [smem:[#allocation5 + $0x34]] }
  0xd6   :  { %v159_v17 = vpop.permute.xlu0 %158 }
  0xd7   :  { %v215_v18 = vpop.permute.xlu1 %214  ;;  %165 = vst.msk [vmem:[#allocation2 + $0x1] sm:$0xff] %vm164_vm2, %v159_v17 }
  0xd8   :  { %221 = vst.msk [vmem:[#allocation2 + $0x1] sm:$0xff] %vm220_vm3, %v215_v18 }
  0xda   :  { %v161_v19 = vpop.permute.xlu0 %160 }
  0xdb   :  { %v217_v20 = vpop.permute.xlu1 %216  ;;  %166 = vst.msk [vmem:[#allocation2 + $0x9] sm:$0xff] %vm164_vm2, %v161_v19 }
  0xdc   :  { %222 = vst.msk [vmem:[#allocation2 + $0x9] sm:$0xff] %vm220_vm3, %v217_v20 }
  0xde   :  { %v173_v22 = vpop.permute.xlu0 %172 }
  0xdf   :  { %v175_v23 = vpop.permute.xlu1 %174  ;;  %v5035_v24 = vld [vmem:[#allocation2] sm:$0xff]  ;;  %179 = vst.msk [vmem:[#allocation2 + $0x19] sm:$0xff] %vm164_vm2, %v173_v22 }
  0xe0   :  { %180 = vst.msk [vmem:[#allocation2 + $0x21] sm:$0xff] %vm164_vm2, %v175_v23  ;;  %v298_v25 = vmul.f32 %v297_v21, %v5035_v24  ;;  %v354_v31 = vmul.f32 %v353_v26, %v5035_v24  ;;  %v5050_v32 = vld [vmem:[#allocation2 + $0x1] sm:$0xff] }
  0xe1   :  { %v436_v37 = vmul.f32 %v435_v33, %v5050_v32  ;;  %v492_v43 = vmul.f32 %v491_v39, %v5050_v32 }
  0xe2   :  { %302 = vrot.lane.b32.xlu0 %v298_v25, %s4861_s11  ;;  %v229_v27 = vpop.permute.xlu0 %228 }
  0xe3   :  { %v231_v28 = vpop.permute.xlu1 %230  ;;  %v5044_v29 = vld [vmem:[#allocation2 + $0x8] sm:$0xff]  ;;  %234 = vst.msk [vmem:[#allocation2 + $0x19] sm:$0xff] %vm220_vm3, %v229_v27  ;;  %v1263_v27 = vstv %s4358_s21  ;;  %s5273_s21 = sld [smem:[#allocation5 + $0x35]] }
  0xe4   :  { %235 = vst.msk [vmem:[#allocation2 + $0x21] sm:$0xff] %vm220_vm3, %v231_v28  ;;  %v299_v30 = vmul.f32 %v297_v21, %v5044_v29  ;;  %v355_v36 = vmul.f32 %v353_v26, %v5044_v29  ;;  %v5061_v38 = vld [vmem:[#allocation2 + $0x9] sm:$0xff]  ;;  %v1181_v21 = vstv %s4350_s20  ;;  %s5267_s20 = sld [smem:[#allocation5 + $0x9]] }
  0xe5   :  { %v437_v42 = vmul.f32 %v435_v33, %v5061_v38  ;;  %v5074_v44 = vld [vmem:[#allocation2 + $0x2] sm:$0xff]  ;;  %v493_v48 = vmul.f32 %v491_v39, %v5061_v38  ;;  %v5085_v50 = vld [vmem:[#allocation2 + $0xa] sm:$0xff]  ;;  %v1319_v33 = vstv %s4362_s1  ;;  %s5281_s1 = sld [smem:[#allocation5 + $0x37]] }
  0xe6   :  { %304 = vrot.lane.b32.xlu1 %v299_v30, %s4861_s11  ;;  %358 = vrot.lane.b32.xlu0 %v354_v31, %s4862_s13  ;;  %v187_v34 = vpop.permute.xlu0 %186  ;;  %v574_v49 = vmul.f32 %v573_v45, %v5074_v44  ;;  %v575_v56 = vmul.f32 %v573_v45, %v5085_v50  ;;  %v630_v57 = vmul.f32 %v629_v51, %v5074_v44  ;;  %v1539_v45 = vstv %s4382_s23  ;;  %s5300_s23 = sld [smem:[#allocation5 + $0x3a]] }
  0xe7   :  { %v189_v35 = vpop.permute.xlu1 %188  ;;  %193 = vst.msk [vmem:[#allocation2 + $0x31] sm:$0xff] %vm164_vm2, %v187_v34  ;;  %v631_v61 = vmul.f32 %v629_v51, %v5085_v50  ;;  %v1595_v51 = vstv %s4386_s7  ;;  %s5305_s7 = sld [smem:[#allocation5 + $0xf]] }
  0xe8   :  { %194 = vst.msk [vmem:[#allocation2 + $0x39] sm:$0xff] %vm164_vm2, %v189_v35 }
  0xea   :  { %360 = vrot.lane.b32.xlu1 %v355_v36, %s4862_s13  ;;  %440 = vrot.lane.b32.xlu0 %v436_v37, %s4861_s11  ;;  %v242_v40 = vpop.permute.xlu0 %241  ;;  %v5090_v54 = vld [vmem:[#allocation2 + $0x18] sm:$0xff]  ;;  %v1401_v37 = vstv %s4370_s3  ;;  %s5286_s3 = sld [smem:[#allocation5 + $0xc]] }
  0xeb   :  { %v244_v41 = vpop.permute.xlu1 %243  ;;  %247 = vst.msk [vmem:[#allocation2 + $0x31] sm:$0xff] %vm220_vm3, %v242_v40  ;;  %v712_v58 = vmul.f32 %v711_v55, %v5090_v54  ;;  %v5100_v59 = vld [vmem:[#allocation2 + $0x20] sm:$0xff]  ;;  %v768_v63 = vmul.f32 %v767_v60, %v5090_v54 }
  0xec   :  { %248 = vst.msk [vmem:[#allocation2 + $0x39] sm:$0xff] %vm220_vm3, %v244_v41  ;;  %v713_v62 = vmul.f32 %v711_v55, %v5100_v59  ;;  %v5108_v0 = vld [vmem:[#allocation2 + $0x19] sm:$0xff]  ;;  %v769_v2 = vmul.f32 %v767_v60, %v5100_v59  ;;  %v5114_v5 = vld [vmem:[#allocation2 + $0x21] sm:$0xff] }
  0xed   :  { %v850_v3 = vmul.f32 %v849_v1, %v5108_v0  ;;  %v851_v7 = vmul.f32 %v849_v1, %v5114_v5  ;;  %v906_v8 = vmul.f32 %v905_v6, %v5108_v0  ;;  %v5120_v9 = vld [vmem:[#allocation2 + $0x1a] sm:$0xff]  ;;  %v907_v11 = vmul.f32 %v905_v6, %v5114_v5  ;;  %v5126_v13 = vld [vmem:[#allocation2 + $0x22] sm:$0xff] }
  0xee   :  { %442 = vrot.lane.b32.xlu1 %v437_v42, %s4861_s11  ;;  %496 = vrot.lane.b32.xlu0 %v492_v43, %s4862_s13  ;;  %v201_v46 = vpop.permute.xlu0 %200  ;;  %v988_v12 = vmul.f32 %v987_v10, %v5120_v9  ;;  %v989_v17 = vmul.f32 %v987_v10, %v5126_v13  ;;  %v1044_v18 = vmul.f32 %v1043_v14, %v5120_v9  ;;  %v1457_v42 = vstv %s4374_s22  ;;  %s5292_s22 = sld [smem:[#allocation5 + $0x38]] }
  0xef   :  { %v203_v47 = vpop.permute.xlu1 %202  ;;  %207 = vst.msk [vmem:[#allocation2 + $0x49] sm:$0xff] %vm164_vm2, %v201_v46  ;;  %v1045_v22 = vmul.f32 %v1043_v14, %v5126_v13  ;;  %v1871_v10 = vstv %s4410_s26  ;;  %v311_v14 = vstv %s4275_s29  ;;  %s5330_s26 = sld [smem:[#allocation5 + $0x3e]] }
  0xf0   :  { %208 = vst.msk [vmem:[#allocation2 + $0x51] sm:$0xff] %vm164_vm2, %v203_v47  ;;  %s5338_s29 = sld [smem:[#allocation5 + $0x40]] }
  0xf2   :  { %498 = vrot.lane.b32.xlu1 %v493_v48, %s4862_s13  ;;  %578 = vrot.lane.b32.xlu0 %v574_v49, %s4861_s11  ;;  %v255_v52 = vpop.permute.xlu0 %254  ;;  %v5130_v15 = vld [vmem:[#allocation2 + $0x30] sm:$0xff] }
  0xf3   :  { %v257_v53 = vpop.permute.xlu1 %256  ;;  %260 = vst.msk [vmem:[#allocation2 + $0x49] sm:$0xff] %vm220_vm3, %v255_v52  ;;  %v1126_v19 = vmul.f32 %v1125_v16, %v5130_v15  ;;  %v5137_v20 = vld [vmem:[#allocation2 + $0x38] sm:$0xff]  ;;  %v1182_v25 = vmul.f32 %v1181_v21, %v5130_v15 }
  0xf4   :  { %261 = vst.msk [vmem:[#allocation2 + $0x51] sm:$0xff] %vm220_vm3, %v257_v53  ;;  %v1127_v23 = vmul.f32 %v1125_v16, %v5137_v20  ;;  %v5144_v26 = vld [vmem:[#allocation2 + $0x31] sm:$0xff]  ;;  %v1183_v28 = vmul.f32 %v1181_v21, %v5137_v20  ;;  %v5150_v31 = vld [vmem:[#allocation2 + $0x39] sm:$0xff] }
  0xf5   :  { %v1264_v30 = vmul.f32 %v1263_v27, %v5144_v26  ;;  %v1265_v34 = vmul.f32 %v1263_v27, %v5150_v31  ;;  %v1320_v35 = vmul.f32 %v1319_v33, %v5144_v26  ;;  %v5156_v36 = vld [vmem:[#allocation2 + $0x32] sm:$0xff]  ;;  %v1321_v39 = vmul.f32 %v1319_v33, %v5150_v31  ;;  %v5162_v41 = vld [vmem:[#allocation2 + $0x3a] sm:$0xff] }
  0xf6   :  { %580 = vrot.lane.b32.xlu1 %v575_v56, %s4861_s11  ;;  %634 = vrot.lane.b32.xlu0 %v630_v57, %s4862_s13  ;;  %v1402_v40 = vmul.f32 %v1401_v37, %v5156_v36  ;;  %v1403_v46 = vmul.f32 %v1401_v37, %v5162_v41  ;;  %v1458_v47 = vmul.f32 %v1457_v42, %v5156_v36  ;;  %v1677_v57 = vstv %s4394_s8  ;;  %s5311_s8 = sld [smem:[#allocation5 + $0x3b]] }
  0xf7   :  { %v1459_v52 = vmul.f32 %v1457_v42, %v5162_v41  ;;  %v505_v27 = vstv %s4291_s27  ;;  %v587_v33 = vstv %s4299_s28  ;;  %v263_v42 = vstv %s5220_s14  ;;  %s5357_s27 = sld [smem:[#allocation5 + $0x44]] }
  0xf8   :  { %v588_v37 = vmul.f32 %v587_v33, %v5074_v44  ;;  %s5362_s28 = sld [smem:[#allocation5 + $0x18]] }
  0xf9   :  { %s5381_s14 = sld [smem:[#allocation5 + $0x1b]] }
  0xfa   :  { %636 = vrot.lane.b32.xlu1 %v631_v61, %s4862_s13  ;;  %716 = vrot.lane.b32.xlu0 %v712_v58, %s4861_s11  ;;  %v5166_v43 = vld [vmem:[#allocation2 + $0x48] sm:$0xff] }
  0xfb   :  { %v1540_v48 = vmul.f32 %v1539_v45, %v5166_v43  ;;  %v5173_v49 = vld [vmem:[#allocation2 + $0x50] sm:$0xff]  ;;  %v1596_v55 = vmul.f32 %v1595_v51, %v5166_v43 }
  0xfc   :  { %v1541_v53 = vmul.f32 %v1539_v45, %v5173_v49  ;;  %v5180_v56 = vld [vmem:[#allocation2 + $0x49] sm:$0xff]  ;;  %v1597_v58 = vmul.f32 %v1595_v51, %v5173_v49  ;;  %v5186_v61 = vld [vmem:[#allocation2 + $0x51] sm:$0xff] }
  0xfd   :  { %v1678_v60 = vmul.f32 %v1677_v57, %v5180_v56 }
  0xfe   :  { %718 = vrot.lane.b32.xlu1 %v713_v62, %s4861_s11  ;;  %772 = vrot.lane.b32.xlu0 %v768_v63, %s4862_s13  ;;  %v1733_v62 = vstv %s4398_s24  ;;  %v1679_v63 = vmul.f32 %v1677_v57, %v5186_v61  ;;  %s5319_s24 = sld [smem:[#allocation5 + $0x3d]] }
  0xff   :  { %v1734_v1 = vmul.f32 %v1733_v62, %v5180_v56  ;;  %v1735_v6 = vmul.f32 %v1733_v62, %v5186_v61 }
 0x102   :  { %774 = vrot.lane.b32.xlu1 %v769_v2, %s4862_s13  ;;  %854 = vrot.lane.b32.xlu0 %v850_v3, %s4861_s11  ;;  %v5192_v2 = vld [vmem:[#allocation2 + $0x4a] sm:$0xff]  ;;  %v1815_v3 = vstv %s4406_s25  ;;  %s5324_s25 = sld [smem:[#allocation5 + $0x12]] }
 0x106   :  { %856 = vrot.lane.b32.xlu1 %v851_v7, %s4861_s11  ;;  %910 = vrot.lane.b32.xlu0 %v906_v8, %s4862_s13  ;;  %v1816_v7 = vmul.f32 %v1815_v3, %v5192_v2  ;;  %v5198_v8 = vld [vmem:[#allocation2 + $0x52] sm:$0xff] }
 0x107   :  { %v1873_v16 = vmul.f32 %v1871_v10, %v5198_v8 }
 0x10a   :  { %912 = vrot.lane.b32.xlu1 %v907_v11, %s4862_s13  ;;  %992 = vrot.lane.b32.xlu0 %v988_v12, %s4861_s11  ;;  %v1817_v11 = vmul.f32 %v1815_v3, %v5198_v8  ;;  %v1872_v12 = vmul.f32 %v1871_v10, %v5192_v2 }
 0x10e   :  { %994 = vrot.lane.b32.xlu1 %v989_v17, %s4861_s11  ;;  %1048 = vrot.lane.b32.xlu0 %v1044_v18, %s4862_s13  ;;  %v312_v17 = vmul.f32 %v311_v14, %v5035_v24  ;;  %v367_v18 = vstv %s4279_s6  ;;  %s5343_s6 = sld [smem:[#allocation5 + $0x15]] }
 0x10f   :  { %v368_v21 = vmul.f32 %v367_v18, %v5035_v24 }
 0x112   :  { %1050 = vrot.lane.b32.xlu1 %v1045_v22, %s4862_s13  ;;  %1130 = vrot.lane.b32.xlu0 %v1126_v19, %s4861_s11  ;;  %v313_v19 = vmul.f32 %v311_v14, %v5044_v29  ;;  %v449_v22 = vstv %s4287_s0  ;;  %s5349_s0 = sld [smem:[#allocation5 + $0x41]] }
 0x116   :  { %1132 = vrot.lane.b32.xlu1 %v1127_v23, %s4861_s11  ;;  %1186 = vrot.lane.b32.xlu0 %v1182_v25, %s4862_s13  ;;  %v369_v23 = vmul.f32 %v367_v18, %v5044_v29  ;;  %v450_v25 = vmul.f32 %v449_v22, %v5050_v32 }
 0x11a   :  { %1188 = vrot.lane.b32.xlu1 %v1183_v28, %s4862_s13  ;;  %1268 = vrot.lane.b32.xlu0 %v1264_v30, %s4861_s11  ;;  %v451_v28 = vmul.f32 %v449_v22, %v5061_v38  ;;  %v506_v30 = vmul.f32 %v505_v27, %v5050_v32 }
 0x11e   :  { %1270 = vrot.lane.b32.xlu1 %v1265_v34, %s4861_s11  ;;  %1324 = vrot.lane.b32.xlu0 %v1320_v35, %s4862_s13  ;;  %v273_v34 = vstv %s272_s30  ;;  %v507_v35 = vmul.f32 %v505_v27, %v5061_v38  ;;  %s5366_s30 = sld [smem:[#allocation5 + $0x43]] }
 0x11f   :  { %v275_v51 = vmul.f32 %v273_v34, %v5044_v29 }
 0x122   :  { %1326 = vrot.lane.b32.xlu1 %v1321_v39, %s4862_s13  ;;  %1406 = vrot.lane.b32.xlu0 %v1402_v40, %s4861_s11  ;;  %v274_v39 = vmul.f32 %v273_v34, %v5035_v24  ;;  %v643_v40 = vstv %s5216_s12  ;;  %s5370_s12 = sld [smem:[#allocation5 + $0x46]] }
 0x126   :  { %1408 = vrot.lane.b32.xlu1 %v1403_v46, %s4861_s11  ;;  %1462 = vrot.lane.b32.xlu0 %v1458_v47, %s4862_s13  ;;  %v589_v46 = vmul.f32 %v587_v33, %v5085_v50  ;;  %v644_v47 = vmul.f32 %v643_v40, %v5074_v44 }
 0x12a   :  { %1464 = vrot.lane.b32.xlu1 %v1459_v52, %s4862_s13  ;;  %1544 = vrot.lane.b32.xlu0 %v1540_v48, %s4861_s11  ;;  %v276_v48 = vadd.f32 %v274_v39, %v263_v42  ;;  %v725_v52 = vstv %s5224_s15  ;;  %s5388_s15 = sld [smem:[#allocation5 + $0x47]] }
 0x12b   :  { %v726_v62 = vmul.f32 %v725_v52, %v5090_v54  ;;  %v727_v14 = vmul.f32 %v725_v52, %v5100_v59  ;;  %v687_v52 = vstv %s5267_s20  ;;  %s5433_s20 = sld [smem:[#allocation5 + $0x4f]] }
 0x12e   :  { %1546 = vrot.lane.b32.xlu1 %v1541_v53, %s4861_s11  ;;  %1600 = vrot.lane.b32.xlu0 %v1596_v55, %s4862_s13  ;;  %v411_v53 = vstv %s5228_s16  ;;  %s5395_s16 = sld [smem:[#allocation5 + $0x49]] }
 0x12f   :  { %v412_v3 = vmul.f32 %v411_v53, %v5050_v32  ;;  %v413_v18 = vmul.f32 %v411_v53, %v5061_v38 }
 0x132   :  { %1602 = vrot.lane.b32.xlu1 %v1597_v58, %s4862_s13  ;;  %1682 = vrot.lane.b32.xlu0 %v1678_v60, %s4861_s11  ;;  %v645_v60 = vmul.f32 %v643_v40, %v5085_v50 }
 0x136   :  { %1684 = vrot.lane.b32.xlu1 %v1679_v63, %s4861_s11  ;;  %1738 = vrot.lane.b32.xlu0 %v1734_v1, %s4862_s13  ;;  %v277_v63 = vadd.f32 %v275_v51, %v263_v42  ;;  %v1001_v51 = vstv %s5262_s19  ;;  %s5425_s19 = sld [smem:[#allocation5 + $0x4d]] }
 0x13a   :  { %1740 = vrot.lane.b32.xlu1 %v1735_v6, %s4862_s13  ;;  %1820 = vrot.lane.b32.xlu0 %v1816_v7, %s4861_s11  ;;  %v781_v6 = vstv %s5234_s17  ;;  %s5400_s17 = sld [smem:[#allocation5 + $0x1e]] }
 0x13e   :  { %1822 = vrot.lane.b32.xlu1 %v1817_v11, %s4861_s11  ;;  %1876 = vrot.lane.b32.xlu0 %v1872_v12, %s4862_s13 }
 0x142   :  { %1878 = vrot.lane.b32.xlu1 %v1873_v16, %s4862_s13  ;;  %316 = vrot.lane.b32.xlu0 %v312_v17, %s4861_s11  ;;  %v782_v16 = vmul.f32 %v781_v6, %v5090_v54 }
 0x146   :  { %318 = vrot.lane.b32.xlu1 %v313_v19, %s4861_s11  ;;  %372 = vrot.lane.b32.xlu0 %v368_v21, %s4862_s13  ;;  %v863_v19 = vstv %s5243_s2  ;;  %v549_v21 = vstv %s5248_s5  ;;  %s5406_s2 = sld [smem:[#allocation5 + $0x4a]] }
 0x147   :  { %v550_v34 = vmul.f32 %v549_v21, %v5074_v44  ;;  %s5414_s5 = sld [smem:[#allocation5 + $0x4c]] }
 0x14a   :  { %374 = vrot.lane.b32.xlu1 %v369_v23, %s4862_s13  ;;  %454 = vrot.lane.b32.xlu0 %v450_v25, %s4861_s11 }
 0x14e   :  { %456 = vrot.lane.b32.xlu1 %v451_v28, %s4861_s11  ;;  %510 = vrot.lane.b32.xlu0 %v506_v30, %s4862_s13  ;;  %v783_v28 = vmul.f32 %v781_v6, %v5100_v59  ;;  %v864_v30 = vmul.f32 %v863_v19, %v5108_v0 }
 0x152   :  { %512 = vrot.lane.b32.xlu1 %v507_v35, %s4862_s13  ;;  %592 = vrot.lane.b32.xlu0 %v588_v37, %s4861_s11  ;;  %v919_v35 = vstv %s5254_s18  ;;  %s5419_s18 = sld [smem:[#allocation5 + $0x21]] }
 0x154   :  { %v303_v45 = vpop.permute.xlu0 %302 }
 0x155   :  { %v308_v55 = vadd.f32 %v303_v45, %v276_v48  ;;  %v865_v45 = vmul.f32 %v863_v19, %v5114_v5  ;;  %v551_v48 = vmul.f32 %v549_v21, %v5085_v50  ;;  %v825_v19 = vstv %s5286_s3  ;;  %s5448_s3 = sld [smem:[#allocation7 + $0x1]] }
 0x156   :  { %594 = vrot.lane.b32.xlu1 %v589_v46, %s4861_s11  ;;  %648 = vrot.lane.b32.xlu0 %v644_v47, %s4862_s13  ;;  %v920_v46 = vmul.f32 %v919_v35, %v5108_v0 }
 0x158   :  { %v305_v57 = vpop.permute.xlu1 %304  ;;  %v359_v58 = vpop.permute.xlu0 %358 }
 0x159   :  { %v364_v1 = vadd.f32 %v359_v58, %v308_v55  ;;  %v309_v7 = vadd.f32 %v305_v57, %v277_v63 }
 0x15a   :  { %650 = vrot.lane.b32.xlu1 %v645_v60, %s4862_s13  ;;  %730 = vrot.lane.b32.xlu0 %v726_v62, %s4861_s11  ;;  %v921_v60 = vmul.f32 %v919_v35, %v5114_v5  ;;  %v1002_v62 = vmul.f32 %v1001_v51, %v5120_v9 }
 0x15b   :  { %v414_v10 = vadd.f32 %v412_v3, %v364_v1  ;;  %v688_v1 = vmul.f32 %v687_v52, %v5090_v54  ;;  %v1057_v3 = vstv %s5273_s21  ;;  %s5438_s21 = sld [smem:[#allocation5 + $0x24]] }
 0x15c   :  { %v361_v11 = vpop.permute.xlu1 %360  ;;  %v441_v12 = vpop.permute.xlu0 %440 }
 0x15d   :  { %v365_v17 = vadd.f32 %v361_v11, %v309_v7  ;;  %v446_v22 = vadd.f32 %v441_v12, %v414_v10  ;;  %v1003_v12 = vmul.f32 %v1001_v51, %v5126_v13  ;;  %v963_v51 = vstv %s5305_s7  ;;  %s5477_s7 = sld [smem:[#allocation5 + $0x53]] }
 0x15e   :  { %732 = vrot.lane.b32.xlu1 %v727_v14, %s4861_s11  ;;  %786 = vrot.lane.b32.xlu0 %v782_v16, %s4862_s13  ;;  %v1058_v14 = vmul.f32 %v1057_v3, %v5120_v9 }
 0x15f   :  { %v415_v23 = vadd.f32 %v413_v18, %v365_v17  ;;  %v689_v17 = vmul.f32 %v687_v52, %v5100_v59  ;;  %v1139_v18 = vstv %s5281_s1  ;;  %s5444_s1 = sld [smem:[#allocation5 + $0x50]] }
 0x160   :  { %v443_v25 = vpop.permute.xlu1 %442  ;;  %v497_v27 = vpop.permute.xlu0 %496 }
 0x161   :  { %v502_v33 = vadd.f32 %v497_v27, %v446_v22  ;;  %v447_v37 = vadd.f32 %v443_v25, %v415_v23  ;;  %v1059_v27 = vmul.f32 %v1057_v3, %v5126_v13 }
 0x162   :  { %788 = vrot.lane.b32.xlu1 %v783_v28, %s4862_s13  ;;  %868 = vrot.lane.b32.xlu0 %v864_v30, %s4861_s11  ;;  %v1140_v28 = vmul.f32 %v1139_v18, %v5130_v15 }
 0x163   :  { %v552_v39 = vadd.f32 %v550_v34, %v502_v33  ;;  %v826_v33 = vmul.f32 %v825_v19, %v5108_v0  ;;  %v1195_v34 = vstv %s5292_s22  ;;  %s5458_s22 = sld [smem:[#allocation5 + $0x52]] }
 0x164   :  { %v499_v40 = vpop.permute.xlu1 %498  ;;  %v579_v42 = vpop.permute.xlu0 %578 }
 0x165   :  { %v503_v47 = vadd.f32 %v499_v40, %v447_v37  ;;  %v584_v53 = vadd.f32 %v579_v42, %v552_v39  ;;  %v1141_v42 = vmul.f32 %v1139_v18, %v5137_v20 }
 0x166   :  { %870 = vrot.lane.b32.xlu1 %v865_v45, %s4861_s11  ;;  %924 = vrot.lane.b32.xlu0 %v920_v46, %s4862_s13  ;;  %v1196_v45 = vmul.f32 %v1195_v34, %v5130_v15 }
 0x167   :  { %v553_v55 = vadd.f32 %v551_v48, %v503_v47  ;;  %v827_v47 = vmul.f32 %v825_v19, %v5114_v5  ;;  %v1277_v48 = vstv %s5300_s23  ;;  %s5463_s23 = sld [smem:[#allocation5 + $0x27]] }
 0x168   :  { %v581_v57 = vpop.permute.xlu1 %580  ;;  %v635_v58 = vpop.permute.xlu0 %634 }
 0x169   :  { %v640_v63 = vadd.f32 %v635_v58, %v584_v53  ;;  %v585_v6 = vadd.f32 %v581_v57, %v553_v55  ;;  %v1197_v58 = vmul.f32 %v1195_v34, %v5137_v20 }
 0x16a   :  { %926 = vrot.lane.b32.xlu1 %v921_v60, %s4862_s13  ;;  %1006 = vrot.lane.b32.xlu0 %v1002_v62, %s4861_s11  ;;  %v1278_v60 = vmul.f32 %v1277_v48, %v5144_v26 }
 0x16b   :  { %v690_v7 = vadd.f32 %v688_v1, %v640_v63  ;;  %v964_v63 = vmul.f32 %v963_v51, %v5120_v9  ;;  %v1333_v1 = vstv %s5311_s8  ;;  %v965_v9 = vmul.f32 %v963_v51, %v5126_v13  ;;  %s5490_s8 = sld [smem:[#allocation5 + $0x55]] }
 0x16c   :  { %v637_v10 = vpop.permute.xlu1 %636  ;;  %v717_v11 = vpop.permute.xlu0 %716 }
 0x16d   :  { %v641_v16 = vadd.f32 %v637_v10, %v585_v6  ;;  %v722_v21 = vadd.f32 %v717_v11, %v690_v7  ;;  %v1279_v11 = vmul.f32 %v1277_v48, %v5150_v31 }
 0x16e   :  { %1008 = vrot.lane.b32.xlu1 %v1003_v12, %s4861_s11  ;;  %1062 = vrot.lane.b32.xlu0 %v1058_v14, %s4862_s13  ;;  %v1334_v12 = vmul.f32 %v1333_v1, %v5144_v26 }
 0x16f   :  { %v691_v22 = vadd.f32 %v689_v17, %v641_v16  ;;  %v1415_v16 = vstv %s5319_s24  ;;  %v1101_v17 = vstv %s5324_s25  ;;  %s5495_s24 = sld [smem:[#allocation5 + $0x2a]] }
 0x170   :  { %v719_v23 = vpop.permute.xlu1 %718  ;;  %v773_v25 = vpop.permute.xlu0 %772  ;;  %s5503_s25 = sld [smem:[#allocation5 + $0x56]] }
 0x171   :  { %v778_v30 = vadd.f32 %v773_v25, %v722_v21  ;;  %v723_v35 = vadd.f32 %v719_v23, %v691_v22  ;;  %v1335_v23 = vmul.f32 %v1333_v1, %v5150_v31  ;;  %v1416_v25 = vmul.f32 %v1415_v16, %v5156_v36 }
 0x172   :  { %1064 = vrot.lane.b32.xlu1 %v1059_v27, %s4862_s13  ;;  %1144 = vrot.lane.b32.xlu0 %v1140_v28, %s4861_s11  ;;  %v1102_v27 = vmul.f32 %v1101_v17, %v5130_v15  ;;  %v1471_v28 = vstv %s5330_s26  ;;  %v1553_v15 = vstv %s5338_s29  ;;  %s5513_s26 = sld [smem:[#allocation5 + $0x58]] }
 0x173   :  { %v828_v37 = vadd.f32 %v826_v33, %v778_v30  ;;  %v1555_v1 = vmul.f32 %v1553_v15, %v5173_v49  ;;  %s5518_s29 = sld [smem:[#allocation5 + $0x2d]] }
 0x174   :  { %v775_v39 = vpop.permute.xlu1 %774  ;;  %v855_v40 = vpop.permute.xlu0 %854 }
 0x175   :  { %v779_v46 = vadd.f32 %v775_v39, %v723_v35  ;;  %v860_v52 = vadd.f32 %v855_v40, %v828_v37  ;;  %v1417_v37 = vmul.f32 %v1415_v16, %v5162_v41  ;;  %v1472_v39 = vmul.f32 %v1471_v28, %v5156_v36 }
 0x176   :  { %1146 = vrot.lane.b32.xlu1 %v1141_v42, %s4861_s11  ;;  %1200 = vrot.lane.b32.xlu0 %v1196_v45, %s4862_s13  ;;  %v1103_v42 = vmul.f32 %v1101_v17, %v5137_v20  ;;  %v1239_v45 = vstv %s5343_s6  ;;  %s5536_s6 = sld [smem:[#allocation5 + $0x59]] }
 0x177   :  { %v829_v53 = vadd.f32 %v827_v47, %v779_v46 }
 0x178   :  { %v857_v55 = vpop.permute.xlu1 %856  ;;  %v911_v57 = vpop.permute.xlu0 %910 }
 0x179   :  { %v916_v62 = vadd.f32 %v911_v57, %v860_v52  ;;  %v861_v3 = vadd.f32 %v857_v55, %v829_v53  ;;  %v1473_v52 = vmul.f32 %v1471_v28, %v5162_v41  ;;  %v1554_v53 = vmul.f32 %v1553_v15, %v5166_v43 }
 0x17a   :  { %1202 = vrot.lane.b32.xlu1 %v1197_v58, %s4862_s13  ;;  %1282 = vrot.lane.b32.xlu0 %v1278_v60, %s4861_s11  ;;  %v1240_v55 = vmul.f32 %v1239_v45, %v5144_v26  ;;  %v1609_v57 = vstv %s5349_s0  ;;  %v1241_v26 = vmul.f32 %v1239_v45, %v5150_v31  ;;  %v1691_v31 = vstv %s5366_s30  ;;  %s5541_s0 = sld [smem:[#allocation5 + $0x30]] }
 0x17b   :  { %v966_v6 = vadd.f32 %v964_v63, %v916_v62  ;;  %v1611_v16 = vmul.f32 %v1609_v57, %v5173_v49  ;;  %v1885_v45 = vstv %s5388_s15  ;;  %s5582_s30 = sld [smem:[#allocation5 + $0x39]] }
 0x17c   :  { %v913_v7 = vpop.permute.xlu1 %912  ;;  %v993_v10 = vpop.permute.xlu0 %992  ;;  %s5631_s15 = sld [smem:[#allocation5 + $0x5b]] }
 0x17d   :  { %v917_v14 = vadd.f32 %v913_v7, %v861_v3  ;;  %v998_v18 = vadd.f32 %v993_v10, %v966_v6  ;;  %v1610_v3 = vmul.f32 %v1609_v57, %v5166_v43  ;;  %v1747_v7 = vstv %s5357_s27  ;;  %s5563_s27 = sld [smem:[#allocation5 + $0x33]] }
 0x17e   :  { %1284 = vrot.lane.b32.xlu1 %v1279_v11, %s4861_s11  ;;  %1338 = vrot.lane.b32.xlu0 %v1334_v12, %s4862_s13  ;;  %v1377_v10 = vstv %s5362_s28  ;;  %v1748_v17 = vmul.f32 %v1747_v7, %v5180_v56  ;;  %v1653_v57 = vstv %s5400_s17  ;;  %s5572_s28 = sld [smem:[#allocation5 + $0x36]] }
 0x17f   :  { %v967_v19 = vadd.f32 %v965_v9, %v917_v14  ;;  %s5639_s17 = sld [smem:[#allocation5 + $0x5c]] }
 0x180   :  { %v995_v21 = vpop.permute.xlu1 %994  ;;  %v1049_v22 = vpop.permute.xlu0 %1048 }
 0x181   :  { %v1054_v13 = vadd.f32 %v1049_v22, %v998_v18  ;;  %v999_v30 = vadd.f32 %v995_v21, %v967_v19  ;;  %v1378_v19 = vmul.f32 %v1377_v10, %v5156_v36  ;;  %v1829_v21 = vstv %s5370_s12  ;;  %s5608_s12 = sld [smem:[#allocation5 + $0x3c]] }
 0x182   :  { %1340 = vrot.lane.b32.xlu1 %v1335_v23, %s4862_s13  ;;  %1420 = vrot.lane.b32.xlu0 %v1416_v25, %s4861_s11  ;;  %v1830_v28 = vmul.f32 %v1829_v21, %v5192_v2  ;;  %v1379_v36 = vmul.f32 %v1377_v10, %v5162_v41 }
 0x183   :  { %v1104_v33 = vadd.f32 %v1102_v27, %v1054_v13  ;;  %v1692_v27 = vmul.f32 %v1691_v31, %v5180_v56 }
 0x184   :  { %v1051_v34 = vpop.permute.xlu1 %1050  ;;  %v1131_v35 = vpop.permute.xlu0 %1130 }
 0x185   :  { %v1055_v40 = vadd.f32 %v1051_v34, %v999_v30  ;;  %v1136_v46 = vadd.f32 %v1131_v35, %v1104_v33  ;;  %v1515_v33 = vstv %s5381_s14  ;;  %s5619_s14 = sld [smem:[#allocation5 + $0x3f]] }
 0x186   :  { %1422 = vrot.lane.b32.xlu1 %v1417_v37, %s4861_s11  ;;  %1476 = vrot.lane.b32.xlu0 %v1472_v39, %s4862_s13  ;;  %v1516_v41 = vmul.f32 %v1515_v33, %v5166_v43  ;;  %v1517_v43 = vmul.f32 %v1515_v33, %v5173_v49 }
 0x187   :  { %v1105_v47 = vadd.f32 %v1103_v42, %v1055_v40  ;;  %v1693_v40 = vmul.f32 %v1691_v31, %v5186_v61  ;;  %v1831_v42 = vmul.f32 %v1829_v21, %v5198_v8 }
 0x188   :  { %v1133_v48 = vpop.permute.xlu1 %1132  ;;  %v1187_v51 = vpop.permute.xlu0 %1186 }
 0x189   :  { %v1192_v20 = vadd.f32 %v1187_v51, %v1136_v46  ;;  %v1137_v58 = vadd.f32 %v1133_v48, %v1105_v47 }
 0x18a   :  { %1478 = vrot.lane.b32.xlu1 %v1473_v52, %s4862_s13  ;;  %1558 = vrot.lane.b32.xlu0 %v1554_v53, %s4861_s11  ;;  %v1749_v52 = vmul.f32 %v1747_v7, %v5186_v61  ;;  %v1886_v53 = vmul.f32 %v1885_v45, %v5192_v2 }
 0x18b   :  { %v1242_v60 = vadd.f32 %v1240_v55, %v1192_v20  ;;  %v325_v55 = vstv %s5395_s16  ;;  %s5634_s16 = sld [smem:[#allocation5 + $0x42]] }
 0x18c   :  { %v1189_v62 = vpop.permute.xlu1 %1188  ;;  %v1269_v63 = vpop.permute.xlu0 %1268 }
 0x18d   :  { %v1193_v6 = vadd.f32 %v1189_v62, %v1137_v58  ;;  %v1274_v11 = vadd.f32 %v1269_v63, %v1242_v60 }
 0x18e   :  { %1560 = vrot.lane.b32.xlu1 %v1555_v1, %s4861_s11  ;;  %1614 = vrot.lane.b32.xlu0 %v1610_v3, %s4862_s13  ;;  %v1887_v1 = vmul.f32 %v1885_v45, %v5198_v8  ;;  %v326_v3 = vmul.f32 %v325_v55, %v5035_v24  ;;  %v657_v45 = vstv %s5444_s1  ;;  %s5682_s1 = sld [smem:[#allocation5 + $0x62]] }
 0x18f   :  { %v1243_v12 = vadd.f32 %v1241_v26, %v1193_v6  ;;  %v1654_v6 = vmul.f32 %v1653_v57, %v5180_v56  ;;  %v381_v26 = vstv %s5406_s2  ;;  %v1655_v56 = vmul.f32 %v1653_v57, %v5186_v61  ;;  %s5649_s2 = sld [smem:[#allocation5 + $0x5e]] }
 0x190   :  { %v1271_v14 = vpop.permute.xlu1 %1270  ;;  %v1325_v9 = vpop.permute.xlu0 %1324 }
 0x191   :  { %v1330_v18 = vadd.f32 %v1325_v9, %v1274_v11  ;;  %v1275_v22 = vadd.f32 %v1271_v14, %v1243_v12  ;;  %v327_v14 = vmul.f32 %v325_v55, %v5044_v29  ;;  %v382_v9 = vmul.f32 %v381_v26, %v5035_v24 }
 0x192   :  { %1616 = vrot.lane.b32.xlu1 %v1611_v16, %s4862_s13  ;;  %1752 = vrot.lane.b32.xlu0 %v1748_v17, %s4862_s13  ;;  %v463_v17 = vstv %s5414_s5  ;;  %v383_v24 = vmul.f32 %v381_v26, %v5044_v29  ;;  %v417_v55 = vstv %s5463_s23  ;;  %s5652_s5 = sld [smem:[#allocation5 + $0x45]] }
 0x193   :  { %v1380_v23 = vadd.f32 %v1378_v19, %v1330_v18  ;;  %v1791_v18 = vstv %s5419_s18  ;;  %s5659_s18 = sld [smem:[#allocation5 + $0x5f]] }
 0x194   :  { %v1327_v25 = vpop.permute.xlu1 %1326  ;;  %v1407_v13 = vpop.permute.xlu0 %1406  ;;  %s5713_s23 = sld [smem:[#allocation5 + $0x65]] }
 0x195   :  { %v1331_v30 = vadd.f32 %v1327_v25, %v1275_v22  ;;  %v1412_v34 = vadd.f32 %v1407_v13, %v1380_v23  ;;  %v464_v23 = vmul.f32 %v463_v17, %v5050_v32  ;;  %v1792_v25 = vmul.f32 %v1791_v18, %v5192_v2 }
 0x196   :  { %1696 = vrot.lane.b32.xlu1 %v1692_v27, %s4861_s11  ;;  %1834 = vrot.lane.b32.xlu0 %v1830_v28, %s4861_s11  ;;  %v519_v13 = vstv %s5425_s19  ;;  %s5667_s19 = sld [smem:[#allocation5 + $0x61]] }
 0x197   :  { %v1381_v35 = vadd.f32 %v1379_v36, %v1331_v30  ;;  %v465_v36 = vmul.f32 %v463_v17, %v5061_v38  ;;  %v520_v2 = vmul.f32 %v519_v13, %v5050_v32  ;;  %v555_v17 = vstv %s5495_s24  ;;  %s5742_s24 = sld [smem:[#allocation5 + $0x51]] }
 0x198   :  { %v1409_v37 = vpop.permute.xlu1 %1408  ;;  %v1463_v39 = vpop.permute.xlu0 %1462 }
 0x199   :  { %v1468_v15 = vadd.f32 %v1463_v39, %v1412_v34  ;;  %v1413_v46 = vadd.f32 %v1409_v37, %v1381_v35  ;;  %v1793_v34 = vmul.f32 %v1791_v18, %v5198_v8  ;;  %v601_v35 = vstv %s5433_s20  ;;  %s5670_s20 = sld [smem:[#allocation5 + $0x48]] }
 0x19a   :  { %1698 = vrot.lane.b32.xlu1 %v1693_v40, %s4861_s11  ;;  %1836 = vrot.lane.b32.xlu0 %v1831_v42, %s4861_s11  ;;  %v279_v37 = vstv %s5438_s21  ;;  %v521_v42 = vmul.f32 %v519_v13, %v5061_v38  ;;  %v602_v8 = vmul.f32 %v601_v35, %v5074_v44  ;;  %v603_v38 = vmul.f32 %v601_v35, %v5085_v50  ;;  %s5679_s21 = sld [smem:[#allocation7 + $0x2]] }
 0x19b   :  { %v1518_v47 = vadd.f32 %v1516_v41, %v1468_v15  ;;  %v5473_v15 = vld [vmem:[#allocation2] sm:$0xff] }
 0x19c   :  { %v1465_v48 = vpop.permute.xlu1 %1464  ;;  %v1545_v51 = vpop.permute.xlu0 %1544  ;;  %v280_v41 = vmul.f32 %v5473_v15, %v279_v37 }
 0x19d   :  { %v1469_v20 = vadd.f32 %v1465_v48, %v1413_v46  ;;  %v1550_v58 = vadd.f32 %v1545_v51, %v1518_v47  ;;  %v265_v46 = vstv %s5448_s3  ;;  %v658_v51 = vmul.f32 %v657_v45, %v5074_v44  ;;  %s5695_s3 = sld [smem:[#allocation5 + $0x4b]] }
 0x19e   :  { %1754 = vrot.lane.b32.xlu1 %v1749_v52, %s4862_s13  ;;  %1890 = vrot.lane.b32.xlu0 %v1886_v53, %s4862_s13  ;;  %v282_v52 = vadd.f32 %v280_v41, %v265_v46  ;;  %v5486_v53 = vld [vmem:[#allocation2 + $0x8] sm:$0xff]  ;;  %v659_v44 = vmul.f32 %v657_v45, %v5085_v50 }
 0x19f   :  { %v1519_v60 = vadd.f32 %v1517_v43, %v1469_v20  ;;  %v281_v20 = vmul.f32 %v5486_v53, %v279_v37  ;;  %v739_v43 = vstv %s5458_s22  ;;  %v1015_v37 = vstv %s5513_s26  ;;  %s5699_s22 = sld [smem:[#allocation5 + $0x64]] }
 0x1a0   :  { %v1547_v62 = vpop.permute.xlu1 %1546  ;;  %v1601_v63 = vpop.permute.xlu0 %1600  ;;  %s5763_s26 = sld [smem:[#allocation5 + $0x57]] }
 0x1a1   :  { %v1606_v49 = vadd.f32 %v1601_v63, %v1550_v58  ;;  %v1551_v7 = vadd.f32 %v1547_v62, %v1519_v60  ;;  %v740_v62 = vmul.f32 %v739_v43, %v5090_v54  ;;  %v283_v63 = vadd.f32 %v281_v20, %v265_v46  ;;  %v5543_v46 = vld [vmem:[#allocation2 + $0x21] sm:$0xff]  ;;  %v5549_v20 = vld [vmem:[#allocation2 + $0x18] sm:$0xff] }
 0x1a2   :  { %1892 = vrot.lane.b32.xlu1 %v1887_v1, %s4862_s13  ;;  %330 = vrot.lane.b32.xlu0 %v326_v3, %s4861_s11  ;;  %v5499_v3 = vld [vmem:[#allocation2 + $0x1] sm:$0xff] }
 0x1a3   :  { %v1656_v10 = vadd.f32 %v1654_v6, %v1606_v49  ;;  %v418_v49 = vmul.f32 %v5499_v3, %v417_v55  ;;  %v795_v6 = vstv %s5477_s7  ;;  %s5726_s7 = sld [smem:[#allocation5 + $0x4e]] }
 0x1a4   :  { %v1603_v11 = vpop.permute.xlu1 %1602  ;;  %v1683_v12 = vpop.permute.xlu0 %1682 }
 0x1a5   :  { %v1607_v16 = vadd.f32 %v1603_v11, %v1551_v7  ;;  %v1688_v19 = vadd.f32 %v1683_v12, %v1656_v10  ;;  %v741_v11 = vmul.f32 %v739_v43, %v5100_v59  ;;  %v796_v12 = vmul.f32 %v795_v6, %v5090_v54 }
 0x1a6   :  { %332 = vrot.lane.b32.xlu1 %v327_v14, %s4861_s11  ;;  %386 = vrot.lane.b32.xlu0 %v382_v9, %s4862_s13  ;;  %v5509_v9 = vld [vmem:[#allocation2 + $0x9] sm:$0xff] }
 0x1a7   :  { %v1657_v31 = vadd.f32 %v1655_v56, %v1607_v16  ;;  %v419_v16 = vmul.f32 %v5509_v9, %v417_v55  ;;  %v877_v56 = vstv %s5490_s8  ;;  %s5734_s8 = sld [smem:[#allocation5 + $0x67]] }
 0x1a8   :  { %v1685_v21 = vpop.permute.xlu1 %1684  ;;  %v1739_v22 = vpop.permute.xlu0 %1738 }
 0x1a9   :  { %v1744_v61 = vadd.f32 %v1739_v22, %v1688_v19  ;;  %v1689_v27 = vadd.f32 %v1685_v21, %v1657_v31  ;;  %v797_v21 = vmul.f32 %v795_v6, %v5100_v59  ;;  %v878_v22 = vmul.f32 %v877_v56, %v5108_v0 }
 0x1aa   :  { %388 = vrot.lane.b32.xlu1 %v383_v24, %s4862_s13  ;;  %468 = vrot.lane.b32.xlu0 %v464_v23, %s4861_s11  ;;  %v5522_v23 = vld [vmem:[#allocation2 + $0x2] sm:$0xff]  ;;  %v879_v59 = vmul.f32 %v877_v56, %v5114_v5  ;;  %v1071_v6 = vstv %s5536_s6  ;;  %s4400_s6 = sld [smem:[#allocation5 + $0x68]] }
 0x1ab   :  { %v5450_v28 = vadd.f32 %v1792_v25, %v1744_v61  ;;  %v556_v61 = vmul.f32 %v5522_v23, %v555_v17  ;;  %v933_v25 = vstv %s5503_s25  ;;  %s5753_s25 = sld [smem:[#allocation5 + $0x54]] }
 0x1ac   :  { %v1741_v29 = vpop.permute.xlu1 %1740  ;;  %v5452_v30 = vpop.permute.xlu0 %1820 }
 0x1ad   :  { %v1745_v33 = vadd.f32 %v1741_v29, %v1689_v27 }
 0x1ae   :  { %470 = vrot.lane.b32.xlu1 %v465_v36, %s4861_s11  ;;  %524 = vrot.lane.b32.xlu0 %v520_v2, %s4862_s13  ;;  %v5529_v2 = vld [vmem:[#allocation2 + $0x19] sm:$0xff] }
 0x1af   :  { %v5465_v39 = vadd.f32 %v1793_v34, %v1745_v33  ;;  %v934_v0 = vmul.f32 %v5529_v2, %v933_v25  ;;  %v5532_v34 = vld [vmem:[#allocation2 + $0xa] sm:$0xff] }
 0x1b0   :  { %v5467_v40 = vpop.permute.xlu1 %1822  ;;  %v5469_v32 = vpop.permute.xlu0 %1876  ;;  %v557_v35 = vmul.f32 %v5532_v34, %v555_v17 }
 0x1b2   :  { %526 = vrot.lane.b32.xlu1 %v521_v42, %s4862_s13  ;;  %606 = vrot.lane.b32.xlu0 %v602_v8, %s4861_s11  ;;  %v693_v42 = vstv %s5518_s29  ;;  %s5783_s29 = sld [smem:[#allocation5 + $0x5a]] }
 0x1b3   :  { %v694_v43 = vmul.f32 %v5549_v20, %v693_v42 }
 0x1b4   :  { %v5482_v47 = vpop.permute.xlu1 %1878  ;;  %v317_v48 = vpop.permute.xlu0 %316 }
 0x1b5   :  { %v322_v57 = vadd.f32 %v317_v48, %v282_v52  ;;  %v935_v48 = vmul.f32 %v5543_v46, %v933_v25 }
 0x1b6   :  { %608 = vrot.lane.b32.xlu1 %v603_v38, %s4861_s11  ;;  %662 = vrot.lane.b32.xlu0 %v658_v51, %s4862_s13  ;;  %v5546_v38 = vld [vmem:[#allocation2 + $0x1a] sm:$0xff] }
 0x1b7   :  { %v1016_v51 = vmul.f32 %v5546_v38, %v1015_v37 }
 0x1b8   :  { %v319_v58 = vpop.permute.xlu1 %318  ;;  %v373_v60 = vpop.permute.xlu0 %372 }
 0x1b9   :  { %v378_v1 = vadd.f32 %v373_v60, %v322_v57  ;;  %v323_v26 = vadd.f32 %v319_v58, %v283_v63 }
 0x1ba   :  { %664 = vrot.lane.b32.xlu1 %v659_v44, %s4862_s13  ;;  %744 = vrot.lane.b32.xlu0 %v740_v62, %s4861_s11  ;;  %v5554_v44 = vld [vmem:[#allocation2 + $0x22] sm:$0xff] }
 0x1bb   :  { %v420_v7 = vadd.f32 %v418_v49, %v378_v1  ;;  %v1017_v62 = vmul.f32 %v5554_v44, %v1015_v37  ;;  %v5557_v1 = vld [vmem:[#allocation2 + $0x20] sm:$0xff] }
 0x1bc   :  { %v375_v50 = vpop.permute.xlu1 %374  ;;  %v455_v10 = vpop.permute.xlu0 %454  ;;  %v695_v49 = vmul.f32 %v5557_v1, %v693_v42  ;;  %v1826_v42 = vadd.f32 %v5452_v30, %v5450_v28 }
 0x1bd   :  { %v379_v14 = vadd.f32 %v375_v50, %v323_v26  ;;  %v460_v18 = vadd.f32 %v455_v10, %v420_v7  ;;  %v831_v26 = vstv %s5541_s0  ;;  %s4408_s0 = sld [smem:[#allocation5 + $0x6a]] }
 0x1be   :  { %746 = vrot.lane.b32.xlu1 %v741_v11, %s4861_s11  ;;  %800 = vrot.lane.b32.xlu0 %v796_v12, %s4862_s13  ;;  %v1073_v12 = vmul.f32 %v5554_v44, %v1071_v6  ;;  %v832_v56 = vmul.f32 %v5529_v2, %v831_v26 }
 0x1bf   :  { %v421_v19 = vadd.f32 %v419_v16, %v379_v14  ;;  %v131_v14 = vlaneseq }
 0x1c0   :  { %v457_v31 = vpop.permute.xlu1 %456  ;;  %v511_v54 = vpop.permute.xlu0 %510 }
 0x1c1   :  { %v516_v24 = vadd.f32 %v511_v54, %v460_v18  ;;  %v461_v13 = vadd.f32 %v457_v31, %v421_v19  ;;  %v132_v54 = vand.u32 127, %v131_v14 }
 0x1c2   :  { %802 = vrot.lane.b32.xlu1 %v797_v21, %s4862_s13  ;;  %882 = vrot.lane.b32.xlu0 %v878_v22, %s4861_s11  ;;  %v833_v22 = vmul.f32 %v5543_v46, %v831_v26  ;;  %v5602_v26 = vld [vmem:[#allocation2 + $0x38] sm:$0xff] }
 0x1c3   :  { %v558_v27 = vadd.f32 %v556_v61, %v516_v24  ;;  %v969_v24 = vstv %s5563_s27  ;;  %vm133_vm4 = vcmp.ge.s32.totalorder %v132_v54, 1  ;;  %vm134_vm5 = vcmp.le.s32.totalorder %v132_v54, 16  ;;  %s4412_s27 = sld [smem:[#allocation5 + $0x6b]] }
 0x1c4   :  { %v513_v29 = vpop.permute.xlu1 %512  ;;  %v593_v36 = vpop.permute.xlu0 %592  ;;  %vm136_vm6 = vcmp.ge.s32.totalorder %v132_v54, 19  ;;  %vm137_vm7 = vcmp.le.s32.totalorder %v132_v54, 34  ;;  %vm135_vm8 = vmand %vm133_vm4, %vm134_vm5 }
 0x1c5   :  { %v517_v33 = vadd.f32 %v513_v29, %v461_v13  ;;  %v598_v5 = vadd.f32 %v593_v36, %v558_v27  ;;  %v970_v36 = vmul.f32 %v5546_v38, %v969_v24  ;;  %vm138_vm9 = vmand %vm136_vm6, %vm137_vm7  ;;  %vm3939_vm6 = vcmask 130048  }
 0x1c6   :  { %884 = vrot.lane.b32.xlu1 %v879_v59, %s4861_s11  ;;  %938 = vrot.lane.b32.xlu0 %v934_v0, %s4862_s13  ;;  %v1827_v59 = vadd.f32 %v5467_v40, %v5465_v39  ;;  %vm5585_vm10 = vmor %vm135_vm8, %vm138_vm9  ;;  %vm3960_vm7 = vcmask 261248   ;;  %vm4033_vm8 = vcmask 392448   ;;  %vm4054_vm9 = vcmask 523648  }
 0x1c7   :  { %v559_v8 = vadd.f32 %v557_v35, %v517_v33 }
 0x1c8   :  { %v595_v41 = vpop.permute.xlu1 %594  ;;  %v649_v45 = vpop.permute.xlu0 %648 }
 0x1c9   :  { %v654_v52 = vadd.f32 %v649_v45, %v598_v5  ;;  %v599_v55 = vadd.f32 %v595_v41, %v559_v8  ;;  %v1883_v5 = vadd.f32 %v5482_v47, %v1827_v59  ;;  %v971_v41 = vmul.f32 %v5554_v44, %v969_v24  ;;  %v5593_v47 = vld [vmem:[#allocation2 + $0x30] sm:$0xff] }
 0x1ca   :  { %940 = vrot.lane.b32.xlu1 %v935_v48, %s4862_s13  ;;  %1020 = vrot.lane.b32.xlu0 %v1016_v51, %s4861_s11  ;;  %v1107_v45 = vstv %s5572_s28  ;;  %v1882_v48 = vadd.f32 %v5469_v32, %v1826_v42  ;;  %s4277_s28 = sld [smem:[#allocation5 + $0x6d]] }
 0x1cb   :  { %v696_v57 = vadd.f32 %v694_v43, %v654_v52  ;;  %v5591_v28 = vsel %vm5585_vm10, %v1883_v5, 0.0 }
 0x1cc   :  { %v651_v58 = vpop.permute.xlu1 %650  ;;  %v731_v60 = vpop.permute.xlu0 %730  ;;  %v5598_v32 = vsel %vm5585_vm10, %v1882_v48, 0.0  ;;  %v1942_v24 = vmul.f32 %v5591_v28, %v5591_v28 }
 0x1cd   :  { %v655_v63 = vadd.f32 %v651_v58, %v599_v55  ;;  %v736_v7 = vadd.f32 %v731_v60, %v696_v57  ;;  %v1108_v55 = vmul.f32 %v5593_v47, %v1107_v45 }
 0x1ce   :  { %1022 = vrot.lane.b32.xlu1 %v1017_v62, %s4861_s11  ;;  %v1944_v5 = vsel %vm1928_vm11, %v1942_v24, 0.0 }
 0x1cf   :  { %v697_v50 = vadd.f32 %v695_v49, %v655_v63  ;;  %v1930_v63 = vsel %vm1928_vm11, %v5591_v28, 0.0 }
 0x1d0   :  { %v733_v10 = vpop.permute.xlu1 %732  ;;  %v787_v11 = vpop.permute.xlu0 %786 }
 0x1d1   :  { %v792_v16 = vadd.f32 %v787_v11, %v736_v7  ;;  %v737_v17 = vadd.f32 %v733_v10, %v697_v50  ;;  %v1109_v7 = vmul.f32 %v5602_v26, %v1107_v45  ;;  %v1929_v50 = vsel %vm1928_vm11, %v5598_v32, 0.0 }
 0x1d2   :  { %1078 = vrot.lane.b32.xlu1 %v1073_v12, %s4862_s13  ;;  %v1245_v10 = vstv %s5582_s30  ;;  %v1931_v14 = vadd.f32 %v1930_v63, %v1929_v50  ;;  %s4281_s30 = sld [smem:[#allocation5 + $0x6e]] }
 0x1d3   :  { %v834_v18 = vadd.f32 %v832_v56, %v792_v16 }
 0x1d4   :  { %v789_v19 = vpop.permute.xlu1 %788  ;;  %v869_v31 = vpop.permute.xlu0 %868 }
 0x1d5   :  { %v793_v21 = vadd.f32 %v789_v19, %v737_v17  ;;  %v874_v61 = vadd.f32 %v869_v31, %v834_v18  ;;  %v5610_v18 = vld [vmem:[#allocation2 + $0x31] sm:$0xff] }
 0x1d6   :  { %v1246_v19 = vmul.f32 %v5610_v18, %v1245_v10 }
 0x1d7   :  { %v835_v25 = vadd.f32 %v833_v22, %v793_v21 }
 0x1d8   :  { %v871_v13 = vpop.permute.xlu1 %870  ;;  %v925_v27 = vpop.permute.xlu0 %924 }
 0x1d9   :  { %v930_v29 = vadd.f32 %v925_v27, %v874_v61  ;;  %v875_v0 = vadd.f32 %v871_v13, %v835_v25  ;;  %v5615_v25 = vld [vmem:[#allocation2 + $0x39] sm:$0xff]  ;;  %v1383_v27 = vstv %s5608_s12  ;;  %s4289_s12 = sld [smem:[#allocation5 + $0x70]] }
 0x1da   :  { %v1247_v13 = vmul.f32 %v5615_v25, %v1245_v10 }
 0x1db   :  { %v972_v33 = vadd.f32 %v970_v36, %v930_v29  ;;  %v1941_v29 = vmul.f32 %v5598_v32, %v5598_v32 }
 0x1dc   :  { %v927_v35 = vpop.permute.xlu1 %926  ;;  %v1007_v37 = vpop.permute.xlu0 %1006 }
 0x1dd   :  { %v931_v8 = vadd.f32 %v927_v35, %v875_v0  ;;  %v1012_v39 = vadd.f32 %v1007_v37, %v972_v33  ;;  %v5623_v37 = vld [vmem:[#allocation2 + $0x32] sm:$0xff]  ;;  %v1943_v45 = vsel %vm1928_vm11, %v1941_v29, 0.0  ;;  %v1209_v29 = vstv %s5639_s17  ;;  %s5828_s17 = sld [smem:[#allocation5 + $0x76]] }
 0x1de   :  { %v1384_v42 = vmul.f32 %v5623_v37, %v1383_v27 }
 0x1df   :  { %v973_v40 = vadd.f32 %v971_v41, %v931_v8 }
 0x1e0   :  { %v1009_v52 = vpop.permute.xlu1 %1008  ;;  %v1063_v43 = vpop.permute.xlu0 %1062 }
 0x1e1   :  { %v1068_v30 = vadd.f32 %v1063_v43, %v1012_v39  ;;  %v1013_v57 = vadd.f32 %v1009_v52, %v973_v40  ;;  %v1945_v40 = vadd.f32 %v1944_v5, %v1943_v45  ;;  %v5628_v43 = vld [vmem:[#allocation2 + $0x3a] sm:$0xff]  ;;  %v1210_v5 = vmul.f32 %v5593_v47, %v1209_v29 }
 0x1e2   :  { %v1291_v45 = vstv %s5649_s2  ;;  %s5835_s2 = sld [smem:[#allocation5 + $0x77]] }
 0x1e3   :  { %v1110_v58 = vadd.f32 %v1108_v55, %v1068_v30  ;;  %v1385_v30 = vmul.f32 %v5628_v43, %v1383_v27  ;;  %v1521_v55 = vstv %s5619_s14  ;;  %s4293_s14 = sld [smem:[#allocation5 + $0x71]] }
 0x1e4   :  { %v1065_v60 = vpop.permute.xlu1 %1064  ;;  %v1145_v62 = vpop.permute.xlu0 %1144 }
 0x1e5   :  { %v1069_v49 = vadd.f32 %v1065_v60, %v1013_v57  ;;  %v1150_v11 = vadd.f32 %v1145_v62, %v1110_v58 }
 0x1e7   :  { %v1111_v12 = vadd.f32 %v1109_v7, %v1069_v49  ;;  %v5636_v49 = vld [vmem:[#allocation2 + $0x48] sm:$0xff] }
 0x1e8   :  { %v1147_v16 = vpop.permute.xlu1 %1146  ;;  %v1201_v56 = vpop.permute.xlu0 %1200  ;;  %v1522_v7 = vmul.f32 %v5636_v49, %v1521_v55 }
 0x1e9   :  { %v1206_v17 = vadd.f32 %v1201_v56, %v1150_v11  ;;  %1932 = vadd.xlane.f32.xlu0 %v1931_v14  ;;  %v1151_v31 = vadd.f32 %v1147_v16, %v1111_v12  ;;  %v1072_v16 = vmul.f32 %v5546_v38, %v1071_v6  ;;  %v5644_v56 = vld [vmem:[#allocation2 + $0x50] sm:$0xff] }
 0x1eb   :  { %v1248_v54 = vadd.f32 %v1246_v19, %v1206_v17  ;;  %v1523_v17 = vmul.f32 %v5644_v56, %v1521_v55  ;;  %v1153_v19 = vstv %s5631_s15  ;;  %v1211_v55 = vmul.f32 %v5602_v26, %v1209_v29  ;;  %s4301_s15 = sld [smem:[#allocation5 + $0x73]] }
 0x1ec   :  { %v1203_v21 = vpop.permute.xlu1 %1202  ;;  %v1283_v22 = vpop.permute.xlu0 %1282  ;;  %v1154_v6 = vmul.f32 %v5593_v47, %v1153_v19  ;;  %v1485_v29 = vstv %s5682_s1  ;;  %s5873_s1 = sld [smem:[#allocation5 + $0x7d]] }
 0x1ed   :  { %v1207_v61 = vadd.f32 %v1203_v21, %v1151_v31  ;;  %v1288_v36 = vadd.f32 %v1283_v22, %v1248_v54  ;;  %v1659_v31 = vstv %s5634_s16  ;;  %s5822_s16 = sld [smem:[#allocation5 + $0x74]] }
 0x1ef   :  { %v1249_v59 = vadd.f32 %v1247_v13, %v1207_v61  ;;  %v5655_v13 = vld [vmem:[#allocation2 + $0x49] sm:$0xff] }
 0x1f0   :  { %v1285_v0 = vpop.permute.xlu1 %1284  ;;  %v1339_v33 = vpop.permute.xlu0 %1338  ;;  %v1660_v27 = vmul.f32 %v5655_v13, %v1659_v31 }
 0x1f1   :  { %v1344_v35 = vadd.f32 %v1339_v33, %v1288_v36  ;;  %v1289_v8 = vadd.f32 %v1285_v0, %v1249_v59 }
 0x1f3   :  { %v1386_v41 = vadd.f32 %v1384_v42, %v1344_v35  ;;  %v1155_v42 = vmul.f32 %v5602_v26, %v1153_v19  ;;  %v5703_v19 = vld [vmem:[#allocation2 + $0x52] sm:$0xff] }
 0x1f4   :  { %v1341_v48 = vpop.permute.xlu1 %1340  ;;  %v1421_v39 = vpop.permute.xlu0 %1420 }
 0x1f5   :  { %v1345_v52 = vadd.f32 %v1341_v48, %v1289_v8  ;;  %v1426_v57 = vadd.f32 %v1421_v39, %v1386_v41  ;;  %v5664_v8 = vld [vmem:[#allocation2 + $0x51] sm:$0xff] }
 0x1f6   :  { %1946 = vadd.xlane.f32.xlu1 %v1945_v40  ;;  %v1661_v41 = vmul.f32 %v5664_v8, %v1659_v31  ;;  %v1797_v40 = vstv %s5652_s5  ;;  %s5839_s5 = sld [smem:[#allocation5 + $0x5d]] }
 0x1f7   :  { %v1387_v58 = vadd.f32 %v1385_v30, %v1345_v52  ;;  %v1799_v31 = vmul.f32 %v5703_v19, %v1797_v40 }
 0x1f8   :  { %v1423_v60 = vpop.permute.xlu1 %1422  ;;  %v1477_v62 = vpop.permute.xlu0 %1476 }
 0x1f9   :  { %v1482_v63 = vadd.f32 %v1477_v62, %v1426_v57  ;;  %v1427_v50 = vadd.f32 %v1423_v60, %v1387_v58  ;;  %v1292_v57 = vmul.f32 %v5610_v18, %v1291_v45  ;;  %v1347_v58 = vstv %s5659_s18  ;;  %v5684_v62 = vld [vmem:[#allocation2 + $0x4a] sm:$0xff]  ;;  %s5848_s18 = sld [smem:[#allocation5 + $0x79]] }
 0x1fb   :  { %v1524_v10 = vadd.f32 %v1522_v7, %v1482_v63  ;;  %v1798_v63 = vmul.f32 %v5684_v62, %v1797_v40 }
 0x1fc   :  { %v1479_v11 = vpop.permute.xlu1 %1478  ;;  %v1559_v12 = vpop.permute.xlu0 %1558 }
 0x1fd   :  { %v1483_v14 = vadd.f32 %v1479_v11, %v1427_v50  ;;  %v1564_v54 = vadd.f32 %v1559_v12, %v1524_v10  ;;  %v1293_v11 = vmul.f32 %v5615_v25, %v1291_v45  ;;  %v1348_v12 = vmul.f32 %v5610_v18, %v1347_v58 }
 0x1fe   :  { %v423_v45 = vstv %s5695_s3  ;;  %s5878_s3 = sld [smem:[#allocation5 + $0x63]] }
 0x1ff   :  { %1076 = vrot.lane.b32.xlu0 %v1072_v16, %s4862_s13  ;;  %v1525_v21 = vadd.f32 %v1523_v17, %v1483_v14  ;;  %v1429_v14 = vstv %s5667_s19  ;;  %v285_v16 = vstv %s5670_s20  ;;  %s5855_s19 = sld [smem:[#allocation5 + $0x7a]] }
 0x200   :  { %v1561_v22 = vpop.permute.xlu1 %1560  ;;  %v1615_v24 = vpop.permute.xlu0 %1614  ;;  %s5860_s20 = sld [smem:[#allocation5 + $0x60]] }
 0x201   :  { %v1620_v61 = vadd.f32 %v1615_v24, %v1564_v54  ;;  %v1565_v36 = vadd.f32 %v1561_v22, %v1525_v21  ;;  %v1349_v24 = vmul.f32 %v5615_v25, %v1347_v58 }
 0x203   :  { %1158 = vrot.lane.b32.xlu0 %v1154_v6, %s4861_s11  ;;  %v1662_v59 = vadd.f32 %v1660_v27, %v1620_v61  ;;  %v1430_v61 = vmul.f32 %v5623_v37, %v1429_v14  ;;  %v286_v6 = vmul.f32 %v5473_v15, %v285_v16  ;;  %v267_v27 = vstv %s5679_s21  ;;  %s5866_s21 = sld [smem:[#allocation5 + $0x7c]] }
 0x204   :  { %v1617_v0 = vpop.permute.xlu1 %1616  ;;  %v1753_v33 = vpop.permute.xlu0 %1752 }
 0x205   :  { %v1621_v35 = vadd.f32 %v1617_v0, %v1565_v36 }
 0x207   :  { %1160 = vrot.lane.b32.xlu1 %v1155_v42, %s4861_s11  ;;  %1214 = vrot.lane.b32.xlu0 %v1210_v5, %s4862_s13  ;;  %v1663_v48 = vadd.f32 %v1661_v41, %v1621_v35  ;;  %v1431_v35 = vmul.f32 %v5628_v43, %v1429_v14  ;;  %v1486_v42 = vmul.f32 %v5623_v37, %v1485_v29  ;;  %v1567_v41 = vstv %s5699_s22  ;;  %s5885_s22 = sld [smem:[#allocation5 + $0x7f]] }
 0x208   :  { %v1697_v39 = vpop.permute.xlu1 %1696  ;;  %v5675_v52 = vpop.permute.xlu0 %1834  ;;  %v287_v5 = vmul.f32 %v5486_v53, %v285_v16  ;;  %v1568_v58 = vmul.f32 %v5636_v49, %v1567_v41 }
 0x209   :  { %v1702_v30 = vadd.f32 %v1697_v39, %v1662_v59 }
 0x20b   :  { %v1758_v60 = vadd.f32 %v1753_v33, %v1702_v30  ;;  %1216 = vrot.lane.b32.xlu1 %v1211_v55, %s4862_s13  ;;  %1296 = vrot.lane.b32.xlu0 %v1292_v57, %s4861_s11  ;;  %v288_v33 = vadd.f32 %v286_v6, %v267_v27  ;;  %v1487_v30 = vmul.f32 %v5628_v43, %v1485_v29 }
 0x20c   :  { %v1699_v7 = vpop.permute.xlu1 %1698  ;;  %v5689_v50 = vpop.permute.xlu0 %1836  ;;  %v289_v55 = vadd.f32 %v287_v5, %v267_v27 }
 0x20d   :  { %v5691_v10 = vadd.f32 %v1798_v63, %v1758_v60  ;;  %v1703_v17 = vadd.f32 %v1699_v7, %v1663_v48  ;;  %v424_v60 = vmul.f32 %v5499_v3, %v423_v45  ;;  %v1623_v63 = vstv %s5713_s23  ;;  %s5893_s23 = sld [smem:[#allocation5 + $0x80]] }
 0x20f   :  { %1298 = vrot.lane.b32.xlu1 %v1293_v11, %s4861_s11  ;;  %1352 = vrot.lane.b32.xlu0 %v1348_v12, %s4862_s13 }
 0x210   :  { %v1755_v54 = vpop.permute.xlu1 %1754  ;;  %v5706_v21 = vpop.permute.xlu0 %1890 }
 0x211   :  { %v1759_v22 = vadd.f32 %v1755_v54, %v1703_v17  ;;  %v1569_v17 = vmul.f32 %v5644_v56, %v1567_v41  ;;  %v425_v54 = vmul.f32 %v5509_v9, %v423_v45 }
 0x213   :  { %v5715_v36 = vadd.f32 %v1799_v31, %v1759_v22  ;;  %1354 = vrot.lane.b32.xlu1 %v1349_v24, %s4862_s13  ;;  %1434 = vrot.lane.b32.xlu0 %v1430_v61, %s4861_s11  ;;  %v1624_v31 = vmul.f32 %v5636_v49, %v1623_v63  ;;  %v561_v22 = vstv %s5726_s7  ;;  %s5898_s7 = sld [smem:[#allocation5 + $0x66]] }
 0x214   :  { %v5719_v59 = vpop.permute.xlu1 %1892  ;;  %v331_v0 = vpop.permute.xlu0 %330 }
 0x215   :  { %v336_v48 = vadd.f32 %v331_v0, %v288_v33  ;;  %v1625_v0 = vmul.f32 %v5644_v56, %v1623_v63  ;;  %v562_v33 = vmul.f32 %v5522_v23, %v561_v22 }
 0x217   :  { %1436 = vrot.lane.b32.xlu1 %v1431_v35, %s4861_s11  ;;  %1490 = vrot.lane.b32.xlu0 %v1486_v42, %s4862_s13  ;;  %v1705_v35 = vstv %s5734_s8  ;;  %s5904_s8 = sld [smem:[#allocation5 + $0x82]] }
 0x218   :  { %v333_v39 = vpop.permute.xlu1 %332  ;;  %v387_v40 = vpop.permute.xlu0 %386 }
 0x219   :  { %v392_v57 = vadd.f32 %v387_v40, %v336_v48  ;;  %v337_v7 = vadd.f32 %v333_v39, %v289_v55  ;;  %v1706_v39 = vmul.f32 %v5655_v13, %v1705_v35  ;;  %v563_v40 = vmul.f32 %v5532_v34, %v561_v22 }
 0x21a   :  { %v1841_v22 = vadd.f32 %v5689_v50, %v5715_v36 }
 0x21b   :  { %1492 = vrot.lane.b32.xlu1 %v1487_v30, %s4862_s13  ;;  %1572 = vrot.lane.b32.xlu0 %v1568_v58, %s4861_s11  ;;  %v426_v11 = vadd.f32 %v424_v60, %v392_v57  ;;  %v699_v30 = vstv %s5742_s24  ;;  %s5912_s24 = sld [smem:[#allocation5 + $0x83]] }
 0x21c   :  { %v389_v12 = vpop.permute.xlu1 %388  ;;  %v469_v14 = vpop.permute.xlu0 %468 }
 0x21d   :  { %v393_v16 = vadd.f32 %v389_v12, %v337_v7  ;;  %v474_v24 = vadd.f32 %v469_v14, %v426_v11  ;;  %v1707_v7 = vmul.f32 %v5664_v8, %v1705_v35  ;;  %v700_v11 = vmul.f32 %v5549_v20, %v699_v30 }
 0x21f   :  { %1574 = vrot.lane.b32.xlu1 %v1569_v17, %s4861_s11  ;;  %1628 = vrot.lane.b32.xlu0 %v1624_v31, %s4862_s13  ;;  %v427_v61 = vadd.f32 %v425_v54, %v393_v16  ;;  %v701_v54 = vmul.f32 %v5557_v1, %v699_v30 }
 0x220   :  { %v471_v6 = vpop.permute.xlu1 %470  ;;  %v525_v27 = vpop.permute.xlu0 %524 }
 0x221   :  { %v530_v29 = vadd.f32 %v525_v27, %v474_v24  ;;  %v475_v42 = vadd.f32 %v471_v6, %v427_v61  ;;  %v837_v24 = vstv %s5753_s25  ;;  %v1840_v27 = vadd.f32 %v5675_v52, %v5691_v10  ;;  %s5921_s25 = sld [smem:[#allocation5 + $0x85]] }
 0x222   :  { %v838_v35 = vmul.f32 %v5529_v2, %v837_v24  ;;  %v975_v52 = vstv %s5763_s26  ;;  %s4377_s26 = sld [smem:[#allocation5 + $0x86]] }
 0x223   :  { %1630 = vrot.lane.b32.xlu1 %v1625_v0, %s4862_s13  ;;  %v564_v5 = vadd.f32 %v562_v33, %v530_v29  ;;  %v1896_v50 = vadd.f32 %v5706_v21, %v1840_v27  ;;  %v976_v21 = vmul.f32 %v5546_v38, %v975_v52 }
 0x224   :  { %v527_v41 = vpop.permute.xlu1 %526  ;;  %v607_v45 = vpop.permute.xlu0 %606 }
 0x225   :  { %v531_v48 = vadd.f32 %v527_v41, %v475_v42  ;;  %v612_v55 = vadd.f32 %v607_v45, %v564_v5  ;;  %v1897_v42 = vadd.f32 %v5719_v59, %v1841_v22  ;;  %v1113_v22 = vstv %s5783_s29  ;;  %s4385_s29 = sld [smem:[#allocation5 + $0x88]] }
 0x226   :  { %v1115_v27 = vmul.f32 %v5602_v26, %v1113_v22 }
 0x227   :  { %1710 = vrot.lane.b32.xlu1 %v1706_v39, %s4861_s11  ;;  %v565_v57 = vadd.f32 %v563_v40, %v531_v48  ;;  %v839_v39 = vmul.f32 %v5543_v46, %v837_v24  ;;  %v5773_v40 = vsel %vm5585_vm10, %v1897_v42, 0.0 }
 0x228   :  { %v609_v58 = vpop.permute.xlu1 %608  ;;  %v663_v60 = vpop.permute.xlu0 %662 }
 0x229   :  { %v668_v63 = vadd.f32 %v663_v60, %v612_v55  ;;  %v613_v12 = vadd.f32 %v609_v58, %v565_v57  ;;  %v5778_v55 = vsel %vm5585_vm10, %v1896_v50, 0.0  ;;  %v2003_v60 = vsel %vm1928_vm11, %v5773_v40, 0.0 }
 0x22b   :  { %1712 = vrot.lane.b32.xlu1 %v1707_v7, %s4861_s11  ;;  %v702_v14 = vadd.f32 %v700_v11, %v668_v63  ;;  %v2002_v11 = vsel %vm1928_vm11, %v5778_v55, 0.0 }
 0x22c   :  { %v665_v16 = vpop.permute.xlu1 %664  ;;  %v745_v17 = vpop.permute.xlu0 %744 }
 0x22d   :  { %v669_v31 = vadd.f32 %v665_v16, %v613_v12  ;;  %v750_v61 = vadd.f32 %v745_v17, %v702_v14  ;;  %v2004_v14 = vadd.f32 %v2003_v60, %v2002_v11  ;;  %v977_v17 = vmul.f32 %v5554_v44, %v975_v52 }
 0x22f   :  { %v703_v6 = vadd.f32 %v701_v54, %v669_v31 }
 0x230   :  { %v747_v29 = vpop.permute.xlu1 %746  ;;  %v801_v0 = vpop.permute.xlu0 %800 }
 0x231   :  { %v806_v33 = vadd.f32 %v801_v0, %v750_v61  ;;  %v751_v5 = vadd.f32 %v747_v29, %v703_v6  ;;  %v2015_v29 = vmul.f32 %v5773_v40, %v5773_v40 }
 0x233   :  { %v840_v41 = vadd.f32 %v838_v35, %v806_v33  ;;  %v2014_v33 = vmul.f32 %v5778_v55, %v5778_v55  ;;  %v2017_v35 = vsel %vm1928_vm11, %v2015_v29, 0.0 }
 0x234   :  { %v803_v36 = vpop.permute.xlu1 %802  ;;  %v883_v45 = vpop.permute.xlu0 %882 }
 0x235   :  { %v807_v48 = vadd.f32 %v803_v36, %v751_v5  ;;  %v888_v10 = vadd.f32 %v883_v45, %v840_v41  ;;  %v2016_v42 = vsel %vm1928_vm11, %v2014_v33, 0.0  ;;  %v1761_v41 = vstv %s4400_s6  ;;  %s4389_s6 = sld [smem:[#allocation5 + $0x89]] }
 0x236   :  { %v2018_v5 = vadd.f32 %v2017_v35, %v2016_v42  ;;  %v1762_v50 = vmul.f32 %v5655_v13, %v1761_v41  ;;  %v1843_v36 = vstv %s4408_s0  ;;  %v1763_v52 = vmul.f32 %v5664_v8, %v1761_v41  ;;  %s4397_s0 = sld [smem:[#allocation5 + $0x8b]] }
 0x237   :  { %v841_v30 = vadd.f32 %v839_v39, %v807_v48  ;;  %v1844_v45 = vmul.f32 %v5684_v62, %v1843_v36  ;;  %v1845_v48 = vmul.f32 %v5703_v19, %v1843_v36  ;;  %v1899_v39 = vstv %s4412_s27 }
 0x238   :  { %v885_v59 = vpop.permute.xlu1 %884  ;;  %v939_v57 = vpop.permute.xlu0 %938  ;;  %v1114_v42 = vmul.f32 %v5593_v47, %v1113_v22  ;;  %v1251_v22 = vstv %s5839_s5  ;;  %s5971_s5 = sld [smem:[#allocation7 + $0x3]] }
 0x239   :  { %v944_v58 = vadd.f32 %v939_v57, %v888_v10  ;;  %v889_v63 = vadd.f32 %v885_v59, %v841_v30  ;;  %v1900_v10 = vmul.f32 %v5684_v62, %v1899_v39  ;;  %v339_v30 = vstv %s4277_s28 }
 0x23a   :  { %v1901_v59 = vmul.f32 %v5703_v19, %v1899_v39  ;;  %v340_v57 = vmul.f32 %v5473_v15, %v339_v30  ;;  %v809_v39 = vstv %s5835_s2  ;;  %s5969_s2 = sld [smem:[#allocation5 + $0x6c]] }
 0x23b   :  { %v5785_v7 = vadd.f32 %v976_v21, %v944_v58  ;;  %v395_v58 = vstv %s4281_s30  ;;  %v341_v21 = vmul.f32 %v5486_v53, %v339_v30 }
 0x23c   :  { %v941_v12 = vpop.permute.xlu1 %940  ;;  %v396_v60 = vmul.f32 %v5473_v15, %v395_v58  ;;  %v397_v11 = vmul.f32 %v5486_v53, %v395_v58 }
 0x23d   :  { %v945_v16 = vadd.f32 %v941_v12, %v889_v63  ;;  %v477_v63 = vstv %s4289_s12 }
 0x23e   :  { %2005 = vadd.xlane.f32.xlu0 %v2004_v14  ;;  %v478_v12 = vmul.f32 %v5499_v3, %v477_v63  ;;  %v533_v14 = vstv %s4293_s14  ;;  %v479_v15 = vmul.f32 %v5509_v9, %v477_v63 }
 0x23f   :  { %v979_v31 = vadd.f32 %v977_v17, %v945_v16  ;;  %v1021_v16 = vpop.permute.xlu0 %1020  ;;  %v534_v17 = vmul.f32 %v5499_v3, %v533_v14 }
 0x240   :  { %v1023_v54 = vpop.permute.xlu1 %1022  ;;  %v1026_v3 = vadd.f32 %v1021_v16, %v5785_v7 }
 0x241   :  { %v1027_v24 = vadd.f32 %v1023_v54, %v979_v31  ;;  %v615_v31 = vstv %s4301_s15  ;;  %v535_v54 = vmul.f32 %v5509_v9, %v533_v14 }
 0x242   :  { %v617_v33 = vmul.f32 %v5532_v34, %v615_v31 }
 0x244   :  { %v1079_v61 = vpop.permute.xlu1 %1078 }
 0x245   :  { %v1083_v6 = vadd.f32 %v1079_v61, %v1027_v24  ;;  %v616_v24 = vmul.f32 %v5522_v23, %v615_v31  ;;  %v1389_v31 = vstv %s5860_s20  ;;  %s5993_s20 = sld [smem:[#allocation5 + $0x75]] }
 0x247   :  { %v5796_v0 = vadd.f32 %v1115_v27, %v1083_v6  ;;  %v671_v6 = vstv %s5822_s16  ;;  %s5965_s16 = sld [smem:[#allocation5 + $0x69]] }
 0x248   :  { %v672_v9 = vmul.f32 %v5522_v23, %v671_v6 }
 0x24f   :  { %2019 = vadd.xlane.f32.xlu1 %v2018_v5  ;;  %v753_v5 = vstv %s5828_s17 }
 0x250   :  { %v754_v23 = vmul.f32 %v5549_v20, %v753_v5 }
 0x254   :  { %1766 = vrot.lane.b32.xlu0 %v1762_v50, %s4862_s13 }
 0x258   :  { %1848 = vrot.lane.b32.xlu0 %v1844_v45, %s4861_s11  ;;  %v673_v45 = vmul.f32 %v5532_v34, %v671_v6  ;;  %v810_v34 = vmul.f32 %v5549_v20, %v809_v39  ;;  %v811_v20 = vmul.f32 %v5557_v1, %v809_v39 }
 0x25c   :  { %1850 = vrot.lane.b32.xlu0 %v1845_v48, %s4861_s11 }
 0x260   :  { %1768 = vrot.lane.b32.xlu1 %v1763_v52, %s4862_s13  ;;  %1904 = vrot.lane.b32.xlu0 %v1900_v10, %s4862_s13 }
 0x264   :  { %1906 = vrot.lane.b32.xlu1 %v1901_v59, %s4862_s13  ;;  %344 = vrot.lane.b32.xlu0 %v340_v57, %s4861_s11  ;;  %v755_v59 = vmul.f32 %v5557_v1, %v753_v5 }
 0x268   :  { %346 = vrot.lane.b32.xlu1 %v341_v21, %s4861_s11  ;;  %400 = vrot.lane.b32.xlu0 %v396_v60, %s4862_s13  ;;  %v1252_v21 = vmul.f32 %v5610_v18, %v1251_v22  ;;  %v891_v60 = vstv %s5848_s18  ;;  %s5974_s18 = sld [smem:[#allocation5 + $0x6f]] }
 0x269   :  { %v892_v16 = vmul.f32 %v5529_v2, %v891_v60  ;;  %v893_v1 = vmul.f32 %v5543_v46, %v891_v60 }
 0x26c   :  { %402 = vrot.lane.b32.xlu1 %v397_v11, %s4862_s13  ;;  %482 = vrot.lane.b32.xlu0 %v478_v12, %s4861_s11 }
 0x270   :  { %484 = vrot.lane.b32.xlu1 %v479_v15, %s4861_s11  ;;  %538 = vrot.lane.b32.xlu0 %v534_v17, %s4862_s13  ;;  %v947_v17 = vstv %s5855_s19  ;;  %s5980_s19 = sld [smem:[#allocation5 + $0x72]] }
 0x271   :  { %v948_v6 = vmul.f32 %v5529_v2, %v947_v17 }
 0x272   :  { %v1933_v53 = vpop.xlane.xlu0 %1932 }
 0x273   :  { %v1934_v61 = vrot.slane %v1933_v53, 4 }
 0x274   :  { %540 = vrot.lane.b32.xlu1 %v535_v54, %s4862_s13  ;;  %620 = vrot.lane.b32.xlu0 %v616_v24, %s4861_s11 }
 0x275   :  { %v1935_v27 = vadd.f32 %v1934_v61, %v1933_v53 }
 0x276   :  { %v1077_v29 = vpop.permute.xlu0 %1076 }
 0x277   :  { %v1082_v35 = vadd.f32 %v1077_v29, %v1026_v3  ;;  %v1936_v41 = vrot.slane %v1935_v27, 2 }
 0x278   :  { %622 = vrot.lane.b32.xlu1 %v617_v33, %s4861_s11  ;;  %676 = vrot.lane.b32.xlu0 %v672_v9, %s4862_s13  ;;  %v1390_v33 = vmul.f32 %v5623_v37, %v1389_v31  ;;  %v1029_v9 = vstv %s5866_s21  ;;  %s6004_s21 = sld [smem:[#allocation5 + $0x78]] }
 0x279   :  { %v1116_v7 = vadd.f32 %v1114_v42, %v1082_v35  ;;  %v1937_v50 = vadd.f32 %v1936_v41, %v1935_v27 }
 0x27a   :  { %v1159_v36 = vpop.permute.xlu0 %1158 }
 0x27b   :  { %v1938_v48 = vrot.slane %v1937_v50, 1  ;;  %v1164_v52 = vadd.f32 %v1159_v36, %v1116_v7  ;;  %v949_v7 = vmul.f32 %v5543_v46, %v947_v17  ;;  %v1031_v46 = vmul.f32 %v5554_v44, %v1029_v9 }
 0x27c   :  { %678 = vrot.lane.b32.xlu1 %v673_v45, %s4862_s13  ;;  %758 = vrot.lane.b32.xlu0 %v754_v23, %s4861_s11  ;;  %v1085_v23 = vstv %s5873_s1  ;;  %s6006_s1 = sld [smem:[#allocation5 + $0x8c]] }
 0x27d   :  { %v1939_v10 = vadd.f32 %v1938_v48, %v1937_v50  ;;  %v1030_v50 = vmul.f32 %v5546_v38, %v1029_v9  ;;  %v1527_v48 = vstv %s5878_s3  ;;  %s6008_s3 = sld [smem:[#allocation5 + $0x8f]] }
 0x27e   :  { %v1215_v30 = vpop.permute.xlu0 %1214 }
 0x27f   :  { %v1220_v57 = vadd.f32 %v1215_v30, %v1164_v52  ;;  %v1947_v58 = vpop.xlane.xlu1 %1946  ;;  %4586 = vpush %v1939_v10  ;;  %v1086_v10 = vmul.f32 %v5546_v38, %v1085_v23  ;;  %v1087_v38 = vmul.f32 %v5554_v44, %v1085_v23  ;;  %v1499_v23 = vstv %s4377_s26 }
 0x280   :  { %v1948_v63 = vrot.slane %v1947_v58, 4  ;;  %760 = vrot.lane.b32.xlu1 %v755_v59, %s4861_s11  ;;  %814 = vrot.lane.b32.xlu0 %v810_v34, %s4862_s13  ;;  %v1528_v34 = vmul.f32 %v5636_v49, %v1527_v48 }
 0x281   :  { %v1254_v11 = vadd.f32 %v1252_v21, %v1220_v57  ;;  %v1167_v57 = vstv %s5885_s22  ;;  %v1391_v21 = vmul.f32 %v5628_v43, %v1389_v31  ;;  %s6011_s22 = sld [smem:[#allocation5 + $0x7b]] }
 0x282   :  { %v1949_v12 = vadd.f32 %v1948_v63, %v1947_v58  ;;  %v1297_v14 = vpop.permute.xlu0 %1296 }
 0x283   :  { %v1161_v15 = vpop.permute.xlu1 %1160  ;;  %v1302_v54 = vadd.f32 %v1297_v14, %v1254_v11 }
 0x284   :  { %816 = vrot.lane.b32.xlu1 %v811_v20, %s4862_s13  ;;  %896 = vrot.lane.b32.xlu0 %v892_v16, %s4861_s11  ;;  %v1950_v53 = vrot.slane %v1949_v12, 2  ;;  %v1165_v24 = vadd.f32 %v1161_v15, %v5796_v0  ;;  %v1253_v0 = vmul.f32 %v5615_v25, %v1251_v22  ;;  %v1223_v20 = vstv %s5893_s23  ;;  %s6013_s23 = sld [smem:[#allocation5 + $0x8e]] }
 0x285   :  { %v1665_v16 = vstv %s5898_s7  ;;  %s6023_s7 = sld [smem:[#allocation5 + $0x7e]] }
 0x286   :  { %v1353_v61 = vpop.permute.xlu0 %1352  ;;  %v1951_v3 = vadd.f32 %v1950_v53, %v1949_v12  ;;  %v1168_v12 = vmul.f32 %v5593_v47, %v1167_v57  ;;  %v1169_v53 = vmul.f32 %v5602_v26, %v1167_v57  ;;  %v1803_v57 = vstv %s5965_s16  ;;  %s6063_s16 = sld [smem:[#allocation9]] }
 0x287   :  { %v1358_v27 = vadd.f32 %v1353_v61, %v1302_v54  ;;  %v1217_v29 = vpop.permute.xlu1 %1216  ;;  %v1224_v54 = vmul.f32 %v5593_v47, %v1223_v20  ;;  %v1305_v61 = vstv %s5904_s8 }
 0x288   :  { %v1221_v35 = vadd.f32 %v1217_v29, %v1165_v24  ;;  %898 = vrot.lane.b32.xlu1 %v893_v1, %s4861_s11  ;;  %952 = vrot.lane.b32.xlu0 %v948_v6, %s4862_s13  ;;  %v1952_v42 = vrot.slane %v1951_v3, 1  ;;  %v1666_v1 = vmul.f32 %v5655_v13, %v1665_v16  ;;  %v1306_v47 = vmul.f32 %v5610_v18, %v1305_v61 }
 0x289   :  { %v1392_v5 = vadd.f32 %v1390_v33, %v1358_v27  ;;  %v1225_v33 = vmul.f32 %v5602_v26, %v1223_v20  ;;  %v1667_v26 = vmul.f32 %v5664_v8, %v1665_v16 }
 0x28a   :  { %v1435_v2 = vpop.permute.xlu0 %1434  ;;  %v1255_v41 = vadd.f32 %v1253_v0, %v1221_v35  ;;  %v1953_v36 = vadd.f32 %v1952_v42, %v1951_v3  ;;  %v1529_v3 = vmul.f32 %v5644_v56, %v1527_v48  ;;  %v1361_v35 = vstv %s5912_s24  ;;  %s6038_s24 = sld [smem:[#allocation5 + $0x81]] }
 0x28b   :  { %v1299_v45 = vpop.permute.xlu1 %1298  ;;  %v1440_v39 = vadd.f32 %v1435_v2, %v1392_v5  ;;  %v1307_v42 = vmul.f32 %v5615_v25, %v1305_v61  ;;  %v1362_v5 = vmul.f32 %v5610_v18, %v1361_v35  ;;  %v1500_v48 = vmul.f32 %v5623_v37, %v1499_v23 }
 0x28c   :  { %954 = vrot.lane.b32.xlu1 %v949_v7, %s4862_s13  ;;  %1034 = vrot.lane.b32.xlu0 %v1030_v50, %s4861_s11  ;;  %4588 = vpush %v1953_v36  ;;  %v1303_v22 = vadd.f32 %v1299_v45, %v1255_v41  ;;  %v1443_v41 = vstv %s5921_s25  ;;  %v1363_v50 = vmul.f32 %v5615_v25, %v1361_v35  ;;  %s6048_s25 = sld [smem:[#allocation5 + $0x84]] }
 0x28d   :  { %v1444_v36 = vmul.f32 %v5623_v37, %v1443_v41  ;;  %v1445_v18 = vmul.f32 %v5628_v43, %v1443_v41  ;;  %v1501_v25 = vmul.f32 %v5628_v43, %v1499_v23 }
 0x28e   :  { %v1491_v52 = vpop.permute.xlu0 %1490 }
 0x28f   :  { %v1496_v30 = vadd.f32 %v1491_v52, %v1440_v39  ;;  %v1355_v59 = vpop.permute.xlu1 %1354  ;;  %v1581_v39 = vstv %s4385_s29  ;;  %v1637_v52 = vstv %s4389_s6  ;;  %s6053_s6 = sld [smem:[#allocation5 + $0x87]] }
 0x290   :  { %v1359_v58 = vadd.f32 %v1355_v59, %v1303_v22  ;;  %1036 = vrot.lane.b32.xlu1 %v1031_v46, %s4861_s11  ;;  %1090 = vrot.lane.b32.xlu0 %v1086_v10, %s4862_s13  ;;  %v1582_v22 = vmul.f32 %v5636_v49, %v1581_v39  ;;  %v1583_v46 = vmul.f32 %v5644_v56, %v1581_v39 }
 0x291   :  { %v1530_v60 = vadd.f32 %v1528_v34, %v1496_v30  ;;  %v1638_v10 = vmul.f32 %v5636_v49, %v1637_v52  ;;  %v1639_v37 = vmul.f32 %v5644_v56, %v1637_v52  ;;  %v1719_v30 = vstv %s4397_s0 }
 0x292   :  { %v1573_v63 = vpop.permute.xlu0 %1572  ;;  %v1393_v11 = vadd.f32 %v1391_v21, %v1359_v58  ;;  %v1720_v43 = vmul.f32 %v5655_v13, %v1719_v30  ;;  %v1721_v59 = vmul.f32 %v5664_v8, %v1719_v30 }
 0x293   :  { %v1437_v14 = vpop.permute.xlu1 %1436  ;;  %v1578_v15 = vadd.f32 %v1573_v63, %v1530_v60 }
 0x294   :  { %1092 = vrot.lane.b32.xlu1 %v1087_v38, %s4862_s13  ;;  %1172 = vrot.lane.b32.xlu0 %v1168_v12, %s4861_s11  ;;  %v1441_v17 = vadd.f32 %v1437_v14, %v1393_v11  ;;  %v1804_v11 = vmul.f32 %v5684_v62, %v1803_v57 }
 0x296   :  { %v1629_v31 = vpop.permute.xlu0 %1628 }
 0x297   :  { %v1634_v44 = vadd.f32 %v1629_v31, %v1578_v15  ;;  %v1493_v24 = vpop.permute.xlu1 %1492 }
 0x298   :  { %v1497_v6 = vadd.f32 %v1493_v24, %v1441_v17  ;;  %1174 = vrot.lane.b32.xlu1 %v1169_v53, %s4861_s11  ;;  %1228 = vrot.lane.b32.xlu0 %v1224_v54, %s4862_s13  ;;  %v291_v54 = vstv %s5969_s2  ;;  %v4696_v24 = vld [vmem:[#allocation2] sm:$0xff]  ;;  %s4414_s2 = sld [smem:[#allocation9 + $0x1]] }
 0x299   :  { %v1668_v27 = vadd.f32 %v1666_v1, %v1634_v44  ;;  %v292_v61 = vmul.f32 %v4696_v24, %v291_v54 }
 0x29a   :  { %v1531_v29 = vadd.f32 %v1529_v3, %v1497_v6  ;;  %v269_v6 = vstv %s5971_s5 }
 0x29b   :  { %v1575_v9 = vpop.permute.xlu1 %1574 }
 0x29c   :  { %1230 = vrot.lane.b32.xlu1 %v1225_v33, %s4862_s13  ;;  %1310 = vrot.lane.b32.xlu0 %v1306_v47, %s4861_s11  ;;  %v1579_v0 = vadd.f32 %v1575_v9, %v1531_v29  ;;  %v294_v47 = vadd.f32 %v292_v61, %v269_v6  ;;  %v1805_v9 = vmul.f32 %v5703_v19, %v1803_v57 }
 0x29f   :  { %v1631_v2 = vpop.permute.xlu1 %1630 }
 0x2a0   :  { %v1635_v7 = vadd.f32 %v1631_v2, %v1579_v0  ;;  %1312 = vrot.lane.b32.xlu1 %v1307_v42, %s4861_s11  ;;  %1366 = vrot.lane.b32.xlu0 %v1362_v5, %s4862_s13  ;;  %v429_v5 = vstv %s5974_s18  ;;  %s4415_s18 = sld [smem:[#allocation10 + $0x1]] }
 0x2a2   :  { %v5939_v45 = vadd.f32 %v1667_v26, %v1635_v7 }
 0x2a3   :  { %v1711_v56 = vpop.permute.xlu1 %1710 }
 0x2a4   :  { %1368 = vrot.lane.b32.xlu1 %v1363_v50, %s4862_s13  ;;  %1448 = vrot.lane.b32.xlu0 %v1444_v36, %s4861_s11  ;;  %v1716_v58 = vadd.f32 %v1711_v56, %v1668_v27 }
 0x2a7   :  { %v1713_v53 = vpop.permute.xlu1 %1712 }
 0x2a8   :  { %1450 = vrot.lane.b32.xlu1 %v1445_v18, %s4861_s11  ;;  %1504 = vrot.lane.b32.xlu0 %v1500_v48, %s4862_s13  ;;  %v1717_v3 = vadd.f32 %v1713_v53, %v5939_v45  ;;  %v4697_v45 = vld [vmem:[#allocation2 + $0x1] sm:$0xff]  ;;  %v4700_v53 = vld [vmem:[#allocation2 + $0x9] sm:$0xff] }
 0x2a9   :  { %v430_v18 = vmul.f32 %v4697_v45, %v429_v5  ;;  %v1775_v45 = vstv %s6006_s1 }
 0x2ac   :  { %1506 = vrot.lane.b32.xlu1 %v1501_v25, %s4862_s13  ;;  %1586 = vrot.lane.b32.xlu0 %v1582_v22, %s4861_s11  ;;  %v4698_v25 = vld [vmem:[#allocation2 + $0x8] sm:$0xff] }
 0x2ad   :  { %v293_v22 = vmul.f32 %v4698_v25, %v291_v54  ;;  %v431_v54 = vmul.f32 %v4700_v53, %v429_v5  ;;  %v4703_v25 = vld [vmem:[#allocation2 + $0x19] sm:$0xff]  ;;  %v4708_v53 = vld [vmem:[#allocation2 + $0x21] sm:$0xff] }
 0x2af   :  { %v295_v56 = vadd.f32 %v293_v22, %v269_v6 }
 0x2b0   :  { %1588 = vrot.lane.b32.xlu1 %v1583_v46, %s4861_s11  ;;  %1642 = vrot.lane.b32.xlu0 %v1638_v10, %s4862_s13  ;;  %s4587_s27 = spop %4586 }
 0x2b1   :  { %s5959_s28 = smul.f32 0.001953125, %s4587_s27 }
 0x2b3   :  { %s1957_s30 = smul.f32 %s5959_s28, %s5959_s28 }
 0x2b4   :  { %1644 = vrot.lane.b32.xlu1 %v1639_v37, %s4862_s13 }
 0x2b8   :  { %1724 = vrot.lane.b32.xlu1 %v1720_v43, %s4861_s11 }
 0x2bc   :  { %1726 = vrot.lane.b32.xlu1 %v1721_v59, %s4861_s11 }
 0x2bd   :  { %s4589_s12 = spop %4588 }
 0x2be   :  { %s1956_s14 = smul.f32 0.001953125, %s4589_s12 }
 0x2c0   :  { %s1958_s15 = ssub.f32 %s1956_s14, %s1957_s30 }
 0x2c1   :  { %s6058_s14 = sld [smem:[#allocation5 + $0x8a]] }
 0x2c2   :  { %s1962_s17 = sadd.f32 1e-05, %s1958_s15 }
 0x2c3   :  { %s4405_s15 = sld [smem:[#allocation5 + $0x8d]] }
 0x2c4   :  { %v1963_v49 = vstv %s1962_s17  ;;  %s6069_s17 = sld [smem:[#allocation10]] }
 0x2c5   :  { %4656 = vrsqrt.f32 %v1963_v49 }
 0x2c7   :  { %v2006_v13 = vpop.xlane.xlu0 %2005 }
 0x2c8   :  { %v2007_v34 = vrot.slane %v2006_v13, 4 }
 0x2ca   :  { %v2008_v21 = vadd.f32 %v2007_v34, %v2006_v13  ;;  %v567_v13 = vstv %s5980_s19 }
 0x2cb   :  { %v1767_v60 = vpop.permute.xlu0 %1766 }
 0x2cc   :  { %v1772_v63 = vadd.f32 %v1767_v60, %v1716_v58  ;;  %v2009_v38 = vrot.slane %v2008_v21, 2 }
 0x2ce   :  { %v1806_v12 = vadd.f32 %v1804_v11, %v1772_v63  ;;  %v2010_v14 = vadd.f32 %v2009_v38, %v2008_v21 }
 0x2cf   :  { %v1849_v20 = vpop.permute.xlu0 %1848 }
 0x2d0   :  { %v2011_v16 = vrot.slane %v2010_v14, 1  ;;  %v1854_v27 = vadd.f32 %v1849_v20, %v1806_v12 }
 0x2d2   :  { %v4657_v15 = vpop.eup %4656  ;;  %v2012_v17 = vadd.f32 %v2011_v16, %v2010_v14  ;;  %v4699_v16 = vld [vmem:[#allocation2 + $0x2] sm:$0xff] }
 0x2d3   :  { %4590 = vpush %v4657_v15  ;;  %v1851_v31 = vpop.permute.xlu0 %1850  ;;  %v568_v15 = vmul.f32 %v4699_v16, %v567_v13  ;;  %v1959_v16 = vstv %s5959_s28 }
 0x2d4   :  { %4592 = vpush %v2012_v17 }
 0x2d7   :  { %v1905_v62 = vpop.permute.xlu0 %1904 }
 0x2d8   :  { %v2020_v44 = vpop.xlane.xlu1 %2019  ;;  %v1910_v0 = vadd.f32 %v1905_v62, %v1854_v27 }
 0x2d9   :  { %v2021_v1 = vrot.slane %v2020_v44, 4 }
 0x2da   :  { %v5984_v48 = vsel %vm5585_vm10, %v1910_v0, 0.0  ;;  %v4702_v0 = vld [vmem:[#allocation2 + $0xa] sm:$0xff] }
 0x2db   :  { %v2022_v29 = vadd.f32 %v2021_v1, %v2020_v44  ;;  %v345_v33 = vpop.permute.xlu0 %344  ;;  %v2085_v43 = vmul.f32 %v5984_v48, %v5984_v48  ;;  %v2073_v58 = vsel %vm1928_vm11, %v5984_v48, 0.0  ;;  %v705_v1 = vstv %s5993_s20  ;;  %s6204_s20 = sld [smem:[#allocation12 + $0x4d]] }
 0x2dc   :  { %v1769_v35 = vpop.permute.xlu1 %1768  ;;  %v350_v41 = vadd.f32 %v345_v33, %v294_v47  ;;  %v4701_v47 = vld [vmem:[#allocation2 + $0x18] sm:$0xff] }
 0x2dd   :  { %v1773_v42 = vadd.f32 %v1769_v35, %v1717_v3  ;;  %v2023_v2 = vrot.slane %v2022_v29, 2  ;;  %v2087_v14 = vsel %vm1928_vm11, %v2085_v43, 0.0 }
 0x2df   :  { %v1807_v7 = vadd.f32 %v1805_v9, %v1773_v42  ;;  %v401_v26 = vpop.permute.xlu0 %400  ;;  %v2024_v50 = vadd.f32 %v2023_v2, %v2022_v29  ;;  %v706_v9 = vmul.f32 %v4701_v47, %v705_v1  ;;  %v569_v42 = vmul.f32 %v4702_v0, %v567_v13 }
 0x2e0   :  { %v406_v36 = vadd.f32 %v401_v26, %v350_v41  ;;  %v1907_v23 = vpop.permute.xlu1 %1906  ;;  %v843_v26 = vstv %s6004_s21 }
 0x2e1   :  { %v1855_v39 = vadd.f32 %v1851_v31, %v1807_v7  ;;  %v2025_v52 = vrot.slane %v2024_v50, 1  ;;  %v844_v22 = vmul.f32 %v4703_v25, %v843_v26 }
 0x2e2   :  { %v432_v46 = vadd.f32 %v430_v18, %v406_v36 }
 0x2e3   :  { %v1911_v10 = vadd.f32 %v1907_v23, %v1855_v39  ;;  %v483_v37 = vpop.permute.xlu0 %482  ;;  %v2026_v30 = vadd.f32 %v2025_v52, %v2024_v50 }
 0x2e4   :  { %v347_v59 = vpop.permute.xlu1 %346  ;;  %v488_v57 = vadd.f32 %v483_v37, %v432_v46  ;;  %v4704_v46 = vld [vmem:[#allocation2 + $0x20] sm:$0xff] }
 0x2e5   :  { %v5990_v49 = vsel %vm5585_vm10, %v1911_v10, 0.0  ;;  %4594 = vpush %v2026_v30  ;;  %v351_v60 = vadd.f32 %v347_v59, %v295_v56  ;;  %v707_v10 = vmul.f32 %v4704_v46, %v705_v1  ;;  %v1777_v30 = vmul.f32 %v5664_v8, %v1775_v45  ;;  %v4711_v46 = vld [vmem:[#allocation2 + $0x31] sm:$0xff] }
 0x2e6   :  { %v2086_v34 = vmul.f32 %v5990_v49, %v5990_v49  ;;  %v2074_v21 = vsel %vm1928_vm11, %v5990_v49, 0.0  ;;  %v1913_v56 = vstv %s6008_s3  ;;  %v1960_v1 = vsub.f32 %v5598_v32, %v1959_v16 }
 0x2e7   :  { %v539_v63 = vpop.permute.xlu0 %538  ;;  %v2075_v11 = vadd.f32 %v2074_v21, %v2073_v58  ;;  %v981_v58 = vstv %s6011_s22 }
 0x2e8   :  { %v544_v38 = vadd.f32 %v539_v63, %v488_v57  ;;  %v403_v12 = vpop.permute.xlu1 %402  ;;  %v2088_v20 = vsel %vm1928_vm11, %v2086_v34, 0.0  ;;  %v6019_v34 = vld [vmem:[#allocation2 + $0x49] sm:$0xff]  ;;  %v1857_v63 = vstv %s6013_s23 }
 0x2e9   :  { %v407_v17 = vadd.f32 %v403_v12, %v351_v60  ;;  %2076 = vadd.xlane.f32.xlu0 %v2075_v11  ;;  %v2089_v31 = vadd.f32 %v2088_v20, %v2087_v14  ;;  %v1776_v57 = vmul.f32 %v6019_v34, %v1775_v45  ;;  %v1915_v60 = vmul.f32 %v5703_v19, %v1913_v56  ;;  %v4706_v14 = vld [vmem:[#allocation2 + $0x1a] sm:$0xff] }
 0x2ea   :  { %v570_v62 = vadd.f32 %v568_v15, %v544_v38  ;;  %v982_v20 = vmul.f32 %v4706_v14, %v981_v58  ;;  %v1257_v45 = vstv %s6038_s24  ;;  %s6125_s24 = sld [smem:[#allocation12 + $0x1]] }
 0x2eb   :  { %2090 = vadd.xlane.f32.xlu1 %v2089_v31  ;;  %v621_v44 = vpop.permute.xlu0 %620  ;;  %v433_v24 = vadd.f32 %v431_v54, %v407_v17  ;;  %v6030_v17 = vld [vmem:[#allocation2 + $0x4a] sm:$0xff]  ;;  %v845_v54 = vmul.f32 %v4708_v53, %v843_v26 }
 0x2ec   :  { %v485_v61 = vpop.permute.xlu1 %484  ;;  %v626_v6 = vadd.f32 %v621_v44, %v570_v62  ;;  %v1858_v31 = vmul.f32 %v6030_v17, %v1857_v63 }
 0x2ed   :  { %v489_v3 = vadd.f32 %v485_v61, %v433_v24 }
 0x2ef   :  { %v677_v27 = vpop.permute.xlu0 %676 }
 0x2f0   :  { %v682_v29 = vadd.f32 %v677_v27, %v626_v6  ;;  %v541_v33 = vpop.permute.xlu1 %540  ;;  %v1961_v6 = vsub.f32 %v5591_v28, %v1959_v16  ;;  %v1859_v27 = vmul.f32 %v5703_v19, %v1857_v63  ;;  %v4709_v28 = vld [vmem:[#allocation2 + $0x30] sm:$0xff]  ;;  %v1914_v19 = vmul.f32 %v6030_v17, %v1913_v56 }
 0x2f1   :  { %v545_v35 = vadd.f32 %v541_v33, %v489_v3 }
 0x2f2   :  { %v708_v5 = vadd.f32 %v706_v9, %v682_v29  ;;  %v1119_v29 = vstv %s6023_s7 }
 0x2f3   :  { %v759_v2 = vpop.permute.xlu0 %758  ;;  %v571_v41 = vadd.f32 %v569_v42, %v545_v35 }
 0x2f4   :  { %v623_v7 = vpop.permute.xlu1 %622  ;;  %v764_v50 = vadd.f32 %v759_v2, %v708_v5  ;;  %v1120_v5 = vmul.f32 %v4709_v28, %v1119_v29 }
 0x2f5   :  { %v627_v36 = vadd.f32 %v623_v7, %v571_v41  ;;  %v4710_v41 = vld [vmem:[#allocation2 + $0x22] sm:$0xff] }
 0x2f6   :  { %v983_v7 = vmul.f32 %v4710_v41, %v981_v58  ;;  %v1395_v58 = vstv %s6048_s25  ;;  %s6128_s25 = sld [smem:[#allocation12 + $0x2]] }
 0x2f7   :  { %v815_v23 = vpop.permute.xlu0 %814 }
 0x2f8   :  { %v820_v18 = vadd.f32 %v815_v23, %v764_v50  ;;  %v679_v39 = vpop.permute.xlu1 %678 }
 0x2f9   :  { %v683_v52 = vadd.f32 %v679_v39, %v627_v36 }
 0x2fa   :  { %v846_v37 = vadd.f32 %v844_v22, %v820_v18 }
 0x2fb   :  { %v897_v43 = vpop.permute.xlu0 %896  ;;  %v709_v59 = vadd.f32 %v707_v10, %v683_v52  ;;  %v1258_v10 = vmul.f32 %v4711_v46, %v1257_v45 }
 0x2fc   :  { %v761_v13 = vpop.permute.xlu1 %760  ;;  %1782 = vrot.lane.b32.xlu1 %v1777_v30, %s4862_s13  ;;  %v902_v21 = vadd.f32 %v897_v43, %v846_v37  ;;  %v4712_v30 = vld [vmem:[#allocation2 + $0x38] sm:$0xff] }
 0x2fd   :  { %v765_v11 = vadd.f32 %v761_v13, %v709_v59  ;;  %v1121_v43 = vmul.f32 %v4712_v30, %v1119_v29  ;;  %v4718_v30 = vld [vmem:[#allocation2 + $0x51] sm:$0xff] }
 0x2ff   :  { %1780 = vrot.lane.b32.xlu0 %v1776_v57, %s4862_s13  ;;  %v953_v8 = vpop.permute.xlu0 %952 }
 0x300   :  { %v958_v38 = vadd.f32 %v953_v8, %v902_v21  ;;  %v817_v12 = vpop.permute.xlu1 %816  ;;  %1920 = vrot.lane.b32.xlu1 %v1915_v60, %s4862_s13 }
 0x301   :  { %v821_v15 = vadd.f32 %v817_v12, %v765_v11 }
 0x302   :  { %v984_v62 = vadd.f32 %v982_v20, %v958_v38  ;;  %v4713_v38 = vld [vmem:[#allocation2 + $0x32] sm:$0xff] }
 0x303   :  { %1862 = vrot.lane.b32.xlu0 %v1858_v31, %s4861_s11  ;;  %v1035_v44 = vpop.permute.xlu0 %1034  ;;  %v847_v24 = vadd.f32 %v845_v54, %v821_v15  ;;  %v1396_v12 = vmul.f32 %v4713_v38, %v1395_v58  ;;  %v4714_v20 = vld [vmem:[#allocation2 + $0x39] sm:$0xff] }
 0x304   :  { %v899_v61 = vpop.permute.xlu1 %898  ;;  %s4591_s8 = spop %4590  ;;  %v1040_v33 = vadd.f32 %v1035_v44, %v984_v62  ;;  %v1259_v16 = vmul.f32 %v4714_v20, %v1257_v45  ;;  %v1533_v44 = vstv %s6053_s6  ;;  %v4717_v45 = vld [vmem:[#allocation2 + $0x50] sm:$0xff]  ;;  %s4450_s6 = sld [smem:[#allocation12 + $0x7]] }
 0x305   :  { %v1966_v3 = vstv %s4591_s8  ;;  %v903_v35 = vadd.f32 %v899_v61, %v847_v24  ;;  %s4593_s26 = spop %4592 }
 0x306   :  { %v6040_v47 = vmul.f32 %v1966_v3, %v1960_v1  ;;  %v6042_v9 = vmul.f32 %v1966_v3, %v1961_v6  ;;  %s6050_s29 = smul.f32 0.001953125, %s4593_s26  ;;  %s4438_s26 = sld [smem:[#allocation12 + $0x4]] }
 0x307   :  { %1864 = vrot.lane.b32.xlu0 %v1859_v27, %s4861_s11  ;;  %v1091_v0 = vpop.permute.xlu0 %1090  ;;  %v4715_v27 = vld [vmem:[#allocation2 + $0x48] sm:$0xff] }
 0x308   :  { %v1096_v32 = vadd.f32 %v1091_v0, %v1040_v33  ;;  %v955_v42 = vpop.permute.xlu1 %954  ;;  %s2030_s0 = smul.f32 %s6050_s29, %s6050_s29  ;;  %v1534_v29 = vmul.f32 %v4715_v27, %v1533_v44 }
 0x309   :  { %v959_v2 = vadd.f32 %v955_v42, %v903_v35  ;;  %v4716_v35 = vld [vmem:[#allocation2 + $0x3a] sm:$0xff] }
 0x30a   :  { %v1122_v26 = vadd.f32 %v1120_v5, %v1096_v32  ;;  %v1397_v0 = vmul.f32 %v4716_v35, %v1395_v58 }
 0x30b   :  { %1918 = vrot.lane.b32.xlu0 %v1914_v19, %s4862_s13  ;;  %v1173_v50 = vpop.permute.xlu0 %1172  ;;  %v985_v36 = vadd.f32 %v983_v7, %v959_v2  ;;  %v1671_v2 = vstv %s6058_s14  ;;  %s4451_s14 = sld [smem:[#allocation12 + $0x2b]] }
 0x30c   :  { %v1037_v23 = vpop.permute.xlu1 %1036  ;;  %v1178_v18 = vadd.f32 %v1173_v50, %v1122_v26 }
 0x30d   :  { %v1041_v39 = vadd.f32 %v1037_v23, %v985_v36  ;;  %v1672_v36 = vmul.f32 %v6019_v34, %v1671_v2  ;;  %v1809_v34 = vstv %s4405_s15  ;;  %s4455_s15 = sld [smem:[#allocation12 + $0x2c]] }
 0x30e   :  { %v1810_v38 = vmul.f32 %v6030_v17, %v1809_v34 }
 0x30f   :  { %v1229_v25 = vpop.permute.xlu0 %1228 }
 0x310   :  { %v1234_v22 = vadd.f32 %v1229_v25, %v1178_v18  ;;  %v1093_v52 = vpop.permute.xlu1 %1092  ;;  %v1535_v18 = vmul.f32 %v4717_v45, %v1533_v44 }
 0x311   :  { %v1097_v37 = vadd.f32 %v1093_v52, %v1041_v39 }
 0x312   :  { %v1260_v59 = vadd.f32 %v1258_v10, %v1234_v22 }
 0x313   :  { %v1311_v56 = vpop.permute.xlu0 %1310  ;;  %v1123_v13 = vadd.f32 %v1121_v43, %v1097_v37  ;;  %v1673_v43 = vmul.f32 %v4718_v30, %v1671_v2 }
 0x314   :  { %v1175_v57 = vpop.permute.xlu1 %1174  ;;  %v1316_v21 = vadd.f32 %v1311_v56, %v1260_v59 }
 0x315   :  { %v1179_v60 = vadd.f32 %v1175_v57, %v1123_v13 }
 0x316   :  { %s4595_s27 = spop %4594 }
 0x317   :  { %s2029_s28 = smul.f32 0.001953125, %s4595_s27  ;;  %v1367_v63 = vpop.permute.xlu0 %1366  ;;  %s4427_s27 = sld [smem:[#allocation12 + $0x25]] }
 0x318   :  { %v1372_v11 = vadd.f32 %v1367_v63, %v1316_v21  ;;  %v1231_v8 = vpop.permute.xlu1 %1230 }
 0x319   :  { %s2031_s30 = ssub.f32 %s2029_s28, %s2030_s0  ;;  %v1235_v14 = vadd.f32 %v1231_v8, %v1179_v60 }
 0x31a   :  { %v1398_v15 = vadd.f32 %v1396_v12, %v1372_v11  ;;  %s4454_s0 = sld [smem:[#allocation12 + $0x8]] }
 0x31b   :  { %s2035_s12 = sadd.f32 1e-05, %s2031_s30  ;;  %v1449_v31 = vpop.permute.xlu0 %1448  ;;  %v1261_v53 = vadd.f32 %v1259_v16, %v1235_v14 }
 0x31c   :  { %v1313_v54 = vpop.permute.xlu1 %1312  ;;  %v1454_v24 = vadd.f32 %v1449_v31, %v1398_v15  ;;  %v4719_v31 = vld [vmem:[#allocation2 + $0x52] sm:$0xff]  ;;  %s4431_s28 = sld [smem:[#allocation12 + $0x26]] }
 0x31d   :  { %v2036_v62 = vstv %s2035_s12  ;;  %v1317_v61 = vadd.f32 %v1313_v54, %v1261_v53  ;;  %v1811_v53 = vmul.f32 %v4719_v31, %v1809_v34  ;;  %v6095_v34 = vstv %s7336_s4  ;;  %s4863_s4 = smov 1   ;;  %s4439_s30 = sld [smem:[#allocation12 + $0x28]] }
 0x31e   :  { %4658 = vrsqrt.f32 %v2036_v62  ;;  %s4443_s12 = sld [smem:[#allocation12 + $0x29]] }
 0x31f   :  { %v1505_v1 = vpop.permute.xlu0 %1504 }
 0x320   :  { %v1510_v6 = vadd.f32 %v1505_v1, %v1454_v24  ;;  %v1369_v3 = vpop.permute.xlu1 %1368 }
 0x321   :  { %v1373_v33 = vadd.f32 %v1369_v3, %v1317_v61 }
 0x322   :  { %v1536_v32 = vadd.f32 %v1534_v29, %v1510_v6 }
 0x323   :  { %v1587_v42 = vpop.permute.xlu0 %1586  ;;  %v1399_v28 = vadd.f32 %v1397_v0, %v1373_v33 }
 0x324   :  { %v1451_v5 = vpop.permute.xlu1 %1450  ;;  %v1592_v19 = vadd.f32 %v1587_v42, %v1536_v32 }
 0x325   :  { %v1455_v41 = vadd.f32 %v1451_v5, %v1399_v28 }
 0x327   :  { %v1643_v7 = vpop.permute.xlu0 %1642 }
 0x328   :  { %v1648_v26 = vadd.f32 %v1643_v7, %v1592_v19  ;;  %v1507_v50 = vpop.permute.xlu1 %1506 }
 0x329   :  { %v1511_v23 = vadd.f32 %v1507_v50, %v1455_v41 }
 0x32a   :  { %v1674_v39 = vadd.f32 %v1672_v36, %v1648_v26  ;;  %v2032_v36 = vstv %s6050_s29  ;;  %s4442_s29 = sld [smem:[#allocation12 + $0x5]] }
 0x32b   :  { %v4659_v25 = vpop.eup %4658  ;;  %v1537_v22 = vadd.f32 %v1535_v18, %v1511_v23  ;;  %v2033_v30 = vsub.f32 %v5778_v55, %v2032_v36 }
 0x32c   :  { %v1589_v52 = vpop.permute.xlu1 %1588  ;;  %4596 = vpush %v4659_v25 }
 0x32d   :  { %v1593_v46 = vadd.f32 %v1589_v52, %v1537_v22  ;;  %v2034_v52 = vsub.f32 %v5773_v40, %v2032_v36  ;;  %v2304_v36 = vstv %s6128_s25 }
 0x330   :  { %v1645_v10 = vpop.permute.xlu1 %1644 }
 0x331   :  { %v1649_v37 = vadd.f32 %v1645_v10, %v1593_v46 }
 0x333   :  { %v1675_v59 = vadd.f32 %v1673_v43, %v1649_v37  ;;  %v1974_v37 = vstv %s6069_s17  ;;  %v2043_v43 = vstv %s4414_s2  ;;  %s6188_s17 = sld [smem:[#allocation12 + $0x4a]] }
 0x334   :  { %v1725_v56 = vpop.permute.xlu1 %1724  ;;  %s6194_s2 = sld [smem:[#allocation12 + $0x4c]] }
 0x335   :  { %v1730_v60 = vadd.f32 %v1725_v56, %v1674_v39  ;;  %v1970_v39 = vstv %s6063_s16  ;;  %s4428_s16 = sld [smem:[#allocation12 + $0x49]] }
 0x336   :  { %v1972_v46 = vmul.f32 %v1970_v39, %v6042_v9 }
 0x338   :  { %v1727_v13 = vpop.permute.xlu1 %1726 }
 0x339   :  { %v1731_v12 = vadd.f32 %v1727_v13, %v1675_v59  ;;  %v1971_v59 = vmul.f32 %v1970_v39, %v6040_v47  ;;  %v1976_v13 = vadd.f32 %v1974_v37, %v1972_v46  ;;  %v2386_v39 = vstv %s4438_s26  ;;  %s4462_s26 = sld [smem:[#allocation12 + $0xa]] }
 0x33a   :  { %v2442_v46 = vstv %s4442_s29  ;;  %s4466_s29 = sld [smem:[#allocation12 + $0xb]] }
 0x33b   :  { %v1975_v40 = vadd.f32 %v1974_v37, %v1971_v59  ;;  %v1981_v9 = vmul.f32 %v6095_v34, %v1976_v13  ;;  %vm1978_vm12 = vcmp.gt.f32.partialorder %v1976_v13, 0.0 }
 0x33d   :  { %v1980_v55 = vmul.f32 %v6095_v34, %v1975_v40  ;;  %v1983_v47 = vsel %vm1978_vm12, %v1976_v13, %v1981_v9  ;;  %vm1977_vm14 = vcmp.gt.f32.partialorder %v1975_v40, 0.0  ;;  %vm4221_vm12 = vcmask 917248  }
 0x35d   :  { %s4597_s5 = spop %4596 }
 0x35e   :  { %v2039_v25 = vstv %s4597_s5  ;;  %s6198_s5 = sld [smem:[#allocation9 + $0x2]] }
 0x35f   :  { %v2041_v10 = vmul.f32 %v2039_v25, %v2034_v52  ;;  %v2040_v56 = vmul.f32 %v2039_v25, %v2033_v30 }
 0x372   :  { %v2077_v57 = vpop.xlane.xlu0 %2076 }
 0x373   :  { %v2078_v58 = vrot.slane %v2077_v57, 4 }
 0x374   :  { %v2091_v21 = vpop.xlane.xlu1 %2090 }
 0x375   :  { %v2079_v63 = vadd.f32 %v2078_v58, %v2077_v57  ;;  %v2092_v11 = vrot.slane %v2091_v21, 4  ;;  %v2045_v57 = vmul.f32 %v2043_v43, %v2041_v10  ;;  %v2047_v58 = vstv %s4415_s18 }
 0x376   :  { %v1781_v8 = vpop.permute.xlu0 %1780 }
 0x377   :  { %v2093_v14 = vadd.f32 %v2092_v11, %v2091_v21  ;;  %v1786_v20 = vadd.f32 %v1781_v8, %v1730_v60  ;;  %v2080_v16 = vrot.slane %v2079_v63, 2  ;;  %v2044_v21 = vmul.f32 %v2043_v43, %v2040_v56 }
 0x378   :  { %v1783_v15 = vpop.permute.xlu1 %1782  ;;  %v2049_v60 = vadd.f32 %v2047_v58, %v2045_v57  ;;  %v1985_v8 = vsel %vm5585_vm10, %v1983_v47, 0.0  ;;  %v2524_v43 = vstv %s4450_s6  ;;  %v2580_v57 = vstv %s4454_s0  ;;  %s4474_s6 = sld [smem:[#allocation12 + $0xd]] }
 0x379   :  { %v1787_v54 = vadd.f32 %v1783_v15, %v1731_v12  ;;  %v1812_v62 = vadd.f32 %v1810_v38, %v1786_v20  ;;  %v2081_v44 = vadd.f32 %v2080_v16, %v2079_v63  ;;  %v2094_v24 = vrot.slane %v2093_v14, 2  ;;  %s4478_s0 = sld [smem:[#allocation12 + $0xe]] }
 0x37a   :  { %v1863_v61 = vpop.permute.xlu0 %1862  ;;  %v2048_v63 = vadd.f32 %v2047_v58, %v2044_v21  ;;  %v2053_v11 = vmul.f32 %v2049_v60, %v6095_v34  ;;  %vm2051_vm15 = vcmp.gt.f32.partialorder %v2049_v60, 0.0  ;;  %v1982_v38 = vsel %vm1977_vm14, %v1975_v40, %v1980_v55 }
 0x37b   :  { %v1813_v1 = vadd.f32 %v1811_v53, %v1787_v54  ;;  %v2082_v6 = vrot.slane %v2081_v44, 1  ;;  %v2095_v3 = vadd.f32 %v2094_v24, %v2093_v14  ;;  %v1868_v32 = vadd.f32 %v1863_v61, %v1812_v62 }
 0x37c   :  { %v1921_v0 = vpop.permute.xlu1 %1920  ;;  %v2052_v12 = vmul.f32 %v2048_v63, %v6095_v34  ;;  %v2055_v14 = vsel %vm2051_vm15, %v2049_v60, %v2053_v11  ;;  %vm2050_vm0 = vcmp.gt.f32.partialorder %v2048_v63, 0.0  ;;  %v1984_v20 = vsel %vm5585_vm10, %v1982_v38, 0.0 }
 0x37d   :  { %v2083_v27 = vadd.f32 %v2082_v6, %v2081_v44  ;;  %v2096_v29 = vrot.slane %v2095_v3, 1  ;;  %v2057_v4 = vsel %vm5585_vm10, %v2055_v14, 0.0  ;;  %v2262_v21 = vstv %s4427_s27  ;;  %s4486_s27 = sld [smem:[#allocation12 + $0x10]] }
 0x37e   :  { %v1865_v33 = vpop.permute.xlu0 %1864  ;;  %v2054_v16 = vsel %vm2050_vm0, %v2048_v63, %v2052_v12  ;;  %v2318_v63 = vstv %s4431_s28  ;;  %v2400_v11 = vstv %s4439_s30  ;;  %v2456_v12 = vstv %s4443_s12  ;;  %s4490_s28 = sld [smem:[#allocation12 + $0x11]] }
 0x37f   :  { %v1869_v35 = vadd.f32 %v1865_v33, %v1813_v1  ;;  %4598 = vpush %v2083_v27  ;;  %v2097_v17 = vadd.f32 %v2096_v29, %v2095_v3  ;;  %v2056_v15 = vsel %vm5585_vm10, %v2054_v16, 0.0  ;;  %s4463_s30 = sld [smem:[#allocation12 + $0x2e]] }
 0x380   :  { %s4467_s12 = sld [smem:[#allocation12 + $0x2f]] }
 0x381   :  { %v1925_v42 = vadd.f32 %v1921_v0, %v1869_v35  ;;  %4600 = vpush %v2097_v17 }
 0x382   :  { %v1919_v28 = vpop.permute.xlu0 %1918 }
 0x383   :  { %v6067_v5 = vsel %vm5585_vm10, %v1925_v42, 0.0  ;;  %v1924_v2 = vadd.f32 %v1919_v28, %v1868_v32  ;;  %v2248_v42 = vstv %s6125_s24  ;;  %s6226_s24 = sld [smem:[#allocation12 + $0x50]] }
 0x384   :  { %v2157_v19 = vmul.f32 %v6067_v5, %v6067_v5  ;;  %v2145_v50 = vsel %vm1928_vm11, %v6067_v5, 0.0 }
 0x385   :  { %v6075_v41 = vsel %vm5585_vm10, %v1924_v2, 0.0 }
 0x386   :  { %v2156_v7 = vmul.f32 %v6075_v41, %v6075_v41  ;;  %v2144_v26 = vsel %vm1928_vm11, %v6075_v41, 0.0  ;;  %v2159_v18 = vsel %vm1928_vm11, %v2157_v19, 0.0 }
 0x387   :  { %v2146_v23 = vadd.f32 %v2145_v50, %v2144_v26 }
 0x388   :  { %v2158_v45 = vsel %vm1928_vm11, %v2156_v7, 0.0 }
 0x389   :  { %2147 = vadd.xlane.f32.xlu0 %v2146_v23  ;;  %v2160_v22 = vadd.f32 %v2159_v18, %v2158_v45 }
 0x38b   :  { %2161 = vadd.xlane.f32.xlu1 %v2160_v22 }
 0x39c   :  { %1990 = vrot.lane.b32.xlu1 %v1985_v8, %s4863_s4 }
 0x39f   :  { %1988 = vrot.lane.b32.xlu0 %v1984_v20, %s4863_s4 }
 0x3a0   :  { %2062 = vrot.lane.b32.xlu1 %v2057_v4, %s4863_s4  ;;  %v2538_v4 = vstv %s4451_s14  ;;  %s4475_s14 = sld [smem:[#allocation12 + $0x31]] }
 0x3a3   :  { %2060 = vrot.lane.b32.xlu0 %v2056_v15, %s4863_s4 }
 0x3b0   :  { %s4599_s21 = spop %4598 }
 0x3b1   :  { %s6121_s1 = smul.f32 0.001953125, %s4599_s21 }
 0x3b2   :  { %s4601_s3 = spop %4600 }
 0x3b3   :  { %s2101_s22 = smul.f32 %s6121_s1, %s6121_s1 }
 0x3b4   :  { %s2100_s23 = smul.f32 0.001953125, %s4601_s3  ;;  %s6210_s3 = sld [smem:[#allocation10 + $0x2]] }
 0x3b6   :  { %s2102_s7 = ssub.f32 %s2100_s23, %s2101_s22 }
 0x3b8   :  { %s2106_s8 = sadd.f32 1e-05, %s2102_s7 }
 0x3b9   :  { %s6218_s7 = sld [smem:[#allocation12 + $0x4f]] }
 0x3ba   :  { %v2107_v31 = vstv %s2106_s8 }
 0x3bb   :  { %4660 = vrsqrt.f32 %v2107_v31  ;;  %v2594_v31 = vstv %s4455_s15  ;;  %s4479_s15 = sld [smem:[#allocation12 + $0x32]] }
 0x3c8   :  { %v4661_v53 = vpop.eup %4660 }
 0x3c9   :  { %4602 = vpush %v4661_v53 }
 0x3fa   :  { %s4603_s18 = spop %4602 }
 0x412   :  { %v2148_v54 = vpop.xlane.xlu0 %2147 }
 0x413   :  { %v2149_v62 = vrot.slane %v2148_v54, 4 }
 0x414   :  { %v2162_v44 = vpop.xlane.xlu1 %2161 }
 0x415   :  { %v2150_v24 = vadd.f32 %v2149_v62, %v2148_v54  ;;  %v2163_v61 = vrot.slane %v2162_v44, 4  ;;  %v2276_v62 = vstv %s4428_s16  ;;  %s2223_s16 = sld [smem:[#allocation12]] }
 0x416   :  { %v1989_v1 = vpop.permute.xlu0 %1988 }
 0x417   :  { %v2164_v6 = vadd.f32 %v2163_v61, %v2162_v44  ;;  %1995 = vst.msk [vmem:[#allocation3 + $0x1] sm:$0xff] %vm1994_vm1, %v1989_v1  ;;  %v2151_v3 = vrot.slane %v2150_v24, 2  ;;  %v2103_v61 = vstv %s6121_s1  ;;  %v2332_v1 = vstv %s6188_s17  ;;  %s4487_s17 = sld [smem:[#allocation12 + $0x34]] }
 0x418   :  { %v1991_v27 = vpop.permute.xlu1 %1990 }
 0x419   :  { %1996 = vst.msk [vmem:[#allocation3 + $0x9] sm:$0xff] %vm1994_vm1, %v1991_v27  ;;  %v2152_v29 = vadd.f32 %v2151_v3, %v2150_v24  ;;  %v2165_v33 = vrot.slane %v2164_v6, 2  ;;  %v2110_v3 = vstv %s4603_s18  ;;  %v2104_v27 = vsub.f32 %v5984_v48, %v2103_v61  ;;  %s6304_s18 = sld [smem:[#allocation12 + $0x3]] }
 0x41a   :  { %v2061_v35 = vpop.permute.xlu0 %2060  ;;  %v2114_v48 = vstv %s6198_s5  ;;  %s6300_s5 = sld [smem:[#allocation12 + $0x35]] }
 0x41b   :  { %2067 = vst.msk [vmem:[#allocation3 + $0x19] sm:$0xff] %vm1994_vm1, %v2061_v35  ;;  %v2153_v17 = vrot.slane %v2152_v29, 1  ;;  %v2166_v0 = vadd.f32 %v2165_v33, %v2164_v6  ;;  %v2414_v33 = vstv %s6194_s2  ;;  %v2105_v35 = vsub.f32 %v5990_v49, %v2103_v61  ;;  %s2213_s2 = sld [smem:[#allocation13]] }
 0x41c   :  { %v2063_v32 = vpop.permute.xlu1 %2062 }
 0x41d   :  { %2068 = vst.msk [vmem:[#allocation3 + $0x21] sm:$0xff] %vm1994_vm1, %v2063_v32  ;;  %v2154_v28 = vadd.f32 %v2153_v17, %v2152_v29  ;;  %v2167_v2 = vrot.slane %v2166_v0, 1  ;;  %v2111_v17 = vmul.f32 %v2110_v3, %v2104_v27  ;;  %v2112_v32 = vmul.f32 %v2110_v3, %v2105_v35 }
 0x41e   :  { %v6134_v19 = vld [vmem:[#allocation3] sm:$0xff] }
 0x41f   :  { %4604 = vpush %v2154_v28  ;;  %v2168_v7 = vadd.f32 %v2167_v2, %v2166_v0  ;;  %v2249_v26 = vmul.f32 %v2248_v42, %v6134_v19  ;;  %v2305_v45 = vmul.f32 %v2304_v36, %v6134_v19  ;;  %v6144_v18 = vld [vmem:[#allocation3 + $0x1] sm:$0xff]  ;;  %v2263_v9 = vmul.f32 %v2262_v21, %v6134_v19 }
 0x420   :  { %v6137_v50 = vld [vmem:[#allocation3 + $0x8] sm:$0xff]  ;;  %v2387_v52 = vmul.f32 %v2386_v39, %v6144_v18  ;;  %v2443_v37 = vmul.f32 %v2442_v46, %v6144_v18  ;;  %v2319_v47 = vmul.f32 %v2318_v63, %v6134_v19  ;;  %v2401_v38 = vmul.f32 %v2400_v11, %v6144_v18 }
 0x421   :  { %4606 = vpush %v2168_v7  ;;  %2253 = vrot.lane.b32.xlu0 %v2249_v26, %s4861_s11  ;;  %v2250_v23 = vmul.f32 %v2248_v42, %v6137_v50  ;;  %v2306_v25 = vmul.f32 %v2304_v36, %v6137_v50  ;;  %v6148_v22 = vld [vmem:[#allocation3 + $0x9] sm:$0xff]  ;;  %v2264_v55 = vmul.f32 %v2262_v21, %v6137_v50  ;;  %v2470_v28 = vstv %s6204_s20  ;;  %s6317_s20 = sld [smem:[#allocation12 + $0x53]] }
 0x422   :  { %v2388_v10 = vmul.f32 %v2386_v39, %v6148_v22  ;;  %v6156_v30 = vld [vmem:[#allocation3 + $0x2] sm:$0xff]  ;;  %v2444_v59 = vmul.f32 %v2442_v46, %v6148_v22  ;;  %v6160_v56 = vld [vmem:[#allocation3 + $0xa] sm:$0xff]  ;;  %v2320_v8 = vmul.f32 %v2318_v63, %v6137_v50  ;;  %v2402_v14 = vmul.f32 %v2400_v11, %v6148_v22 }
 0x423   :  { %2255 = vrot.lane.b32.xlu1 %v2250_v23, %s4861_s11  ;;  %v2525_v13 = vmul.f32 %v2524_v43, %v6156_v30  ;;  %v2526_v58 = vmul.f32 %v2524_v43, %v6160_v56  ;;  %v2581_v40 = vmul.f32 %v2580_v57, %v6156_v30  ;;  %v2582_v60 = vmul.f32 %v2580_v57, %v6160_v56 }
 0x424   :  { %v2457_v20 = vmul.f32 %v2456_v12, %v6144_v18  ;;  %v2458_v16 = vmul.f32 %v2456_v12, %v6148_v22  ;;  %v2539_v15 = vmul.f32 %v2538_v4, %v6156_v30  ;;  %v2540_v53 = vmul.f32 %v2538_v4, %v6160_v56  ;;  %v6280_v61 = vld [vmem:[#allocation3 + $0x22] sm:$0xff] }
 0x425   :  { %2309 = vrot.lane.b32.xlu0 %v2305_v45, %s4862_s13  ;;  %v2595_v54 = vmul.f32 %v2594_v31, %v6156_v30  ;;  %v2596_v44 = vmul.f32 %v2594_v31, %v6160_v56  ;;  %v2277_v24 = vmul.f32 %v2276_v62, %v6134_v19  ;;  %v2278_v6 = vmul.f32 %v2276_v62, %v6137_v50  ;;  %v6276_v62 = vld [vmem:[#allocation3 + $0x1a] sm:$0xff] }
 0x426   :  { %v2333_v29 = vmul.f32 %v2332_v1, %v6134_v19  ;;  %v2334_v0 = vmul.f32 %v2332_v1, %v6137_v50  ;;  %v2415_v42 = vmul.f32 %v2414_v33, %v6144_v18  ;;  %v2115_v2 = vmul.f32 %v2114_v48, %v2111_v17 }
 0x427   :  { %2311 = vrot.lane.b32.xlu1 %v2306_v25, %s4862_s13  ;;  %v2416_v49 = vmul.f32 %v2414_v33, %v6148_v22  ;;  %v2118_v7 = vstv %s6210_s3  ;;  %v2116_v36 = vmul.f32 %v2114_v48, %v2112_v32  ;;  %v2471_v23 = vmul.f32 %v2470_v28, %v6144_v18  ;;  %s6322_s3 = sld [smem:[#allocation12 + $0x6]] }
 0x428   :  { %v2552_v45 = vstv %s6218_s7  ;;  %v2119_v39 = vadd.f32 %v2118_v7, %v2115_v2  ;;  %v2472_v25 = vmul.f32 %v2470_v28, %v6148_v22  ;;  %v2662_v63 = vstv %s4462_s26  ;;  %s6339_s7 = sld [smem:[#allocation12 + $0x56]] }
 0x429   :  { %2391 = vrot.lane.b32.xlu0 %v2387_v52, %s4861_s11  ;;  %v2120_v52 = vadd.f32 %v2118_v7, %v2116_v36  ;;  %v2553_v46 = vmul.f32 %v2552_v45, %v6156_v30  ;;  %v2856_v31 = vstv %s4478_s0  ;;  %v2732_v17 = vstv %s4467_s12  ;;  %s6363_s26 = sld [smem:[#allocation13 + $0x1]] }
 0x42a   :  { %v2123_v43 = vmul.f32 %v2119_v39, %v6095_v34  ;;  %vm2121_vm2 = vcmp.gt.f32.partialorder %v2119_v39, 0.0  ;;  %v2814_v32 = vstv %s4475_s14  ;;  %v2870_v2 = vstv %s4479_s15  ;;  %s6400_s0 = sld [smem:[#allocation12 + $0x2a]] }
 0x42b   :  { %2393 = vrot.lane.b32.xlu1 %v2388_v10, %s4861_s11  ;;  %v2608_v10 = vstv %s6226_s24  ;;  %vm2122_vm3 = vcmp.gt.f32.partialorder %v2120_v52, 0.0  ;;  %v2224_v7 = vstv %s2223_s16  ;;  %s6348_s24 = sld [smem:[#allocation12 + $0x9]] }
 0x42c   :  { %v2610_v57 = vmul.f32 %v2608_v10, %v6160_v56  ;;  %v2225_v36 = vmul.f32 %v2224_v7, %v6134_v19  ;;  %s4436_s12 = sld [smem:[#allocation12 + $0x4b]] }
 0x42d   :  { %2447 = vrot.lane.b32.xlu0 %v2443_v37, %s4862_s13  ;;  %v2554_v37 = vmul.f32 %v2552_v45, %v6160_v56  ;;  %s4460_s14 = sld [smem:[#allocation12 + $0x51]] }
 0x42e   :  { %s6434_s15 = sld [smem:[#allocation12 + $0xc]] }
 0x42f   :  { %2449 = vrot.lane.b32.xlu1 %v2444_v59, %s4862_s13  ;;  %v2609_v59 = vmul.f32 %v2608_v10, %v6156_v30  ;;  %s4498_s16 = sld [smem:[#allocation12 + $0x13]] }
 0x431   :  { %2529 = vrot.lane.b32.xlu0 %v2525_v13, %s4861_s11  ;;  %v2124_v13 = vmul.f32 %v2120_v52, %v6095_v34 }
 0x433   :  { %2531 = vrot.lane.b32.xlu1 %v2526_v58, %s4861_s11  ;;  %v2125_v58 = vsel %vm2121_vm2, %v2119_v39, %v2123_v43  ;;  %v2214_v39 = vstv %s2213_s2  ;;  %s6446_s2 = sld [smem:[#allocation12 + $0xf]] }
 0x434   :  { %v2227_v10 = vadd.f32 %v2225_v36, %v2214_v39 }
 0x435   :  { %2585 = vrot.lane.b32.xlu0 %v2581_v40, %s4862_s13  ;;  %v2126_v40 = vsel %vm2122_vm3, %v2120_v52, %v2124_v13  ;;  %v2362_v13 = vstv %s6304_s18  ;;  %s6460_s18 = sld [smem:[#allocation12 + $0x17]] }
 0x437   :  { %2587 = vrot.lane.b32.xlu1 %v2582_v60, %s4862_s13  ;;  %v6249_v60 = vld [vmem:[#allocation3 + $0x18] sm:$0xff] }
 0x438   :  { %v2663_v11 = vmul.f32 %v2662_v63, %v6249_v60  ;;  %v2733_v48 = vmul.f32 %v2732_v17, %v6249_v60 }
 0x439   :  { %2267 = vrot.lane.b32.xlu0 %v2263_v9, %s4861_s11  ;;  %v2127_v9 = vsel %vm5585_vm10, %v2125_v58, 0.0 }
 0x43b   :  { %2269 = vrot.lane.b32.xlu1 %v2264_v55, %s4861_s11  ;;  %v6254_v55 = vld [vmem:[#allocation3 + $0x20] sm:$0xff] }
 0x43d   :  { %2323 = vrot.lane.b32.xlu0 %v2319_v47, %s4862_s13  ;;  %v2128_v47 = vsel %vm5585_vm10, %v2126_v40, 0.0 }
 0x43f   :  { %2325 = vrot.lane.b32.xlu1 %v2320_v8, %s4862_s13  ;;  %v2718_v8 = vstv %s4466_s29  ;;  %s6370_s29 = sld [smem:[#allocation12 + $0x59]] }
 0x440   :  { %v2719_v12 = vmul.f32 %v2718_v8, %v6249_v60  ;;  %v2720_v4 = vmul.f32 %v2718_v8, %v6254_v55 }
 0x441   :  { %2405 = vrot.lane.b32.xlu0 %v2401_v38, %s4861_s11  ;;  %v2664_v38 = vmul.f32 %v2662_v63, %v6254_v55 }
 0x443   :  { %2407 = vrot.lane.b32.xlu1 %v2402_v14, %s4861_s11  ;;  %v6264_v14 = vld [vmem:[#allocation3 + $0x19] sm:$0xff] }
 0x444   :  { %v2815_v28 = vmul.f32 %v2814_v32, %v6264_v14 }
 0x445   :  { %2461 = vrot.lane.b32.xlu0 %v2457_v20, %s4862_s13  ;;  %v2800_v20 = vstv %s4474_s6  ;;  %s6375_s6 = sld [smem:[#allocation12 + $0x27]] }
 0x447   :  { %2463 = vrot.lane.b32.xlu1 %v2458_v16, %s4862_s13  ;;  %v6268_v16 = vld [vmem:[#allocation3 + $0x21] sm:$0xff] }
 0x448   :  { %v2872_v45 = vmul.f32 %v2870_v2, %v6268_v16 }
 0x449   :  { %2543 = vrot.lane.b32.xlu0 %v2539_v15, %s4861_s11  ;;  %v2801_v15 = vmul.f32 %v2800_v20, %v6264_v14 }
 0x44b   :  { %2545 = vrot.lane.b32.xlu1 %v2540_v53, %s4861_s11  ;;  %v2802_v53 = vmul.f32 %v2800_v20, %v6268_v16 }
 0x44d   :  { %2599 = vrot.lane.b32.xlu0 %v2595_v54, %s4862_s13  ;;  %v2857_v54 = vmul.f32 %v2856_v31, %v6264_v14 }
 0x44f   :  { %2601 = vrot.lane.b32.xlu1 %v2596_v44, %s4862_s13  ;;  %v2938_v44 = vstv %s4486_s27  ;;  %s6412_s27 = sld [smem:[#allocation12 + $0x48]] }
 0x450   :  { %s4605_s19 = spop %4604  ;;  %v2939_v1 = vmul.f32 %v2938_v44, %v6276_v62  ;;  %v2940_v3 = vmul.f32 %v2938_v44, %v6280_v61  ;;  %v2746_v44 = vstv %s6317_s20  ;;  %s6473_s20 = sld [smem:[#allocation12 + $0x12]] }
 0x451   :  { %s6206_s21 = smul.f32 0.001953125, %s4605_s19  ;;  %2281 = vrot.lane.b32.xlu0 %v2277_v24, %s4861_s11  ;;  %v2858_v24 = vmul.f32 %v2856_v31, %v6268_v16  ;;  %s6309_s19 = sld [smem:[#allocation12 + $0x52]] }
 0x452   :  { %s4607_s22 = spop %4606 }
 0x453   :  { %s2172_s1 = smul.f32 %s6206_s21, %s6206_s21  ;;  %2283 = vrot.lane.b32.xlu1 %v2278_v6, %s4861_s11  ;;  %v2994_v6 = vstv %s4490_s28  ;;  %s4459_s28 = sld [smem:[#allocation12 + $0x2d]] }
 0x454   :  { %s2171_s23 = smul.f32 0.001953125, %s4607_s22  ;;  %v2995_v27 = vmul.f32 %v2994_v6, %v6276_v62  ;;  %v2996_v33 = vmul.f32 %v2994_v6, %v6280_v61  ;;  %s6328_s22 = sld [smem:[#allocation12 + $0x55]]  ;;  %v2500_v6 = vstv %s6322_s3 }
 0x455   :  { %2337 = vrot.lane.b32.xlu0 %v2333_v29, %s4862_s13  ;;  %v2676_v29 = vstv %s4463_s30  ;;  %v2502_v36 = vmul.f32 %v2500_v6, %v6160_v56  ;;  %s4421_s30 = sld [smem:[#allocation13 + $0x2]] }
 0x456   :  { %s2173_s8 = ssub.f32 %s2171_s23, %s2172_s1  ;;  %v2677_v35 = vmul.f32 %v2676_v29, %v6249_v60 }
 0x457   :  { %2339 = vrot.lane.b32.xlu1 %v2334_v0, %s4862_s13  ;;  %v2678_v0 = vmul.f32 %v2676_v29, %v6254_v55  ;;  %s6332_s1 = sld [smem:[#allocation9 + $0x3]] }
 0x458   :  { %s2177_s25 = sadd.f32 1e-05, %s2173_s8 }
 0x459   :  { %2419 = vrot.lane.b32.xlu0 %v2415_v42, %s4861_s11  ;;  %v2734_v42 = vmul.f32 %v2732_v17, %v6254_v55  ;;  %s6343_s8 = sld [smem:[#allocation12 + $0x24]] }
 0x45a   :  { %v2178_v26 = vstv %s2177_s25  ;;  %s6351_s25 = sld [smem:[#allocation10 + $0x3]] }
 0x45b   :  { %4662 = vrsqrt.f32 %v2178_v26  ;;  %2421 = vrot.lane.b32.xlu1 %v2416_v49, %s4861_s11  ;;  %v2816_v49 = vmul.f32 %v2814_v32, %v6268_v16  ;;  %v2871_v26 = vmul.f32 %v2870_v2, %v6264_v14  ;;  %v2828_v32 = vstv %s6328_s22  ;;  %s6483_s3 = sld [smem:[#allocation12 + $0x1a]] }
 0x45c   :  { %s6490_s22 = sld [smem:[#allocation12 + $0x30]] }
 0x45d   :  { %2475 = vrot.lane.b32.xlu0 %v2471_v23, %s4862_s13  ;;  %v2952_v23 = vstv %s4487_s17  ;;  %s6443_s17 = sld [smem:[#allocation12 + $0x14]] }
 0x45f   :  { %2477 = vrot.lane.b32.xlu1 %v2472_v25, %s4862_s13  ;;  %v2226_v25 = vmul.f32 %v2224_v7, %v6137_v50 }
 0x461   :  { %2557 = vrot.lane.b32.xlu0 %v2553_v46, %s4861_s11  ;;  %v2953_v46 = vmul.f32 %v2952_v23, %v6276_v62  ;;  %v2228_v58 = vadd.f32 %v2226_v25, %v2214_v39  ;;  %v2884_v25 = vstv %s6339_s7  ;;  %s6515_s7 = sld [smem:[#allocation12 + $0x33]] }
 0x463   :  { %2559 = vrot.lane.b32.xlu1 %v2554_v37, %s4861_s11  ;;  %v3008_v37 = vstv %s6300_s5  ;;  %s6449_s5 = sld [smem:[#allocation12 + $0x16]] }
 0x465   :  { %2613 = vrot.lane.b32.xlu0 %v2609_v59, %s4862_s13  ;;  %v2954_v59 = vmul.f32 %v2952_v23, %v6280_v61 }
 0x467   :  { %2615 = vrot.lane.b32.xlu1 %v2610_v57, %s4862_s13 }
 0x468   :  { %v4663_v21 = vpop.eup %4662 }
 0x469   :  { %4608 = vpush %v4663_v21  ;;  %2131 = vrot.lane.b32.xlu0 %v2127_v9, %s4863_s4  ;;  %v3009_v21 = vmul.f32 %v3008_v37, %v6276_v62 }
 0x46b   :  { %2133 = vrot.lane.b32.xlu1 %v2128_v47, %s4863_s4  ;;  %v2363_v47 = vmul.f32 %v2362_v13, %v6144_v18 }
 0x46d   :  { %2667 = vrot.lane.b32.xlu0 %v2663_v11, %s4861_s11  ;;  %v2690_v11 = vstv %s6309_s19  ;;  %s6467_s19 = sld [smem:[#allocation12 + $0x19]] }
 0x46e   :  { %v2691_v31 = vmul.f32 %v2690_v11, %v6249_v60 }
 0x46f   :  { %2669 = vrot.lane.b32.xlu1 %v2664_v38, %s4861_s11  ;;  %v3010_v38 = vmul.f32 %v3008_v37, %v6280_v61  ;;  %v2230_v37 = vstv %s6343_s8  ;;  %s6521_s8 = sld [smem:[#allocation12 + $0x3a]] }
 0x471   :  { %2723 = vrot.lane.b32.xlu0 %v2719_v12, %s4862_s13 }
 0x473   :  { %2725 = vrot.lane.b32.xlu1 %v2720_v4, %s4862_s13  ;;  %v2364_v4 = vmul.f32 %v2362_v13, %v6148_v22 }
 0x475   :  { %2805 = vrot.lane.b32.xlu0 %v2801_v15, %s4861_s11 }
 0x477   :  { %2807 = vrot.lane.b32.xlu1 %v2802_v53, %s4861_s11  ;;  %v2174_v53 = vstv %s6206_s21  ;;  %s6356_s21 = sld [smem:[#allocation12 + $0x58]] }
 0x478   :  { %v2175_v29 = vsub.f32 %v6075_v41, %v2174_v53  ;;  %v2748_v41 = vmul.f32 %v2746_v44, %v6254_v55 }
 0x479   :  { %2861 = vrot.lane.b32.xlu0 %v2857_v54, %s4862_s13 }
 0x47b   :  { %2863 = vrot.lane.b32.xlu1 %v2858_v24, %s4862_s13 }
 0x47d   :  { %2943 = vrot.lane.b32.xlu0 %v2939_v1, %s4861_s11  ;;  %v2692_v1 = vmul.f32 %v2690_v11, %v6254_v55 }
 0x47f   :  { %2945 = vrot.lane.b32.xlu1 %v2940_v3, %s4861_s11 }
 0x481   :  { %2999 = vrot.lane.b32.xlu0 %v2995_v27, %s4862_s13 }
 0x483   :  { %3001 = vrot.lane.b32.xlu1 %v2996_v33, %s4862_s13 }
 0x485   :  { %2681 = vrot.lane.b32.xlu0 %v2677_v35, %s4861_s11  ;;  %v2747_v35 = vmul.f32 %v2746_v44, %v6249_v60 }
 0x487   :  { %2683 = vrot.lane.b32.xlu1 %v2678_v0, %s4861_s11 }
 0x489   :  { %2737 = vrot.lane.b32.xlu0 %v2733_v48, %s4862_s13  ;;  %v2501_v48 = vmul.f32 %v2500_v6, %v6156_v30  ;;  %v3022_v6 = vstv %s6370_s29  ;;  %s6557_s29 = sld [smem:[#allocation12 + $0x54]] }
 0x48b   :  { %2739 = vrot.lane.b32.xlu1 %v2734_v42, %s4862_s13  ;;  %v2176_v42 = vsub.f32 %v6067_v5, %v2174_v53 }
 0x48d   :  { %2819 = vrot.lane.b32.xlu0 %v2815_v28, %s4861_s11 }
 0x48f   :  { %2821 = vrot.lane.b32.xlu1 %v2816_v49, %s4861_s11  ;;  %v2185_v49 = vstv %s6332_s1  ;;  %s6495_s1 = sld [smem:[#allocation12 + $0x37]] }
 0x491   :  { %2875 = vrot.lane.b32.xlu0 %v2871_v26, %s4862_s13 }
 0x493   :  { %2877 = vrot.lane.b32.xlu1 %v2872_v45, %s4862_s13  ;;  %v2254_v52 = vpop.permute.xlu0 %2253  ;;  %v2829_v45 = vmul.f32 %v2828_v32, %v6264_v14 }
 0x494   :  { %v2259_v57 = vadd.f32 %v2254_v52, %v2227_v10  ;;  %v2830_v10 = vmul.f32 %v2828_v32, %v6268_v16  ;;  %v3023_v32 = vmul.f32 %v3022_v6, %v6276_v62 }
 0x495   :  { %v2256_v43 = vpop.permute.xlu1 %2255  ;;  %2957 = vrot.lane.b32.xlu0 %v2953_v46, %s4861_s11 }
 0x496   :  { %v2260_v9 = vadd.f32 %v2256_v43, %v2228_v58  ;;  %v2638_v43 = vstv %s6348_s24  ;;  %s6531_s24 = sld [smem:[#allocation12 + $0x3b]] }
 0x497   :  { %2959 = vrot.lane.b32.xlu1 %v2954_v59, %s4861_s11  ;;  %v2310_v40 = vpop.permute.xlu0 %2309  ;;  %v2189_v59 = vstv %s6351_s25  ;;  %v2639_v11 = vmul.f32 %v2638_v43, %v6249_v60  ;;  %v2640_v53 = vmul.f32 %v2638_v43, %v6254_v55  ;;  %s6538_s25 = sld [smem:[#allocation12 + $0x3d]] }
 0x498   :  { %v2315_v63 = vadd.f32 %v2310_v40, %v2259_v57  ;;  %v2885_v40 = vmul.f32 %v2884_v25, %v6264_v14 }
 0x499   :  { %v2312_v8 = vpop.permute.xlu1 %2311  ;;  %3013 = vrot.lane.b32.xlu0 %v3009_v21, %s4862_s13  ;;  %v2966_v21 = vstv %s6356_s21  ;;  %s6542_s21 = sld [smem:[#allocation12 + $0x36]] }
 0x49a   :  { %v2316_v12 = vadd.f32 %v2312_v8, %v2260_v9  ;;  %v2365_v20 = vadd.f32 %v2363_v47, %v2315_v63  ;;  %s6335_s23 = spop %4608  ;;  %v2231_v47 = vmul.f32 %v2230_v37, %v6134_v19 }
 0x49b   :  { %3015 = vrot.lane.b32.xlu1 %v3010_v38, %s4862_s13  ;;  %v2392_v15 = vpop.permute.xlu0 %2391  ;;  %v2181_v3 = vstv %s6335_s23  ;;  %s6506_s23 = sld [smem:[#allocation12 + $0x38]] }
 0x49c   :  { %v2366_v54 = vadd.f32 %v2364_v4, %v2316_v12  ;;  %v2397_v27 = vadd.f32 %v2392_v15, %v2365_v20  ;;  %v2182_v28 = vmul.f32 %v2181_v3, %v2175_v29  ;;  %v2183_v23 = vmul.f32 %v2181_v3, %v2176_v42 }
 0x49d   :  { %v2394_v24 = vpop.permute.xlu1 %2393  ;;  %2695 = vrot.lane.b32.xlu0 %v2691_v31, %s4861_s11  ;;  %v2886_v12 = vmul.f32 %v2884_v25, %v6268_v16  ;;  %v2216_v20 = vstv %s6363_s26  ;;  %v2232_v15 = vmul.f32 %v2230_v37, %v6137_v50  ;;  %v2968_v29 = vmul.f32 %v2966_v21, %v6280_v61  ;;  %s6550_s26 = sld [smem:[#allocation12 + $0x3e]] }
 0x49e   :  { %v2398_v17 = vadd.f32 %v2394_v24, %v2366_v54  ;;  %v2186_v52 = vmul.f32 %v2185_v49, %v2182_v28  ;;  %v2187_v57 = vmul.f32 %v2185_v49, %v2183_v23  ;;  %v2967_v24 = vmul.f32 %v2966_v21, %v6276_v62 }
 0x49f   :  { %2697 = vrot.lane.b32.xlu1 %v2692_v1, %s4861_s11  ;;  %v2448_v33 = vpop.permute.xlu0 %2447  ;;  %v2233_v1 = vadd.f32 %v2231_v47, %v2216_v20 }
 0x4a0   :  { %v2453_v0 = vadd.f32 %v2448_v33, %v2397_v27  ;;  %v2190_v8 = vadd.f32 %v2189_v59, %v2186_v52  ;;  %v2191_v54 = vadd.f32 %v2189_v59, %v2187_v57  ;;  %v2368_v33 = vstv %s6375_s6  ;;  %s6560_s6 = sld [smem:[#allocation12 + $0x5b]] }
 0x4a1   :  { %v2450_v2 = vpop.permute.xlu1 %2449  ;;  %2751 = vrot.lane.b32.xlu0 %v2747_v35, %s4862_s13 }
 0x4a2   :  { %v2454_v7 = vadd.f32 %v2450_v2, %v2398_v17  ;;  %v2503_v26 = vadd.f32 %v2501_v48, %v2453_v0  ;;  %v2194_v35 = vmul.f32 %v2190_v8, %v6095_v34  ;;  %v2234_v0 = vadd.f32 %v2232_v15, %v2216_v20 }
 0x4a3   :  { %2753 = vrot.lane.b32.xlu1 %v2748_v41, %s4862_s13  ;;  %v2530_v5 = vpop.permute.xlu0 %2529  ;;  %vm2192_vm4 = vcmp.gt.f32.partialorder %v2190_v8, 0.0  ;;  %v2195_v42 = vmul.f32 %v2191_v54, %v6095_v34  ;;  %v2369_v41 = vmul.f32 %v2368_v33, %v6144_v18  ;;  %vm2193_vm5 = vcmp.gt.f32.partialorder %v2191_v54, 0.0 }
 0x4a4   :  { %v2504_v39 = vadd.f32 %v2502_v36, %v2454_v7  ;;  %v2535_v13 = vadd.f32 %v2530_v5, %v2503_v26  ;;  %v3024_v7 = vmul.f32 %v3022_v6, %v6280_v61  ;;  %v2196_v26 = vsel %vm2192_vm4, %v2190_v8, %v2194_v35 }
 0x4a5   :  { %v2532_v46 = vpop.permute.xlu1 %2531  ;;  %2833 = vrot.lane.b32.xlu0 %v2829_v45, %s4861_s11  ;;  %v2370_v5 = vmul.f32 %v2368_v33, %v6148_v22  ;;  %v2197_v34 = vsel %vm2193_vm5, %v2191_v54, %v2195_v42  ;;  %v2198_v25 = vsel %vm5585_vm10, %v2196_v26, 0.0  ;;  %v2236_v8 = vstv %s6412_s27  ;;  %s6578_s27 = sld [smem:[#allocation12 + $0x57]] }
 0x4a6   :  { %v2536_v9 = vadd.f32 %v2532_v46, %v2504_v39  ;;  %v2506_v46 = vstv %s6400_s0  ;;  %v2199_v37 = vsel %vm5585_vm10, %v2197_v34, 0.0  ;;  %v2238_v6 = vmul.f32 %v2236_v8, %v6137_v50  ;;  %s6569_s0 = sld [smem:[#allocation12 + $0x5c]] }
 0x4a7   :  { %2835 = vrot.lane.b32.xlu1 %v2830_v10, %s4861_s11  ;;  %v2586_v58 = vpop.permute.xlu0 %2585  ;;  %v2507_v57 = vmul.f32 %v2506_v46, %v6156_v30 }
 0x4a8   :  { %v2591_v63 = vadd.f32 %v2586_v58, %v2535_v13 }
 0x4a9   :  { %v2588_v38 = vpop.permute.xlu1 %2587  ;;  %2889 = vrot.lane.b32.xlu0 %v2885_v40, %s4862_s13 }
 0x4aa   :  { %v2592_v4 = vadd.f32 %v2588_v38, %v2536_v9  ;;  %v6388_v31 = vadd.f32 %v2639_v11, %v2591_v63  ;;  %v2508_v9 = vmul.f32 %v2506_v46, %v6160_v56  ;;  %v2644_v38 = vstv %s4459_s28  ;;  %s6584_s28 = sld [smem:[#allocation12 + $0x5e]] }
 0x4ab   :  { %2891 = vrot.lane.b32.xlu1 %v2886_v12, %s4862_s13  ;;  %v2268_v44 = vpop.permute.xlu0 %2267  ;;  %v2645_v54 = vmul.f32 %v2644_v38, %v6249_v60 }
 0x4ac   :  { %v6394_v3 = vadd.f32 %v2640_v53, %v2592_v4  ;;  %v2273_v17 = vadd.f32 %v2268_v44, %v2233_v1  ;;  %v2237_v53 = vmul.f32 %v2236_v8, %v6134_v19 }
 0x4ad   :  { %v2270_v27 = vpop.permute.xlu1 %2269  ;;  %2971 = vrot.lane.b32.xlu0 %v2967_v24, %s4861_s11  ;;  %v2218_v24 = vstv %s4421_s30  ;;  %s6594_s30 = sld [smem:[#allocation12 + $0x5f]] }
 0x4ae   :  { %v2274_v28 = vadd.f32 %v2270_v27, %v2234_v0  ;;  %v2239_v35 = vadd.f32 %v2237_v53, %v2218_v24  ;;  %v2240_v19 = vadd.f32 %v2238_v6, %v2218_v24 }
 0x4af   :  { %2973 = vrot.lane.b32.xlu1 %v2968_v29, %s4861_s11  ;;  %v2324_v48 = vpop.permute.xlu0 %2323  ;;  %v2646_v29 = vmul.f32 %v2644_v38, %v6254_v55 }
 0x4b0   :  { %v2329_v2 = vadd.f32 %v2324_v48, %v2273_v17  ;;  %v2374_v48 = vstv %s4436_s12  ;;  %s6601_s12 = sld [smem:[#allocation12 + $0x61]] }
 0x4b1   :  { %v2326_v49 = vpop.permute.xlu1 %2325  ;;  %3027 = vrot.lane.b32.xlu0 %v3023_v32, %s4862_s13  ;;  %v2376_v26 = vmul.f32 %v2374_v48, %v6148_v22  ;;  %v2650_v22 = vstv %s4460_s14  ;;  %s6613_s14 = sld [smem:[#allocation12 + $0x62]] }
 0x4b2   :  { %v2330_v36 = vadd.f32 %v2326_v49, %v2274_v28  ;;  %v2371_v23 = vadd.f32 %v2369_v41, %v2329_v2  ;;  %v2375_v41 = vmul.f32 %v2374_v48, %v6144_v18 }
 0x4b3   :  { %3029 = vrot.lane.b32.xlu1 %v3024_v7, %s4862_s13  ;;  %v2406_v45 = vpop.permute.xlu0 %2405 }
 0x4b4   :  { %v2372_v39 = vadd.f32 %v2370_v5, %v2330_v36  ;;  %v2411_v10 = vadd.f32 %v2406_v45, %v2371_v23 }
 0x4b5   :  { %v2408_v52 = vpop.permute.xlu1 %2407  ;;  %2202 = vrot.lane.b32.xlu0 %v2198_v25, %s4863_s4 }
 0x4b6   :  { %v2412_v59 = vadd.f32 %v2408_v52, %v2372_v39 }
 0x4b7   :  { %2204 = vrot.lane.b32.xlu1 %v2199_v37, %s4863_s4  ;;  %v2462_v43 = vpop.permute.xlu0 %2461  ;;  %s4448_s4 = sld [smem:[#allocation12 + $0x4e]] }
 0x4b8   :  { %v2467_v13 = vadd.f32 %v2462_v43, %v2411_v10 }
 0x4b9   :  { %v2464_v58 = vpop.permute.xlu1 %2463 }
 0x4ba   :  { %v2468_v40 = vadd.f32 %v2464_v58, %v2412_v59  ;;  %v2509_v21 = vadd.f32 %v2507_v57, %v2467_v13 }
 0x4bb   :  { %v2544_v63 = vpop.permute.xlu0 %2543 }
 0x4bc   :  { %v2510_v47 = vadd.f32 %v2508_v9, %v2468_v40  ;;  %v2549_v12 = vadd.f32 %v2544_v63, %v2509_v21  ;;  %v2651_v63 = vmul.f32 %v2650_v22, %v6249_v60 }
 0x4bd   :  { %v2546_v11 = vpop.permute.xlu1 %2545  ;;  %v2512_v45 = vstv %s4448_s4  ;;  %s6605_s4 = sld [smem:[#allocation12 + $0x5a]] }
 0x4be   :  { %v2550_v4 = vadd.f32 %v2546_v11, %v2510_v47  ;;  %v2513_v46 = vmul.f32 %v2512_v45, %v6156_v30  ;;  %v2514_v18 = vmul.f32 %v2512_v45, %v6160_v56  ;;  %v2652_v56 = vmul.f32 %v2650_v22, %v6254_v55 }
 0x4bf   :  { %v2600_v20 = vpop.permute.xlu0 %2599  ;;  %v3352_v22 = vstv %s6467_s19  ;;  %s4535_s19 = sld [smem:[#allocation12 + $0x40]] }
 0x4c0   :  { %v2605_v15 = vadd.f32 %v2600_v20, %v2549_v12 }
 0x4c1   :  { %v2602_v44 = vpop.permute.xlu1 %2601 }
 0x4c2   :  { %v2606_v1 = vadd.f32 %v2602_v44, %v2550_v4  ;;  %v6425_v27 = vadd.f32 %v2645_v54, %v2605_v15  ;;  %v3076_v4 = vstv %s4498_s16  ;;  %v2776_v15 = vstv %s6434_s15  ;;  %s4534_s15 = sld [smem:[#allocation12 + $0x1c]] }
 0x4c3   :  { %v2282_v33 = vpop.permute.xlu0 %2281  ;;  %v2777_v6 = vmul.f32 %v2776_v15, %v6264_v14  ;;  %s4538_s16 = sld [smem:[#allocation12 + $0x1d]] }
 0x4c4   :  { %v6428_v17 = vadd.f32 %v2646_v29, %v2606_v1  ;;  %v2287_v32 = vadd.f32 %v2282_v33, %v2239_v35  ;;  %v3132_v35 = vstv %s6443_s17  ;;  %s4546_s17 = sld [smem:[#allocation12 + $0x1f]] }
 0x4c5   :  { %v2284_v0 = vpop.permute.xlu1 %2283 }
 0x4c6   :  { %v2288_v28 = vadd.f32 %v2284_v0, %v2240_v19 }
 0x4c7   :  { %v2338_v42 = vpop.permute.xlu0 %2337 }
 0x4c8   :  { %v2343_v2 = vadd.f32 %v2338_v42, %v2287_v32 }
 0x4c9   :  { %v2340_v49 = vpop.permute.xlu1 %2339 }
 0x4ca   :  { %v2344_v50 = vadd.f32 %v2340_v49, %v2288_v28  ;;  %v2377_v7 = vadd.f32 %v2375_v41, %v2343_v2  ;;  %v3214_v41 = vstv %s6449_s5  ;;  %v2914_v49 = vstv %s6446_s2  ;;  %s4550_s2 = sld [smem:[#allocation12 + $0x20]] }
 0x4cb   :  { %v2420_v36 = vpop.permute.xlu0 %2419  ;;  %s4558_s5 = sld [smem:[#allocation12 + $0x22]] }
 0x4cc   :  { %v2378_v23 = vadd.f32 %v2376_v26, %v2344_v50  ;;  %v2425_v34 = vadd.f32 %v2420_v36, %v2377_v7 }
 0x4cd   :  { %v2422_v5 = vpop.permute.xlu1 %2421 }
 0x4ce   :  { %v2426_v25 = vadd.f32 %v2422_v5, %v2378_v23 }
 0x4cf   :  { %v2476_v39 = vpop.permute.xlu0 %2475 }
 0x4d0   :  { %v2481_v52 = vadd.f32 %v2476_v39, %v2425_v34  ;;  %v2915_v34 = vmul.f32 %v2914_v49, %v6276_v62 }
 0x4d1   :  { %v2478_v10 = vpop.permute.xlu1 %2477 }
 0x4d2   :  { %v2482_v37 = vadd.f32 %v2478_v10, %v2426_v25  ;;  %v2515_v43 = vadd.f32 %v2513_v46, %v2481_v52  ;;  %v3270_v25 = vstv %s6460_s18  ;;  %s4562_s18 = sld [smem:[#allocation12 + $0x23]] }
 0x4d3   :  { %v2558_v59 = vpop.permute.xlu0 %2557 }
 0x4d4   :  { %v2516_v13 = vadd.f32 %v2514_v18, %v2482_v37  ;;  %v2563_v58 = vadd.f32 %v2558_v59, %v2515_v43  ;;  %v2916_v37 = vmul.f32 %v2914_v49, %v6280_v61 }
 0x4d5   :  { %v2560_v57 = vpop.permute.xlu1 %2559 }
 0x4d6   :  { %v2564_v21 = vadd.f32 %v2560_v57, %v2516_v13 }
 0x4d7   :  { %v2614_v40 = vpop.permute.xlu0 %2613 }
 0x4d8   :  { %v2619_v9 = vadd.f32 %v2614_v40, %v2563_v58  ;;  %v3052_v58 = vstv %s6473_s20  ;;  %s4539_s20 = sld [smem:[#allocation12 + $0x41]] }
 0x4d9   :  { %v2616_v47 = vpop.permute.xlu1 %2615 }
 0x4da   :  { %v2620_v30 = vadd.f32 %v2616_v47, %v2564_v21  ;;  %v6437_v11 = vadd.f32 %v2651_v63, %v2619_v9 }
 0x4db   :  { %v2132_v8 = vpop.permute.xlu0 %2131 }
 0x4dc   :  { %2138 = vst.msk [vmem:[#allocation3 + $0x31] sm:$0xff] %vm1994_vm1, %v2132_v8  ;;  %v6441_v38 = vadd.f32 %v2652_v56, %v2620_v30 }
 0x4dd   :  { %v2134_v12 = vpop.permute.xlu1 %2133 }
 0x4de   :  { %2139 = vst.msk [vmem:[#allocation3 + $0x39] sm:$0xff] %vm1994_vm1, %v2134_v12 }
 0x4df   :  { %v2668_v60 = vpop.permute.xlu0 %2667 }
 0x4e0   :  { %v2673_v55 = vadd.f32 %v2668_v60, %v6388_v31  ;;  %v3408_v60 = vstv %s6483_s3  ;;  %s6675_s3 = sld [smem:[#allocation12 + $0x44]] }
 0x4e1   :  { %v2670_v20 = vpop.permute.xlu1 %2669 }
 0x4e2   :  { %v2674_v44 = vadd.f32 %v2670_v20, %v6394_v3  ;;  %v2778_v3 = vmul.f32 %v2776_v15, %v6268_v16 }
 0x4e3   :  { %v6452_v53 = vld [vmem:[#allocation3 + $0x30] sm:$0xff]  ;;  %v2724_v54 = vpop.permute.xlu0 %2723 }
 0x4e4   :  { %v2729_v24 = vadd.f32 %v2724_v54, %v2673_v55  ;;  %v3077_v1 = vmul.f32 %v3076_v4, %v6452_v53  ;;  %v3133_v42 = vmul.f32 %v3132_v35, %v6452_v53  ;;  %v6469_v28 = vld [vmem:[#allocation3 + $0x31] sm:$0xff]  ;;  %v3053_v8 = vmul.f32 %v3052_v58, %v6452_v53 }
 0x4e5   :  { %v6457_v29 = vld [vmem:[#allocation3 + $0x38] sm:$0xff]  ;;  %v2726_v33 = vpop.permute.xlu1 %2725  ;;  %v3215_v45 = vmul.f32 %v3214_v41, %v6469_v28  ;;  %v3271_v59 = vmul.f32 %v3270_v25, %v6469_v28 }
 0x4e6   :  { %v2730_v0 = vadd.f32 %v2726_v33, %v2674_v44  ;;  %3081 = vrot.lane.b32.xlu0 %v3077_v1, %s4861_s11  ;;  %v2779_v31 = vadd.f32 %v2777_v6, %v2729_v24  ;;  %v3078_v48 = vmul.f32 %v3076_v4, %v6457_v29  ;;  %v3134_v7 = vmul.f32 %v3132_v35, %v6457_v29  ;;  %v6477_v26 = vld [vmem:[#allocation3 + $0x39] sm:$0xff] }
 0x4e7   :  { %v2806_v32 = vpop.permute.xlu0 %2805  ;;  %v3216_v10 = vmul.f32 %v3214_v41, %v6477_v26  ;;  %v6492_v13 = vld [vmem:[#allocation3 + $0x32] sm:$0xff]  ;;  %v3272_v21 = vmul.f32 %v3270_v25, %v6477_v26  ;;  %v6500_v9 = vld [vmem:[#allocation3 + $0x3a] sm:$0xff]  ;;  %v3054_v55 = vmul.f32 %v3052_v58, %v6457_v29  ;;  %v3090_v6 = vstv %s6495_s1  ;;  %s4559_s1 = sld [smem:[#allocation12 + $0x46]] }
 0x4e8   :  { %3083 = vrot.lane.b32.xlu1 %v3078_v48, %s4861_s11  ;;  %v2780_v19 = vadd.f32 %v2778_v3, %v2730_v0  ;;  %v2811_v50 = vadd.f32 %v2806_v32, %v2779_v31  ;;  %v3353_v56 = vmul.f32 %v3352_v22, %v6492_v13  ;;  %v3354_v4 = vmul.f32 %v3352_v22, %v6500_v9 }
 0x4e9   :  { %v2808_v2 = vpop.permute.xlu1 %2807  ;;  %v3409_v44 = vmul.f32 %v3408_v60, %v6492_v13  ;;  %v2782_v33 = vstv %s6490_s22  ;;  %v3410_v0 = vmul.f32 %v3408_v60, %v6500_v9  ;;  %v3091_v32 = vmul.f32 %v3090_v6, %v6452_v53  ;;  %s4547_s22 = sld [smem:[#allocation12 + $0x43]] }
 0x4ea   :  { %3137 = vrot.lane.b32.xlu0 %v3133_v42, %s4862_s13  ;;  %v2812_v23 = vadd.f32 %v2808_v2, %v2780_v19  ;;  %v2783_v19 = vmul.f32 %v2782_v33, %v6264_v14  ;;  %v3146_v2 = vstv %s6506_s23  ;;  %v3092_v49 = vmul.f32 %v3090_v6, %v6457_v29  ;;  %s6690_s23 = sld [smem:[#allocation12 + $0x47]] }
 0x4eb   :  { %v2862_v36 = vpop.permute.xlu0 %2861 }
 0x4ec   :  { %v2867_v5 = vadd.f32 %v2862_v36, %v2811_v50  ;;  %3139 = vrot.lane.b32.xlu1 %v3134_v7, %s4862_s13  ;;  %v3147_v36 = vmul.f32 %v3146_v2, %v6452_v53 }
 0x4ed   :  { %v2864_v39 = vpop.permute.xlu1 %2863 }
 0x4ee   :  { %v2868_v52 = vadd.f32 %v2864_v39, %v2812_v23  ;;  %3219 = vrot.lane.b32.xlu0 %v3215_v45, %s4861_s11  ;;  %v2917_v46 = vadd.f32 %v2915_v34, %v2867_v5  ;;  %v3228_v5 = vstv %s6521_s8  ;;  %v2920_v45 = vstv %s6515_s7  ;;  %s4506_s7 = sld [smem:[#allocation12 + $0x15]] }
 0x4ef   :  { %v2944_v43 = vpop.permute.xlu0 %2943  ;;  %v3148_v39 = vmul.f32 %v3146_v2, %v6457_v29  ;;  %v3230_v22 = vmul.f32 %v3228_v5, %v6477_v26  ;;  %v2922_v58 = vmul.f32 %v2920_v45, %v6280_v61  ;;  %s6696_s8 = sld [smem:[#allocation12 + $0x64]] }
 0x4f0   :  { %3221 = vrot.lane.b32.xlu1 %v3216_v10, %s4861_s11  ;;  %v2918_v18 = vadd.f32 %v2916_v37, %v2868_v52  ;;  %v2949_v40 = vadd.f32 %v2944_v43, %v2917_v46  ;;  %v3229_v10 = vmul.f32 %v3228_v5, %v6469_v28  ;;  %v2921_v37 = vmul.f32 %v2920_v45, %v6276_v62 }
 0x4f1   :  { %v2946_v57 = vpop.permute.xlu1 %2945 }
 0x4f2   :  { %3275 = vrot.lane.b32.xlu0 %v3271_v59, %s4862_s13  ;;  %v2950_v47 = vadd.f32 %v2946_v57, %v2918_v18  ;;  %v3284_v18 = vstv %s6531_s24  ;;  %s6703_s24 = sld [smem:[#allocation12 + $0x65]] }
 0x4f3   :  { %v3000_v63 = vpop.permute.xlu0 %2999 }
 0x4f4   :  { %v3005_v30 = vadd.f32 %v3000_v63, %v2949_v40  ;;  %3277 = vrot.lane.b32.xlu1 %v3272_v21, %s4862_s13  ;;  %v3285_v63 = vmul.f32 %v3284_v18, %v6469_v28 }
 0x4f5   :  { %v3002_v12 = vpop.permute.xlu1 %3001 }
 0x4f6   :  { %v3006_v20 = vadd.f32 %v3002_v12, %v2950_v47  ;;  %3357 = vrot.lane.b32.xlu0 %v3353_v56, %s4861_s11  ;;  %v6510_v15 = vadd.f32 %v3053_v8, %v3005_v30  ;;  %v3366_v30 = vstv %s6538_s25  ;;  %v3058_v56 = vstv %s6542_s21  ;;  %s6707_s25 = sld [smem:[#allocation12 + $0x18]] }
 0x4f7   :  { %v2682_v54 = vpop.permute.xlu0 %2681  ;;  %v3286_v12 = vmul.f32 %v3284_v18, %v6477_v26  ;;  %s6715_s21 = sld [smem:[#allocation12 + $0x68]] }
 0x4f8   :  { %3359 = vrot.lane.b32.xlu1 %v3354_v4, %s4861_s11  ;;  %v6517_v24 = vadd.f32 %v3054_v55, %v3006_v20  ;;  %v2687_v35 = vadd.f32 %v2682_v54, %v6425_v27  ;;  %v3367_v55 = vmul.f32 %v3366_v30, %v6492_v13  ;;  %v3059_v54 = vmul.f32 %v3058_v56, %v6452_v53 }
 0x4f9   :  { %v2684_v1 = vpop.permute.xlu1 %2683 }
 0x4fa   :  { %3413 = vrot.lane.b32.xlu0 %v3409_v44, %s4862_s13  ;;  %v2688_v48 = vadd.f32 %v2684_v1, %v6428_v17  ;;  %v2784_v17 = vmul.f32 %v2782_v33, %v6268_v16  ;;  %v3422_v1 = vstv %s6550_s26  ;;  %v3368_v33 = vmul.f32 %v3366_v30, %v6500_v9  ;;  %s6720_s26 = sld [smem:[#allocation12 + $0x67]] }
 0x4fb   :  { %v2738_v31 = vpop.permute.xlu0 %2737 }
 0x4fc   :  { %v2743_v3 = vadd.f32 %v2738_v31, %v2687_v35  ;;  %3415 = vrot.lane.b32.xlu1 %v3410_v0, %s4862_s13  ;;  %v3060_v0 = vmul.f32 %v3058_v56, %v6457_v29 }
 0x4fd   :  { %v2740_v42 = vpop.permute.xlu1 %2739 }
 0x4fe   :  { %v2744_v27 = vadd.f32 %v2740_v42, %v2688_v48  ;;  %3095 = vrot.lane.b32.xlu0 %v3091_v32, %s4861_s11  ;;  %v2785_v41 = vadd.f32 %v2783_v19, %v2743_v3  ;;  %v3423_v48 = vmul.f32 %v3422_v1, %v6492_v13  ;;  %v3104_v19 = vstv %s6560_s6  ;;  %s6730_s6 = sld [smem:[#allocation12 + $0x1b]] }
 0x4ff   :  { %v2820_v50 = vpop.permute.xlu0 %2819  ;;  %v2788_v42 = vstv %s6557_s29  ;;  %v3106_v45 = vmul.f32 %v3104_v19, %v6457_v29  ;;  %s6725_s29 = sld [smem:[#allocation12 + $0x6a]] }
 0x500   :  { %3097 = vrot.lane.b32.xlu1 %v3092_v49, %s4861_s11  ;;  %v2786_v7 = vadd.f32 %v2784_v17, %v2744_v27  ;;  %v2825_v34 = vadd.f32 %v2820_v50, %v2785_v41  ;;  %v3424_v27 = vmul.f32 %v3422_v1, %v6500_v9  ;;  %v3105_v50 = vmul.f32 %v3104_v19, %v6452_v53 }
 0x501   :  { %v2822_v23 = vpop.permute.xlu1 %2821 }
 0x502   :  { %3151 = vrot.lane.b32.xlu0 %v3147_v36, %s4862_s13  ;;  %v2826_v52 = vadd.f32 %v2822_v23, %v2786_v7  ;;  %v2789_v7 = vmul.f32 %v2788_v42, %v6264_v14  ;;  %v3160_v23 = vstv %s6569_s0  ;;  %s6743_s0 = sld [smem:[#allocation12 + $0x6b]] }
 0x503   :  { %v2876_v25 = vpop.permute.xlu0 %2875 }
 0x504   :  { %v2881_v46 = vadd.f32 %v2876_v25, %v2825_v34  ;;  %3153 = vrot.lane.b32.xlu1 %v3148_v39, %s4862_s13  ;;  %v3161_v25 = vmul.f32 %v3160_v23, %v6452_v53 }
 0x505   :  { %v2878_v43 = vpop.permute.xlu1 %2877 }
 0x506   :  { %v2882_v59 = vadd.f32 %v2878_v43, %v2826_v52  ;;  %3233 = vrot.lane.b32.xlu0 %v3229_v10, %s4861_s11  ;;  %v2923_v57 = vadd.f32 %v2921_v37, %v2881_v46  ;;  %v3242_v52 = vstv %s6584_s28  ;;  %v2926_v46 = vstv %s6578_s27  ;;  %s6747_s27 = sld [smem:[#allocation12 + $0x39]] }
 0x507   :  { %v2958_v40 = vpop.permute.xlu0 %2957  ;;  %v3162_v37 = vmul.f32 %v3160_v23, %v6457_v29  ;;  %s6752_s28 = sld [smem:[#allocation12 + $0x6d]] }
 0x508   :  { %3235 = vrot.lane.b32.xlu1 %v3230_v22, %s4861_s11  ;;  %v2924_v21 = vadd.f32 %v2922_v58, %v2882_v59  ;;  %v2963_v8 = vadd.f32 %v2958_v40, %v2923_v57  ;;  %v3243_v59 = vmul.f32 %v3242_v52, %v6469_v28  ;;  %v2927_v57 = vmul.f32 %v2926_v46, %v6276_v62 }
 0x509   :  { %v2960_v47 = vpop.permute.xlu1 %2959  ;;  %v3298_v58 = vstv %s6594_s30  ;;  %s6763_s30 = sld [smem:[#allocation12 + $0x6e]] }
 0x50a   :  { %3289 = vrot.lane.b32.xlu0 %v3285_v63, %s4862_s13  ;;  %v2964_v20 = vadd.f32 %v2960_v47, %v2924_v21  ;;  %v3244_v63 = vmul.f32 %v3242_v52, %v6477_v26  ;;  %v2928_v47 = vmul.f32 %v2926_v46, %v6280_v61  ;;  %v3766_v52 = vstv %s4558_s5  ;;  %s6823_s5 = sld [smem:[#allocation12 + $0x76]] }
 0x50b   :  { %v3014_v60 = vpop.permute.xlu0 %3013 }
 0x50c   :  { %v3019_v4 = vadd.f32 %v3014_v60, %v2963_v8  ;;  %3291 = vrot.lane.b32.xlu1 %v3286_v12, %s4862_s13  ;;  %v3299_v8 = vmul.f32 %v3298_v58, %v6469_v28  ;;  %v3380_v12 = vstv %s6601_s12  ;;  %v3064_v60 = vstv %s6605_s4  ;;  %s6770_s12 = sld [smem:[#allocation12 + $0x3c]] }
 0x50d   :  { %v3016_v44 = vpop.permute.xlu1 %3015  ;;  %v3381_v61 = vmul.f32 %v3380_v12, %v6492_v13  ;;  %v3065_v1 = vmul.f32 %v3064_v60, %v6452_v53  ;;  %s6778_s4 = sld [smem:[#allocation12 + $0x70]] }
 0x50e   :  { %v3020_v6 = vadd.f32 %v3016_v44, %v2964_v20  ;;  %3371 = vrot.lane.b32.xlu0 %v3367_v55, %s4861_s11  ;;  %v6573_v35 = vadd.f32 %v3059_v54, %v3019_v4  ;;  %v3300_v4 = vmul.f32 %v3298_v58, %v6477_v26  ;;  %v3560_v58 = vstv %s4539_s20  ;;  %s6853_s20 = sld [smem:[#allocation12 + $0x79]] }
 0x50f   :  { %v2696_v31 = vpop.permute.xlu0 %2695 }
 0x510   :  { %3373 = vrot.lane.b32.xlu1 %v3368_v33, %s4861_s11  ;;  %v6580_v3 = vadd.f32 %v3060_v0, %v3020_v6  ;;  %v2701_v2 = vadd.f32 %v2696_v31, %v6437_v11  ;;  %v3436_v33 = vstv %s6613_s14  ;;  %v3382_v31 = vmul.f32 %v3380_v12, %v6500_v9  ;;  %s6790_s14 = sld [smem:[#allocation12 + $0x71]] }
 0x511   :  { %v2698_v32 = vpop.permute.xlu1 %2697 }
 0x512   :  { %3427 = vrot.lane.b32.xlu0 %v3423_v48, %s4862_s13  ;;  %v2702_v49 = vadd.f32 %v2698_v32, %v6441_v38  ;;  %v2790_v38 = vmul.f32 %v2788_v42, %v6268_v16  ;;  %v3066_v32 = vmul.f32 %v3064_v60, %v6457_v29  ;;  %v3437_v42 = vmul.f32 %v3436_v33, %v6492_v13 }
 0x513   :  { %v2752_v41 = vpop.permute.xlu0 %2751  ;;  %v3490_v29 = vstv %s4534_s15  ;;  %s6795_s15 = sld [smem:[#allocation12 + $0x3f]] }
 0x514   :  { %v2757_v17 = vadd.f32 %v2752_v41, %v2701_v2  ;;  %3429 = vrot.lane.b32.xlu1 %v3424_v27, %s4862_s13  ;;  %v3438_v27 = vmul.f32 %v3436_v33, %v6500_v9 }
 0x515   :  { %v2754_v36 = vpop.permute.xlu1 %2753 }
 0x516   :  { %v2758_v11 = vadd.f32 %v2754_v36, %v2702_v49  ;;  %3109 = vrot.lane.b32.xlu0 %v3105_v50, %s4861_s11  ;;  %v2791_v5 = vadd.f32 %v2789_v7, %v2757_v17  ;;  %v3546_v50 = vstv %s4538_s16  ;;  %s6801_s16 = sld [smem:[#allocation12 + $0x73]] }
 0x517   :  { %v2834_v34 = vpop.permute.xlu0 %2833 }
 0x518   :  { %3111 = vrot.lane.b32.xlu1 %v3106_v45, %s4861_s11  ;;  %v2792_v39 = vadd.f32 %v2790_v38, %v2758_v11  ;;  %v2839_v10 = vadd.f32 %v2834_v34, %v2791_v5  ;;  %v3628_v11 = vstv %s4546_s17  ;;  %v3684_v34 = vstv %s4550_s2  ;;  %s6811_s17 = sld [smem:[#allocation12 + $0x74]] }
 0x519   :  { %v2836_v14 = vpop.permute.xlu1 %2835  ;;  %s6817_s2 = sld [smem:[#allocation12 + $0x5d]] }
 0x51a   :  { %3165 = vrot.lane.b32.xlu0 %v3161_v25, %s4862_s13  ;;  %v2840_v43 = vadd.f32 %v2836_v14, %v2792_v39 }
 0x51b   :  { %v2890_v16 = vpop.permute.xlu0 %2889 }
 0x51c   :  { %v2895_v18 = vadd.f32 %v2890_v16, %v2839_v10  ;;  %3167 = vrot.lane.b32.xlu1 %v3162_v37, %s4862_s13  ;;  %v3822_v16 = vstv %s4562_s18  ;;  %s6836_s18 = sld [smem:[#allocation12 + $0x77]] }
 0x51d   :  { %v2892_v22 = vpop.permute.xlu1 %2891 }
 0x51e   :  { %v2896_v40 = vadd.f32 %v2892_v22, %v2840_v43  ;;  %3247 = vrot.lane.b32.xlu0 %v3243_v59, %s4861_s11  ;;  %v2929_v21 = vadd.f32 %v2927_v57, %v2895_v18  ;;  %v3504_v59 = vstv %s4535_s19  ;;  %s6845_s19 = sld [smem:[#allocation12 + $0x60]] }
 0x51f   :  { %v2972_v30 = vpop.permute.xlu0 %2971 }
 0x520   :  { %3249 = vrot.lane.b32.xlu1 %v3244_v63, %s4861_s11  ;;  %v2930_v56 = vadd.f32 %v2928_v47, %v2896_v40  ;;  %v2977_v20 = vadd.f32 %v2972_v30, %v2929_v21  ;;  %v3698_v63 = vstv %s6675_s3  ;;  %v3642_v30 = vstv %s4547_s22  ;;  %s6863_s3 = sld [smem:[#allocation12 + $0x7a]] }
 0x521   :  { %v2974_v62 = vpop.permute.xlu1 %2973  ;;  %s6870_s22 = sld [smem:[#allocation12 + $0x63]] }
 0x522   :  { %3303 = vrot.lane.b32.xlu0 %v3299_v8, %s4862_s13  ;;  %v2978_v54 = vadd.f32 %v2974_v62, %v2930_v56  ;;  %v3780_v8 = vstv %s4559_s1  ;;  %s6876_s1 = sld [smem:[#allocation12 + $0x7c]] }
 0x523   :  { %v3028_v55 = vpop.permute.xlu0 %3027 }
 0x524   :  { %v3033_v44 = vadd.f32 %v3028_v55, %v2977_v20  ;;  %3305 = vrot.lane.b32.xlu1 %v3300_v4, %s4862_s13  ;;  %v3836_v55 = vstv %s6690_s23  ;;  %s6886_s23 = sld [smem:[#allocation12 + $0x7d]] }
 0x525   :  { %v3030_v6 = vpop.permute.xlu1 %3029 }
 0x526   :  { %v3034_v0 = vadd.f32 %v3030_v6, %v2978_v54  ;;  %3385 = vrot.lane.b32.xlu0 %v3381_v61, %s4861_s11  ;;  %v6630_v48 = vadd.f32 %v3065_v1, %v3033_v44  ;;  %v3190_v61 = vstv %s4506_s7  ;;  %s6896_s7 = sld [smem:[#allocation12 + $0x7f]] }
 0x527   :  { %v2203_v19 = vpop.permute.xlu0 %2202 }
 0x528   :  { %2209 = vst.msk [vmem:[#allocation3 + $0x49] sm:$0xff] %vm1994_vm1, %v2203_v19  ;;  %3387 = vrot.lane.b32.xlu1 %v3382_v31, %s4861_s11  ;;  %v6636_v53 = vadd.f32 %v3066_v32, %v3034_v0  ;;  %v3191_v32 = vmul.f32 %v3190_v61, %v6469_v28  ;;  %v3518_v19 = vstv %s6696_s8  ;;  %s6901_s8 = sld [smem:[#allocation12 + $0x1e]] }
 0x529   :  { %v2205_v2 = vpop.permute.xlu1 %2204 }
 0x52a   :  { %2210 = vst.msk [vmem:[#allocation3 + $0x51] sm:$0xff] %vm1994_vm1, %v2205_v2  ;;  %3441 = vrot.lane.b32.xlu0 %v3437_v42, %s4862_s13 }
 0x52c   :  { %3443 = vrot.lane.b32.xlu1 %v3438_v27, %s4862_s13 }
 0x52f   :  { %v6642_v41 = vld [vmem:[#allocation3 + $0x48] sm:$0xff] }
 0x530   :  { %v3491_v49 = vmul.f32 %v3490_v29, %v6642_v41  ;;  %v3547_v36 = vmul.f32 %v3546_v50, %v6642_v41  ;;  %v6651_v23 = vld [vmem:[#allocation3 + $0x49] sm:$0xff]  ;;  %v3505_v22 = vmul.f32 %v3504_v59, %v6642_v41  ;;  %v3561_v21 = vmul.f32 %v3560_v58, %v6642_v41 }
 0x531   :  { %v6645_v17 = vld [vmem:[#allocation3 + $0x50] sm:$0xff]  ;;  %v3629_v38 = vmul.f32 %v3628_v11, %v6651_v23  ;;  %v3685_v25 = vmul.f32 %v3684_v34, %v6651_v23  ;;  %v3699_v56 = vmul.f32 %v3698_v63, %v6651_v23  ;;  %v3643_v62 = vmul.f32 %v3642_v30, %v6651_v23 }
 0x532   :  { %3495 = vrot.lane.b32.xlu0 %v3491_v49, %s4861_s11  ;;  %v3492_v7 = vmul.f32 %v3490_v29, %v6645_v17  ;;  %v3548_v5 = vmul.f32 %v3546_v50, %v6645_v17  ;;  %v6655_v45 = vld [vmem:[#allocation3 + $0x51] sm:$0xff]  ;;  %v3506_v40 = vmul.f32 %v3504_v59, %v6645_v17  ;;  %v3562_v47 = vmul.f32 %v3560_v58, %v6645_v17 }
 0x533   :  { %v3630_v39 = vmul.f32 %v3628_v11, %v6655_v45  ;;  %v6663_v14 = vld [vmem:[#allocation3 + $0x4a] sm:$0xff]  ;;  %v3686_v46 = vmul.f32 %v3684_v34, %v6655_v45  ;;  %v6667_v10 = vld [vmem:[#allocation3 + $0x52] sm:$0xff]  ;;  %v3644_v60 = vmul.f32 %v3642_v30, %v6655_v45  ;;  %v3700_v44 = vmul.f32 %v3698_v63, %v6655_v45 }
 0x534   :  { %3497 = vrot.lane.b32.xlu1 %v3492_v7, %s4861_s11  ;;  %v3767_v37 = vmul.f32 %v3766_v52, %v6663_v14  ;;  %v3768_v43 = vmul.f32 %v3766_v52, %v6667_v10  ;;  %v3823_v18 = vmul.f32 %v3822_v16, %v6663_v14  ;;  %v3824_v57 = vmul.f32 %v3822_v16, %v6667_v10 }
 0x535   :  { %v3781_v12 = vmul.f32 %v3780_v8, %v6663_v14  ;;  %v3782_v4 = vmul.f32 %v3780_v8, %v6667_v10  ;;  %v3837_v33 = vmul.f32 %v3836_v55, %v6663_v14  ;;  %v3192_v29 = vmul.f32 %v3190_v61, %v6477_v26 }
 0x536   :  { %3551 = vrot.lane.b32.xlu0 %v3547_v36, %s4862_s13  ;;  %v3519_v49 = vmul.f32 %v3518_v19, %v6642_v41  ;;  %v3574_v7 = vstv %s6703_s24  ;;  %v3520_v11 = vmul.f32 %v3518_v19, %v6645_v17  ;;  %v3794_v63 = vstv %s6725_s29  ;;  %s6911_s24 = sld [smem:[#allocation12 + $0x80]] }
 0x537   :  { %s4543_s29 = sld [smem:[#allocation12 + $0x42]] }
 0x538   :  { %3553 = vrot.lane.b32.xlu1 %v3548_v5, %s4862_s13  ;;  %v3328_v5 = vstv %s6707_s25  ;;  %s6922_s25 = sld [smem:[#allocation12 + $0x82]] }
 0x53a   :  { %3633 = vrot.lane.b32.xlu0 %v3629_v38, %s4861_s11 }
 0x53c   :  { %3635 = vrot.lane.b32.xlu1 %v3630_v39, %s4861_s11  ;;  %v3575_v39 = vmul.f32 %v3574_v7, %v6642_v41 }
 0x53e   :  { %3689 = vrot.lane.b32.xlu0 %v3685_v25, %s4862_s13 }
 0x540   :  { %3691 = vrot.lane.b32.xlu1 %v3686_v46, %s4862_s13  ;;  %v3329_v46 = vmul.f32 %v3328_v5, %v6492_v13 }
 0x542   :  { %3771 = vrot.lane.b32.xlu0 %v3767_v37, %s4861_s11  ;;  %v3712_v37 = vstv %s6715_s21  ;;  %s6927_s21 = sld [smem:[#allocation12 + $0x21]] }
 0x543   :  { %v3714_v19 = vmul.f32 %v3712_v37, %v6655_v45 }
 0x544   :  { %3773 = vrot.lane.b32.xlu1 %v3768_v43, %s4861_s11  ;;  %v3576_v43 = vmul.f32 %v3574_v7, %v6645_v17 }
 0x546   :  { %3827 = vrot.lane.b32.xlu0 %v3823_v18, %s4862_s13 }
 0x548   :  { %3829 = vrot.lane.b32.xlu1 %v3824_v57, %s4862_s13  ;;  %v3330_v57 = vmul.f32 %v3328_v5, %v6500_v9 }
 0x54a   :  { %3509 = vrot.lane.b32.xlu0 %v3505_v22, %s4861_s11  ;;  %v3656_v22 = vstv %s6720_s26  ;;  %s6937_s26 = sld [smem:[#allocation12 + $0x83]] }
 0x54b   :  { %v3657_v30 = vmul.f32 %v3656_v22, %v6651_v23 }
 0x54c   :  { %3511 = vrot.lane.b32.xlu1 %v3506_v40, %s4861_s11  ;;  %v3713_v40 = vmul.f32 %v3712_v37, %v6651_v23 }
 0x54e   :  { %3565 = vrot.lane.b32.xlu0 %v3561_v21, %s4862_s13 }
 0x550   :  { %3567 = vrot.lane.b32.xlu1 %v3562_v47, %s4862_s13 }
 0x552   :  { %3703 = vrot.lane.b32.xlu0 %v3699_v56, %s4862_s13  ;;  %v3466_v56 = vstv %s6730_s6  ;;  %s4555_s6 = sld [smem:[#allocation12 + $0x45]] }
 0x554   :  { %3647 = vrot.lane.b32.xlu1 %v3643_v62, %s4861_s11 }
 0x556   :  { %3785 = vrot.lane.b32.xlu0 %v3781_v12, %s4861_s11  ;;  %v3795_v12 = vmul.f32 %v3794_v63, %v6663_v14 }
 0x558   :  { %3649 = vrot.lane.b32.xlu1 %v3644_v60, %s4861_s11  ;;  %v3082_v20 = vpop.permute.xlu0 %3081 }
 0x559   :  { %v3087_v1 = vadd.f32 %v3082_v20, %v6510_v15  ;;  %v3838_v15 = vmul.f32 %v3836_v55, %v6667_v10 }
 0x55a   :  { %v3084_v54 = vpop.permute.xlu1 %3083  ;;  %3787 = vrot.lane.b32.xlu0 %v3782_v4, %s4861_s11  ;;  %v3467_v4 = vmul.f32 %v3466_v56, %v6642_v41 }
 0x55b   :  { %v3088_v0 = vadd.f32 %v3084_v54, %v6517_v24  ;;  %v3658_v54 = vmul.f32 %v3656_v22, %v6655_v45 }
 0x55c   :  { %3705 = vrot.lane.b32.xlu1 %v3700_v44, %s4862_s13  ;;  %v3138_v6 = vpop.permute.xlu0 %3137 }
 0x55d   :  { %v3143_v31 = vadd.f32 %v3138_v6, %v3087_v1  ;;  %v3468_v1 = vmul.f32 %v3466_v56, %v6645_v17 }
 0x55e   :  { %v3140_v42 = vpop.permute.xlu1 %3139  ;;  %3841 = vrot.lane.b32.xlu0 %v3837_v33, %s4862_s13  ;;  %v3796_v33 = vmul.f32 %v3794_v63, %v6667_v10 }
 0x55f   :  { %v3144_v2 = vadd.f32 %v3140_v42, %v3088_v0  ;;  %v3193_v27 = vadd.f32 %v3191_v32, %v3143_v31  ;;  %v3850_v0 = vstv %s6743_s0  ;;  %v3196_v42 = vstv %s6747_s27  ;;  %s4544_s0 = sld [smem:[#allocation12 + $0x66]] }
 0x560   :  { %3843 = vrot.lane.b32.xlu1 %v3838_v15, %s4862_s13  ;;  %v3220_v24 = vpop.permute.xlu0 %3219  ;;  %v3852_v37 = vmul.f32 %v3850_v0, %v6667_v10  ;;  %s7000_s27 = sld [smem:[#allocation12 + $0x69]] }
 0x561   :  { %v3194_v50 = vadd.f32 %v3192_v29, %v3144_v2  ;;  %v3225_v38 = vadd.f32 %v3220_v24, %v3193_v27  ;;  %v3851_v27 = vmul.f32 %v3850_v0, %v6663_v14 }
 0x562   :  { %v3222_v36 = vpop.permute.xlu1 %3221  ;;  %3523 = vrot.lane.b32.xlu0 %v3519_v49, %s4861_s11  ;;  %v2290_v49 = vstv %s6752_s28  ;;  %s4425_s28 = sld [smem:[#allocation12 + $0x6c]] }
 0x563   :  { %v3226_v25 = vadd.f32 %v3222_v36, %v3194_v50  ;;  %v3197_v50 = vmul.f32 %v3196_v42, %v6469_v28  ;;  %v6781_v36 = vld [vmem:[#allocation3 + $0x8] sm:$0xff] }
 0x564   :  { %3525 = vrot.lane.b32.xlu1 %v3520_v11, %s4861_s11  ;;  %v3276_v34 = vpop.permute.xlu0 %3275 }
 0x565   :  { %v3281_v52 = vadd.f32 %v3276_v34, %v3225_v38  ;;  %v3198_v38 = vmul.f32 %v3196_v42, %v6477_v26  ;;  %v6786_v34 = vld [vmem:[#allocation3] sm:$0xff] }
 0x566   :  { %v3278_v16 = vpop.permute.xlu1 %3277  ;;  %3579 = vrot.lane.b32.xlu0 %v3575_v39, %s4862_s13  ;;  %v2291_v39 = vmul.f32 %v6786_v34, %v2290_v49 }
 0x567   :  { %v3282_v18 = vadd.f32 %v3278_v16, %v3226_v25  ;;  %v3331_v59 = vadd.f32 %v3329_v46, %v3281_v52  ;;  %v2346_v52 = vstv %s6763_s30  ;;  %v3334_v16 = vstv %s6770_s12  ;;  %s4525_s30 = sld [smem:[#allocation12 + $0x85]] }
 0x568   :  { %3581 = vrot.lane.b32.xlu1 %v3576_v43, %s4862_s13  ;;  %v3358_v58 = vpop.permute.xlu0 %3357  ;;  %v2348_v63 = vmul.f32 %v6781_v36, %v2346_v52  ;;  %v3336_v56 = vmul.f32 %v3334_v16, %v6500_v9  ;;  %s4422_s12 = sld [smem:[#allocation13 + $0x3]] }
 0x569   :  { %v3332_v21 = vadd.f32 %v3330_v57, %v3282_v18  ;;  %v3363_v8 = vadd.f32 %v3358_v58, %v3331_v59  ;;  %v2347_v59 = vmul.f32 %v6786_v34, %v2346_v52  ;;  %v3335_v58 = vmul.f32 %v3334_v16, %v6492_v13 }
 0x56a   :  { %v3360_v47 = vpop.permute.xlu1 %3359  ;;  %3717 = vrot.lane.b32.xlu0 %v3713_v40, %s4862_s13  ;;  %v2428_v40 = vstv %s6778_s4  ;;  %s4437_s4 = sld [smem:[#allocation12 + $0x6f]] }
 0x56b   :  { %v3364_v60 = vadd.f32 %v3360_v47, %v3332_v21 }
 0x56c   :  { %3661 = vrot.lane.b32.xlu1 %v3657_v30, %s4861_s11  ;;  %v3414_v62 = vpop.permute.xlu0 %3413 }
 0x56d   :  { %v3419_v20 = vadd.f32 %v3414_v62, %v3363_v8  ;;  %v6807_v62 = vld [vmem:[#allocation3 + $0x1] sm:$0xff] }
 0x56e   :  { %v3416_v55 = vpop.permute.xlu1 %3415  ;;  %3799 = vrot.lane.b32.xlu0 %v3795_v12, %s4861_s11  ;;  %v2429_v12 = vmul.f32 %v6807_v62, %v2428_v40 }
 0x56f   :  { %v3420_v44 = vadd.f32 %v3416_v55, %v3364_v60  ;;  %v6757_v61 = vadd.f32 %v3467_v4, %v3419_v20  ;;  %v2484_v20 = vstv %s6790_s14  ;;  %v6814_v55 = vld [vmem:[#allocation3 + $0x9] sm:$0xff]  ;;  %s4449_s14 = sld [smem:[#allocation12 + $0x72]] }
 0x570   :  { %3663 = vrot.lane.b32.xlu1 %v3658_v54, %s4861_s11  ;;  %v3096_v6 = vpop.permute.xlu0 %3095  ;;  %v2430_v54 = vmul.f32 %v6814_v55, %v2428_v40  ;;  %v6859_v40 = vld [vmem:[#allocation3 + $0x18] sm:$0xff] }
 0x571   :  { %v6765_v31 = vadd.f32 %v3468_v1, %v3420_v44  ;;  %v3101_v15 = vadd.f32 %v3096_v6, %v6573_v35  ;;  %v2292_v35 = vmul.f32 %v6781_v36, %v2290_v49  ;;  %v3472_v44 = vstv %s6795_s15  ;;  %s4461_s15 = sld [smem:[#allocation12 + $0x75]] }
 0x572   :  { %v3098_v32 = vpop.permute.xlu1 %3097  ;;  %3801 = vrot.lane.b32.xlu0 %v3796_v33, %s4861_s11  ;;  %v2485_v33 = vmul.f32 %v6807_v62, %v2484_v20  ;;  %v3473_v42 = vmul.f32 %v3472_v44, %v6642_v41 }
 0x573   :  { %v3102_v29 = vadd.f32 %v3098_v32, %v6580_v3 }
 0x574   :  { %3719 = vrot.lane.b32.xlu1 %v3714_v19, %s4862_s13  ;;  %v3152_v2 = vpop.permute.xlu0 %3151  ;;  %v2566_v19 = vstv %s6801_s16  ;;  %s7042_s16 = sld [smem:[#allocation12 + $0x78]] }
 0x575   :  { %v3157_v24 = vadd.f32 %v3152_v2, %v3101_v15  ;;  %v2486_v2 = vmul.f32 %v6814_v55, %v2484_v20 }
 0x576   :  { %v3154_v7 = vpop.permute.xlu1 %3153  ;;  %3855 = vrot.lane.b32.xlu0 %v3851_v27, %s4862_s13 }
 0x577   :  { %v3158_v11 = vadd.f32 %v3154_v7, %v3102_v29  ;;  %v3199_v5 = vadd.f32 %v3197_v50, %v3157_v24  ;;  %v3474_v24 = vmul.f32 %v3472_v44, %v6645_v17  ;;  %v6832_v50 = vld [vmem:[#allocation3 + $0x2] sm:$0xff]  ;;  %v2842_v44 = vstv %s6853_s20  ;;  %s7079_s20 = sld [smem:[#allocation12 + $0x89]] }
 0x578   :  { %2297 = vrot.lane.b32.xlu1 %v2292_v35, %s4861_s11  ;;  %v3234_v3 = vpop.permute.xlu0 %3233  ;;  %v2567_v7 = vmul.f32 %v6832_v50, %v2566_v19  ;;  %v2622_v35 = vstv %s6811_s17  ;;  %s7058_s17 = sld [smem:[#allocation12 + $0x7b]] }
 0x579   :  { %v3200_v25 = vadd.f32 %v3198_v38, %v3158_v11  ;;  %v3239_v43 = vadd.f32 %v3234_v3, %v3199_v5  ;;  %v6841_v38 = vld [vmem:[#allocation3 + $0xa] sm:$0xff] }
 0x57a   :  { %v3236_v46 = vpop.permute.xlu1 %3235  ;;  %2295 = vrot.lane.b32.xlu0 %v2291_v39, %s4861_s11  ;;  %v2568_v3 = vmul.f32 %v6841_v38, %v2566_v19  ;;  %v3202_v39 = vstv %s6817_s2  ;;  %s4497_s2 = sld [smem:[#allocation12 + $0x7e]] }
 0x57b   :  { %v3240_v57 = vadd.f32 %v3236_v46, %v3200_v25  ;;  %v2623_v46 = vmul.f32 %v6832_v50, %v2622_v35 }
 0x57c   :  { %3857 = vrot.lane.b32.xlu1 %v3852_v37, %s4862_s13  ;;  %v3290_v18 = vpop.permute.xlu0 %3289 }
 0x57d   :  { %v3295_v22 = vadd.f32 %v3290_v18, %v3239_v43  ;;  %v3203_v43 = vmul.f32 %v3202_v39, %v6469_v28  ;;  %v2704_v18 = vstv %s6823_s5  ;;  %s4529_s5 = sld [smem:[#allocation12 + $0x86]] }
 0x57e   :  { %v3292_v21 = vpop.permute.xlu1 %3291  ;;  %2351 = vrot.lane.b32.xlu0 %v2347_v59, %s4862_s13  ;;  %v2705_v28 = vmul.f32 %v6859_v40, %v2704_v18 }
 0x57f   :  { %v3296_v47 = vadd.f32 %v3292_v21, %v3240_v57  ;;  %v3337_v30 = vadd.f32 %v3335_v58, %v3295_v22  ;;  %v3204_v58 = vmul.f32 %v3202_v39, %v6477_v26  ;;  %v3340_v26 = vstv %s6845_s19  ;;  %s7075_s19 = sld [smem:[#allocation12 + $0x88]] }
 0x580   :  { %2353 = vrot.lane.b32.xlu1 %v2348_v63, %s4862_s13  ;;  %v3372_v8 = vpop.permute.xlu0 %3371  ;;  %v2760_v63 = vstv %s6836_s18  ;;  %s7073_s18 = sld [smem:[#allocation12 + $0x81]] }
 0x581   :  { %v3338_v60 = vadd.f32 %v3336_v56, %v3296_v47  ;;  %v3377_v1 = vadd.f32 %v3372_v8, %v3337_v30  ;;  %v6866_v30 = vld [vmem:[#allocation3 + $0x20] sm:$0xff] }
 0x582   :  { %v3374_v4 = vpop.permute.xlu1 %3373  ;;  %2433 = vrot.lane.b32.xlu0 %v2429_v12, %s4861_s11  ;;  %v2706_v56 = vmul.f32 %v6866_v30, %v2704_v18 }
 0x583   :  { %v3378_v0 = vadd.f32 %v3374_v4, %v3338_v60  ;;  %v2761_v60 = vmul.f32 %v6859_v40, %v2760_v63 }
 0x584   :  { %2435 = vrot.lane.b32.xlu1 %v2430_v54, %s4861_s11  ;;  %v3428_v6 = vpop.permute.xlu0 %3427  ;;  %v3341_v54 = vmul.f32 %v3340_v26, %v6492_v13 }
 0x585   :  { %v3433_v32 = vadd.f32 %v3428_v6, %v3377_v1  ;;  %v2762_v6 = vmul.f32 %v6866_v30, %v2760_v63 }
 0x586   :  { %v3430_v15 = vpop.permute.xlu1 %3429  ;;  %2489 = vrot.lane.b32.xlu0 %v2485_v33, %s4862_s13 }
 0x587   :  { %v3434_v27 = vadd.f32 %v3430_v15, %v3378_v0  ;;  %v6828_v29 = vadd.f32 %v3473_v42, %v3433_v32  ;;  %v3342_v32 = vmul.f32 %v3340_v26, %v6500_v9  ;;  %v6882_v42 = vld [vmem:[#allocation3 + $0x19] sm:$0xff]  ;;  %v3478_v9 = vstv %s6870_s22  ;;  %s7089_s22 = sld [smem:[#allocation12 + $0x8b]] }
 0x588   :  { %2491 = vrot.lane.b32.xlu1 %v2486_v2, %s4862_s13  ;;  %v3110_v49 = vpop.permute.xlu0 %3109  ;;  %v2843_v13 = vmul.f32 %v6882_v42, %v2842_v44  ;;  %v2898_v2 = vstv %s6863_s3  ;;  %v3480_v18 = vmul.f32 %v3478_v9, %v6645_v17  ;;  %s7083_s3 = sld [smem:[#allocation12 + $0x84]] }
 0x589   :  { %v6838_v11 = vadd.f32 %v3474_v24, %v3434_v27  ;;  %v3115_v25 = vadd.f32 %v3110_v49, %v6630_v48  ;;  %v2624_v48 = vmul.f32 %v6841_v38, %v2622_v35  ;;  %v6889_v24 = vld [vmem:[#allocation3 + $0x21] sm:$0xff] }
 0x58a   :  { %v3112_v5 = vpop.permute.xlu1 %3111  ;;  %2571 = vrot.lane.b32.xlu0 %v2567_v7, %s4861_s11  ;;  %v2844_v49 = vmul.f32 %v6889_v24, %v2842_v44 }
 0x58b   :  { %v3116_v37 = vadd.f32 %v3112_v5, %v6636_v53  ;;  %v2899_v5 = vmul.f32 %v6882_v42, %v2898_v2 }
 0x58c   :  { %2573 = vrot.lane.b32.xlu1 %v2568_v3, %s4861_s11  ;;  %v3166_v52 = vpop.permute.xlu0 %3165 }
 0x58d   :  { %v3171_v16 = vadd.f32 %v3166_v52, %v3115_v25  ;;  %v2980_v25 = vstv %s6876_s1  ;;  %v3479_v52 = vmul.f32 %v3478_v9, %v6642_v41  ;;  %s4553_s1 = sld [smem:[#allocation12 + $0x8c]] }
 0x58e   :  { %v3168_v59 = vpop.permute.xlu1 %3167  ;;  %2627 = vrot.lane.b32.xlu0 %v2623_v46, %s4862_s13 }
 0x58f   :  { %v3172_v57 = vadd.f32 %v3168_v59, %v3116_v37  ;;  %v3205_v22 = vadd.f32 %v3203_v43, %v3171_v16  ;;  %v2900_v37 = vmul.f32 %v6889_v24, %v2898_v2  ;;  %v6907_v59 = vld [vmem:[#allocation3 + $0x1a] sm:$0xff] }
 0x590   :  { %2629 = vrot.lane.b32.xlu1 %v2624_v48, %s4862_s13  ;;  %v3248_v53 = vpop.permute.xlu0 %3247  ;;  %v2981_v41 = vmul.f32 %v6907_v59, %v2980_v25  ;;  %v3036_v48 = vstv %s6886_s23  ;;  %s4561_s23 = sld [smem:[#allocation12 + $0x8e]] }
 0x591   :  { %v3206_v21 = vadd.f32 %v3204_v58, %v3172_v57  ;;  %v3253_v8 = vadd.f32 %v3248_v53, %v3205_v22  ;;  %v6916_v22 = vld [vmem:[#allocation3 + $0x22] sm:$0xff]  ;;  %v3037_v53 = vmul.f32 %v6907_v59, %v3036_v48 }
 0x592   :  { %v3250_v47 = vpop.permute.xlu1 %3249  ;;  %2709 = vrot.lane.b32.xlu0 %v2705_v28, %s4861_s11  ;;  %v2982_v58 = vmul.f32 %v6916_v22, %v2980_v25  ;;  %v3118_v28 = vstv %s6896_s7  ;;  %v3038_v63 = vmul.f32 %v6916_v22, %v3036_v48  ;;  %v3312_v25 = vstv %s6937_s26  ;;  %s4565_s7 = sld [smem:[#allocation12 + $0x8f]] }
 0x593   :  { %v3254_v20 = vadd.f32 %v3250_v47, %v3206_v21  ;;  %v3604_v47 = vstv %s6901_s8  ;;  %s4533_s8 = sld [smem:[#allocation12 + $0x87]] }
 0x594   :  { %2711 = vrot.lane.b32.xlu1 %v2706_v56, %s4861_s11  ;;  %v3304_v12 = vpop.permute.xlu0 %3303 }
 0x595   :  { %v3309_v4 = vadd.f32 %v3304_v12, %v3253_v8  ;;  %v6931_v8 = vld [vmem:[#allocation3 + $0x30] sm:$0xff] }
 0x596   :  { %v3306_v1 = vpop.permute.xlu1 %3305  ;;  %2765 = vrot.lane.b32.xlu0 %v2761_v60, %s4862_s13  ;;  %v3119_v12 = vmul.f32 %v6931_v8, %v3118_v28 }
 0x597   :  { %v3310_v33 = vadd.f32 %v3306_v1, %v3254_v20  ;;  %v3343_v0 = vadd.f32 %v3341_v54, %v3309_v4  ;;  %v3605_v4 = vmul.f32 %v3604_v47, %v6651_v23  ;;  %v3174_v54 = vstv %s6911_s24  ;;  %s7162_s24 = sld [smem:[#allocation12 + $0x8a]] }
 0x598   :  { %2767 = vrot.lane.b32.xlu1 %v2762_v6, %s4862_s13  ;;  %v3386_v19 = vpop.permute.xlu0 %3385 }
 0x599   :  { %v3344_v15 = vadd.f32 %v3342_v32, %v3310_v33  ;;  %v3391_v7 = vadd.f32 %v3386_v19, %v3343_v0  ;;  %v3606_v0 = vmul.f32 %v3604_v47, %v6655_v45  ;;  %v3175_v32 = vmul.f32 %v6931_v8, %v3174_v54 }
 0x59a   :  { %v3388_v27 = vpop.permute.xlu1 %3387  ;;  %2847 = vrot.lane.b32.xlu0 %v2843_v13, %s4861_s11  ;;  %v3256_v13 = vstv %s6922_s25 }
 0x59b   :  { %v3392_v3 = vadd.f32 %v3388_v27, %v3344_v15  ;;  %v3742_v27 = vstv %s6927_s21 }
 0x59c   :  { %2849 = vrot.lane.b32.xlu1 %v2844_v49, %s4861_s11  ;;  %v3442_v35 = vpop.permute.xlu0 %3441 }
 0x59d   :  { %v3447_v39 = vadd.f32 %v3442_v35, %v3391_v7  ;;  %v6951_v7 = vld [vmem:[#allocation3 + $0x31] sm:$0xff] }
 0x59e   :  { %v3444_v46 = vpop.permute.xlu1 %3443  ;;  %2903 = vrot.lane.b32.xlu0 %v2899_v5, %s4862_s13  ;;  %v3257_v35 = vmul.f32 %v6951_v7, %v3256_v13 }
 0x59f   :  { %v3448_v16 = vadd.f32 %v3444_v46, %v3392_v3  ;;  %v6903_v43 = vadd.f32 %v3479_v52, %v3447_v39  ;;  %v3743_v39 = vmul.f32 %v3742_v27, %v6663_v14  ;;  %v6957_v46 = vld [vmem:[#allocation3 + $0x39] sm:$0xff] }
 0x5a0   :  { %2905 = vrot.lane.b32.xlu1 %v2900_v37, %s4862_s13  ;;  %v3258_v37 = vmul.f32 %v6957_v46, %v3256_v13 }
 0x5a1   :  { %v6913_v57 = vadd.f32 %v3480_v18, %v3448_v16 }
 0x5a2   :  { %2985 = vrot.lane.b32.xlu0 %v2981_v41, %s4861_s11  ;;  %v3744_v41 = vmul.f32 %v3742_v27, %v6667_v10 }
 0x5a4   :  { %2987 = vrot.lane.b32.xlu1 %v2982_v58, %s4861_s11  ;;  %v3496_v17 = vpop.permute.xlu0 %3495  ;;  %v3313_v58 = vmul.f32 %v6951_v7, %v3312_v25 }
 0x5a5   :  { %v3501_v56 = vadd.f32 %v3496_v17, %v6757_v61  ;;  %v6940_v61 = vld [vmem:[#allocation3 + $0x38] sm:$0xff] }
 0x5a6   :  { %v3498_v21 = vpop.permute.xlu1 %3497  ;;  %3041 = vrot.lane.b32.xlu0 %v3037_v53, %s4862_s13  ;;  %v3120_v1 = vmul.f32 %v6940_v61, %v3118_v28  ;;  %v3176_v2 = vmul.f32 %v6940_v61, %v3174_v54  ;;  %v3314_v28 = vmul.f32 %v6957_v46, %v3312_v25 }
 0x5a7   :  { %v3502_v60 = vadd.f32 %v3498_v21, %v6765_v31 }
 0x5a8   :  { %3043 = vrot.lane.b32.xlu1 %v3038_v63, %s4862_s13  ;;  %v3552_v26 = vpop.permute.xlu0 %3551 }
 0x5a9   :  { %v3557_v20 = vadd.f32 %v3552_v26, %v3501_v56  ;;  %v3610_v26 = vstv %s4543_s29 }
 0x5aa   :  { %v3554_v44 = vpop.permute.xlu1 %3553  ;;  %3123 = vrot.lane.b32.xlu0 %v3119_v12, %s4861_s11  ;;  %v3611_v54 = vmul.f32 %v3610_v26, %v6651_v23 }
 0x5ab   :  { %v3558_v6 = vadd.f32 %v3554_v44, %v3502_v60  ;;  %v3607_v33 = vadd.f32 %v3605_v4, %v3557_v20 }
 0x5ac   :  { %3125 = vrot.lane.b32.xlu1 %v3120_v1, %s4861_s11  ;;  %v3634_v31 = vpop.permute.xlu0 %3633 }
 0x5ad   :  { %v3608_v19 = vadd.f32 %v3606_v0, %v3558_v6  ;;  %v3639_v49 = vadd.f32 %v3634_v31, %v3607_v33  ;;  %v3612_v33 = vmul.f32 %v3610_v26, %v6655_v45  ;;  %v3616_v26 = vstv %s4544_s0 }
 0x5ae   :  { %v3636_v15 = vpop.permute.xlu1 %3635  ;;  %3179 = vrot.lane.b32.xlu0 %v3175_v32, %s4862_s13 }
 0x5af   :  { %v3640_v5 = vadd.f32 %v3636_v15, %v3608_v19  ;;  %v3748_v19 = vstv %s4555_s6 }
 0x5b0   :  { %3181 = vrot.lane.b32.xlu1 %v3176_v2, %s4862_s13  ;;  %v3690_v9 = vpop.permute.xlu0 %3689 }
 0x5b1   :  { %v3695_v3 = vadd.f32 %v3690_v9, %v3639_v49 }
 0x5b2   :  { %v3692_v52 = vpop.permute.xlu1 %3691  ;;  %3261 = vrot.lane.b32.xlu0 %v3257_v35, %s4861_s11 }
 0x5b3   :  { %v3696_v16 = vadd.f32 %v3692_v52, %v3640_v5  ;;  %v3745_v18 = vadd.f32 %v3743_v39, %v3695_v3 }
 0x5b4   :  { %3263 = vrot.lane.b32.xlu1 %v3258_v37, %s4861_s11  ;;  %v3772_v48 = vpop.permute.xlu0 %3771 }
 0x5b5   :  { %v3746_v17 = vadd.f32 %v3744_v41, %v3696_v16  ;;  %v3750_v16 = vmul.f32 %v3748_v19, %v6667_v10 }
 0x5b6   :  { %v3774_v53 = vpop.permute.xlu1 %3773  ;;  %3317 = vrot.lane.b32.xlu0 %v3313_v58, %s4862_s13 }
 0x5b7   :  { %v3778_v13 = vadd.f32 %v3774_v53, %v3746_v17 }
 0x5b8   :  { %3319 = vrot.lane.b32.xlu1 %v3314_v28, %s4862_s13  ;;  %v3828_v21 = vpop.permute.xlu0 %3827 }
 0x5ba   :  { %v3830_v63 = vpop.permute.xlu1 %3829 }
 0x5bb   :  { %v3834_v27 = vadd.f32 %v3830_v63, %v3778_v13 }
 0x5bc   :  { %v3510_v47 = vpop.permute.xlu0 %3509 }
 0x5bd   :  { %v3515_v12 = vadd.f32 %v3510_v47, %v6828_v29  ;;  %v3777_v29 = vadd.f32 %v3772_v48, %v3745_v18  ;;  %v6979_v39 = vsel %vm5585_vm10, %v3834_v27, 0.0 }
 0x5be   :  { %v3512_v56 = vpop.permute.xlu1 %3511  ;;  %v3880_v48 = vsel %vm1928_vm11, %v6979_v39, 0.0  ;;  %v3892_v28 = vmul.f32 %v6979_v39, %v6979_v39 }
 0x5bf   :  { %v3516_v20 = vadd.f32 %v3512_v56, %v6838_v11  ;;  %v3749_v11 = vmul.f32 %v3748_v19, %v6663_v14  ;;  %v3833_v35 = vadd.f32 %v3828_v21, %v3777_v29 }
 0x5c0   :  { %v3566_v60 = vpop.permute.xlu0 %3565 }
 0x5c1   :  { %v3571_v4 = vadd.f32 %v3566_v60, %v3515_v12  ;;  %v6983_v37 = vsel %vm5585_vm10, %v3833_v35, 0.0  ;;  %v3894_v60 = vsel %vm1928_vm11, %v3892_v28, 0.0 }
 0x5c2   :  { %v3568_v44 = vpop.permute.xlu1 %3567  ;;  %v3879_v53 = vsel %vm1928_vm11, %v6983_v37, 0.0  ;;  %v3891_v47 = vmul.f32 %v6983_v37, %v6983_v37 }
 0x5c3   :  { %v3572_v1 = vadd.f32 %v3568_v44, %v3516_v20  ;;  %v3613_v6 = vadd.f32 %v3611_v54, %v3571_v4  ;;  %v3881_v21 = vadd.f32 %v3880_v48, %v3879_v53 }
 0x5c4   :  { %v3704_v0 = vpop.permute.xlu0 %3703  ;;  %v3893_v44 = vsel %vm1928_vm11, %v3891_v47, 0.0  ;;  %v7023_v47 = vld [vmem:[#allocation3 + $0x32] sm:$0xff] }
 0x5c5   :  { %v3614_v31 = vadd.f32 %v3612_v33, %v3572_v1  ;;  %v3617_v1 = vmul.f32 %v3616_v26, %v6651_v23  ;;  %v3895_v33 = vadd.f32 %v3894_v60, %v3893_v44  ;;  %v7027_v60 = vld [vmem:[#allocation3 + $0x3a] sm:$0xff] }
 0x5c6   :  { %v3648_v32 = vpop.permute.xlu1 %3647 }
 0x5c7   :  { %v3653_v15 = vadd.f32 %v3648_v32, %v3613_v6  ;;  %v3618_v32 = vmul.f32 %v3616_v26, %v6655_v45  ;;  %v2242_v45 = vstv %s4425_s28 }
 0x5c8   :  { %v6970_v2 = vpop.permute.xlu0 %3785  ;;  %v2243_v53 = vmul.f32 %v6786_v34, %v2242_v45 }
 0x5c9   :  { %v3709_v49 = vadd.f32 %v3704_v0, %v3653_v15  ;;  %v3754_v15 = vstv %s7000_s27  ;;  %s4557_s27 = sld [smem:[#allocation12 + $0x8d]] }
 0x5ca   :  { %v3650_v9 = vpop.permute.xlu1 %3649  ;;  %v3755_v23 = vmul.f32 %v3754_v15, %v6663_v14  ;;  %v2220_v14 = vstv %s4422_s12 }
 0x5cb   :  { %v6973_v5 = vadd.f32 %v3749_v11, %v3709_v49  ;;  %v3654_v25 = vadd.f32 %v3650_v9, %v3614_v31 }
 0x5cc   :  { %v6975_v3 = vpop.permute.xlu0 %3787 }
 0x5ce   :  { %v3706_v52 = vpop.permute.xlu1 %3705 }
 0x5cf   :  { %v3710_v18 = vadd.f32 %v3706_v52, %v3654_v25  ;;  %v2244_v25 = vmul.f32 %v6781_v36, %v2242_v45 }
 0x5d0   :  { %v6986_v41 = vpop.permute.xlu0 %3841 }
 0x5d1   :  { %v6990_v58 = vadd.f32 %v3750_v16, %v3710_v18  ;;  %v3394_v16 = vstv %s4525_s30  ;;  %v3756_v18 = vmul.f32 %v3754_v15, %v6667_v10 }
 0x5d2   :  { %v6992_v17 = vpop.permute.xlu1 %3843  ;;  %v3396_v10 = vmul.f32 %v7027_v60, %v3394_v16 }
 0x5d4   :  { %v3524_v63 = vpop.permute.xlu0 %3523 }
 0x5d5   :  { %3882 = vadd.xlane.f32.xlu0 %v3881_v21  ;;  %v3529_v12 = vadd.f32 %v3524_v63, %v6903_v43  ;;  %v2246_v63 = vadd.f32 %v2244_v25, %v2220_v14 }
 0x5d6   :  { %v3526_v56 = vpop.permute.xlu1 %3525 }
 0x5d7   :  { %v3530_v4 = vadd.f32 %v3526_v56, %v6913_v57  ;;  %v3395_v56 = vmul.f32 %v7023_v47, %v3394_v16 }
 0x5d8   :  { %v3580_v20 = vpop.permute.xlu0 %3579 }
 0x5d9   :  { %v3585_v54 = vadd.f32 %v3580_v20, %v3529_v12  ;;  %v2245_v12 = vadd.f32 %v2243_v53, %v2220_v14  ;;  %v3791_v53 = vadd.f32 %v6970_v2, %v6973_v5 }
 0x5da   :  { %v3582_v6 = vpop.permute.xlu1 %3581 }
 0x5db   :  { %v3586_v0 = vadd.f32 %v3582_v6, %v3530_v4  ;;  %v3619_v31 = vadd.f32 %v3617_v1, %v3585_v54  ;;  %v2380_v54 = vstv %s4437_s4 }
 0x5dc   :  { %3896 = vadd.xlane.f32.xlu1 %v3895_v33  ;;  %v3718_v19 = vpop.permute.xlu0 %3717  ;;  %v2381_v6 = vmul.f32 %v6807_v62, %v2380_v54 }
 0x5dd   :  { %v3620_v43 = vadd.f32 %v3618_v32, %v3586_v0  ;;  %v2382_v32 = vmul.f32 %v6814_v55, %v2380_v54 }
 0x5de   :  { %v3662_v13 = vpop.permute.xlu1 %3661 }
 0x5df   :  { %v3667_v29 = vadd.f32 %v3662_v13, %v3619_v31 }
 0x5e0   :  { %v7009_v57 = vpop.permute.xlu0 %3799 }
 0x5e1   :  { %v3723_v27 = vadd.f32 %v3718_v19, %v3667_v29  ;;  %v2518_v29 = vstv %s4449_s14 }
 0x5e2   :  { %v3664_v49 = vpop.permute.xlu1 %3663  ;;  %v2519_v45 = vmul.f32 %v6832_v50, %v2518_v29  ;;  %v2520_v16 = vmul.f32 %v6841_v38, %v2518_v29 }
 0x5e3   :  { %v7012_v11 = vadd.f32 %v3755_v23, %v3723_v27  ;;  %v3668_v35 = vadd.f32 %v3664_v49, %v3620_v43 }
 0x5e4   :  { %v7014_v9 = vpop.permute.xlu0 %3801 }
 0x5e6   :  { %v3720_v52 = vpop.permute.xlu1 %3719 }
 0x5e7   :  { %v3724_v48 = vadd.f32 %v3720_v52, %v3668_v35  ;;  %v3792_v35 = vadd.f32 %v6975_v3, %v6990_v58  ;;  %v3847_v3 = vadd.f32 %v6986_v41, %v3791_v53 }
 0x5e8   :  { %v7019_v28 = vpop.permute.xlu0 %3855 }
 0x5e9   :  { %v7021_v21 = vadd.f32 %v3756_v18, %v3724_v48  ;;  %v3848_v14 = vadd.f32 %v6992_v17, %v3792_v35 }
 0x5ea   :  { %v2298_v26 = vpop.permute.xlu1 %2297 }
 0x5eb   :  { %v2302_v36 = vadd.f32 %v2298_v26, %v2246_v63  ;;  %3399 = vrot.lane.b32.xlu0 %v3395_v56, %s4861_s11  ;;  %v2656_v56 = vstv %s4461_s15 }
 0x5ec   :  { %v2296_v34 = vpop.permute.xlu0 %2295  ;;  %v2657_v38 = vmul.f32 %v6859_v40, %v2656_v56  ;;  %v2658_v17 = vmul.f32 %v6866_v30, %v2656_v56 }
 0x5ed   :  { %v2301_v20 = vadd.f32 %v2296_v34, %v2245_v12  ;;  %3401 = vrot.lane.b32.xlu1 %v3396_v10, %s4861_s11  ;;  %v7053_v10 = vsel %vm5585_vm10, %v3847_v3, 0.0 }
 0x5ee   :  { %v7031_v4 = vpop.permute.xlu1 %3857 }
 0x5f0   :  { %v2352_v44 = vpop.permute.xlu0 %2351 }
 0x5f1   :  { %v2357_v1 = vadd.f32 %v2352_v44, %v2301_v20  ;;  %v2794_v44 = vstv %s7042_s16 }
 0x5f2   :  { %v2354_v33 = vpop.permute.xlu1 %2353  ;;  %v2796_v29 = vmul.f32 %v6889_v24, %v2794_v44 }
 0x5f3   :  { %v2358_v0 = vadd.f32 %v2354_v33, %v2302_v36  ;;  %v2383_v31 = vadd.f32 %v2381_v6, %v2357_v1  ;;  %v7048_v36 = vsel %vm5585_vm10, %v3848_v14, 0.0  ;;  %v3965_v6 = vsel %vm1928_vm11, %v7053_v10, 0.0 }
 0x5f4   :  { %v2434_v19 = vpop.permute.xlu0 %2433  ;;  %v3966_v54 = vsel %vm1928_vm11, %v7048_v36, 0.0  ;;  %v3978_v30 = vmul.f32 %v7048_v36, %v7048_v36 }
 0x5f5   :  { %v2439_v43 = vadd.f32 %v2434_v19, %v2383_v31  ;;  %v2384_v13 = vadd.f32 %v2382_v32, %v2358_v0  ;;  %v3967_v0 = vadd.f32 %v3966_v54, %v3965_v6  ;;  %v2795_v32 = vmul.f32 %v6882_v42, %v2794_v44 }
 0x5f6   :  { %v2436_v15 = vpop.permute.xlu1 %2435  ;;  %v3977_v19 = vmul.f32 %v7053_v10, %v7053_v10 }
 0x5f7   :  { %v2440_v27 = vadd.f32 %v2436_v15, %v2384_v13 }
 0x5f8   :  { %v2490_v23 = vpop.permute.xlu0 %2489 }
 0x5f9   :  { %v2495_v49 = vadd.f32 %v2490_v23, %v2439_v43  ;;  %v3980_v23 = vsel %vm1928_vm11, %v3978_v30, 0.0 }
 0x5fa   :  { %v2492_v62 = vpop.permute.xlu1 %2491 }
 0x5fb   :  { %v2496_v25 = vadd.f32 %v2492_v62, %v2440_v27  ;;  %v2521_v52 = vadd.f32 %v2519_v45, %v2495_v49  ;;  %v3979_v62 = vsel %vm1928_vm11, %v3977_v19, 0.0 }
 0x5fc   :  { %v2572_v55 = vpop.permute.xlu0 %2571 }
 0x5fd   :  { %v2577_v18 = vadd.f32 %v2572_v55, %v2521_v52  ;;  %v2522_v48 = vadd.f32 %v2520_v16, %v2496_v25  ;;  %v2932_v25 = vstv %s7058_s17  ;;  %v3981_v52 = vadd.f32 %v3980_v23, %v3979_v62  ;;  %s3919_s17 = sld [smem:[#allocation15]] }
 0x5fe   :  { %v2574_v63 = vpop.permute.xlu1 %2573  ;;  %v2934_v14 = vmul.f32 %v6916_v22, %v2932_v25 }
 0x5ff   :  { %v2578_v50 = vadd.f32 %v2574_v63, %v2522_v48 }
 0x600   :  { %v2628_v58 = vpop.permute.xlu0 %2627 }
 0x601   :  { %v2633_v26 = vadd.f32 %v2628_v58, %v2577_v18  ;;  %v2933_v18 = vmul.f32 %v6907_v59, %v2932_v25  ;;  %v3070_v58 = vstv %s4497_s2  ;;  %v3346_v25 = vstv %s7083_s3 }
 0x602   :  { %v2630_v12 = vpop.permute.xlu1 %2629  ;;  %v3071_v59 = vmul.f32 %v6931_v8, %v3070_v58  ;;  %v3532_v8 = vstv %s7075_s19  ;;  %s4568_s19 = sld [smem:[#allocation15 + $0x1]] }
 0x603   :  { %v2634_v2 = vadd.f32 %v2630_v12, %v2578_v50  ;;  %v2659_v5 = vadd.f32 %v2657_v38, %v2633_v26 }
 0x604   :  { %v2710_v34 = vpop.permute.xlu0 %2709 }
 0x605   :  { %v2715_v20 = vadd.f32 %v2710_v34, %v2659_v5  ;;  %v2660_v41 = vadd.f32 %v2658_v17, %v2634_v2  ;;  %v3072_v17 = vmul.f32 %v6940_v61, %v3070_v58  ;;  %v3450_v34 = vstv %s4529_s5  ;;  %s3923_s5 = sld [smem:[#allocation16]] }
 0x606   :  { %v2712_v40 = vpop.permute.xlu1 %2711  ;;  %v3451_v44 = vmul.f32 %v7023_v47, %v3450_v34  ;;  %v3452_v61 = vmul.f32 %v7027_v60, %v3450_v34  ;;  %v3806_v58 = vadd.f32 %v7014_v9, %v7021_v21  ;;  %v3808_v34 = vstv %s4561_s23 }
 0x607   :  { %v2716_v1 = vadd.f32 %v2712_v40, %v2660_v41 }
 0x608   :  { %v2766_v33 = vpop.permute.xlu0 %2765 }
 0x609   :  { %v2771_v31 = vadd.f32 %v2766_v33, %v2715_v20 }
 0x60a   :  { %v2768_v43 = vpop.permute.xlu1 %2767  ;;  %3968 = vadd.xlane.f32.xlu0 %v3967_v0 }
 0x60b   :  { %v2772_v13 = vadd.f32 %v2768_v43, %v2716_v1  ;;  %v2797_v15 = vadd.f32 %v2795_v32, %v2771_v31  ;;  %v3208_v1 = vstv %s7073_s18  ;;  %v7092_v32 = vld [vmem:[#allocation3 + $0x48] sm:$0xff]  ;;  %s4864_s18 = smov 109  }
 0x60c   :  { %v2848_v27 = vpop.permute.xlu0 %2847  ;;  %v3209_v0 = vmul.f32 %v6951_v7, %v3208_v1  ;;  %v3533_v19 = vmul.f32 %v7092_v32, %v3532_v8  ;;  %v7098_v7 = vld [vmem:[#allocation3 + $0x50] sm:$0xff] }
 0x60d   :  { %v2853_v49 = vadd.f32 %v2848_v27, %v2797_v15  ;;  %v2798_v45 = vadd.f32 %v2796_v29, %v2772_v13  ;;  %v3210_v15 = vmul.f32 %v6957_v46, %v3208_v1  ;;  %v3588_v29 = vstv %s7079_s20  ;;  %s4569_s20 = sld [smem:[#allocation16 + $0x1]] }
 0x60e   :  { %v2850_v35 = vpop.permute.xlu1 %2849  ;;  %v3534_v23 = vmul.f32 %v7098_v7, %v3532_v8  ;;  %v3589_v62 = vmul.f32 %v7092_v32, %v3588_v29 }
 0x60f   :  { %v2854_v42 = vadd.f32 %v2850_v35, %v2798_v45 }
 0x610   :  { %v2904_v16 = vpop.permute.xlu0 %2903 }
 0x611   :  { %v2909_v55 = vadd.f32 %v2904_v16, %v2853_v49  ;;  %3982 = vadd.xlane.f32.xlu1 %v3981_v52  ;;  %v3590_v52 = vmul.f32 %v7098_v7, %v3588_v29 }
 0x612   :  { %v2906_v48 = vpop.permute.xlu1 %2905 }
 0x613   :  { %v2910_v53 = vadd.f32 %v2906_v48, %v2854_v42  ;;  %v2935_v24 = vadd.f32 %v2933_v18, %v2909_v55  ;;  %v3670_v55 = vstv %s7089_s22  ;;  %v3347_v18 = vmul.f32 %v7023_v47, %v3346_v25 }
 0x614   :  { %v2986_v63 = vpop.permute.xlu0 %2985 }
 0x615   :  { %v2991_v56 = vadd.f32 %v2986_v63, %v2935_v24  ;;  %v2936_v50 = vadd.f32 %v2934_v14, %v2910_v53  ;;  %v3348_v14 = vmul.f32 %v7027_v60, %v3346_v25  ;;  %v7112_v63 = vld [vmem:[#allocation3 + $0x49] sm:$0xff]  ;;  %v3805_v60 = vadd.f32 %v7009_v57, %v7012_v11 }
 0x616   :  { %v2988_v3 = vpop.permute.xlu1 %2987  ;;  %v3484_v25 = vstv %s4533_s8 }
 0x617   :  { %v2992_v26 = vadd.f32 %v2988_v3, %v2936_v50  ;;  %v7118_v3 = vld [vmem:[#allocation3 + $0x51] sm:$0xff] }
 0x618   :  { %v3042_v38 = vpop.permute.xlu0 %3041  ;;  %v3672_v47 = vmul.f32 %v7118_v3, %v3670_v55 }
 0x619   :  { %v3047_v12 = vadd.f32 %v3042_v38, %v2991_v56  ;;  %v3671_v56 = vmul.f32 %v7112_v63, %v3670_v55  ;;  %v3861_v38 = vadd.f32 %v7019_v28, %v3805_v60  ;;  %v3485_v55 = vmul.f32 %v7092_v32, %v3484_v25 }
 0x61a   :  { %v3044_v2 = vpop.permute.xlu1 %3043 }
 0x61b   :  { %v3048_v5 = vadd.f32 %v3044_v2, %v2992_v26  ;;  %v3073_v22 = vadd.f32 %v3071_v59, %v3047_v12  ;;  %v3862_v26 = vadd.f32 %v7031_v4, %v3806_v58  ;;  %v7134_v59 = vsel %vm5585_vm10, %v3861_v38, 0.0 }
 0x61c   :  { %v3124_v20 = vpop.permute.xlu0 %3123  ;;  %v4059_v9 = vsel %vm1928_vm11, %v7134_v59, 0.0  ;;  %v4071_v11 = vmul.f32 %v7134_v59, %v7134_v59 }
 0x61d   :  { %v3129_v41 = vadd.f32 %v3124_v20, %v3073_v22  ;;  %v3074_v54 = vadd.f32 %v3072_v17, %v3048_v5  ;;  %v7130_v12 = vsel %vm5585_vm10, %v3862_v26, 0.0  ;;  %v3726_v22 = vstv %s4553_s1 }
 0x61e   :  { %v3126_v40 = vpop.permute.xlu1 %3125  ;;  %v4060_v2 = vsel %vm1928_vm11, %v7130_v12, 0.0  ;;  %v4072_v57 = vmul.f32 %v7130_v12, %v7130_v12  ;;  %v4073_v4 = vsel %vm1928_vm11, %v4071_v11, 0.0  ;;  %v3727_v17 = vmul.f32 %v7112_v63, %v3726_v22 }
 0x61f   :  { %v3130_v6 = vadd.f32 %v3126_v40, %v3074_v54  ;;  %v4061_v21 = vadd.f32 %v4060_v2, %v4059_v9  ;;  %v7148_v54 = vld [vmem:[#allocation3 + $0x4a] sm:$0xff] }
 0x620   :  { %3455 = vrot.lane.b32.xlu0 %v3451_v44, %s4862_s13  ;;  %v3180_v30 = vpop.permute.xlu0 %3179  ;;  %v4074_v28 = vsel %vm1928_vm11, %v4072_v57, 0.0  ;;  %v3809_v40 = vmul.f32 %v7148_v54, %v3808_v34 }
 0x621   :  { %v3185_v33 = vadd.f32 %v3180_v30, %v3129_v41  ;;  %v4075_v5 = vadd.f32 %v4074_v28, %v4073_v4  ;;  %v3864_v30 = vstv %s4565_s7 }
 0x622   :  { %v3182_v31 = vpop.permute.xlu1 %3181  ;;  %3457 = vrot.lane.b32.xlu1 %v3452_v61, %s4862_s13 }
 0x623   :  { %v3186_v43 = vadd.f32 %v3182_v31, %v3130_v6  ;;  %v3211_v13 = vadd.f32 %v3209_v0, %v3185_v33  ;;  %v7152_v6 = vld [vmem:[#allocation3 + $0x52] sm:$0xff]  ;;  %v3728_v33 = vmul.f32 %v7118_v3, %v3726_v22 }
 0x624   :  { %3537 = vrot.lane.b32.xlu0 %v3533_v19, %s4861_s11  ;;  %v3262_v27 = vpop.permute.xlu0 %3261  ;;  %v3810_v8 = vmul.f32 %v7152_v6, %v3808_v34  ;;  %v3865_v19 = vmul.f32 %v7148_v54, %v3864_v30 }
 0x625   :  { %v3267_v49 = vadd.f32 %v3262_v27, %v3211_v13  ;;  %v3212_v45 = vadd.f32 %v3210_v15, %v3186_v43  ;;  %v3866_v15 = vmul.f32 %v7152_v6, %v3864_v30 }
 0x626   :  { %v3264_v35 = vpop.permute.xlu1 %3263  ;;  %3539 = vrot.lane.b32.xlu1 %v3534_v23, %s4861_s11 }
 0x627   :  { %v3268_v42 = vadd.f32 %v3264_v35, %v3212_v45 }
 0x628   :  { %3593 = vrot.lane.b32.xlu0 %v3589_v62, %s4862_s13  ;;  %v3318_v46 = vpop.permute.xlu0 %3317 }
 0x629   :  { %v3323_v16 = vadd.f32 %v3318_v46, %v3267_v49 }
 0x62a   :  { %v3320_v48 = vpop.permute.xlu1 %3319  ;;  %3595 = vrot.lane.b32.xlu1 %v3590_v52, %s4862_s13 }
 0x62b   :  { %v3324_v53 = vadd.f32 %v3320_v48, %v3268_v42  ;;  %v7109_v24 = vadd.f32 %v3347_v18, %v3323_v16 }
 0x62d   :  { %v7115_v50 = vadd.f32 %v3348_v14, %v3324_v53 }
 0x62e   :  { %3675 = vrot.lane.b32.xlu1 %v3671_v56, %s4861_s11  ;;  %v3622_v56 = vstv %s7162_s24 }
 0x62f   :  { %v3623_v2 = vmul.f32 %v7112_v63, %v3622_v56 }
 0x632   :  { %3677 = vrot.lane.b32.xlu1 %v3672_v47, %s4861_s11 }
 0x647   :  { %4062 = vadd.xlane.f32.xlu0 %v4061_v21 }
 0x656   :  { %4076 = vadd.xlane.f32.xlu1 %v4075_v5  ;;  %v3624_v5 = vmul.f32 %v7118_v3, %v3622_v56 }
 0x65d   :  { %3731 = vrot.lane.b32.xlu0 %v3727_v17, %s4862_s13 }
 0x65e   :  { %v3883_v20 = vpop.xlane.xlu0 %3882 }
 0x65f   :  { %v3884_v41 = vrot.slane %v3883_v20, 4 }
 0x661   :  { %v3885_v44 = vadd.f32 %v3884_v41, %v3883_v20  ;;  %3813 = vrot.lane.b32.xlu0 %v3809_v40, %s4861_s11 }
 0x662   :  { %v3400_v35 = vpop.permute.xlu0 %3399 }
 0x663   :  { %v3886_v1 = vrot.slane %v3885_v44, 2  ;;  %v3405_v42 = vadd.f32 %v3400_v35, %v7109_v24  ;;  %v3486_v24 = vmul.f32 %v7098_v7, %v3484_v25 }
 0x665   :  { %v3897_v61 = vpop.xlane.xlu1 %3896  ;;  %3815 = vrot.lane.b32.xlu0 %v3810_v8, %s4861_s11  ;;  %v3887_v0 = vadd.f32 %v3886_v1, %v3885_v44 }
 0x666   :  { %v3898_v31 = vrot.slane %v3897_v61, 4 }
 0x667   :  { %3733 = vrot.lane.b32.xlu1 %v3728_v33, %s4862_s13  ;;  %v3888_v43 = vrot.slane %v3887_v0, 1 }
 0x668   :  { %v3899_v13 = vadd.f32 %v3898_v31, %v3897_v61 }
 0x669   :  { %3869 = vrot.lane.b32.xlu0 %v3865_v19, %s4862_s13  ;;  %v3889_v29 = vadd.f32 %v3888_v43, %v3887_v0  ;;  %v3402_v46 = vpop.permute.xlu1 %3401  ;;  %v3760_v0 = vstv %s4557_s27 }
 0x66a   :  { %v3900_v27 = vrot.slane %v3899_v13, 2  ;;  %v3406_v14 = vadd.f32 %v3402_v46, %v7115_v50  ;;  %v3762_v46 = vmul.f32 %v7152_v6, %v3760_v0 }
 0x66b   :  { %3871 = vrot.lane.b32.xlu1 %v3866_v15, %s4862_s13  ;;  %4610 = vpush %v3889_v29 }
 0x66c   :  { %v3901_v23 = vadd.f32 %v3900_v27, %v3899_v13  ;;  %v3761_v13 = vmul.f32 %v7148_v54, %v3760_v0 }
 0x66e   :  { %v3902_v49 = vrot.slane %v3901_v23, 1 }
 0x670   :  { %v3903_v45 = vadd.f32 %v3902_v49, %v3901_v23 }
 0x672   :  { %4612 = vpush %v3903_v45 }
 0x693   :  { %v3969_v62 = vpop.xlane.xlu0 %3968 }
 0x694   :  { %v3970_v50 = vrot.slane %v3969_v62, 4 }
 0x696   :  { %v3971_v22 = vadd.f32 %v3970_v50, %v3969_v62 }
 0x697   :  { %v3456_v52 = vpop.permute.xlu0 %3455 }
 0x698   :  { %v3461_v16 = vadd.f32 %v3456_v52, %v3405_v42  ;;  %v3972_v34 = vrot.slane %v3971_v22, 2 }
 0x69a   :  { %v3983_v18 = vpop.xlane.xlu1 %3982  ;;  %v3487_v48 = vadd.f32 %v3485_v55, %v3461_v16  ;;  %v3973_v41 = vadd.f32 %v3972_v34, %v3971_v22  ;;  %v3920_v22 = vstv %s3919_s17 }
 0x69b   :  { %v3538_v53 = vpop.permute.xlu0 %3537  ;;  %v3984_v57 = vrot.slane %v3983_v18, 4 }
 0x69c   :  { %s4611_s13 = spop %4610  ;;  %v3543_v47 = vadd.f32 %v3538_v53, %v3487_v48  ;;  %v3974_v44 = vrot.slane %v3973_v41, 1 }
 0x69d   :  { %s7168_s25 = smul.f32 0.001953125, %s4611_s13  ;;  %v3985_v7 = vadd.f32 %v3984_v57, %v3983_v18 }
 0x69e   :  { %v3458_v58 = vpop.permute.xlu1 %3457  ;;  %v3975_v30 = vadd.f32 %v3974_v44, %v3973_v41 }
 0x69f   :  { %v3462_v60 = vadd.f32 %v3458_v58, %v3406_v14  ;;  %v3594_v26 = vpop.permute.xlu0 %3593  ;;  %s3907_s21 = smul.f32 %s7168_s25, %s7168_s25  ;;  %v3986_v20 = vrot.slane %v3985_v7, 2 }
 0x6a0   :  { %v3599_v38 = vadd.f32 %v3594_v26, %v3543_v47 }
 0x6a1   :  { %v3488_v32 = vadd.f32 %v3486_v24, %v3462_v60  ;;  %v3987_v40 = vadd.f32 %v3986_v20, %v3985_v7  ;;  %v3924_v20 = vstv %s3923_s5 }
 0x6a2   :  { %v3540_v9 = vpop.permute.xlu1 %3539  ;;  %v3625_v21 = vadd.f32 %v3623_v2, %v3599_v38 }
 0x6a3   :  { %s4613_s26 = spop %4612  ;;  %v3544_v11 = vadd.f32 %v3540_v9, %v3488_v32  ;;  %v3988_v1 = vrot.slane %v3987_v40, 1  ;;  %v3909_v9 = vstv %s7168_s25  ;;  %s4574_s25 = sld [smem:[#allocation15 + $0x2]] }
 0x6a4   :  { %s3906_s29 = smul.f32 0.001953125, %s4613_s26 }
 0x6a5   :  { %v3989_v61 = vadd.f32 %v3988_v1, %v3987_v40 }
 0x6a6   :  { %s3908_s6 = ssub.f32 %s3906_s29, %s3907_s21  ;;  %v3596_v28 = vpop.permute.xlu1 %3595 }
 0x6a7   :  { %v3600_v4 = vadd.f32 %v3596_v28, %v3544_v11  ;;  %v3911_v28 = vsub.f32 %v6979_v39, %v3909_v9  ;;  %s4575_s21 = sld [smem:[#allocation16 + $0x2]] }
 0x6a8   :  { %s3912_s0 = sadd.f32 1e-05, %s3908_s6 }
 0x6a9   :  { %v3626_v17 = vadd.f32 %v3624_v5, %v3600_v4  ;;  %v3910_v5 = vsub.f32 %v6983_v37, %v3909_v9 }
 0x6aa   :  { %v3913_v63 = vstv %s3912_s0  ;;  %v3676_v3 = vpop.permute.xlu1 %3675 }
 0x6ab   :  { %4664 = vrsqrt.f32 %v3913_v63  ;;  %v3681_v31 = vadd.f32 %v3676_v3, %v3625_v21 }
 0x6ae   :  { %v3678_v27 = vpop.permute.xlu1 %3677 }
 0x6af   :  { %v3682_v35 = vadd.f32 %v3678_v27, %v3626_v17 }
 0x6b8   :  { %v4665_v8 = vpop.eup %4664 }
 0x6b9   :  { %4614 = vpush %v4665_v8 }
 0x6ba   :  { %4616 = vpush %v3975_v30 }
 0x6bb   :  { %4618 = vpush %v3989_v61 }
 0x6d0   :  { %v4063_v33 = vpop.xlane.xlu0 %4062 }
 0x6d1   :  { %v4064_v58 = vrot.slane %v4063_v33, 4 }
 0x6d3   :  { %v4065_v2 = vadd.f32 %v4064_v58, %v4063_v33 }
 0x6d4   :  { %v3732_v19 = vpop.permute.xlu0 %3731 }
 0x6d5   :  { %v3737_v43 = vadd.f32 %v3732_v19, %v3681_v31  ;;  %v4066_v50 = vrot.slane %v4065_v2, 2  ;;  %v4006_v31 = vstv %s4568_s19  ;;  %s4870_s19 = smov 96  }
 0x6d7   :  { %v3763_v15 = vadd.f32 %v3761_v13, %v3737_v43  ;;  %v4067_v7 = vadd.f32 %v4066_v50, %v4065_v2  ;;  %v4010_v13 = vstv %s4569_s20 }
 0x6d8   :  { %v3814_v29 = vpop.permute.xlu0 %3813 }
 0x6d9   :  { %v3819_v62 = vadd.f32 %v3814_v29, %v3763_v15  ;;  %v4068_v41 = vrot.slane %v4067_v7, 1 }
 0x6db   :  { %v4069_v30 = vadd.f32 %v4068_v41, %v4067_v7 }
 0x6dc   :  { %v3816_v23 = vpop.permute.xlu0 %3815 }
 0x6df   :  { %v4077_v49 = vpop.xlane.xlu1 %4076 }
 0x6e0   :  { %v3870_v45 = vpop.permute.xlu0 %3869  ;;  %v4078_v60 = vrot.slane %v4077_v49, 4 }
 0x6e1   :  { %v3875_v42 = vadd.f32 %v3870_v45, %v3819_v62 }
 0x6e2   :  { %v4079_v32 = vadd.f32 %v4078_v60, %v4077_v49 }
 0x6e3   :  { %v3734_v25 = vpop.permute.xlu1 %3733  ;;  %v7179_v55 = vsel %vm5585_vm10, %v3875_v42, 0.0 }
 0x6e4   :  { %v3738_v52 = vadd.f32 %v3734_v25, %v3682_v35  ;;  %v4165_v53 = vmul.f32 %v7179_v55, %v7179_v55  ;;  %v4153_v6 = vsel %vm1928_vm11, %v7179_v55, 0.0  ;;  %v4080_v11 = vrot.slane %v4079_v32, 2 }
 0x6e6   :  { %v3764_v16 = vadd.f32 %v3762_v46, %v3738_v52  ;;  %v4167_v26 = vsel %vm1928_vm11, %v4165_v53, 0.0  ;;  %v4081_v17 = vadd.f32 %v4080_v11, %v4079_v32 }
 0x6e7   :  { %v3872_v54 = vpop.permute.xlu1 %3871 }
 0x6e8   :  { %v3820_v18 = vadd.f32 %v3816_v23, %v3764_v16  ;;  %v4082_v40 = vrot.slane %v4081_v17, 1 }
 0x6ea   :  { %v3876_v48 = vadd.f32 %v3872_v54, %v3820_v18  ;;  %s7181_s28 = spop %4614  ;;  %v4083_v61 = vadd.f32 %v4082_v40, %v4081_v17 }
 0x6eb   :  { %s4617_s30 = spop %4616  ;;  %v3916_v57 = vstv %s7181_s28 }
 0x6ec   :  { %v7187_v14 = vsel %vm5585_vm10, %v3876_v48, 0.0  ;;  %s7189_s12 = smul.f32 0.001953125, %s4617_s30  ;;  %s4619_s4 = spop %4618  ;;  %v3918_v4 = vmul.f32 %v3916_v57, %v3911_v28  ;;  %v3917_v63 = vmul.f32 %v3916_v57, %v3910_v5  ;;  %v4100_v48 = vstv %s4574_s25 }
 0x6ed   :  { %v4154_v56 = vsel %vm1928_vm11, %v7187_v14, 0.0  ;;  %v4166_v47 = vmul.f32 %v7187_v14, %v7187_v14  ;;  %s3992_s14 = smul.f32 0.001953125, %s4619_s4  ;;  %s4580_s4 = sld [smem:[#allocation15 + $0x3]]  ;;  %vm4127_vm10 = vcmask 654848  }
 0x6ee   :  { %s3993_s15 = smul.f32 %s7189_s12, %s7189_s12  ;;  %v4155_v51 = vadd.f32 %v4154_v56, %v4153_v6  ;;  %v3922_v34 = vmul.f32 %v3920_v22, %v3918_v4  ;;  %v3921_v44 = vmul.f32 %v3920_v22, %v3917_v63  ;;  %v3995_v37 = vstv %s7189_s12 }
 0x6ef   :  { %v4168_v24 = vsel %vm1928_vm11, %v4166_v47, 0.0  ;;  %v3996_v3 = vsub.f32 %v7053_v10, %v3995_v37  ;;  %v3997_v33 = vsub.f32 %v7048_v36, %v3995_v37  ;;  %v4104_v47 = vstv %s4575_s21  ;;  %v4571_v37 = vld [vmem:[%s7341_s9 + $0x18] sm:$0xff] }
 0x6f0   :  { %s3994_s16 = ssub.f32 %s3992_s14, %s3993_s15  ;;  %4156 = vadd.xlane.f32.xlu0 %v4155_v51  ;;  %v4169_v38 = vadd.f32 %v4168_v24, %v4167_v26  ;;  %v7205_v1 = vadd.f32 %v3924_v20, %v3922_v34  ;;  %v7209_v39 = vadd.f32 %v3924_v20, %v3921_v44  ;;  %vm4148_vm11 = vcmask 786048  }
 0x6f1   :  { %s4581_s14 = sld [smem:[#allocation16 + $0x3]] }
 0x6f2   :  { %s3998_s2 = sadd.f32 1e-05, %s3994_s16  ;;  %4170 = vadd.xlane.f32.xlu1 %v4169_v38 }
 0x6f3   :  { %v4194_v4 = vstv %s4580_s4 }
 0x6f4   :  { %v3999_v21 = vstv %s3998_s2 }
 0x6f5   :  { %4666 = vrsqrt.f32 %v3999_v21 }
 0x6f7   :  { %v4198_v7 = vstv %s4581_s14 }
 0x702   :  { %v4667_v8 = vpop.eup %4666 }
 0x703   :  { %4620 = vpush %v4667_v8  ;;  %3946 = vrot.lane.b32.xlu1 %v7205_v1, %s4864_s18 }
 0x704   :  { %4622 = vpush %v4069_v30 }
 0x705   :  { %4624 = vpush %v4083_v61 }
 0x706   :  { %3944 = vrot.lane.b32.xlu0 %v7209_v39, %s4864_s18 }
 0x734   :  { %s4621_s3 = spop %4620 }
 0x735   :  { %v4002_v0 = vstv %s4621_s3  ;;  %s4623_s22 = spop %4622 }
 0x736   :  { %v4003_v19 = vmul.f32 %v4002_v0, %v3996_v3  ;;  %v4004_v43 = vmul.f32 %v4002_v0, %v3997_v33  ;;  %s4085_s1 = smul.f32 0.001953125, %s4623_s22  ;;  %s4625_s23 = spop %4624  ;;  %v4570_v3 = vld [vmem:[%s7341_s9 + $0x10] sm:$0xff] }
 0x737   :  { %s4086_s7 = smul.f32 0.001953125, %s4625_s23  ;;  %s4865_s22 = smov 16  }
 0x738   :  { %v4007_v15 = vmul.f32 %v4006_v31, %v4003_v19  ;;  %v4008_v29 = vmul.f32 %v4006_v31, %v4004_v43  ;;  %s4087_s8 = smul.f32 %s4085_s1, %s4085_s1  ;;  %v4089_v35 = vstv %s4085_s1  ;;  %v4572_v19 = vld [vmem:[%s7341_s9 + $0x50] sm:$0xff]  ;;  %s4871_s1 = smov 112  }
 0x739   :  { %v4090_v16 = vsub.f32 %v7134_v59, %v4089_v35  ;;  %v4091_v18 = vsub.f32 %v7130_v12, %v4089_v35  ;;  %v4578_v35 = vld [vmem:[%s7341_s9 + $0x60] sm:$0xff] }
 0x73a   :  { %v4011_v27 = vadd.f32 %v4010_v13, %v4007_v15  ;;  %v4012_v23 = vadd.f32 %v4010_v13, %v4008_v29  ;;  %s4088_s24 = ssub.f32 %s4086_s7, %s4087_s8  ;;  %s4866_s8 = smov 32  }
 0x73c   :  { %s4092_s13 = sadd.f32 1e-05, %s4088_s24  ;;  %4019 = vrot.lane.b32.xlu1 %v4012_v23, %s4861_s11  ;;  %4017 = vrot.lane.b32.xlu0 %v4011_v27, %s4861_s11 }
 0x73e   :  { %v4093_v36 = vstv %s4092_s13 }
 0x73f   :  { %4668 = vrsqrt.f32 %v4093_v36 }
 0x740   :  { %4040 = vrot.lane.b32.xlu1 %v4012_v23, %s4864_s18  ;;  %4038 = vrot.lane.b32.xlu0 %v4011_v27, %s4864_s18  ;;  %v4577_v27 = vld [vmem:[%s7341_s9 + $0x28] sm:$0xff]  ;;  %v4576_v23 = vld [vmem:[%s7341_s9 + $0x20] sm:$0xff] }
 0x74c   :  { %v4669_v10 = vpop.eup %4668 }
 0x74d   :  { %4626 = vpush %v4669_v10 }
 0x779   :  { %v4157_v49 = vpop.xlane.xlu0 %4156 }
 0x77a   :  { %v4158_v45 = vrot.slane %v4157_v49, 4 }
 0x77b   :  { %v4171_v62 = vpop.xlane.xlu1 %4170 }
 0x77c   :  { %v4159_v25 = vadd.f32 %v4158_v45, %v4157_v49  ;;  %v4172_v42 = vrot.slane %v4171_v62, 4  ;;  %v4579_v49 = vld [vmem:[%s7341_s9 + $0x68] sm:$0xff] }
 0x77d   :  { %v3945_v41 = vpop.permute.xlu0 %3944 }
 0x77e   :  { %v4160_v46 = vrot.slane %v4159_v25, 2  ;;  %v4173_v52 = vadd.f32 %v4172_v42, %v4171_v62  ;;  %s4627_s26 = spop %4626 }
 0x77f   :  { %v4096_v54 = vstv %s4627_s26  ;;  %v3947_v40 = vpop.permute.xlu1 %3946  ;;  %s4867_s26 = smov 48  }
 0x780   :  { %v4174_v53 = vrot.slane %v4173_v52, 2  ;;  %v4097_v6 = vmul.f32 %v4096_v54, %v4090_v16  ;;  %v4098_v56 = vmul.f32 %v4096_v54, %v4091_v18  ;;  %v4161_v58 = vadd.f32 %v4160_v46, %v4159_v25  ;;  %v4583_v46 = vld [vmem:[%s7341_s9 + $0x38] sm:$0xff] }
 0x782   :  { %v4101_v51 = vmul.f32 %v4100_v48, %v4097_v6  ;;  %v4102_v60 = vmul.f32 %v4100_v48, %v4098_v56  ;;  %v4175_v26 = vadd.f32 %v4174_v53, %v4173_v52  ;;  %v4162_v24 = vrot.slane %v4161_v58, 1  ;;  %v4582_v52 = vld [vmem:[%s7341_s9 + $0x30] sm:$0xff]  ;;  %v4585_v53 = vld [vmem:[%s7341_s9 + $0x78] sm:$0xff] }
 0x783   :  { %v4584_v6 = vld [vmem:[%s7341_s9 + $0x70] sm:$0xff] }
 0x784   :  { %v4105_v38 = vadd.f32 %v4104_v47, %v4101_v51  ;;  %v4106_v2 = vadd.f32 %v4104_v47, %v4102_v60  ;;  %v4176_v32 = vrot.slane %v4175_v26, 1  ;;  %v4163_v9 = vadd.f32 %v4162_v24, %v4161_v58  ;;  %v3928_v60 = vld [vmem:[%s7341_s9 + $0x8] sm:$0xff] }
 0x786   :  { %4113 = vrot.lane.b32.xlu1 %v4106_v2, %s4861_s11  ;;  %4111 = vrot.lane.b32.xlu0 %v4105_v38, %s4861_s11  ;;  %v4177_v12 = vadd.f32 %v4176_v32, %v4175_v26  ;;  %4628 = vpush %v4163_v9  ;;  %v3927_v26 = vld [vmem:[%s7341_s9] sm:$0xff] }
 0x788   :  { %4630 = vpush %v4177_v12 }
 0x78a   :  { %4134 = vrot.lane.b32.xlu1 %v4106_v2, %s4864_s18  ;;  %4132 = vrot.lane.b32.xlu0 %v4105_v38, %s4864_s18 }
 0x7ae   :  { %v4020_v44 = vpop.permute.xlu1 %4019  ;;  %v4018_v8 = vpop.permute.xlu0 %4017 }
 0x7af   :  { %v4024_v31 = vadd.f32 %v4571_v37, %v4020_v44 }
 0x7b2   :  { %v4041_v33 = vpop.permute.xlu1 %4040  ;;  %v4039_v0 = vpop.permute.xlu0 %4038 }
 0x7b3   :  { %v4044_v29 = vadd.f32 %v4572_v19, %v4039_v0 }
 0x7b7   :  { %s4629_s29 = spop %4628 }
 0x7b8   :  { %s4179_s6 = smul.f32 0.001953125, %s4629_s29 }
 0x7b9   :  { %s4631_s0 = spop %4630 }
 0x7ba   :  { %s4180_s27 = smul.f32 0.001953125, %s4631_s0  ;;  %v4183_v50 = vstv %s4179_s6 }
 0x7bb   :  { %s4181_s28 = smul.f32 %s4179_s6, %s4179_s6  ;;  %v4184_v57 = vsub.f32 %v7179_v55, %v4183_v50  ;;  %v4185_v11 = vsub.f32 %v7187_v14, %v4183_v50  ;;  %v4566_v55 = vld [vmem:[%s7341_s9 + $0x40] sm:$0xff]  ;;  %v4567_v14 = vld [vmem:[%s7341_s9 + $0x48] sm:$0xff] }
 0x7bc   :  { %v3950_v30 = vadd.f32 %v4566_v55, %v3945_v41  ;;  %v3951_v61 = vadd.f32 %v4567_v14, %v3947_v40 }
 0x7bd   :  { %s4182_s30 = ssub.f32 %s4180_s27, %s4181_s28  ;;  %s4868_s28 = smov 64  }
 0x7bf   :  { %s4186_s12 = sadd.f32 1e-05, %s4182_s30  ;;  %s4869_s30 = smov 80  }
 0x7c1   :  { %v4187_v59 = vstv %s4186_s12 }
 0x7c2   :  { %4670 = vrsqrt.f32 %v4187_v59 }
 0x7cf   :  { %v4671_v21 = vpop.eup %4670 }
 0x7d0   :  { %4632 = vpush %v4671_v21 }
 0x7f8   :  { %v4114_v43 = vpop.permute.xlu1 %4113  ;;  %v4112_v13 = vpop.permute.xlu0 %4111 }
 0x7f9   :  { %v4118_v36 = vadd.f32 %v4577_v27, %v4114_v43  ;;  %v4117_v10 = vadd.f32 %v4576_v23, %v4112_v13 }
 0x7fc   :  { %v4135_v45 = vpop.permute.xlu1 %4134  ;;  %v4133_v62 = vpop.permute.xlu0 %4132 }
 0x7fd   :  { %v4139_v25 = vadd.f32 %v4579_v49, %v4135_v45  ;;  %v4138_v42 = vadd.f32 %v4578_v35, %v4133_v62 }
 0x801   :  { %s4633_s15 = spop %4632 }
 0x802   :  { %v4190_v28 = vstv %s4633_s15 }
 0x803   :  { %v4191_v5 = vmul.f32 %v4190_v28, %v4184_v57  ;;  %v4192_v22 = vmul.f32 %v4190_v28, %v4185_v11 }
 0x805   :  { %v4195_v17 = vmul.f32 %v4194_v4, %v4191_v5  ;;  %v4196_v63 = vmul.f32 %v4194_v4, %v4192_v22 }
 0x807   :  { %v4199_v34 = vadd.f32 %v4198_v7, %v4195_v17  ;;  %v4200_v20 = vadd.f32 %v4198_v7, %v4196_v63 }
 0x809   :  { %4207 = vrot.lane.b32.xlu1 %v4200_v20, %s4861_s11  ;;  %4205 = vrot.lane.b32.xlu0 %v4199_v34, %s4861_s11 }
 0x80d   :  { %4228 = vrot.lane.b32.xlu1 %v4200_v20, %s4864_s18  ;;  %4226 = vrot.lane.b32.xlu0 %v4199_v34, %s4864_s18 }
 0x811   :  { %3933 = vrot.lane.b32.xlu1 %v7205_v1, %s4861_s11  ;;  %3931 = vrot.lane.b32.xlu0 %v7209_v39, %s4861_s11  ;;  %v4023_v1 = vadd.f32 %v4570_v3, %v4018_v8  ;;  %v4573_v39 = vld [vmem:[%s7341_s9 + $0x58] sm:$0xff] }
 0x812   :  { %v4045_v15 = vadd.f32 %v4573_v39, %v4041_v33 }
 0x815   :  { %3956 = vrot.lane.b32.xlu1 %v3951_v61, %s4865_s22  ;;  %3954 = vrot.lane.b32.xlu0 %v3950_v30, %s4865_s22 }
 0x819   :  { %4029 = vrot.lane.b32.xlu1 %v4024_v31, %s4866_s8  ;;  %4027 = vrot.lane.b32.xlu0 %v4023_v1, %s4866_s8 }
 0x81d   :  { %4050 = vrot.lane.b32.xlu1 %v4045_v15, %s4867_s26  ;;  %4048 = vrot.lane.b32.xlu0 %v4044_v29, %s4867_s26 }
 0x821   :  { %4123 = vrot.lane.b32.xlu1 %v4118_v36, %s4868_s28  ;;  %4121 = vrot.lane.b32.xlu0 %v4117_v10, %s4868_s28 }
 0x825   :  { %4144 = vrot.lane.b32.xlu1 %v4139_v25, %s4869_s30  ;;  %4142 = vrot.lane.b32.xlu0 %v4138_v42, %s4869_s30 }
 0x87b   :  { %v4208_v16 = vpop.permute.xlu1 %4207  ;;  %v4206_v18 = vpop.permute.xlu0 %4205 }
 0x87c   :  { %v4212_v54 = vadd.f32 %v4583_v46, %v4208_v16  ;;  %v4211_v48 = vadd.f32 %v4582_v52, %v4206_v18 }
 0x87e   :  { %4217 = vrot.lane.b32.xlu1 %v4212_v54, %s4870_s19  ;;  %4215 = vrot.lane.b32.xlu0 %v4211_v48, %s4870_s19 }
 0x87f   :  { %v4229_v56 = vpop.permute.xlu1 %4228  ;;  %v4227_v47 = vpop.permute.xlu0 %4226 }
 0x880   :  { %v4233_v58 = vadd.f32 %v4585_v53, %v4229_v56  ;;  %v4232_v51 = vadd.f32 %v4584_v6, %v4227_v47 }
 0x882   :  { %4238 = vrot.lane.b32.xlu1 %v4233_v58, %s4871_s1  ;;  %4236 = vrot.lane.b32.xlu0 %v4232_v51, %s4871_s1 }
 0x883   :  { %v3934_v24 = vpop.permute.xlu1 %3933  ;;  %v3932_v38 = vpop.permute.xlu0 %3931 }
 0x884   :  { %v3938_v2 = vadd.f32 %v3934_v24, %v3928_v60  ;;  %v3937_v32 = vadd.f32 %v3932_v38, %v3927_v26 }
 0x886   :  { %3941 = vst.msk [vmem:[%s7342_s10 + $0x8] sm:$0xff] %vm3939_vm6, %v3938_v2  ;;  %3940 = vst.msk [vmem:[%s7342_s10] sm:$0xff] %vm3939_vm6, %v3937_v32 }
 0x887   :  { %v3957_v9 = vpop.permute.xlu1 %3956  ;;  %v3955_v12 = vpop.permute.xlu0 %3954 }
 0x888   :  { %3962 = vst.msk [vmem:[%s7342_s10 + $0x8] sm:$0xff] %vm3960_vm7, %v3957_v9  ;;  %3961 = vst.msk [vmem:[%s7342_s10] sm:$0xff] %vm3960_vm7, %v3955_v12 }
 0x88b   :  { %v4030_v59 = vpop.permute.xlu1 %4029  ;;  %v4028_v21 = vpop.permute.xlu0 %4027 }
 0x88c   :  { %4035 = vst.msk [vmem:[%s7342_s10 + $0x8] sm:$0xff] %vm4033_vm8, %v4030_v59  ;;  %4034 = vst.msk [vmem:[%s7342_s10] sm:$0xff] %vm4033_vm8, %v4028_v21 }
 0x88f   :  { %v4051_v50 = vpop.permute.xlu1 %4050  ;;  %v4049_v57 = vpop.permute.xlu0 %4048 }
 0x890   :  { %4056 = vst.msk [vmem:[%s7342_s10 + $0x8] sm:$0xff] %vm4054_vm9, %v4051_v50  ;;  %4055 = vst.msk [vmem:[%s7342_s10] sm:$0xff] %vm4054_vm9, %v4049_v57 }
 0x893   :  { %v4124_v11 = vpop.permute.xlu1 %4123  ;;  %v4122_v28 = vpop.permute.xlu0 %4121 }
 0x894   :  { %4129 = vst.msk [vmem:[%s7342_s10 + $0x8] sm:$0xff] %vm4127_vm10, %v4124_v11  ;;  %4128 = vst.msk [vmem:[%s7342_s10] sm:$0xff] %vm4127_vm10, %v4122_v28 }
 0x897   :  { %v4145_v4 = vpop.permute.xlu1 %4144  ;;  %v4143_v5 = vpop.permute.xlu0 %4142 }
 0x898   :  { %4150 = vst.msk [vmem:[%s7342_s10 + $0x8] sm:$0xff] %vm4148_vm11, %v4145_v4  ;;  %4149 = vst.msk [vmem:[%s7342_s10] sm:$0xff] %vm4148_vm11, %v4143_v5 }
 0x8f0   :  { %v4218_v22 = vpop.permute.xlu1 %4217  ;;  %v4216_v7 = vpop.permute.xlu0 %4215 }
 0x8f1   :  { %4223 = vst.msk [vmem:[%s7342_s10 + $0x8] sm:$0xff] %vm4221_vm12, %v4218_v22  ;;  %4222 = vst.msk [vmem:[%s7342_s10] sm:$0xff] %vm4221_vm12, %v4216_v7 }
 0x8f4   :  { %v4239_v17 = vpop.permute.xlu1 %4238  ;;  %v4237_v63 = vpop.permute.xlu0 %4236 }
 0x8f5   :  { %4244 = vst.msk [vmem:[%s7342_s10 + $0x8] sm:$0xff] %vm4242_vm13, %v4239_v17  ;;  %4243 = vst.msk [vmem:[%s7342_s10] sm:$0xff] %vm4242_vm13, %v4237_v63 }
 0x8f6   :  { %4249 = vsyncpa [#allocation6], 1 }
 0x8f7   :  { %4250 = vsyncpa [#allocation8], 1 }
 0x8f8   :  { %4251 = vsyncpa [#allocation11], 1 }
 0x8f9   :  { %4252 = vsyncpa [#allocation14], 1 }
 0x8fa   :  { %4253 = vsyncpa [#allocation17], 1 }

</bundles_post_ra>
